<compile_context>
chip_gen: v7x
topology: tpu7x:2x2x1
jax: 0.10.0
libtpu: 0.0.40
codegen_flags: <defaults>
</compile_context>

<pallas_src>
import jax
import jax.numpy as jnp
from jax import lax
from jax.experimental import pallas as pl
from jax.experimental.pallas import tpu as pltpu


def _round_up(x, m):
    return ((x + m - 1) // m) * m


def gru_mlp_kernel(gi0_ref, whhbd_ref, wih1_ref,
                   fc1w_ref, fc1b_ref, fc2w_ref, fc2b_ref,
                   out_ref, h_ref, h1all_ref):
    # gi0_ref:   (T*Bp, 3*dp)   precomputed Embedding@Wih0 gather (time-major)
    # whhbd_ref: (2*dp, 6*dp)   blockdiag(Whh0, Whh1): [h0|h1] @ W -> [gh0|gh1]
    # wih1_ref:  (dp, 3*dp)     layer-1 input weight
    # fc1w/b:    (dp, Hp) / (1, Hp)
    # fc2w/b:    (Hp, Vp) / (1, Vp)
    # out_ref:   (T, Bp, Vp)
    # h_ref:     (Bp, 2*dp) f32 scratch — packed carry [h0 | h1]
    # h1all_ref: (T*Bp, dp) f32 scratch — all layer-1 hidden states
    T, B, Vp = out_ref.shape
    dp = wih1_ref.shape[0]
    mm_dtype = whhbd_ref.dtype            # f32 or bf16 (MXU input dtype)

    h_ref[...] = jnp.zeros_like(h_ref)    # h0 = h1 = 0

    def gates(gi, gh, h):
        # PyTorch GRU (bias=False), gate order (r, z, n); elementwise math in f32.
        r = jax.nn.sigmoid(gi[:, 0:dp] + gh[:, 0:dp])
        z = jax.nn.sigmoid(gi[:, dp:2 * dp] + gh[:, dp:2 * dp])
        n = jnp.tanh(gi[:, 2 * dp:3 * dp] + r * gh[:, 2 * dp:3 * dp])
        return (1.0 - z) * n + z * h

    def body(t, carry):
        base = pl.multiple_of(t * B, B)                  # B is a multiple of 8
        # Both hidden-to-hidden projections up front (depend only on t-1 state).
        gh = jnp.dot(h_ref[...].astype(mm_dtype), whhbd_ref[...],
                     preferred_element_type=jnp.float32)  # (B, 6dp) = [gh0 | gh1]
        gi0 = gi0_ref[pl.ds(base, B), :].astype(jnp.float32)
        h0n = gates(gi0, gh[:, :3 * dp], h_ref[:, :dp])   # layer 0

        # Only small serially-dependent matmul left on the critical path.
        gi1 = jnp.dot(h0n.astype(mm_dtype), wih1_ref[...],
                      preferred_element_type=jnp.float32)  # (B, 3dp)
        h1n = gates(gi1, gh[:, 3 * dp:], h_ref[:, dp:])    # layer 1

        h_ref[:, :dp] = h0n                                # packed carry update
        h_ref[:, dp:] = h1n
        h1all_ref[pl.ds(base, B), :] = h1n
        return carry

    lax.fori_loop(0, T, body, 0, unroll=min(T, 8))

    # FC head over all timesteps at once; one lane-dense bulk store.
    h1_all = h1all_ref[...].astype(fc1w_ref.dtype)                    # (T*B, dp)
    y = jnp.maximum(
        jnp.dot(h1_all, fc1w_ref[...], preferred_element_type=jnp.float32)
        + fc1b_ref[...], 0.0)
    # Dropout(0.4) == identity at inference.
    logits = jnp.dot(y.astype(fc2w_ref.dtype), fc2w_ref[...],
                     preferred_element_type=jnp.float32) + fc2b_ref[...]
    out_ref[...] = logits.reshape(T, B, Vp)


def model_forward(ids, params, use_bf16=False):
    """ids: (B, T) int32 token indices. Returns (B, T, vocab_out) float32."""
    emb = params["emb"]                      # (V_in, E), row 0 zeros (padding_idx=0)
    B, T = ids.shape
    d = params["whh0"].shape[0]
    H = params["fc1_w"].shape[1]
    V = params["fc2_w"].shape[1]

    dp = _round_up(d, 128)                   # gate width  -> lane-dense slices
    Hp = _round_up(H, 128)
    Vp = _round_up(V, 128)                   # lane-dense output store
    Bp = _round_up(B, 8)                     # sublane-aligned batch
    f32 = jnp.float32

    def pad_gates(w, rows_in, rows_pad):
        # (rows_in, 3*d) -> (rows_pad, 3*dp); each gate zero-padded to dp lanes.
        w3 = w.reshape(rows_in, 3, d)
        out = jnp.zeros((rows_pad, 3, dp), f32)
        out = out.at[:rows_in, :, :d].set(w3)
        return out.reshape(rows_pad, 3 * dp)

    # Embedding + layer-0 input projection folded into ONE gather table.
    emb_proj = pad_gates(emb @ params["wih0"], emb.shape[0], emb.shape[0])  # (V_in, 3dp)
    ids_p = jnp.zeros((Bp, T), ids.dtype).at[:B].set(ids)   # padding rows -> token 0
    gi0 = emb_proj[ids_p]                                   # (Bp, T, 3dp) JAX glue gather
    gi0 = jnp.transpose(gi0, (1, 0, 2)).reshape(T * Bp, 3 * dp)   # time-major

    whh0_p = pad_gates(params["whh0"], d, dp)
    whh1_p = pad_gates(params["whh1"], d, dp)
    wih1_p = pad_gates(params["wih1"], d, dp)

    # Block-diagonal hidden-to-hidden weight: [h0|h1] @ whh_bd -> [gh0 | gh1].
    whh_bd = jnp.zeros((2 * dp, 6 * dp), f32)
    whh_bd = whh_bd.at[:dp, :3 * dp].set(whh0_p)
    whh_bd = whh_bd.at[dp:, 3 * dp:].set(whh1_p)

    fc1w = jnp.zeros((dp, Hp), f32).at[:d, :H].set(params["fc1_w"])
    fc1b = jnp.zeros((1, Hp), f32).at[:, :H].set(params["fc1_b"])
    fc2w = jnp.zeros((Hp, Vp), f32).at[:H, :V].set(params["fc2_w"])
    fc2b = jnp.zeros((1, Vp), f32).at[:, :V].set(params["fc2_b"])

    if use_bf16:
        # bf16 MXU inputs on all generations (v5e/v6e/v7x run bf16 at full rate);
        # f32 accumulation; biases & gate math stay f32.
        cast = lambda a: a.astype(jnp.bfloat16)
        gi0, whh_bd, wih1_p, fc1w, fc2w = map(cast, (gi0, whh_bd, wih1_p, fc1w, fc2w))

    # VMEM budget derived from actual buffer sizes (v7x has only 64 MiB physical).
    def nbytes(*arrs):
        return sum(a.size * a.dtype.itemsize for a in arrs)
    buf_bytes = nbytes(gi0, whh_bd, wih1_p, fc1w, fc1b, fc2w, fc2b)
    buf_bytes += T * Bp * Vp * 4              # output
    buf_bytes += Bp * 2 * dp * 4              # packed-carry scratch
    buf_bytes += T * Bp * dp * 4              # h1all scratch
    vmem_limit = int(min(max(2 * buf_bytes + (4 << 20), 32 << 20), 60 << 20))

    vmem = pl.BlockSpec(memory_space=pltpu.MemorySpace.VMEM)
    out_tm = pl.pallas_call(
        gru_mlp_kernel,
        out_shape=jax.ShapeDtypeStruct((T, Bp, Vp), jnp.float32),
        in_specs=[vmem] * 7,
        out_specs=vmem,
        scratch_shapes=[
            pltpu.VMEM((Bp, 2 * dp), jnp.float32),     # packed carry [h0 | h1]
            pltpu.VMEM((T * Bp, dp), jnp.float32),     # all layer-1 hidden states
        ],
        compiler_params=pltpu.CompilerParams(vmem_limit_bytes=vmem_limit),
    )(gi0, whh_bd, wih1_p, fc1w, fc1b, fc2w, fc2b)

    # TODO(synk): at larger T*B*Vp, emit (Bp, T, Vp) directly from the kernel to
    # delete this extra XLA HBM transpose pass.
    return jnp.transpose(out_tm, (1, 0, 2))[:B, :, :V]


def reference_forward(ids, params):
    """Pure-JAX reference (same math, unpadded) for verification."""
    emb = params["emb"]
    x = emb[ids]                             # (B, T, E)
    B, T, _ = x.shape
    d = params["whh0"].shape[0]

    def cell(x_t, h, wih, whh):
        gi = x_t @ wih
        gh = h @ whh
        r = jax.nn.sigmoid(gi[:, :d] + gh[:, :d])
        z = jax.nn.sigmoid(gi[:, d:2 * d] + gh[:, d:2 * d])
        n = jnp.tanh(gi[:, 2 * d:] + r * gh[:, 2 * d:])
        return (1.0 - z) * n + z * h

    h0 = jnp.zeros((B, d), jnp.float32)
    h1 = jnp.zeros((B, d), jnp.float32)
    outs = []
    for t in range(T):
        h0 = cell(x[:, t, :], h0, params["wih0"], params["whh0"])
        h1 = cell(h0, h1, params["wih1"], params["whh1"])
        y = jnp.maximum(h1 @ params["fc1_w"] + params["fc1_b"], 0.0)
        outs.append(y @ params["fc2_w"] + params["fc2_b"])
    return jnp.stack(outs, axis=1)           # (B, T, V)


def init_params(key, vocab_in, vocab_out, d, emb_size, hidden):
    ks = jax.random.split(key, 10)
    u = lambda k, shape, s: jax.random.uniform(k, shape, jnp.float32, -s, s)

    emb = jax.random.normal(ks[0], (vocab_in, emb_size), jnp.float32)
    emb = emb.at[0].set(0.0)                 # padding_idx=0 -> zero row

    s_g = 1.0 / jnp.sqrt(d)
    # GRU weights stored transposed for right-multiplication: (in, 3d), gate order r,z,n
    return {
        "emb": emb,
        "wih0": u(ks[1], (emb_size, 3 * d), s_g),
        "whh0": u(ks[2], (d, 3 * d), s_g),
        "wih1": u(ks[3], (d, 3 * d), s_g),
        "whh1": u(ks[4], (d, 3 * d), s_g),
        "fc1_w": u(ks[5], (d, hidden), 1.0 / jnp.sqrt(d)),
        "fc1_b": u(ks[6], (1, hidden), 1.0 / jnp.sqrt(d)),
        "fc2_w": u(ks[7], (hidden, vocab_out), 1.0 / jnp.sqrt(hidden)),
        "fc2_b": u(ks[8], (1, vocab_out), 1.0 / jnp.sqrt(hidden)),
    }


if __name__ == "__main__":
    # Small shapes consistent with the module's forward.
    B, T = 2, 8
    vocab_in, vocab_out = 50, 16
    emb_size, d, hidden = 16, 32, 32

    key = jax.random.PRNGKey(0)
    k_ids, k_params = jax.random.split(key)
    ids = jax.random.randint(k_ids, (B, T), 0, vocab_in, dtype=jnp.int32)
    params = init_params(k_params, vocab_in, vocab_out, d, emb_size, hidden)

    ref = reference_forward(ids, params)

    # f32 path: strict correctness check vs pure-JAX reference.
    out = jax.block_until_ready(model_forward(ids, params))
    assert out.shape == (B, T, vocab_out), out.shape
    assert jnp.all(jnp.isfinite(out))
    max_err = float(jnp.max(jnp.abs(out - ref)))
    assert jnp.allclose(out, ref, atol=2e-3, rtol=2e-3), max_err

    # bf16 MXU-input path (all generations): looser tolerance check.
    out_bf16 = jax.block_until_ready(model_forward(ids, params, use_bf16=True))
    assert out_bf16.shape == (B, T, vocab_out)
    assert jnp.all(jnp.isfinite(out_bf16))
    max_err_bf16 = float(jnp.max(jnp.abs(out_bf16 - ref)))
    assert jnp.allclose(out_bf16, ref, atol=1e-1, rtol=1e-1), max_err_bf16

    print("KERNEL_OK")
</pallas_src>

<mosaic_0001>
module attributes {stable_mosaic.version = 11 : i64} {
  func.func @gru_mlp_kernel(%arg0: memref<64x384xf32, #tpu.memory_space<vmem>>, %arg1: memref<256x768xf32, #tpu.memory_space<vmem>>, %arg2: memref<128x384xf32, #tpu.memory_space<vmem>>, %arg3: memref<128x128xf32, #tpu.memory_space<vmem>>, %arg4: memref<1x128xf32, #tpu.memory_space<vmem>>, %arg5: memref<128x128xf32, #tpu.memory_space<vmem>>, %arg6: memref<1x128xf32, #tpu.memory_space<vmem>>, %arg7: memref<8x8x128xf32, #tpu.memory_space<vmem>>, %arg8: memref<8x256xf32, #tpu.memory_space<vmem>>, %arg9: memref<64x128xf32, #tpu.memory_space<vmem>>) attributes {dimension_semantics = [], scalar_prefetch = 0 : i64, scratch_operands = 2 : i64, tpu.core_type = #tpu.core_type<tc>} {
    %cst = arith.constant 0.000000e+00 : f32
    %0 = vector.broadcast %cst : f32 to vector<8x256xf32>
    %c0 = arith.constant 0 : index
    %c0_0 = arith.constant 0 : index
    %1 = vector.load %arg8[%c0, %c0_0] : memref<8x256xf32, #tpu.memory_space<vmem>>, vector<8x256xf32>
    tpu.vector_store %arg8[%c0, %c0_0], %0 {strides = array<i32>} : memref<8x256xf32, #tpu.memory_space<vmem>>, vector<8x256xf32>,
    %c0_i32 = arith.constant 0 : i32
    %c8_i32 = arith.constant 8 : i32
    %2 = arith.muli %c0_i32, %c8_i32 : i32
    %3 = tpu.assume_multiple %2, 8 : i32
    %c0_1 = arith.constant 0 : index
    %c0_2 = arith.constant 0 : index
    %4 = vector.load %arg8[%c0_1, %c0_2] : memref<8x256xf32, #tpu.memory_space<vmem>>, vector<8x256xf32>
    %c0_3 = arith.constant 0 : index
    %c0_4 = arith.constant 0 : index
    %5 = vector.load %arg1[%c0_3, %c0_4] : memref<256x768xf32, #tpu.memory_space<vmem>>, vector<256x768xf32>
    %cst_5 = arith.constant dense<0.000000e+00> : vector<8x768xf32>
    %6 = tpu.matmul %4, %5, %cst_5 {dimension_numbers = #tpu.dot_dimension_numbers<[1], [0], [0], [1], [0, 0, 1, 1], [], []>} : vector<8x256xf32>, vector<256x768xf32>, vector<8x768xf32> -> vector<8x768xf32>
    %7 = arith.index_cast %3 : i32 to index
    %c0_6 = arith.constant 0 : index
    %8 = vector.load %arg0[%7, %c0_6] : memref<64x384xf32, #tpu.memory_space<vmem>>, vector<8x384xf32>
    %9 = vector.extract_strided_slice %6 {offsets = [0, 0], sizes = [8, 384], strides = [1, 1]} : vector<8x768xf32> to vector<8x384xf32>
    %c0_7 = arith.constant 0 : index
    %c0_8 = arith.constant 0 : index
    %10 = vector.load %arg8[%c0_7, %c0_8] : memref<8x256xf32, #tpu.memory_space<vmem>>, vector<8x128xf32>
    %11 = vector.extract_strided_slice %8 {offsets = [0, 0], sizes = [8, 128], strides = [1, 1]} : vector<8x384xf32> to vector<8x128xf32>
    %12 = vector.extract_strided_slice %9 {offsets = [0, 0], sizes = [8, 128], strides = [1, 1]} : vector<8x384xf32> to vector<8x128xf32>
    %13 = arith.addf %11, %12 : vector<8x128xf32>
    %14 = arith.negf %13 : vector<8x128xf32>
    %15 = math.exp %14 : vector<8x128xf32>
    %cst_9 = arith.constant 1.000000e+00 : f32
    %16 = vector.broadcast %cst_9 : f32 to vector<8x128xf32>
    %17 = arith.addf %16, %15 : vector<8x128xf32>
    %18 = arith.divf %16, %17 : vector<8x128xf32>
    %19 = vector.extract_strided_slice %8 {offsets = [0, 128], sizes = [8, 128], strides = [1, 1]} : vector<8x384xf32> to vector<8x128xf32>
    %20 = vector.extract_strided_slice %9 {offsets = [0, 128], sizes = [8, 128], strides = [1, 1]} : vector<8x384xf32> to vector<8x128xf32>
    %21 = arith.addf %19, %20 : vector<8x128xf32>
    %22 = arith.negf %21 : vector<8x128xf32>
    %23 = math.exp %22 : vector<8x128xf32>
    %cst_10 = arith.constant 1.000000e+00 : f32
    %24 = vector.broadcast %cst_10 : f32 to vector<8x128xf32>
    %25 = arith.addf %24, %23 : vector<8x128xf32>
    %26 = arith.divf %24, %25 : vector<8x128xf32>
    %27 = vector.extract_strided_slice %8 {offsets = [0, 256], sizes = [8, 128], strides = [1, 1]} : vector<8x384xf32> to vector<8x128xf32>
    %28 = vector.extract_strided_slice %9 {offsets = [0, 256], sizes = [8, 128], strides = [1, 1]} : vector<8x384xf32> to vector<8x128xf32>
    %29 = arith.mulf %18, %28 : vector<8x128xf32>
    %30 = arith.addf %27, %29 : vector<8x128xf32>
    %31 = math.tanh %30 : vector<8x128xf32>
    %cst_11 = arith.constant 1.000000e+00 : f32
    %32 = vector.broadcast %cst_11 : f32 to vector<8x128xf32>
    %33 = arith.subf %32, %26 : vector<8x128xf32>
    %34 = arith.mulf %33, %31 : vector<8x128xf32>
    %35 = arith.mulf %26, %10 : vector<8x128xf32>
    %36 = arith.addf %34, %35 : vector<8x128xf32>
    %c0_12 = arith.constant 0 : index
    %c0_13 = arith.constant 0 : index
    %37 = vector.load %arg2[%c0_12, %c0_13] : memref<128x384xf32, #tpu.memory_space<vmem>>, vector<128x384xf32>
    %cst_14 = arith.constant dense<0.000000e+00> : vector<8x384xf32>
    %38 = tpu.matmul %36, %37, %cst_14 {dimension_numbers = #tpu.dot_dimension_numbers<[1], [0], [0], [1], [0, 0, 1, 1], [], []>} : vector<8x128xf32>, vector<128x384xf32>, vector<8x384xf32> -> vector<8x384xf32>
    %39 = vector.extract_strided_slice %6 {offsets = [0, 384], sizes = [8, 384], strides = [1, 1]} : vector<8x768xf32> to vector<8x384xf32>
    %c0_15 = arith.constant 0 : index
    %c128 = arith.constant 128 : index
    %40 = vector.load %arg8[%c0_15, %c128] : memref<8x256xf32, #tpu.memory_space<vmem>>, vector<8x128xf32>
    %41 = vector.extract_strided_slice %38 {offsets = [0, 0], sizes = [8, 128], strides = [1, 1]} : vector<8x384xf32> to vector<8x128xf32>
    %42 = vector.extract_strided_slice %39 {offsets = [0, 0], sizes = [8, 128], strides = [1, 1]} : vector<8x384xf32> to vector<8x128xf32>
    %43 = arith.addf %41, %42 : vector<8x128xf32>
    %44 = arith.negf %43 : vector<8x128xf32>
    %45 = math.exp %44 : vector<8x128xf32>
    %cst_16 = arith.constant 1.000000e+00 : f32
    %46 = vector.broadcast %cst_16 : f32 to vector<8x128xf32>
    %47 = arith.addf %46, %45 : vector<8x128xf32>
    %48 = arith.divf %46, %47 : vector<8x128xf32>
    %49 = vector.extract_strided_slice %38 {offsets = [0, 128], sizes = [8, 128], strides = [1, 1]} : vector<8x384xf32> to vector<8x128xf32>
    %50 = vector.extract_strided_slice %39 {offsets = [0, 128], sizes = [8, 128], strides = [1, 1]} : vector<8x384xf32> to vector<8x128xf32>
    %51 = arith.addf %49, %50 : vector<8x128xf32>
    %52 = arith.negf %51 : vector<8x128xf32>
    %53 = math.exp %52 : vector<8x128xf32>
    %cst_17 = arith.constant 1.000000e+00 : f32
    %54 = vector.broadcast %cst_17 : f32 to vector<8x128xf32>
    %55 = arith.addf %54, %53 : vector<8x128xf32>
    %56 = arith.divf %54, %55 : vector<8x128xf32>
    %57 = vector.extract_strided_slice %38 {offsets = [0, 256], sizes = [8, 128], strides = [1, 1]} : vector<8x384xf32> to vector<8x128xf32>
    %58 = vector.extract_strided_slice %39 {offsets = [0, 256], sizes = [8, 128], strides = [1, 1]} : vector<8x384xf32> to vector<8x128xf32>
    %59 = arith.mulf %48, %58 : vector<8x128xf32>
    %60 = arith.addf %57, %59 : vector<8x128xf32>
    %61 = math.tanh %60 : vector<8x128xf32>
    %cst_18 = arith.constant 1.000000e+00 : f32
    %62 = vector.broadcast %cst_18 : f32 to vector<8x128xf32>
    %63 = arith.subf %62, %56 : vector<8x128xf32>
    %64 = arith.mulf %63, %61 : vector<8x128xf32>
    %65 = arith.mulf %56, %40 : vector<8x128xf32>
    %66 = arith.addf %64, %65 : vector<8x128xf32>
    %c0_19 = arith.constant 0 : index
    %c0_20 = arith.constant 0 : index
    %67 = vector.load %arg8[%c0_19, %c0_20] : memref<8x256xf32, #tpu.memory_space<vmem>>, vector<8x128xf32>
    tpu.vector_store %arg8[%c0_19, %c0_20], %36 {strides = array<i32>} : memref<8x256xf32, #tpu.memory_space<vmem>>, vector<8x128xf32>,
    %c0_21 = arith.constant 0 : index
    %c128_22 = arith.constant 128 : index
    %68 = vector.load %arg8[%c0_21, %c128_22] : memref<8x256xf32, #tpu.memory_space<vmem>>, vector<8x128xf32>
    tpu.vector_store %arg8[%c0_21, %c128_22], %66 {strides = array<i32>} : memref<8x256xf32, #tpu.memory_space<vmem>>, vector<8x128xf32>,
    %69 = arith.index_cast %3 : i32 to index
    %c0_23 = arith.constant 0 : index
    %70 = vector.load %arg9[%69, %c0_23] : memref<64x128xf32, #tpu.memory_space<vmem>>, vector<8x128xf32>
    tpu.vector_store %arg9[%69, %c0_23], %66 {strides = array<i32>} : memref<64x128xf32, #tpu.memory_space<vmem>>, vector<8x128xf32>,
    %c1_i32 = arith.constant 1 : i32
    %c8_i32_24 = arith.constant 8 : i32
    %71 = arith.muli %c1_i32, %c8_i32_24 : i32
    %72 = tpu.assume_multiple %71, 8 : i32
    %c0_25 = arith.constant 0 : index
    %c0_26 = arith.constant 0 : index
    %73 = vector.load %arg8[%c0_25, %c0_26] : memref<8x256xf32, #tpu.memory_space<vmem>>, vector<8x256xf32>
    %c0_27 = arith.constant 0 : index
    %c0_28 = arith.constant 0 : index
    %74 = vector.load %arg1[%c0_27, %c0_28] : memref<256x768xf32, #tpu.memory_space<vmem>>, vector<256x768xf32>
    %cst_29 = arith.constant dense<0.000000e+00> : vector<8x768xf32>
    %75 = tpu.matmul %73, %74, %cst_29 {dimension_numbers = #tpu.dot_dimension_numbers<[1], [0], [0], [1], [0, 0, 1, 1], [], []>} : vector<8x256xf32>, vector<256x768xf32>, vector<8x768xf32> -> vector<8x768xf32>
    %76 = arith.index_cast %72 : i32 to index
    %c0_30 = arith.constant 0 : index
    %77 = vector.load %arg0[%76, %c0_30] : memref<64x384xf32, #tpu.memory_space<vmem>>, vector<8x384xf32>
    %78 = vector.extract_strided_slice %75 {offsets = [0, 0], sizes = [8, 384], strides = [1, 1]} : vector<8x768xf32> to vector<8x384xf32>
    %c0_31 = arith.constant 0 : index
    %c0_32 = arith.constant 0 : index
    %79 = vector.load %arg8[%c0_31, %c0_32] : memref<8x256xf32, #tpu.memory_space<vmem>>, vector<8x128xf32>
    %80 = vector.extract_strided_slice %77 {offsets = [0, 0], sizes = [8, 128], strides = [1, 1]} : vector<8x384xf32> to vector<8x128xf32>
    %81 = vector.extract_strided_slice %78 {offsets = [0, 0], sizes = [8, 128], strides = [1, 1]} : vector<8x384xf32> to vector<8x128xf32>
    %82 = arith.addf %80, %81 : vector<8x128xf32>
    %83 = arith.negf %82 : vector<8x128xf32>
    %84 = math.exp %83 : vector<8x128xf32>
    %cst_33 = arith.constant 1.000000e+00 : f32
    %85 = vector.broadcast %cst_33 : f32 to vector<8x128xf32>
    %86 = arith.addf %85, %84 : vector<8x128xf32>
    %87 = arith.divf %85, %86 : vector<8x128xf32>
    %88 = vector.extract_strided_slice %77 {offsets = [0, 128], sizes = [8, 128], strides = [1, 1]} : vector<8x384xf32> to vector<8x128xf32>
    %89 = vector.extract_strided_slice %78 {offsets = [0, 128], sizes = [8, 128], strides = [1, 1]} : vector<8x384xf32> to vector<8x128xf32>
    %90 = arith.addf %88, %89 : vector<8x128xf32>
    %91 = arith.negf %90 : vector<8x128xf32>
    %92 = math.exp %91 : vector<8x128xf32>
    %cst_34 = arith.constant 1.000000e+00 : f32
    %93 = vector.broadcast %cst_34 : f32 to vector<8x128xf32>
    %94 = arith.addf %93, %92 : vector<8x128xf32>
    %95 = arith.divf %93, %94 : vector<8x128xf32>
    %96 = vector.extract_strided_slice %77 {offsets = [0, 256], sizes = [8, 128], strides = [1, 1]} : vector<8x384xf32> to vector<8x128xf32>
    %97 = vector.extract_strided_slice %78 {offsets = [0, 256], sizes = [8, 128], strides = [1, 1]} : vector<8x384xf32> to vector<8x128xf32>
    %98 = arith.mulf %87, %97 : vector<8x128xf32>
    %99 = arith.addf %96, %98 : vector<8x128xf32>
    %100 = math.tanh %99 : vector<8x128xf32>
    %cst_35 = arith.constant 1.000000e+00 : f32
    %101 = vector.broadcast %cst_35 : f32 to vector<8x128xf32>
    %102 = arith.subf %101, %95 : vector<8x128xf32>
    %103 = arith.mulf %102, %100 : vector<8x128xf32>
    %104 = arith.mulf %95, %79 : vector<8x128xf32>
    %105 = arith.addf %103, %104 : vector<8x128xf32>
    %c0_36 = arith.constant 0 : index
    %c0_37 = arith.constant 0 : index
    %106 = vector.load %arg2[%c0_36, %c0_37] : memref<128x384xf32, #tpu.memory_space<vmem>>, vector<128x384xf32>
    %cst_38 = arith.constant dense<0.000000e+00> : vector<8x384xf32>
    %107 = tpu.matmul %105, %106, %cst_38 {dimension_numbers = #tpu.dot_dimension_numbers<[1], [0], [0], [1], [0, 0, 1, 1], [], []>} : vector<8x128xf32>, vector<128x384xf32>, vector<8x384xf32> -> vector<8x384xf32>
    %108 = vector.extract_strided_slice %75 {offsets = [0, 384], sizes = [8, 384], strides = [1, 1]} : vector<8x768xf32> to vector<8x384xf32>
    %c0_39 = arith.constant 0 : index
    %c128_40 = arith.constant 128 : index
    %109 = vector.load %arg8[%c0_39, %c128_40] : memref<8x256xf32, #tpu.memory_space<vmem>>, vector<8x128xf32>
    %110 = vector.extract_strided_slice %107 {offsets = [0, 0], sizes = [8, 128], strides = [1, 1]} : vector<8x384xf32> to vector<8x128xf32>
    %111 = vector.extract_strided_slice %108 {offsets = [0, 0], sizes = [8, 128], strides = [1, 1]} : vector<8x384xf32> to vector<8x128xf32>
    %112 = arith.addf %110, %111 : vector<8x128xf32>
    %113 = arith.negf %112 : vector<8x128xf32>
    %114 = math.exp %113 : vector<8x128xf32>
    %cst_41 = arith.constant 1.000000e+00 : f32
    %115 = vector.broadcast %cst_41 : f32 to vector<8x128xf32>
    %116 = arith.addf %115, %114 : vector<8x128xf32>
    %117 = arith.divf %115, %116 : vector<8x128xf32>
    %118 = vector.extract_strided_slice %107 {offsets = [0, 128], sizes = [8, 128], strides = [1, 1]} : vector<8x384xf32> to vector<8x128xf32>
    %119 = vector.extract_strided_slice %108 {offsets = [0, 128], sizes = [8, 128], strides = [1, 1]} : vector<8x384xf32> to vector<8x128xf32>
    %120 = arith.addf %118, %119 : vector<8x128xf32>
    %121 = arith.negf %120 : vector<8x128xf32>
    %122 = math.exp %121 : vector<8x128xf32>
    %cst_42 = arith.constant 1.000000e+00 : f32
    %123 = vector.broadcast %cst_42 : f32 to vector<8x128xf32>
    %124 = arith.addf %123, %122 : vector<8x128xf32>
    %125 = arith.divf %123, %124 : vector<8x128xf32>
    %126 = vector.extract_strided_slice %107 {offsets = [0, 256], sizes = [8, 128], strides = [1, 1]} : vector<8x384xf32> to vector<8x128xf32>
    %127 = vector.extract_strided_slice %108 {offsets = [0, 256], sizes = [8, 128], strides = [1, 1]} : vector<8x384xf32> to vector<8x128xf32>
    %128 = arith.mulf %117, %127 : vector<8x128xf32>
    %129 = arith.addf %126, %128 : vector<8x128xf32>
    %130 = math.tanh %129 : vector<8x128xf32>
    %cst_43 = arith.constant 1.000000e+00 : f32
    %131 = vector.broadcast %cst_43 : f32 to vector<8x128xf32>
    %132 = arith.subf %131, %125 : vector<8x128xf32>
    %133 = arith.mulf %132, %130 : vector<8x128xf32>
    %134 = arith.mulf %125, %109 : vector<8x128xf32>
    %135 = arith.addf %133, %134 : vector<8x128xf32>
    %c0_44 = arith.constant 0 : index
    %c0_45 = arith.constant 0 : index
    %136 = vector.load %arg8[%c0_44, %c0_45] : memref<8x256xf32, #tpu.memory_space<vmem>>, vector<8x128xf32>
    tpu.vector_store %arg8[%c0_44, %c0_45], %105 {strides = array<i32>} : memref<8x256xf32, #tpu.memory_space<vmem>>, vector<8x128xf32>,
    %c0_46 = arith.constant 0 : index
    %c128_47 = arith.constant 128 : index
    %137 = vector.load %arg8[%c0_46, %c128_47] : memref<8x256xf32, #tpu.memory_space<vmem>>, vector<8x128xf32>
    tpu.vector_store %arg8[%c0_46, %c128_47], %135 {strides = array<i32>} : memref<8x256xf32, #tpu.memory_space<vmem>>, vector<8x128xf32>,
    %138 = arith.index_cast %72 : i32 to index
    %c0_48 = arith.constant 0 : index
    %139 = vector.load %arg9[%138, %c0_48] : memref<64x128xf32, #tpu.memory_space<vmem>>, vector<8x128xf32>
    tpu.vector_store %arg9[%138, %c0_48], %135 {strides = array<i32>} : memref<64x128xf32, #tpu.memory_space<vmem>>, vector<8x128xf32>,
    %c2_i32 = arith.constant 2 : i32
    %c8_i32_49 = arith.constant 8 : i32
    %140 = arith.muli %c2_i32, %c8_i32_49 : i32
    %141 = tpu.assume_multiple %140, 8 : i32
    %c0_50 = arith.constant 0 : index
    %c0_51 = arith.constant 0 : index
    %142 = vector.load %arg8[%c0_50, %c0_51] : memref<8x256xf32, #tpu.memory_space<vmem>>, vector<8x256xf32>
    %c0_52 = arith.constant 0 : index
    %c0_53 = arith.constant 0 : index
    %143 = vector.load %arg1[%c0_52, %c0_53] : memref<256x768xf32, #tpu.memory_space<vmem>>, vector<256x768xf32>
    %cst_54 = arith.constant dense<0.000000e+00> : vector<8x768xf32>
    %144 = tpu.matmul %142, %143, %cst_54 {dimension_numbers = #tpu.dot_dimension_numbers<[1], [0], [0], [1], [0, 0, 1, 1], [], []>} : vector<8x256xf32>, vector<256x768xf32>, vector<8x768xf32> -> vector<8x768xf32>
    %145 = arith.index_cast %141 : i32 to index
    %c0_55 = arith.constant 0 : index
    %146 = vector.load %arg0[%145, %c0_55] : memref<64x384xf32, #tpu.memory_space<vmem>>, vector<8x384xf32>
    %147 = vector.extract_strided_slice %144 {offsets = [0, 0], sizes = [8, 384], strides = [1, 1]} : vector<8x768xf32> to vector<8x384xf32>
    %c0_56 = arith.constant 0 : index
    %c0_57 = arith.constant 0 : index
    %148 = vector.load %arg8[%c0_56, %c0_57] : memref<8x256xf32, #tpu.memory_space<vmem>>, vector<8x128xf32>
    %149 = vector.extract_strided_slice %146 {offsets = [0, 0], sizes = [8, 128], strides = [1, 1]} : vector<8x384xf32> to vector<8x128xf32>
    %150 = vector.extract_strided_slice %147 {offsets = [0, 0], sizes = [8, 128], strides = [1, 1]} : vector<8x384xf32> to vector<8x128xf32>
    %151 = arith.addf %149, %150 : vector<8x128xf32>
    %152 = arith.negf %151 : vector<8x128xf32>
    %153 = math.exp %152 : vector<8x128xf32>
    %cst_58 = arith.constant 1.000000e+00 : f32
    %154 = vector.broadcast %cst_58 : f32 to vector<8x128xf32>
    %155 = arith.addf %154, %153 : vector<8x128xf32>
    %156 = arith.divf %154, %155 : vector<8x128xf32>
    %157 = vector.extract_strided_slice %146 {offsets = [0, 128], sizes = [8, 128], strides = [1, 1]} : vector<8x384xf32> to vector<8x128xf32>
    %158 = vector.extract_strided_slice %147 {offsets = [0, 128], sizes = [8, 128], strides = [1, 1]} : vector<8x384xf32> to vector<8x128xf32>
    %159 = arith.addf %157, %158 : vector<8x128xf32>
    %160 = arith.negf %159 : vector<8x128xf32>
    %161 = math.exp %160 : vector<8x128xf32>
    %cst_59 = arith.constant 1.000000e+00 : f32
    %162 = vector.broadcast %cst_59 : f32 to vector<8x128xf32>
    %163 = arith.addf %162, %161 : vector<8x128xf32>
    %164 = arith.divf %162, %163 : vector<8x128xf32>
    %165 = vector.extract_strided_slice %146 {offsets = [0, 256], sizes = [8, 128], strides = [1, 1]} : vector<8x384xf32> to vector<8x128xf32>
    %166 = vector.extract_strided_slice %147 {offsets = [0, 256], sizes = [8, 128], strides = [1, 1]} : vector<8x384xf32> to vector<8x128xf32>
    %167 = arith.mulf %156, %166 : vector<8x128xf32>
    %168 = arith.addf %165, %167 : vector<8x128xf32>
    %169 = math.tanh %168 : vector<8x128xf32>
    %cst_60 = arith.constant 1.000000e+00 : f32
    %170 = vector.broadcast %cst_60 : f32 to vector<8x128xf32>
    %171 = arith.subf %170, %164 : vector<8x128xf32>
    %172 = arith.mulf %171, %169 : vector<8x128xf32>
    %173 = arith.mulf %164, %148 : vector<8x128xf32>
    %174 = arith.addf %172, %173 : vector<8x128xf32>
    %c0_61 = arith.constant 0 : index
    %c0_62 = arith.constant 0 : index
    %175 = vector.load %arg2[%c0_61, %c0_62] : memref<128x384xf32, #tpu.memory_space<vmem>>, vector<128x384xf32>
    %cst_63 = arith.constant dense<0.000000e+00> : vector<8x384xf32>
    %176 = tpu.matmul %174, %175, %cst_63 {dimension_numbers = #tpu.dot_dimension_numbers<[1], [0], [0], [1], [0, 0, 1, 1], [], []>} : vector<8x128xf32>, vector<128x384xf32>, vector<8x384xf32> -> vector<8x384xf32>
    %177 = vector.extract_strided_slice %144 {offsets = [0, 384], sizes = [8, 384], strides = [1, 1]} : vector<8x768xf32> to vector<8x384xf32>
    %c0_64 = arith.constant 0 : index
    %c128_65 = arith.constant 128 : index
    %178 = vector.load %arg8[%c0_64, %c128_65] : memref<8x256xf32, #tpu.memory_space<vmem>>, vector<8x128xf32>
    %179 = vector.extract_strided_slice %176 {offsets = [0, 0], sizes = [8, 128], strides = [1, 1]} : vector<8x384xf32> to vector<8x128xf32>
    %180 = vector.extract_strided_slice %177 {offsets = [0, 0], sizes = [8, 128], strides = [1, 1]} : vector<8x384xf32> to vector<8x128xf32>
    %181 = arith.addf %179, %180 : vector<8x128xf32>
    %182 = arith.negf %181 : vector<8x128xf32>
    %183 = math.exp %182 : vector<8x128xf32>
    %cst_66 = arith.constant 1.000000e+00 : f32
    %184 = vector.broadcast %cst_66 : f32 to vector<8x128xf32>
    %185 = arith.addf %184, %183 : vector<8x128xf32>
    %186 = arith.divf %184, %185 : vector<8x128xf32>
    %187 = vector.extract_strided_slice %176 {offsets = [0, 128], sizes = [8, 128], strides = [1, 1]} : vector<8x384xf32> to vector<8x128xf32>
    %188 = vector.extract_strided_slice %177 {offsets = [0, 128], sizes = [8, 128], strides = [1, 1]} : vector<8x384xf32> to vector<8x128xf32>
    %189 = arith.addf %187, %188 : vector<8x128xf32>
    %190 = arith.negf %189 : vector<8x128xf32>
    %191 = math.exp %190 : vector<8x128xf32>
    %cst_67 = arith.constant 1.000000e+00 : f32
    %192 = vector.broadcast %cst_67 : f32 to vector<8x128xf32>
    %193 = arith.addf %192, %191 : vector<8x128xf32>
    %194 = arith.divf %192, %193 : vector<8x128xf32>
    %195 = vector.extract_strided_slice %176 {offsets = [0, 256], sizes = [8, 128], strides = [1, 1]} : vector<8x384xf32> to vector<8x128xf32>
    %196 = vector.extract_strided_slice %177 {offsets = [0, 256], sizes = [8, 128], strides = [1, 1]} : vector<8x384xf32> to vector<8x128xf32>
    %197 = arith.mulf %186, %196 : vector<8x128xf32>
    %198 = arith.addf %195, %197 : vector<8x128xf32>
    %199 = math.tanh %198 : vector<8x128xf32>
    %cst_68 = arith.constant 1.000000e+00 : f32
    %200 = vector.broadcast %cst_68 : f32 to vector<8x128xf32>
    %201 = arith.subf %200, %194 : vector<8x128xf32>
    %202 = arith.mulf %201, %199 : vector<8x128xf32>
    %203 = arith.mulf %194, %178 : vector<8x128xf32>
    %204 = arith.addf %202, %203 : vector<8x128xf32>
    %c0_69 = arith.constant 0 : index
    %c0_70 = arith.constant 0 : index
    %205 = vector.load %arg8[%c0_69, %c0_70] : memref<8x256xf32, #tpu.memory_space<vmem>>, vector<8x128xf32>
    tpu.vector_store %arg8[%c0_69, %c0_70], %174 {strides = array<i32>} : memref<8x256xf32, #tpu.memory_space<vmem>>, vector<8x128xf32>,
    %c0_71 = arith.constant 0 : index
    %c128_72 = arith.constant 128 : index
    %206 = vector.load %arg8[%c0_71, %c128_72] : memref<8x256xf32, #tpu.memory_space<vmem>>, vector<8x128xf32>
    tpu.vector_store %arg8[%c0_71, %c128_72], %204 {strides = array<i32>} : memref<8x256xf32, #tpu.memory_space<vmem>>, vector<8x128xf32>,
    %207 = arith.index_cast %141 : i32 to index
    %c0_73 = arith.constant 0 : index
    %208 = vector.load %arg9[%207, %c0_73] : memref<64x128xf32, #tpu.memory_space<vmem>>, vector<8x128xf32>
    tpu.vector_store %arg9[%207, %c0_73], %204 {strides = array<i32>} : memref<64x128xf32, #tpu.memory_space<vmem>>, vector<8x128xf32>,
    %c3_i32 = arith.constant 3 : i32
    %c8_i32_74 = arith.constant 8 : i32
    %209 = arith.muli %c3_i32, %c8_i32_74 : i32
    %210 = tpu.assume_multiple %209, 8 : i32
    %c0_75 = arith.constant 0 : index
    %c0_76 = arith.constant 0 : index
    %211 = vector.load %arg8[%c0_75, %c0_76] : memref<8x256xf32, #tpu.memory_space<vmem>>, vector<8x256xf32>
    %c0_77 = arith.constant 0 : index
    %c0_78 = arith.constant 0 : index
    %212 = vector.load %arg1[%c0_77, %c0_78] : memref<256x768xf32, #tpu.memory_space<vmem>>, vector<256x768xf32>
    %cst_79 = arith.constant dense<0.000000e+00> : vector<8x768xf32>
    %213 = tpu.matmul %211, %212, %cst_79 {dimension_numbers = #tpu.dot_dimension_numbers<[1], [0], [0], [1], [0, 0, 1, 1], [], []>} : vector<8x256xf32>, vector<256x768xf32>, vector<8x768xf32> -> vector<8x768xf32>
    %214 = arith.index_cast %210 : i32 to index
    %c0_80 = arith.constant 0 : index
    %215 = vector.load %arg0[%214, %c0_80] : memref<64x384xf32, #tpu.memory_space<vmem>>, vector<8x384xf32>
    %216 = vector.extract_strided_slice %213 {offsets = [0, 0], sizes = [8, 384], strides = [1, 1]} : vector<8x768xf32> to vector<8x384xf32>
    %c0_81 = arith.constant 0 : index
    %c0_82 = arith.constant 0 : index
    %217 = vector.load %arg8[%c0_81, %c0_82] : memref<8x256xf32, #tpu.memory_space<vmem>>, vector<8x128xf32>
    %218 = vector.extract_strided_slice %215 {offsets = [0, 0], sizes = [8, 128], strides = [1, 1]} : vector<8x384xf32> to vector<8x128xf32>
    %219 = vector.extract_strided_slice %216 {offsets = [0, 0], sizes = [8, 128], strides = [1, 1]} : vector<8x384xf32> to vector<8x128xf32>
    %220 = arith.addf %218, %219 : vector<8x128xf32>
    %221 = arith.negf %220 : vector<8x128xf32>
    %222 = math.exp %221 : vector<8x128xf32>
    %cst_83 = arith.constant 1.000000e+00 : f32
    %223 = vector.broadcast %cst_83 : f32 to vector<8x128xf32>
    %224 = arith.addf %223, %222 : vector<8x128xf32>
    %225 = arith.divf %223, %224 : vector<8x128xf32>
    %226 = vector.extract_strided_slice %215 {offsets = [0, 128], sizes = [8, 128], strides = [1, 1]} : vector<8x384xf32> to vector<8x128xf32>
    %227 = vector.extract_strided_slice %216 {offsets = [0, 128], sizes = [8, 128], strides = [1, 1]} : vector<8x384xf32> to vector<8x128xf32>
    %228 = arith.addf %226, %227 : vector<8x128xf32>
    %229 = arith.negf %228 : vector<8x128xf32>
    %230 = math.exp %229 : vector<8x128xf32>
    %cst_84 = arith.constant 1.000000e+00 : f32
    %231 = vector.broadcast %cst_84 : f32 to vector<8x128xf32>
    %232 = arith.addf %231, %230 : vector<8x128xf32>
    %233 = arith.divf %231, %232 : vector<8x128xf32>
    %234 = vector.extract_strided_slice %215 {offsets = [0, 256], sizes = [8, 128], strides = [1, 1]} : vector<8x384xf32> to vector<8x128xf32>
    %235 = vector.extract_strided_slice %216 {offsets = [0, 256], sizes = [8, 128], strides = [1, 1]} : vector<8x384xf32> to vector<8x128xf32>
    %236 = arith.mulf %225, %235 : vector<8x128xf32>
    %237 = arith.addf %234, %236 : vector<8x128xf32>
    %238 = math.tanh %237 : vector<8x128xf32>
    %cst_85 = arith.constant 1.000000e+00 : f32
    %239 = vector.broadcast %cst_85 : f32 to vector<8x128xf32>
    %240 = arith.subf %239, %233 : vector<8x128xf32>
    %241 = arith.mulf %240, %238 : vector<8x128xf32>
    %242 = arith.mulf %233, %217 : vector<8x128xf32>
    %243 = arith.addf %241, %242 : vector<8x128xf32>
    %c0_86 = arith.constant 0 : index
    %c0_87 = arith.constant 0 : index
    %244 = vector.load %arg2[%c0_86, %c0_87] : memref<128x384xf32, #tpu.memory_space<vmem>>, vector<128x384xf32>
    %cst_88 = arith.constant dense<0.000000e+00> : vector<8x384xf32>
    %245 = tpu.matmul %243, %244, %cst_88 {dimension_numbers = #tpu.dot_dimension_numbers<[1], [0], [0], [1], [0, 0, 1, 1], [], []>} : vector<8x128xf32>, vector<128x384xf32>, vector<8x384xf32> -> vector<8x384xf32>
    %246 = vector.extract_strided_slice %213 {offsets = [0, 384], sizes = [8, 384], strides = [1, 1]} : vector<8x768xf32> to vector<8x384xf32>
    %c0_89 = arith.constant 0 : index
    %c128_90 = arith.constant 128 : index
    %247 = vector.load %arg8[%c0_89, %c128_90] : memref<8x256xf32, #tpu.memory_space<vmem>>, vector<8x128xf32>
    %248 = vector.extract_strided_slice %245 {offsets = [0, 0], sizes = [8, 128], strides = [1, 1]} : vector<8x384xf32> to vector<8x128xf32>
    %249 = vector.extract_strided_slice %246 {offsets = [0, 0], sizes = [8, 128], strides = [1, 1]} : vector<8x384xf32> to vector<8x128xf32>
    %250 = arith.addf %248, %249 : vector<8x128xf32>
    %251 = arith.negf %250 : vector<8x128xf32>
    %252 = math.exp %251 : vector<8x128xf32>
    %cst_91 = arith.constant 1.000000e+00 : f32
    %253 = vector.broadcast %cst_91 : f32 to vector<8x128xf32>
    %254 = arith.addf %253, %252 : vector<8x128xf32>
    %255 = arith.divf %253, %254 : vector<8x128xf32>
    %256 = vector.extract_strided_slice %245 {offsets = [0, 128], sizes = [8, 128], strides = [1, 1]} : vector<8x384xf32> to vector<8x128xf32>
    %257 = vector.extract_strided_slice %246 {offsets = [0, 128], sizes = [8, 128], strides = [1, 1]} : vector<8x384xf32> to vector<8x128xf32>
    %258 = arith.addf %256, %257 : vector<8x128xf32>
    %259 = arith.negf %258 : vector<8x128xf32>
    %260 = math.exp %259 : vector<8x128xf32>
    %cst_92 = arith.constant 1.000000e+00 : f32
    %261 = vector.broadcast %cst_92 : f32 to vector<8x128xf32>
    %262 = arith.addf %261, %260 : vector<8x128xf32>
    %263 = arith.divf %261, %262 : vector<8x128xf32>
    %264 = vector.extract_strided_slice %245 {offsets = [0, 256], sizes = [8, 128], strides = [1, 1]} : vector<8x384xf32> to vector<8x128xf32>
    %265 = vector.extract_strided_slice %246 {offsets = [0, 256], sizes = [8, 128], strides = [1, 1]} : vector<8x384xf32> to vector<8x128xf32>
    %266 = arith.mulf %255, %265 : vector<8x128xf32>
    %267 = arith.addf %264, %266 : vector<8x128xf32>
    %268 = math.tanh %267 : vector<8x128xf32>
    %cst_93 = arith.constant 1.000000e+00 : f32
    %269 = vector.broadcast %cst_93 : f32 to vector<8x128xf32>
    %270 = arith.subf %269, %263 : vector<8x128xf32>
    %271 = arith.mulf %270, %268 : vector<8x128xf32>
    %272 = arith.mulf %263, %247 : vector<8x128xf32>
    %273 = arith.addf %271, %272 : vector<8x128xf32>
    %c0_94 = arith.constant 0 : index
    %c0_95 = arith.constant 0 : index
    %274 = vector.load %arg8[%c0_94, %c0_95] : memref<8x256xf32, #tpu.memory_space<vmem>>, vector<8x128xf32>
    tpu.vector_store %arg8[%c0_94, %c0_95], %243 {strides = array<i32>} : memref<8x256xf32, #tpu.memory_space<vmem>>, vector<8x128xf32>,
    %c0_96 = arith.constant 0 : index
    %c128_97 = arith.constant 128 : index
    %275 = vector.load %arg8[%c0_96, %c128_97] : memref<8x256xf32, #tpu.memory_space<vmem>>, vector<8x128xf32>
    tpu.vector_store %arg8[%c0_96, %c128_97], %273 {strides = array<i32>} : memref<8x256xf32, #tpu.memory_space<vmem>>, vector<8x128xf32>,
    %276 = arith.index_cast %210 : i32 to index
    %c0_98 = arith.constant 0 : index
    %277 = vector.load %arg9[%276, %c0_98] : memref<64x128xf32, #tpu.memory_space<vmem>>, vector<8x128xf32>
    tpu.vector_store %arg9[%276, %c0_98], %273 {strides = array<i32>} : memref<64x128xf32, #tpu.memory_space<vmem>>, vector<8x128xf32>,
    %c4_i32 = arith.constant 4 : i32
    %c8_i32_99 = arith.constant 8 : i32
    %278 = arith.muli %c4_i32, %c8_i32_99 : i32
    %279 = tpu.assume_multiple %278, 8 : i32
    %c0_100 = arith.constant 0 : index
    %c0_101 = arith.constant 0 : index
    %280 = vector.load %arg8[%c0_100, %c0_101] : memref<8x256xf32, #tpu.memory_space<vmem>>, vector<8x256xf32>
    %c0_102 = arith.constant 0 : index
    %c0_103 = arith.constant 0 : index
    %281 = vector.load %arg1[%c0_102, %c0_103] : memref<256x768xf32, #tpu.memory_space<vmem>>, vector<256x768xf32>
    %cst_104 = arith.constant dense<0.000000e+00> : vector<8x768xf32>
    %282 = tpu.matmul %280, %281, %cst_104 {dimension_numbers = #tpu.dot_dimension_numbers<[1], [0], [0], [1], [0, 0, 1, 1], [], []>} : vector<8x256xf32>, vector<256x768xf32>, vector<8x768xf32> -> vector<8x768xf32>
    %283 = arith.index_cast %279 : i32 to index
    %c0_105 = arith.constant 0 : index
    %284 = vector.load %arg0[%283, %c0_105] : memref<64x384xf32, #tpu.memory_space<vmem>>, vector<8x384xf32>
    %285 = vector.extract_strided_slice %282 {offsets = [0, 0], sizes = [8, 384], strides = [1, 1]} : vector<8x768xf32> to vector<8x384xf32>
    %c0_106 = arith.constant 0 : index
    %c0_107 = arith.constant 0 : index
    %286 = vector.load %arg8[%c0_106, %c0_107] : memref<8x256xf32, #tpu.memory_space<vmem>>, vector<8x128xf32>
    %287 = vector.extract_strided_slice %284 {offsets = [0, 0], sizes = [8, 128], strides = [1, 1]} : vector<8x384xf32> to vector<8x128xf32>
    %288 = vector.extract_strided_slice %285 {offsets = [0, 0], sizes = [8, 128], strides = [1, 1]} : vector<8x384xf32> to vector<8x128xf32>
    %289 = arith.addf %287, %288 : vector<8x128xf32>
    %290 = arith.negf %289 : vector<8x128xf32>
    %291 = math.exp %290 : vector<8x128xf32>
    %cst_108 = arith.constant 1.000000e+00 : f32
    %292 = vector.broadcast %cst_108 : f32 to vector<8x128xf32>
    %293 = arith.addf %292, %291 : vector<8x128xf32>
    %294 = arith.divf %292, %293 : vector<8x128xf32>
    %295 = vector.extract_strided_slice %284 {offsets = [0, 128], sizes = [8, 128], strides = [1, 1]} : vector<8x384xf32> to vector<8x128xf32>
    %296 = vector.extract_strided_slice %285 {offsets = [0, 128], sizes = [8, 128], strides = [1, 1]} : vector<8x384xf32> to vector<8x128xf32>
    %297 = arith.addf %295, %296 : vector<8x128xf32>
    %298 = arith.negf %297 : vector<8x128xf32>
    %299 = math.exp %298 : vector<8x128xf32>
    %cst_109 = arith.constant 1.000000e+00 : f32
    %300 = vector.broadcast %cst_109 : f32 to vector<8x128xf32>
    %301 = arith.addf %300, %299 : vector<8x128xf32>
    %302 = arith.divf %300, %301 : vector<8x128xf32>
    %303 = vector.extract_strided_slice %284 {offsets = [0, 256], sizes = [8, 128], strides = [1, 1]} : vector<8x384xf32> to vector<8x128xf32>
    %304 = vector.extract_strided_slice %285 {offsets = [0, 256], sizes = [8, 128], strides = [1, 1]} : vector<8x384xf32> to vector<8x128xf32>
    %305 = arith.mulf %294, %304 : vector<8x128xf32>
    %306 = arith.addf %303, %305 : vector<8x128xf32>
    %307 = math.tanh %306 : vector<8x128xf32>
    %cst_110 = arith.constant 1.000000e+00 : f32
    %308 = vector.broadcast %cst_110 : f32 to vector<8x128xf32>
    %309 = arith.subf %308, %302 : vector<8x128xf32>
    %310 = arith.mulf %309, %307 : vector<8x128xf32>
    %311 = arith.mulf %302, %286 : vector<8x128xf32>
    %312 = arith.addf %310, %311 : vector<8x128xf32>
    %c0_111 = arith.constant 0 : index
    %c0_112 = arith.constant 0 : index
    %313 = vector.load %arg2[%c0_111, %c0_112] : memref<128x384xf32, #tpu.memory_space<vmem>>, vector<128x384xf32>
    %cst_113 = arith.constant dense<0.000000e+00> : vector<8x384xf32>
    %314 = tpu.matmul %312, %313, %cst_113 {dimension_numbers = #tpu.dot_dimension_numbers<[1], [0], [0], [1], [0, 0, 1, 1], [], []>} : vector<8x128xf32>, vector<128x384xf32>, vector<8x384xf32> -> vector<8x384xf32>
    %315 = vector.extract_strided_slice %282 {offsets = [0, 384], sizes = [8, 384], strides = [1, 1]} : vector<8x768xf32> to vector<8x384xf32>
    %c0_114 = arith.constant 0 : index
    %c128_115 = arith.constant 128 : index
    %316 = vector.load %arg8[%c0_114, %c128_115] : memref<8x256xf32, #tpu.memory_space<vmem>>, vector<8x128xf32>
    %317 = vector.extract_strided_slice %314 {offsets = [0, 0], sizes = [8, 128], strides = [1, 1]} : vector<8x384xf32> to vector<8x128xf32>
    %318 = vector.extract_strided_slice %315 {offsets = [0, 0], sizes = [8, 128], strides = [1, 1]} : vector<8x384xf32> to vector<8x128xf32>
    %319 = arith.addf %317, %318 : vector<8x128xf32>
    %320 = arith.negf %319 : vector<8x128xf32>
    %321 = math.exp %320 : vector<8x128xf32>
    %cst_116 = arith.constant 1.000000e+00 : f32
    %322 = vector.broadcast %cst_116 : f32 to vector<8x128xf32>
    %323 = arith.addf %322, %321 : vector<8x128xf32>
    %324 = arith.divf %322, %323 : vector<8x128xf32>
    %325 = vector.extract_strided_slice %314 {offsets = [0, 128], sizes = [8, 128], strides = [1, 1]} : vector<8x384xf32> to vector<8x128xf32>
    %326 = vector.extract_strided_slice %315 {offsets = [0, 128], sizes = [8, 128], strides = [1, 1]} : vector<8x384xf32> to vector<8x128xf32>
    %327 = arith.addf %325, %326 : vector<8x128xf32>
    %328 = arith.negf %327 : vector<8x128xf32>
    %329 = math.exp %328 : vector<8x128xf32>
    %cst_117 = arith.constant 1.000000e+00 : f32
    %330 = vector.broadcast %cst_117 : f32 to vector<8x128xf32>
    %331 = arith.addf %330, %329 : vector<8x128xf32>
    %332 = arith.divf %330, %331 : vector<8x128xf32>
    %333 = vector.extract_strided_slice %314 {offsets = [0, 256], sizes = [8, 128], strides = [1, 1]} : vector<8x384xf32> to vector<8x128xf32>
    %334 = vector.extract_strided_slice %315 {offsets = [0, 256], sizes = [8, 128], strides = [1, 1]} : vector<8x384xf32> to vector<8x128xf32>
    %335 = arith.mulf %324, %334 : vector<8x128xf32>
    %336 = arith.addf %333, %335 : vector<8x128xf32>
    %337 = math.tanh %336 : vector<8x128xf32>
    %cst_118 = arith.constant 1.000000e+00 : f32
    %338 = vector.broadcast %cst_118 : f32 to vector<8x128xf32>
    %339 = arith.subf %338, %332 : vector<8x128xf32>
    %340 = arith.mulf %339, %337 : vector<8x128xf32>
    %341 = arith.mulf %332, %316 : vector<8x128xf32>
    %342 = arith.addf %340, %341 : vector<8x128xf32>
    %c0_119 = arith.constant 0 : index
    %c0_120 = arith.constant 0 : index
    %343 = vector.load %arg8[%c0_119, %c0_120] : memref<8x256xf32, #tpu.memory_space<vmem>>, vector<8x128xf32>
    tpu.vector_store %arg8[%c0_119, %c0_120], %312 {strides = array<i32>} : memref<8x256xf32, #tpu.memory_space<vmem>>, vector<8x128xf32>,
    %c0_121 = arith.constant 0 : index
    %c128_122 = arith.constant 128 : index
    %344 = vector.load %arg8[%c0_121, %c128_122] : memref<8x256xf32, #tpu.memory_space<vmem>>, vector<8x128xf32>
    tpu.vector_store %arg8[%c0_121, %c128_122], %342 {strides = array<i32>} : memref<8x256xf32, #tpu.memory_space<vmem>>, vector<8x128xf32>,
    %345 = arith.index_cast %279 : i32 to index
    %c0_123 = arith.constant 0 : index
    %346 = vector.load %arg9[%345, %c0_123] : memref<64x128xf32, #tpu.memory_space<vmem>>, vector<8x128xf32>
    tpu.vector_store %arg9[%345, %c0_123], %342 {strides = array<i32>} : memref<64x128xf32, #tpu.memory_space<vmem>>, vector<8x128xf32>,
    %c5_i32 = arith.constant 5 : i32
    %c8_i32_124 = arith.constant 8 : i32
    %347 = arith.muli %c5_i32, %c8_i32_124 : i32
    %348 = tpu.assume_multiple %347, 8 : i32
    %c0_125 = arith.constant 0 : index
    %c0_126 = arith.constant 0 : index
    %349 = vector.load %arg8[%c0_125, %c0_126] : memref<8x256xf32, #tpu.memory_space<vmem>>, vector<8x256xf32>
    %c0_127 = arith.constant 0 : index
    %c0_128 = arith.constant 0 : index
    %350 = vector.load %arg1[%c0_127, %c0_128] : memref<256x768xf32, #tpu.memory_space<vmem>>, vector<256x768xf32>
    %cst_129 = arith.constant dense<0.000000e+00> : vector<8x768xf32>
    %351 = tpu.matmul %349, %350, %cst_129 {dimension_numbers = #tpu.dot_dimension_numbers<[1], [0], [0], [1], [0, 0, 1, 1], [], []>} : vector<8x256xf32>, vector<256x768xf32>, vector<8x768xf32> -> vector<8x768xf32>
    %352 = arith.index_cast %348 : i32 to index
    %c0_130 = arith.constant 0 : index
    %353 = vector.load %arg0[%352, %c0_130] : memref<64x384xf32, #tpu.memory_space<vmem>>, vector<8x384xf32>
    %354 = vector.extract_strided_slice %351 {offsets = [0, 0], sizes = [8, 384], strides = [1, 1]} : vector<8x768xf32> to vector<8x384xf32>
    %c0_131 = arith.constant 0 : index
    %c0_132 = arith.constant 0 : index
    %355 = vector.load %arg8[%c0_131, %c0_132] : memref<8x256xf32, #tpu.memory_space<vmem>>, vector<8x128xf32>
    %356 = vector.extract_strided_slice %353 {offsets = [0, 0], sizes = [8, 128], strides = [1, 1]} : vector<8x384xf32> to vector<8x128xf32>
    %357 = vector.extract_strided_slice %354 {offsets = [0, 0], sizes = [8, 128], strides = [1, 1]} : vector<8x384xf32> to vector<8x128xf32>
    %358 = arith.addf %356, %357 : vector<8x128xf32>
    %359 = arith.negf %358 : vector<8x128xf32>
    %360 = math.exp %359 : vector<8x128xf32>
    %cst_133 = arith.constant 1.000000e+00 : f32
    %361 = vector.broadcast %cst_133 : f32 to vector<8x128xf32>
    %362 = arith.addf %361, %360 : vector<8x128xf32>
    %363 = arith.divf %361, %362 : vector<8x128xf32>
    %364 = vector.extract_strided_slice %353 {offsets = [0, 128], sizes = [8, 128], strides = [1, 1]} : vector<8x384xf32> to vector<8x128xf32>
    %365 = vector.extract_strided_slice %354 {offsets = [0, 128], sizes = [8, 128], strides = [1, 1]} : vector<8x384xf32> to vector<8x128xf32>
    %366 = arith.addf %364, %365 : vector<8x128xf32>
    %367 = arith.negf %366 : vector<8x128xf32>
    %368 = math.exp %367 : vector<8x128xf32>
    %cst_134 = arith.constant 1.000000e+00 : f32
    %369 = vector.broadcast %cst_134 : f32 to vector<8x128xf32>
    %370 = arith.addf %369, %368 : vector<8x128xf32>
    %371 = arith.divf %369, %370 : vector<8x128xf32>
    %372 = vector.extract_strided_slice %353 {offsets = [0, 256], sizes = [8, 128], strides = [1, 1]} : vector<8x384xf32> to vector<8x128xf32>
    %373 = vector.extract_strided_slice %354 {offsets = [0, 256], sizes = [8, 128], strides = [1, 1]} : vector<8x384xf32> to vector<8x128xf32>
    %374 = arith.mulf %363, %373 : vector<8x128xf32>
    %375 = arith.addf %372, %374 : vector<8x128xf32>
    %376 = math.tanh %375 : vector<8x128xf32>
    %cst_135 = arith.constant 1.000000e+00 : f32
    %377 = vector.broadcast %cst_135 : f32 to vector<8x128xf32>
    %378 = arith.subf %377, %371 : vector<8x128xf32>
    %379 = arith.mulf %378, %376 : vector<8x128xf32>
    %380 = arith.mulf %371, %355 : vector<8x128xf32>
    %381 = arith.addf %379, %380 : vector<8x128xf32>
    %c0_136 = arith.constant 0 : index
    %c0_137 = arith.constant 0 : index
    %382 = vector.load %arg2[%c0_136, %c0_137] : memref<128x384xf32, #tpu.memory_space<vmem>>, vector<128x384xf32>
    %cst_138 = arith.constant dense<0.000000e+00> : vector<8x384xf32>
    %383 = tpu.matmul %381, %382, %cst_138 {dimension_numbers = #tpu.dot_dimension_numbers<[1], [0], [0], [1], [0, 0, 1, 1], [], []>} : vector<8x128xf32>, vector<128x384xf32>, vector<8x384xf32> -> vector<8x384xf32>
    %384 = vector.extract_strided_slice %351 {offsets = [0, 384], sizes = [8, 384], strides = [1, 1]} : vector<8x768xf32> to vector<8x384xf32>
    %c0_139 = arith.constant 0 : index
    %c128_140 = arith.constant 128 : index
    %385 = vector.load %arg8[%c0_139, %c128_140] : memref<8x256xf32, #tpu.memory_space<vmem>>, vector<8x128xf32>
    %386 = vector.extract_strided_slice %383 {offsets = [0, 0], sizes = [8, 128], strides = [1, 1]} : vector<8x384xf32> to vector<8x128xf32>
    %387 = vector.extract_strided_slice %384 {offsets = [0, 0], sizes = [8, 128], strides = [1, 1]} : vector<8x384xf32> to vector<8x128xf32>
    %388 = arith.addf %386, %387 : vector<8x128xf32>
    %389 = arith.negf %388 : vector<8x128xf32>
    %390 = math.exp %389 : vector<8x128xf32>
    %cst_141 = arith.constant 1.000000e+00 : f32
    %391 = vector.broadcast %cst_141 : f32 to vector<8x128xf32>
    %392 = arith.addf %391, %390 : vector<8x128xf32>
    %393 = arith.divf %391, %392 : vector<8x128xf32>
    %394 = vector.extract_strided_slice %383 {offsets = [0, 128], sizes = [8, 128], strides = [1, 1]} : vector<8x384xf32> to vector<8x128xf32>
    %395 = vector.extract_strided_slice %384 {offsets = [0, 128], sizes = [8, 128], strides = [1, 1]} : vector<8x384xf32> to vector<8x128xf32>
    %396 = arith.addf %394, %395 : vector<8x128xf32>
    %397 = arith.negf %396 : vector<8x128xf32>
    %398 = math.exp %397 : vector<8x128xf32>
    %cst_142 = arith.constant 1.000000e+00 : f32
    %399 = vector.broadcast %cst_142 : f32 to vector<8x128xf32>
    %400 = arith.addf %399, %398 : vector<8x128xf32>
    %401 = arith.divf %399, %400 : vector<8x128xf32>
    %402 = vector.extract_strided_slice %383 {offsets = [0, 256], sizes = [8, 128], strides = [1, 1]} : vector<8x384xf32> to vector<8x128xf32>
    %403 = vector.extract_strided_slice %384 {offsets = [0, 256], sizes = [8, 128], strides = [1, 1]} : vector<8x384xf32> to vector<8x128xf32>
    %404 = arith.mulf %393, %403 : vector<8x128xf32>
    %405 = arith.addf %402, %404 : vector<8x128xf32>
    %406 = math.tanh %405 : vector<8x128xf32>
    %cst_143 = arith.constant 1.000000e+00 : f32
    %407 = vector.broadcast %cst_143 : f32 to vector<8x128xf32>
    %408 = arith.subf %407, %401 : vector<8x128xf32>
    %409 = arith.mulf %408, %406 : vector<8x128xf32>
    %410 = arith.mulf %401, %385 : vector<8x128xf32>
    %411 = arith.addf %409, %410 : vector<8x128xf32>
    %c0_144 = arith.constant 0 : index
    %c0_145 = arith.constant 0 : index
    %412 = vector.load %arg8[%c0_144, %c0_145] : memref<8x256xf32, #tpu.memory_space<vmem>>, vector<8x128xf32>
    tpu.vector_store %arg8[%c0_144, %c0_145], %381 {strides = array<i32>} : memref<8x256xf32, #tpu.memory_space<vmem>>, vector<8x128xf32>,
    %c0_146 = arith.constant 0 : index
    %c128_147 = arith.constant 128 : index
    %413 = vector.load %arg8[%c0_146, %c128_147] : memref<8x256xf32, #tpu.memory_space<vmem>>, vector<8x128xf32>
    tpu.vector_store %arg8[%c0_146, %c128_147], %411 {strides = array<i32>} : memref<8x256xf32, #tpu.memory_space<vmem>>, vector<8x128xf32>,
    %414 = arith.index_cast %348 : i32 to index
    %c0_148 = arith.constant 0 : index
    %415 = vector.load %arg9[%414, %c0_148] : memref<64x128xf32, #tpu.memory_space<vmem>>, vector<8x128xf32>
    tpu.vector_store %arg9[%414, %c0_148], %411 {strides = array<i32>} : memref<64x128xf32, #tpu.memory_space<vmem>>, vector<8x128xf32>,
    %c6_i32 = arith.constant 6 : i32
    %c8_i32_149 = arith.constant 8 : i32
    %416 = arith.muli %c6_i32, %c8_i32_149 : i32
    %417 = tpu.assume_multiple %416, 8 : i32
    %c0_150 = arith.constant 0 : index
    %c0_151 = arith.constant 0 : index
    %418 = vector.load %arg8[%c0_150, %c0_151] : memref<8x256xf32, #tpu.memory_space<vmem>>, vector<8x256xf32>
    %c0_152 = arith.constant 0 : index
    %c0_153 = arith.constant 0 : index
    %419 = vector.load %arg1[%c0_152, %c0_153] : memref<256x768xf32, #tpu.memory_space<vmem>>, vector<256x768xf32>
    %cst_154 = arith.constant dense<0.000000e+00> : vector<8x768xf32>
    %420 = tpu.matmul %418, %419, %cst_154 {dimension_numbers = #tpu.dot_dimension_numbers<[1], [0], [0], [1], [0, 0, 1, 1], [], []>} : vector<8x256xf32>, vector<256x768xf32>, vector<8x768xf32> -> vector<8x768xf32>
    %421 = arith.index_cast %417 : i32 to index
    %c0_155 = arith.constant 0 : index
    %422 = vector.load %arg0[%421, %c0_155] : memref<64x384xf32, #tpu.memory_space<vmem>>, vector<8x384xf32>
    %423 = vector.extract_strided_slice %420 {offsets = [0, 0], sizes = [8, 384], strides = [1, 1]} : vector<8x768xf32> to vector<8x384xf32>
    %c0_156 = arith.constant 0 : index
    %c0_157 = arith.constant 0 : index
    %424 = vector.load %arg8[%c0_156, %c0_157] : memref<8x256xf32, #tpu.memory_space<vmem>>, vector<8x128xf32>
    %425 = vector.extract_strided_slice %422 {offsets = [0, 0], sizes = [8, 128], strides = [1, 1]} : vector<8x384xf32> to vector<8x128xf32>
    %426 = vector.extract_strided_slice %423 {offsets = [0, 0], sizes = [8, 128], strides = [1, 1]} : vector<8x384xf32> to vector<8x128xf32>
    %427 = arith.addf %425, %426 : vector<8x128xf32>
    %428 = arith.negf %427 : vector<8x128xf32>
    %429 = math.exp %428 : vector<8x128xf32>
    %cst_158 = arith.constant 1.000000e+00 : f32
    %430 = vector.broadcast %cst_158 : f32 to vector<8x128xf32>
    %431 = arith.addf %430, %429 : vector<8x128xf32>
    %432 = arith.divf %430, %431 : vector<8x128xf32>
    %433 = vector.extract_strided_slice %422 {offsets = [0, 128], sizes = [8, 128], strides = [1, 1]} : vector<8x384xf32> to vector<8x128xf32>
    %434 = vector.extract_strided_slice %423 {offsets = [0, 128], sizes = [8, 128], strides = [1, 1]} : vector<8x384xf32> to vector<8x128xf32>
    %435 = arith.addf %433, %434 : vector<8x128xf32>
    %436 = arith.negf %435 : vector<8x128xf32>
    %437 = math.exp %436 : vector<8x128xf32>
    %cst_159 = arith.constant 1.000000e+00 : f32
    %438 = vector.broadcast %cst_159 : f32 to vector<8x128xf32>
    %439 = arith.addf %438, %437 : vector<8x128xf32>
    %440 = arith.divf %438, %439 : vector<8x128xf32>
    %441 = vector.extract_strided_slice %422 {offsets = [0, 256], sizes = [8, 128], strides = [1, 1]} : vector<8x384xf32> to vector<8x128xf32>
    %442 = vector.extract_strided_slice %423 {offsets = [0, 256], sizes = [8, 128], strides = [1, 1]} : vector<8x384xf32> to vector<8x128xf32>
    %443 = arith.mulf %432, %442 : vector<8x128xf32>
    %444 = arith.addf %441, %443 : vector<8x128xf32>
    %445 = math.tanh %444 : vector<8x128xf32>
    %cst_160 = arith.constant 1.000000e+00 : f32
    %446 = vector.broadcast %cst_160 : f32 to vector<8x128xf32>
    %447 = arith.subf %446, %440 : vector<8x128xf32>
    %448 = arith.mulf %447, %445 : vector<8x128xf32>
    %449 = arith.mulf %440, %424 : vector<8x128xf32>
    %450 = arith.addf %448, %449 : vector<8x128xf32>
    %c0_161 = arith.constant 0 : index
    %c0_162 = arith.constant 0 : index
    %451 = vector.load %arg2[%c0_161, %c0_162] : memref<128x384xf32, #tpu.memory_space<vmem>>, vector<128x384xf32>
    %cst_163 = arith.constant dense<0.000000e+00> : vector<8x384xf32>
    %452 = tpu.matmul %450, %451, %cst_163 {dimension_numbers = #tpu.dot_dimension_numbers<[1], [0], [0], [1], [0, 0, 1, 1], [], []>} : vector<8x128xf32>, vector<128x384xf32>, vector<8x384xf32> -> vector<8x384xf32>
    %453 = vector.extract_strided_slice %420 {offsets = [0, 384], sizes = [8, 384], strides = [1, 1]} : vector<8x768xf32> to vector<8x384xf32>
    %c0_164 = arith.constant 0 : index
    %c128_165 = arith.constant 128 : index
    %454 = vector.load %arg8[%c0_164, %c128_165] : memref<8x256xf32, #tpu.memory_space<vmem>>, vector<8x128xf32>
    %455 = vector.extract_strided_slice %452 {offsets = [0, 0], sizes = [8, 128], strides = [1, 1]} : vector<8x384xf32> to vector<8x128xf32>
    %456 = vector.extract_strided_slice %453 {offsets = [0, 0], sizes = [8, 128], strides = [1, 1]} : vector<8x384xf32> to vector<8x128xf32>
    %457 = arith.addf %455, %456 : vector<8x128xf32>
    %458 = arith.negf %457 : vector<8x128xf32>
    %459 = math.exp %458 : vector<8x128xf32>
    %cst_166 = arith.constant 1.000000e+00 : f32
    %460 = vector.broadcast %cst_166 : f32 to vector<8x128xf32>
    %461 = arith.addf %460, %459 : vector<8x128xf32>
    %462 = arith.divf %460, %461 : vector<8x128xf32>
    %463 = vector.extract_strided_slice %452 {offsets = [0, 128], sizes = [8, 128], strides = [1, 1]} : vector<8x384xf32> to vector<8x128xf32>
    %464 = vector.extract_strided_slice %453 {offsets = [0, 128], sizes = [8, 128], strides = [1, 1]} : vector<8x384xf32> to vector<8x128xf32>
    %465 = arith.addf %463, %464 : vector<8x128xf32>
    %466 = arith.negf %465 : vector<8x128xf32>
    %467 = math.exp %466 : vector<8x128xf32>
    %cst_167 = arith.constant 1.000000e+00 : f32
    %468 = vector.broadcast %cst_167 : f32 to vector<8x128xf32>
    %469 = arith.addf %468, %467 : vector<8x128xf32>
    %470 = arith.divf %468, %469 : vector<8x128xf32>
    %471 = vector.extract_strided_slice %452 {offsets = [0, 256], sizes = [8, 128], strides = [1, 1]} : vector<8x384xf32> to vector<8x128xf32>
    %472 = vector.extract_strided_slice %453 {offsets = [0, 256], sizes = [8, 128], strides = [1, 1]} : vector<8x384xf32> to vector<8x128xf32>
    %473 = arith.mulf %462, %472 : vector<8x128xf32>
    %474 = arith.addf %471, %473 : vector<8x128xf32>
    %475 = math.tanh %474 : vector<8x128xf32>
    %cst_168 = arith.constant 1.000000e+00 : f32
    %476 = vector.broadcast %cst_168 : f32 to vector<8x128xf32>
    %477 = arith.subf %476, %470 : vector<8x128xf32>
    %478 = arith.mulf %477, %475 : vector<8x128xf32>
    %479 = arith.mulf %470, %454 : vector<8x128xf32>
    %480 = arith.addf %478, %479 : vector<8x128xf32>
    %c0_169 = arith.constant 0 : index
    %c0_170 = arith.constant 0 : index
    %481 = vector.load %arg8[%c0_169, %c0_170] : memref<8x256xf32, #tpu.memory_space<vmem>>, vector<8x128xf32>
    tpu.vector_store %arg8[%c0_169, %c0_170], %450 {strides = array<i32>} : memref<8x256xf32, #tpu.memory_space<vmem>>, vector<8x128xf32>,
    %c0_171 = arith.constant 0 : index
    %c128_172 = arith.constant 128 : index
    %482 = vector.load %arg8[%c0_171, %c128_172] : memref<8x256xf32, #tpu.memory_space<vmem>>, vector<8x128xf32>
    tpu.vector_store %arg8[%c0_171, %c128_172], %480 {strides = array<i32>} : memref<8x256xf32, #tpu.memory_space<vmem>>, vector<8x128xf32>,
    %483 = arith.index_cast %417 : i32 to index
    %c0_173 = arith.constant 0 : index
    %484 = vector.load %arg9[%483, %c0_173] : memref<64x128xf32, #tpu.memory_space<vmem>>, vector<8x128xf32>
    tpu.vector_store %arg9[%483, %c0_173], %480 {strides = array<i32>} : memref<64x128xf32, #tpu.memory_space<vmem>>, vector<8x128xf32>,
    %c7_i32 = arith.constant 7 : i32
    %c8_i32_174 = arith.constant 8 : i32
    %485 = arith.muli %c7_i32, %c8_i32_174 : i32
    %486 = tpu.assume_multiple %485, 8 : i32
    %c0_175 = arith.constant 0 : index
    %c0_176 = arith.constant 0 : index
    %487 = vector.load %arg8[%c0_175, %c0_176] : memref<8x256xf32, #tpu.memory_space<vmem>>, vector<8x256xf32>
    %c0_177 = arith.constant 0 : index
    %c0_178 = arith.constant 0 : index
    %488 = vector.load %arg1[%c0_177, %c0_178] : memref<256x768xf32, #tpu.memory_space<vmem>>, vector<256x768xf32>
    %cst_179 = arith.constant dense<0.000000e+00> : vector<8x768xf32>
    %489 = tpu.matmul %487, %488, %cst_179 {dimension_numbers = #tpu.dot_dimension_numbers<[1], [0], [0], [1], [0, 0, 1, 1], [], []>} : vector<8x256xf32>, vector<256x768xf32>, vector<8x768xf32> -> vector<8x768xf32>
    %490 = arith.index_cast %486 : i32 to index
    %c0_180 = arith.constant 0 : index
    %491 = vector.load %arg0[%490, %c0_180] : memref<64x384xf32, #tpu.memory_space<vmem>>, vector<8x384xf32>
    %492 = vector.extract_strided_slice %489 {offsets = [0, 0], sizes = [8, 384], strides = [1, 1]} : vector<8x768xf32> to vector<8x384xf32>
    %c0_181 = arith.constant 0 : index
    %c0_182 = arith.constant 0 : index
    %493 = vector.load %arg8[%c0_181, %c0_182] : memref<8x256xf32, #tpu.memory_space<vmem>>, vector<8x128xf32>
    %494 = vector.extract_strided_slice %491 {offsets = [0, 0], sizes = [8, 128], strides = [1, 1]} : vector<8x384xf32> to vector<8x128xf32>
    %495 = vector.extract_strided_slice %492 {offsets = [0, 0], sizes = [8, 128], strides = [1, 1]} : vector<8x384xf32> to vector<8x128xf32>
    %496 = arith.addf %494, %495 : vector<8x128xf32>
    %497 = arith.negf %496 : vector<8x128xf32>
    %498 = math.exp %497 : vector<8x128xf32>
    %cst_183 = arith.constant 1.000000e+00 : f32
    %499 = vector.broadcast %cst_183 : f32 to vector<8x128xf32>
    %500 = arith.addf %499, %498 : vector<8x128xf32>
    %501 = arith.divf %499, %500 : vector<8x128xf32>
    %502 = vector.extract_strided_slice %491 {offsets = [0, 128], sizes = [8, 128], strides = [1, 1]} : vector<8x384xf32> to vector<8x128xf32>
    %503 = vector.extract_strided_slice %492 {offsets = [0, 128], sizes = [8, 128], strides = [1, 1]} : vector<8x384xf32> to vector<8x128xf32>
    %504 = arith.addf %502, %503 : vector<8x128xf32>
    %505 = arith.negf %504 : vector<8x128xf32>
    %506 = math.exp %505 : vector<8x128xf32>
    %cst_184 = arith.constant 1.000000e+00 : f32
    %507 = vector.broadcast %cst_184 : f32 to vector<8x128xf32>
    %508 = arith.addf %507, %506 : vector<8x128xf32>
    %509 = arith.divf %507, %508 : vector<8x128xf32>
    %510 = vector.extract_strided_slice %491 {offsets = [0, 256], sizes = [8, 128], strides = [1, 1]} : vector<8x384xf32> to vector<8x128xf32>
    %511 = vector.extract_strided_slice %492 {offsets = [0, 256], sizes = [8, 128], strides = [1, 1]} : vector<8x384xf32> to vector<8x128xf32>
    %512 = arith.mulf %501, %511 : vector<8x128xf32>
    %513 = arith.addf %510, %512 : vector<8x128xf32>
    %514 = math.tanh %513 : vector<8x128xf32>
    %cst_185 = arith.constant 1.000000e+00 : f32
    %515 = vector.broadcast %cst_185 : f32 to vector<8x128xf32>
    %516 = arith.subf %515, %509 : vector<8x128xf32>
    %517 = arith.mulf %516, %514 : vector<8x128xf32>
    %518 = arith.mulf %509, %493 : vector<8x128xf32>
    %519 = arith.addf %517, %518 : vector<8x128xf32>
    %c0_186 = arith.constant 0 : index
    %c0_187 = arith.constant 0 : index
    %520 = vector.load %arg2[%c0_186, %c0_187] : memref<128x384xf32, #tpu.memory_space<vmem>>, vector<128x384xf32>
    %cst_188 = arith.constant dense<0.000000e+00> : vector<8x384xf32>
    %521 = tpu.matmul %519, %520, %cst_188 {dimension_numbers = #tpu.dot_dimension_numbers<[1], [0], [0], [1], [0, 0, 1, 1], [], []>} : vector<8x128xf32>, vector<128x384xf32>, vector<8x384xf32> -> vector<8x384xf32>
    %522 = vector.extract_strided_slice %489 {offsets = [0, 384], sizes = [8, 384], strides = [1, 1]} : vector<8x768xf32> to vector<8x384xf32>
    %c0_189 = arith.constant 0 : index
    %c128_190 = arith.constant 128 : index
    %523 = vector.load %arg8[%c0_189, %c128_190] : memref<8x256xf32, #tpu.memory_space<vmem>>, vector<8x128xf32>
    %524 = vector.extract_strided_slice %521 {offsets = [0, 0], sizes = [8, 128], strides = [1, 1]} : vector<8x384xf32> to vector<8x128xf32>
    %525 = vector.extract_strided_slice %522 {offsets = [0, 0], sizes = [8, 128], strides = [1, 1]} : vector<8x384xf32> to vector<8x128xf32>
    %526 = arith.addf %524, %525 : vector<8x128xf32>
    %527 = arith.negf %526 : vector<8x128xf32>
    %528 = math.exp %527 : vector<8x128xf32>
    %cst_191 = arith.constant 1.000000e+00 : f32
    %529 = vector.broadcast %cst_191 : f32 to vector<8x128xf32>
    %530 = arith.addf %529, %528 : vector<8x128xf32>
    %531 = arith.divf %529, %530 : vector<8x128xf32>
    %532 = vector.extract_strided_slice %521 {offsets = [0, 128], sizes = [8, 128], strides = [1, 1]} : vector<8x384xf32> to vector<8x128xf32>
    %533 = vector.extract_strided_slice %522 {offsets = [0, 128], sizes = [8, 128], strides = [1, 1]} : vector<8x384xf32> to vector<8x128xf32>
    %534 = arith.addf %532, %533 : vector<8x128xf32>
    %535 = arith.negf %534 : vector<8x128xf32>
    %536 = math.exp %535 : vector<8x128xf32>
    %cst_192 = arith.constant 1.000000e+00 : f32
    %537 = vector.broadcast %cst_192 : f32 to vector<8x128xf32>
    %538 = arith.addf %537, %536 : vector<8x128xf32>
    %539 = arith.divf %537, %538 : vector<8x128xf32>
    %540 = vector.extract_strided_slice %521 {offsets = [0, 256], sizes = [8, 128], strides = [1, 1]} : vector<8x384xf32> to vector<8x128xf32>
    %541 = vector.extract_strided_slice %522 {offsets = [0, 256], sizes = [8, 128], strides = [1, 1]} : vector<8x384xf32> to vector<8x128xf32>
    %542 = arith.mulf %531, %541 : vector<8x128xf32>
    %543 = arith.addf %540, %542 : vector<8x128xf32>
    %544 = math.tanh %543 : vector<8x128xf32>
    %cst_193 = arith.constant 1.000000e+00 : f32
    %545 = vector.broadcast %cst_193 : f32 to vector<8x128xf32>
    %546 = arith.subf %545, %539 : vector<8x128xf32>
    %547 = arith.mulf %546, %544 : vector<8x128xf32>
    %548 = arith.mulf %539, %523 : vector<8x128xf32>
    %549 = arith.addf %547, %548 : vector<8x128xf32>
    %c0_194 = arith.constant 0 : index
    %c0_195 = arith.constant 0 : index
    %550 = vector.load %arg8[%c0_194, %c0_195] : memref<8x256xf32, #tpu.memory_space<vmem>>, vector<8x128xf32>
    tpu.vector_store %arg8[%c0_194, %c0_195], %519 {strides = array<i32>} : memref<8x256xf32, #tpu.memory_space<vmem>>, vector<8x128xf32>,
    %c0_196 = arith.constant 0 : index
    %c128_197 = arith.constant 128 : index
    %551 = vector.load %arg8[%c0_196, %c128_197] : memref<8x256xf32, #tpu.memory_space<vmem>>, vector<8x128xf32>
    tpu.vector_store %arg8[%c0_196, %c128_197], %549 {strides = array<i32>} : memref<8x256xf32, #tpu.memory_space<vmem>>, vector<8x128xf32>,
    %552 = arith.index_cast %486 : i32 to index
    %c0_198 = arith.constant 0 : index
    %553 = vector.load %arg9[%552, %c0_198] : memref<64x128xf32, #tpu.memory_space<vmem>>, vector<8x128xf32>
    tpu.vector_store %arg9[%552, %c0_198], %549 {strides = array<i32>} : memref<64x128xf32, #tpu.memory_space<vmem>>, vector<8x128xf32>,
    %c8_i32_199 = arith.constant 8 : i32
    %c0_200 = arith.constant 0 : index
    %c0_201 = arith.constant 0 : index
    %554 = vector.load %arg9[%c0_200, %c0_201] : memref<64x128xf32, #tpu.memory_space<vmem>>, vector<64x128xf32>
    %c0_202 = arith.constant 0 : index
    %c0_203 = arith.constant 0 : index
    %555 = vector.load %arg3[%c0_202, %c0_203] : memref<128x128xf32, #tpu.memory_space<vmem>>, vector<128x128xf32>
    %cst_204 = arith.constant dense<0.000000e+00> : vector<64x128xf32>
    %556 = tpu.matmul %554, %555, %cst_204 {dimension_numbers = #tpu.dot_dimension_numbers<[1], [0], [0], [1], [0, 0, 1, 1], [], []>} : vector<64x128xf32>, vector<128x128xf32>, vector<64x128xf32> -> vector<64x128xf32>
    %c0_205 = arith.constant 0 : index
    %c0_206 = arith.constant 0 : index
    %557 = vector.load %arg4[%c0_205, %c0_206] : memref<1x128xf32, #tpu.memory_space<vmem>>, vector<1x128xf32>
    %558 = vector.broadcast %557 : vector<1x128xf32> to vector<64x128xf32>
    %559 = arith.addf %556, %558 : vector<64x128xf32>
    %cst_207 = arith.constant 0.000000e+00 : f32
    %560 = vector.broadcast %cst_207 : f32 to vector<64x128xf32>
    %561 = arith.maximumf %559, %560 : vector<64x128xf32>
    %c0_208 = arith.constant 0 : index
    %c0_209 = arith.constant 0 : index
    %562 = vector.load %arg5[%c0_208, %c0_209] : memref<128x128xf32, #tpu.memory_space<vmem>>, vector<128x128xf32>
    %cst_210 = arith.constant dense<0.000000e+00> : vector<64x128xf32>
    %563 = tpu.matmul %561, %562, %cst_210 {dimension_numbers = #tpu.dot_dimension_numbers<[1], [0], [0], [1], [0, 0, 1, 1], [], []>} : vector<64x128xf32>, vector<128x128xf32>, vector<64x128xf32> -> vector<64x128xf32>
    %c0_211 = arith.constant 0 : index
    %c0_212 = arith.constant 0 : index
    %564 = vector.load %arg6[%c0_211, %c0_212] : memref<1x128xf32, #tpu.memory_space<vmem>>, vector<1x128xf32>
    %565 = vector.broadcast %564 : vector<1x128xf32> to vector<64x128xf32>
    %566 = arith.addf %563, %565 : vector<64x128xf32>
    %567 = vector.shape_cast %566 : vector<64x128xf32> to vector<8x8x128xf32>
    %c0_213 = arith.constant 0 : index
    %c0_214 = arith.constant 0 : index
    %c0_215 = arith.constant 0 : index
    %568 = vector.load %arg7[%c0_213, %c0_214, %c0_215] : memref<8x8x128xf32, #tpu.memory_space<vmem>>, vector<8x8x128xf32>
    tpu.vector_store %arg7[%c0_213, %c0_214, %c0_215], %567 {strides = array<i32>} : memref<8x8x128xf32, #tpu.memory_space<vmem>>, vector<8x8x128xf32>,
    return
  }
}

</mosaic_0001>

<bundles_post_ra>
// kernel: tpu_custom_call.1
= control target key start
LH: loop header
LB: loop body
LE: loop exit
PB: predicated region body
PF: predicated region fallthrough
CT: control target
= control target key end

     0   :  { %12 = vsyncpa [#allocation5], 0  ;;  %s9110_s0 = inlined_call_operand.hbm [shape: f32[64,384], index: 0, kind: input, shape index: {}]   ;;  %s9111_s1 = inlined_call_operand.hbm [shape: f32[256,768], index: 1, kind: input, shape index: {}]   ;;  %s9112_s2 = inlined_call_operand.hbm [shape: f32[128,384], index: 2, kind: input, shape index: {}]   ;;  %s9113_s3 = inlined_call_operand.hbm [shape: f32[128,128], index: 3, kind: input, shape index: {}]   ;;  %s9114_s4 = inlined_call_operand.vmem [shape: f32[1,128], index: 4, kind: input, shape index: {}]   ;;  %s9115_s5 = inlined_call_operand.hbm [shape: f32[128,128], index: 5, kind: input, shape index: {}]   ;;  %s9116_s6 = inlined_call_operand.vmem [shape: f32[1,128], index: 6, kind: input, shape index: {}]   ;;  %s9117_s7 = inlined_call_operand.hbm [shape: f32[8,8,128], index: 7, kind: output, shape index: {}]  }
   0x1   :  { %13 = vsyncpa [#allocation8], 0 }
   0x2   :  { %14 = vsyncpa [#allocation11], 0 }
   0x3   :  { %15 = vsyncpa [#allocation6], 0  ;;  %s8543_s24 = smov [#allocation7]   ;;  %s8403_s28 = scalar_lea.hbm %s9111_s1, 24576 }
   0x4   :  { %s33_s25 = sshll.u32 %s8543_s24, 4  ;;  %p8404_p0 = scmp.ne.s32.totalorder %s9111_s1, %s8403_s28  ;;  %s34_s25 = int_to_ptr.vmem [resolvable:$true] %s33_s25 }
   0x5   :  { %p8407_p1 = scmp.lt.u32.totalorder %s8403_s28, %s9111_s1 }
   0x7   :  { %p8409_p2 = pnand %p8407_p1, %p8404_p0 }
   0x9   :  { %8412 = shalt.err (!%p8409_p2)
}
   0xa   :  { %s8413_s10 = scalar_lea.vmem %s34_s25, 24576  ;;  %p8418_p4 = scmp.lt.s32.totalorder %s34_s25, %s34_s25 }
   0xb   :  { %p8414_p3 = scmp.ne.s32.totalorder %s34_s25, %s8413_s10  ;;  %p8419_p5 = scmp.lt.s32.totalorder %s8413_s10, %s8413_s10 }
   0xd   :  { %p8420_p6 = por %p8419_p5, %p8418_p4 }
   0xf   :  { %p8421_p7 = pnand %p8420_p6, %p8414_p3 }
  0x11   :  { %8424 = shalt.err (!%p8421_p7)
}
  0x12   :  { %s8544_s11 = smov 768   ;;  %s8545_s12 = smov 48  }
  0x13   :  { %39 = dma.hbm_to_vmem [thread:$0]  %s9111_s1, 24576, %s34_s25, [#allocation8], %s8544_s11, %s8544_s11, %s8545_s12  }
  0x14   :  { %s8546_s15 = smov [#allocation10]   ;;  %s8425_s19 = scalar_lea.hbm %s9113_s3, 2048 }
  0x15   :  { %s57_s16 = sshll.u32 %s8546_s15, 4  ;;  %p8426_p8 = scmp.ne.s32.totalorder %s9113_s3, %s8425_s19  ;;  %s58_s16 = int_to_ptr.vmem [resolvable:$true] %s57_s16 }
  0x16   :  { %p8429_p9 = scmp.lt.u32.totalorder %s8425_s19, %s9113_s3 }
  0x18   :  { %p8431_p10 = pnand %p8429_p9, %p8426_p8 }
  0x1a   :  { %8434 = shalt.err (!%p8431_p10)
}
  0x1b   :  { %s8435_s24 = scalar_lea.vmem %s58_s16, 2048  ;;  %p8440_p12 = scmp.lt.s32.totalorder %s58_s16, %s58_s16 }
  0x1c   :  { %p8436_p11 = scmp.ne.s32.totalorder %s58_s16, %s8435_s24  ;;  %p8441_p13 = scmp.lt.s32.totalorder %s8435_s24, %s8435_s24 }
  0x1e   :  { %p8442_p0 = por %p8441_p13, %p8440_p12 }
  0x20   :  { %p8443_p1 = pnand %p8442_p0, %p8436_p11 }
  0x22   :  { %8446 = shalt.err (!%p8443_p1)
}
  0x23   :  { %s8547_s1 = smov 128   ;;  %s8548_s25 = smov 8  }
  0x24   :  { %63 = dma.hbm_to_vmem [thread:$0]  %s9113_s3, 2048, %s58_s16, [#allocation11], %s8547_s1, %s8547_s1, %s8548_s25  }
  0x25   :  { %s8549_s28 = smov [#allocation4]   ;;  %s8447_s9 = scalar_lea.hbm %s9110_s0, 3072 }
  0x26   :  { %s21_s29 = sshll.u32 %s8549_s28, 4  ;;  %p8448_p2 = scmp.ne.s32.totalorder %s9110_s0, %s8447_s9  ;;  %s22_s29 = int_to_ptr.vmem [resolvable:$true] %s21_s29 }
  0x27   :  { %p8451_p3 = scmp.lt.u32.totalorder %s8447_s9, %s9110_s0 }
  0x29   :  { %p8453_p4 = pnand %p8451_p3, %p8448_p2 }
  0x2b   :  { %8456 = shalt.err (!%p8453_p4)
}
  0x2c   :  { %s8457_s14 = scalar_lea.vmem %s22_s29, 3072  ;;  %p8462_p6 = scmp.lt.s32.totalorder %s22_s29, %s22_s29 }
  0x2d   :  { %p8458_p5 = scmp.ne.s32.totalorder %s22_s29, %s8457_s14  ;;  %p8463_p7 = scmp.lt.s32.totalorder %s8457_s14, %s8457_s14 }
  0x2f   :  { %p8464_p8 = por %p8463_p7, %p8462_p6 }
  0x31   :  { %p8465_p9 = pnand %p8464_p8, %p8458_p5 }
  0x33   :  { %8468 = shalt.err (!%p8465_p9)
}
  0x34   :  { %s8550_s3 = smov 384   ;;  %s8551_s15 = smov 24  }
  0x35   :  { %27 = dma.hbm_to_vmem [thread:$0]  %s9110_s0, 3072, %s22_s29, [#allocation5], %s8550_s3, %s8550_s3, %s8551_s15  }
  0x36   :  { %s8552_s18 = smov [#allocation9]   ;;  %s8553_s20 = smov [#allocation12]  }
  0x37   :  { %s45_s19 = sshll.u32 %s8552_s18, 4  ;;  %s71_s21 = sshll.u32 %s8553_s20, 4  ;;  %s46_s19 = int_to_ptr.vmem [resolvable:$true] %s45_s19  ;;  %s72_s21 = int_to_ptr.vmem [resolvable:$true] %s71_s21 }
  0x38   :  { %s8469_s24 = scalar_lea.hbm %s9112_s2, 6144 }
  0x39   :  { %p8470_p10 = scmp.ne.s32.totalorder %s9112_s2, %s8469_s24  ;;  %p8473_p11 = scmp.lt.u32.totalorder %s8469_s24, %s9112_s2 }
  0x3b   :  { %p8475_p12 = pnand %p8473_p11, %p8470_p10 }
  0x3d   :  { %8478 = shalt.err (!%p8475_p12)
}
  0x3e   :  { %s8479_s0 = scalar_lea.vmem %s46_s19, 6144  ;;  %p8484_p0 = scmp.lt.s32.totalorder %s46_s19, %s46_s19 }
  0x3f   :  { %p8480_p13 = scmp.ne.s32.totalorder %s46_s19, %s8479_s0  ;;  %p8485_p1 = scmp.lt.s32.totalorder %s8479_s0, %s8479_s0 }
  0x41   :  { %p8486_p2 = por %p8485_p1, %p8484_p0 }
  0x43   :  { %p8487_p3 = pnand %p8486_p2, %p8480_p13 }
  0x45   :  { %8490 = shalt.err (!%p8487_p3)
}
  0x46   :  { %51 = dma.hbm_to_vmem [thread:$0]  %s9112_s2, 6144, %s46_s19, [#allocation8], %s8550_s3, %s8550_s3, %s8551_s15  }
  0x47   :  { %s8491_s11 = scalar_lea.hbm %s9115_s5, 2048 }
  0x48   :  { %p8492_p4 = scmp.ne.s32.totalorder %s9115_s5, %s8491_s11  ;;  %p8495_p5 = scmp.lt.u32.totalorder %s8491_s11, %s9115_s5 }
  0x4a   :  { %p8497_p6 = pnand %p8495_p5, %p8492_p4 }
  0x4c   :  { %8500 = shalt.err (!%p8497_p6)
}
  0x4d   :  { %s8501_s17 = scalar_lea.vmem %s72_s21, 2048  ;;  %p8506_p8 = scmp.lt.s32.totalorder %s72_s21, %s72_s21 }
  0x4e   :  { %p8502_p7 = scmp.ne.s32.totalorder %s72_s21, %s8501_s17  ;;  %p8507_p9 = scmp.lt.s32.totalorder %s8501_s17, %s8501_s17 }
  0x50   :  { %p8508_p10 = por %p8507_p9, %p8506_p8 }
  0x52   :  { %p8509_p11 = pnand %p8508_p10, %p8502_p7 }
  0x54   :  { %8512 = shalt.err (!%p8509_p11)
}
  0x55   :  { %77 = dma.hbm_to_vmem [thread:$0]  %s9115_s5, 2048, %s72_s21, [#allocation11], %s8547_s1, %s8547_s1, %s8548_s25  }
  0x56   :  { %8535 = dma.done.wait [#allocation5], 3072  }
  0x57   :  { %8536 = vsyncadd [#allocation5], 4294964224 }
  0x58   :  { %8537 = dma.done.wait [#allocation8], 30720  }
  0x59   :  { %8538 = vsyncadd [#allocation8], 4294936576 }
  0x5a   :  { %8539 = dma.done.wait [#allocation11], 4096  }
  0x5b   :  { %8540 = vsyncadd [#allocation11], 4294963200  ;;  %v8554_v0 = vmov 0.0   ;;  %v100_v1 = vld [vmem:[#allocation7 + $0x8] sm:$0xff]  ;;  %v106_v2 = vld [vmem:[#allocation7 + $0x38] sm:$0xff]  ;;  %vm8556_vm0 = vmmov 0  }
  0x5c   :  { %355 = vmatprep.mubr.f32.mxu0 %v8554_v0  ;;  %426 = vmatprep.mubr.f32.mxu1 %v8554_v0  ;;  %v99_v3 = vld [vmem:[#allocation7] sm:$0xff]  ;;  %v6180_v4 = vpack.c.bf16 %v106_v2, %v100_v1  ;;  %v105_v5 = vld [vmem:[#allocation7 + $0x30] sm:$0xff]  ;;  %v112_v6 = vld [vmem:[#allocation7 + $0x68] sm:$0xff] }
  0x5d   :  { %v118_v7 = vld [vmem:[#allocation7 + $0x98] sm:$0xff]  ;;  %v6182_v8 = vpack.c.bf16 %v105_v5, %v99_v3  ;;  %v111_v10 = vld [vmem:[#allocation7 + $0x60] sm:$0xff]  ;;  %v117_v11 = vld [vmem:[#allocation7 + $0x90] sm:$0xff] }
  0x5e   :  { %v6184_v9 = vpack.c.bf16 %v118_v7, %v112_v6  ;;  %v124_v12 = vld [vmem:[#allocation7 + $0xc8] sm:$0xff]  ;;  %6181 = vmatprep.subr.bf16.mxu0 %v6180_v4  ;;  %v130_v13 = vld [vmem:[#allocation7 + $0xf8] sm:$0xff]  ;;  %v6186_v14 = vpack.c.bf16 %v117_v11, %v111_v10  ;;  %v123_v16 = vld [vmem:[#allocation7 + $0xc0] sm:$0xff] }
  0x5f   :  { %6183 = vmatpush1.bf16.msra.mxu0 %v6182_v8  ;;  %v6188_v15 = vpack.c.bf16 %v130_v13, %v124_v12  ;;  %v129_v17 = vld [vmem:[#allocation7 + $0xf0] sm:$0xff]  ;;  %v136_v18 = vld [vmem:[#allocation7 + $0x128] sm:$0xff]  ;;  %v142_v19 = vld [vmem:[#allocation7 + $0x158] sm:$0xff] }
  0x60   :  { %6185 = vmatprep.subr.bf16.mxu0 %v6184_v9  ;;  %v6190_v20 = vpack.c.bf16 %v129_v17, %v123_v16  ;;  %v135_v21 = vld [vmem:[#allocation7 + $0x120] sm:$0xff]  ;;  %v6192_v22 = vpack.c.bf16 %v142_v19, %v136_v18  ;;  %v141_v23 = vld [vmem:[#allocation7 + $0x150] sm:$0xff]  ;;  %v102_v24 = vld [vmem:[#allocation7 + $0x18] sm:$0xff] }
  0x61   :  { %v108_v25 = vld [vmem:[#allocation7 + $0x48] sm:$0xff]  ;;  %v154_v27 = vld [vmem:[#allocation7 + $0x1b8] sm:$0xff]  ;;  %v101_v29 = vld [vmem:[#allocation7 + $0x10] sm:$0xff]  ;;  %v6194_v31 = vpack.c.bf16 %v141_v23, %v135_v21 }
  0x62   :  { %v148_v26 = vld [vmem:[#allocation7 + $0x188] sm:$0xff]  ;;  %v8666_v28 = vpack.c.bf16 %v108_v25, %v102_v24  ;;  %v107_v30 = vld [vmem:[#allocation7 + $0x40] sm:$0xff]  ;;  %v114_v34 = vld [vmem:[#allocation7 + $0x78] sm:$0xff] }
  0x63   :  { %6187 = vmatpush1.bf16.msra.mxu0 %v6186_v14  ;;  %v147_v32 = vld [vmem:[#allocation7 + $0x180] sm:$0xff]  ;;  %v8669_v33 = vpack.c.bf16 %v107_v30, %v101_v29  ;;  %v120_v35 = vld [vmem:[#allocation7 + $0xa8] sm:$0xff]  ;;  %v6196_v36 = vpack.c.bf16 %v154_v27, %v148_v26  ;;  %v153_v37 = vld [vmem:[#allocation7 + $0x1b0] sm:$0xff] }
  0x64   :  { %6189 = vmatprep.subr.bf16.mxu0 %v6188_v15  ;;  %6245 = vmatprep.subr.bf16.mxu1 %v8666_v28  ;;  %v8671_v38 = vpack.c.bf16 %v120_v35, %v114_v34  ;;  %v113_v39 = vld [vmem:[#allocation7 + $0x70] sm:$0xff]  ;;  %v119_v40 = vld [vmem:[#allocation7 + $0xa0] sm:$0xff]  ;;  %v160_v41 = vld [vmem:[#allocation7 + $0x1e8] sm:$0xff]  ;;  %v6198_v46 = vpack.c.bf16 %v153_v37, %v147_v32 }
  0x65   :  { %v166_v42 = vld [vmem:[#allocation7 + $0x218] sm:$0xff]  ;;  %6247 = vmatpush1.bf16.msra.mxu1 %v8669_v33  ;;  %v8674_v43 = vpack.c.bf16 %v119_v40, %v113_v39  ;;  %v132_v45 = vld [vmem:[#allocation7 + $0x108] sm:$0xff]  ;;  %v159_v47 = vld [vmem:[#allocation7 + $0x1e0] sm:$0xff] }
  0x66   :  { %v126_v44 = vld [vmem:[#allocation7 + $0xd8] sm:$0xff]  ;;  %6249 = vmatprep.subr.bf16.mxu1 %v8671_v38  ;;  %v125_v49 = vld [vmem:[#allocation7 + $0xd0] sm:$0xff]  ;;  %v131_v50 = vld [vmem:[#allocation7 + $0x100] sm:$0xff]  ;;  %v6200_v51 = vpack.c.bf16 %v166_v42, %v160_v41 }
  0x67   :  { %6191 = vmatpush1.bf16.msra.mxu0 %v6190_v20  ;;  %v8677_v48 = vpack.c.bf16 %v132_v45, %v126_v44  ;;  %v165_v52 = vld [vmem:[#allocation7 + $0x210] sm:$0xff]  ;;  %v138_v53 = vld [vmem:[#allocation7 + $0x138] sm:$0xff]  ;;  %v144_v54 = vld [vmem:[#allocation7 + $0x168] sm:$0xff]  ;;  %v8680_v57 = vpack.c.bf16 %v131_v50, %v125_v49 }
  0x68   :  { %6193 = vmatprep.subr.bf16.mxu0 %v6192_v22  ;;  %v172_v55 = vld [vmem:[#allocation7 + $0x248] sm:$0xff]  ;;  %v178_v56 = vld [vmem:[#allocation7 + $0x278] sm:$0xff]  ;;  %v8683_v58 = vpack.c.bf16 %v144_v54, %v138_v53  ;;  %v137_v59 = vld [vmem:[#allocation7 + $0x130] sm:$0xff]  ;;  %v6202_v61 = vpack.c.bf16 %v165_v52, %v159_v47 }
  0x69   :  { %6251 = vmatpush1.bf16.msra.mxu1 %v8674_v43  ;;  %v143_v60 = vld [vmem:[#allocation7 + $0x160] sm:$0xff]  ;;  %v150_v62 = vld [vmem:[#allocation7 + $0x198] sm:$0xff]  ;;  %v156_v63 = vld [vmem:[#allocation7 + $0x1c8] sm:$0xff]  ;;  %v6204_v1 = vpack.c.bf16 %v178_v56, %v172_v55 }
  0x6a   :  { %6253 = vmatprep.subr.bf16.mxu1 %v8677_v48  ;;  %v171_v2 = vld [vmem:[#allocation7 + $0x240] sm:$0xff]  ;;  %v177_v3 = vld [vmem:[#allocation7 + $0x270] sm:$0xff]  ;;  %v184_v4 = vld [vmem:[#allocation7 + $0x2a8] sm:$0xff]  ;;  %v8686_v6 = vpack.c.bf16 %v143_v60, %v137_v59  ;;  %v8689_v7 = vpack.c.bf16 %v156_v63, %v150_v62 }
  0x6b   :  { %6195 = vmatpush1.bf16.msra.mxu0 %v6194_v31  ;;  %v190_v5 = vld [vmem:[#allocation7 + $0x2d8] sm:$0xff]  ;;  %v149_v8 = vld [vmem:[#allocation7 + $0x190] sm:$0xff]  ;;  %v155_v9 = vld [vmem:[#allocation7 + $0x1c0] sm:$0xff]  ;;  %v6206_v10 = vpack.c.bf16 %v177_v3, %v171_v2 }
  0x6c   :  { %6197 = vmatprep.subr.bf16.mxu0 %v6196_v36  ;;  %v162_v11 = vld [vmem:[#allocation7 + $0x1f8] sm:$0xff]  ;;  %v168_v12 = vld [vmem:[#allocation7 + $0x228] sm:$0xff]  ;;  %v6208_v13 = vpack.c.bf16 %v190_v5, %v184_v4  ;;  %v183_v14 = vld [vmem:[#allocation7 + $0x2a0] sm:$0xff]  ;;  %v8692_v18 = vpack.c.bf16 %v155_v9, %v149_v8 }
  0x6d   :  { %6255 = vmatpush1.bf16.msra.mxu1 %v8680_v57  ;;  %v189_v15 = vld [vmem:[#allocation7 + $0x2d0] sm:$0xff]  ;;  %v196_v16 = vld [vmem:[#allocation7 + $0x308] sm:$0xff]  ;;  %v202_v17 = vld [vmem:[#allocation7 + $0x338] sm:$0xff]  ;;  %v8695_v19 = vpack.c.bf16 %v168_v12, %v162_v11 }
  0x6e   :  { %6257 = vmatprep.subr.bf16.mxu1 %v8683_v58  ;;  %v161_v20 = vld [vmem:[#allocation7 + $0x1f0] sm:$0xff]  ;;  %v167_v21 = vld [vmem:[#allocation7 + $0x220] sm:$0xff]  ;;  %v6210_v22 = vpack.c.bf16 %v189_v15, %v183_v14  ;;  %v174_v23 = vld [vmem:[#allocation7 + $0x258] sm:$0xff]  ;;  %v6212_v25 = vpack.c.bf16 %v202_v17, %v196_v16 }
  0x6f   :  { %6199 = vmatpush1.bf16.msra.mxu0 %v6198_v46  ;;  %v180_v24 = vld [vmem:[#allocation7 + $0x288] sm:$0xff]  ;;  %v195_v26 = vld [vmem:[#allocation7 + $0x300] sm:$0xff]  ;;  %v201_v27 = vld [vmem:[#allocation7 + $0x330] sm:$0xff]  ;;  %v8698_v31 = vpack.c.bf16 %v167_v21, %v161_v20 }
  0x70   :  { %6201 = vmatprep.subr.bf16.mxu0 %v6200_v51  ;;  %v208_v29 = vld [vmem:[#allocation7 + $0x368] sm:$0xff]  ;;  %v214_v30 = vld [vmem:[#allocation7 + $0x398] sm:$0xff]  ;;  %v8701_v32 = vpack.c.bf16 %v180_v24, %v174_v23  ;;  %v173_v34 = vld [vmem:[#allocation7 + $0x250] sm:$0xff]  ;;  %v6214_v36 = vpack.c.bf16 %v201_v27, %v195_v26 }
  0x71   :  { %6259 = vmatpush1.bf16.msra.mxu1 %v8686_v6  ;;  %v179_v35 = vld [vmem:[#allocation7 + $0x280] sm:$0xff]  ;;  %v186_v37 = vld [vmem:[#allocation7 + $0x2b8] sm:$0xff]  ;;  %v192_v39 = vld [vmem:[#allocation7 + $0x2e8] sm:$0xff]  ;;  %v6216_v40 = vpack.c.bf16 %v214_v30, %v208_v29 }
  0x72   :  { %6261 = vmatprep.subr.bf16.mxu1 %v8689_v7  ;;  %v207_v41 = vld [vmem:[#allocation7 + $0x360] sm:$0xff]  ;;  %v213_v42 = vld [vmem:[#allocation7 + $0x390] sm:$0xff]  ;;  %v220_v44 = vld [vmem:[#allocation7 + $0x3c8] sm:$0xff]  ;;  %v8704_v46 = vpack.c.bf16 %v179_v35, %v173_v34  ;;  %v8707_v47 = vpack.c.bf16 %v192_v39, %v186_v37 }
  0x73   :  { %6203 = vmatpush1.bf16.msra.mxu0 %v6202_v61  ;;  %v226_v45 = vld [vmem:[#allocation7 + $0x3f8] sm:$0xff]  ;;  %v185_v49 = vld [vmem:[#allocation7 + $0x2b0] sm:$0xff]  ;;  %v191_v50 = vld [vmem:[#allocation7 + $0x2e0] sm:$0xff]  ;;  %v6218_v51 = vpack.c.bf16 %v213_v42, %v207_v41 }
  0x74   :  { %6205 = vmatprep.subr.bf16.mxu0 %v6204_v1  ;;  %v198_v52 = vld [vmem:[#allocation7 + $0x318] sm:$0xff]  ;;  %v204_v53 = vld [vmem:[#allocation7 + $0x348] sm:$0xff]  ;;  %v6220_v54 = vpack.c.bf16 %v226_v45, %v220_v44  ;;  %v219_v55 = vld [vmem:[#allocation7 + $0x3c0] sm:$0xff]  ;;  %v8710_v61 = vpack.c.bf16 %v191_v50, %v185_v49 }
  0x75   :  { %6263 = vmatpush1.bf16.msra.mxu1 %v8692_v18  ;;  %v225_v56 = vld [vmem:[#allocation7 + $0x3f0] sm:$0xff]  ;;  %v232_v59 = vld [vmem:[#allocation7 + $0x428] sm:$0xff]  ;;  %v238_v60 = vld [vmem:[#allocation7 + $0x458] sm:$0xff]  ;;  %v8713_v62 = vpack.c.bf16 %v204_v53, %v198_v52 }
  0x76   :  { %6265 = vmatprep.subr.bf16.mxu1 %v8695_v19  ;;  %v197_v63 = vld [vmem:[#allocation7 + $0x310] sm:$0xff]  ;;  %v203_v1 = vld [vmem:[#allocation7 + $0x340] sm:$0xff]  ;;  %v6222_v2 = vpack.c.bf16 %v225_v56, %v219_v55  ;;  %v210_v3 = vld [vmem:[#allocation7 + $0x378] sm:$0xff]  ;;  %v6224_v5 = vpack.c.bf16 %v238_v60, %v232_v59 }
  0x77   :  { %6207 = vmatpush1.bf16.msra.mxu0 %v6206_v10  ;;  %v216_v4 = vld [vmem:[#allocation7 + $0x3a8] sm:$0xff]  ;;  %v231_v8 = vld [vmem:[#allocation7 + $0x420] sm:$0xff]  ;;  %v237_v9 = vld [vmem:[#allocation7 + $0x450] sm:$0xff]  ;;  %v8716_v12 = vpack.c.bf16 %v203_v1, %v197_v63 }
  0x78   :  { %6209 = vmatprep.subr.bf16.mxu0 %v6208_v13  ;;  %v244_v10 = vld [vmem:[#allocation7 + $0x488] sm:$0xff]  ;;  %v250_v11 = vld [vmem:[#allocation7 + $0x4b8] sm:$0xff]  ;;  %v8719_v13 = vpack.c.bf16 %v216_v4, %v210_v3  ;;  %v209_v14 = vld [vmem:[#allocation7 + $0x370] sm:$0xff]  ;;  %v6226_v16 = vpack.c.bf16 %v237_v9, %v231_v8 }
  0x79   :  { %6267 = vmatpush1.bf16.msra.mxu1 %v8698_v31  ;;  %v215_v15 = vld [vmem:[#allocation7 + $0x3a0] sm:$0xff]  ;;  %v222_v17 = vld [vmem:[#allocation7 + $0x3d8] sm:$0xff]  ;;  %v228_v20 = vld [vmem:[#allocation7 + $0x408] sm:$0xff]  ;;  %v6228_v21 = vpack.c.bf16 %v250_v11, %v244_v10 }
  0x7a   :  { %6269 = vmatprep.subr.bf16.mxu1 %v8701_v32  ;;  %v249_v23 = vld [vmem:[#allocation7 + $0x4b0] sm:$0xff]  ;;  %v256_v24 = vld [vmem:[#allocation7 + $0x4e8] sm:$0xff]  ;;  %v8722_v26 = vpack.c.bf16 %v215_v15, %v209_v14  ;;  %v8725_v27 = vpack.c.bf16 %v228_v20, %v222_v17  ;;  %v227_v30 = vld [vmem:[#allocation7 + $0x400] sm:$0xff] }
  0x7b   :  { %6211 = vmatpush1.bf16.msra.mxu0 %v6210_v22  ;;  %v243_v22 = vld [vmem:[#allocation7 + $0x480] sm:$0xff]  ;;  %v221_v29 = vld [vmem:[#allocation7 + $0x3d0] sm:$0xff]  ;;  %v234_v35 = vld [vmem:[#allocation7 + $0x438] sm:$0xff] }
  0x7c   :  { %6213 = vmatprep.subr.bf16.mxu0 %v6212_v25  ;;  %v262_v25 = vld [vmem:[#allocation7 + $0x518] sm:$0xff]  ;;  %v6230_v34 = vpack.c.bf16 %v249_v23, %v243_v22  ;;  %v255_v39 = vld [vmem:[#allocation7 + $0x4e0] sm:$0xff]  ;;  %v268_v41 = vld [vmem:[#allocation7 + $0x548] sm:$0xff]  ;;  %v8728_v44 = vpack.c.bf16 %v227_v30, %v221_v29 }
  0x7d   :  { %6271 = vmatpush1.bf16.msra.mxu1 %v8704_v46  ;;  %v6232_v37 = vpack.c.bf16 %v262_v25, %v256_v24  ;;  %v274_v42 = vld [vmem:[#allocation7 + $0x578] sm:$0xff]  ;;  %v233_v49 = vld [vmem:[#allocation7 + $0x430] sm:$0xff]  ;;  %v239_v50 = vld [vmem:[#allocation7 + $0x460] sm:$0xff] }
  0x7e   :  { %6273 = vmatprep.subr.bf16.mxu1 %v8707_v47  ;;  %v246_v52 = vld [vmem:[#allocation7 + $0x498] sm:$0xff]  ;;  %v252_v53 = vld [vmem:[#allocation7 + $0x4c8] sm:$0xff]  ;;  %v267_v55 = vld [vmem:[#allocation7 + $0x540] sm:$0xff]  ;;  %v8734_v63 = vpack.c.bf16 %v239_v50, %v233_v49 }
  0x7f   :  { %6215 = vmatpush1.bf16.msra.mxu0 %v6214_v36  ;;  %v240_v36 = vld [vmem:[#allocation7 + $0x468] sm:$0xff]  ;;  %v273_v56 = vld [vmem:[#allocation7 + $0x570] sm:$0xff]  ;;  %v286_v60 = vld [vmem:[#allocation7 + $0x5d8] sm:$0xff]  ;;  %v6292_v1 = vpack.c.bf16 %v252_v53, %v246_v52 }
  0x80   :  { %6217 = vmatprep.subr.bf16.mxu0 %v6216_v40  ;;  %v261_v40 = vld [vmem:[#allocation7 + $0x510] sm:$0xff]  ;;  %v8731_v45 = vpack.c.bf16 %v240_v36, %v234_v35  ;;  %v280_v59 = vld [vmem:[#allocation7 + $0x5a8] sm:$0xff]  ;;  %v251_v3 = vld [vmem:[#allocation7 + $0x4c0] sm:$0xff]  ;;  %v6238_v4 = vpack.c.bf16 %v273_v56, %v267_v55 }
  0x81   :  { %6275 = vmatpush1.bf16.msra.mxu1 %v8710_v61  ;;  %v264_v8 = vld [vmem:[#allocation7 + $0x528] sm:$0xff]  ;;  %v6240_v9 = vpack.c.bf16 %v286_v60, %v280_v59  ;;  %v279_v10 = vld [vmem:[#allocation7 + $0x5a0] sm:$0xff]  ;;  %v285_v11 = vld [vmem:[#allocation7 + $0x5d0] sm:$0xff] }
  0x82   :  { %6277 = vmatprep.subr.bf16.mxu1 %v8713_v62  ;;  %v104_v15 = vld [vmem:[#allocation7 + $0x28] sm:$0xff]  ;;  %v257_v20 = vld [vmem:[#allocation7 + $0x4f0] sm:$0xff]  ;;  %v6242_v22 = vpack.c.bf16 %v285_v11, %v279_v10  ;;  %v270_v23 = vld [vmem:[#allocation7 + $0x558] sm:$0xff] }
  0x83   :  { %6219 = vmatpush1.bf16.msra.mxu0 %v6218_v51  ;;  %v6234_v51 = vpack.c.bf16 %v261_v40, %v255_v39  ;;  %v276_v24 = vld [vmem:[#allocation7 + $0x588] sm:$0xff]  ;;  %v103_v29 = vld [vmem:[#allocation7 + $0x20] sm:$0xff]  ;;  %v109_v30 = vld [vmem:[#allocation7 + $0x50] sm:$0xff] }
  0x84   :  { %6221 = vmatprep.subr.bf16.mxu0 %v6220_v54  ;;  %v6236_v54 = vpack.c.bf16 %v274_v42, %v268_v41  ;;  %v116_v35 = vld [vmem:[#allocation7 + $0x88] sm:$0xff]  ;;  %v122_v36 = vld [vmem:[#allocation7 + $0xb8] sm:$0xff]  ;;  %v269_v39 = vld [vmem:[#allocation7 + $0x550] sm:$0xff]  ;;  %v6310_v49 = vpack.c.bf16 %v109_v30, %v103_v29 }
  0x85   :  { %6279 = vmatpush1.bf16.msra.mxu1 %v8716_v12  ;;  %v275_v40 = vld [vmem:[#allocation7 + $0x580] sm:$0xff]  ;;  %v282_v41 = vld [vmem:[#allocation7 + $0x5b8] sm:$0xff]  ;;  %v288_v42 = vld [vmem:[#allocation7 + $0x5e8] sm:$0xff]  ;;  %v6312_v50 = vpack.c.bf16 %v122_v36, %v116_v35 }
  0x86   :  { %6281 = vmatprep.subr.bf16.mxu1 %v8719_v13  ;;  %v121_v52 = vld [vmem:[#allocation7 + $0xb0] sm:$0xff]  ;;  %v6302_v53 = vpack.c.bf16 %v275_v40, %v269_v39  ;;  %v134_v55 = vld [vmem:[#allocation7 + $0x118] sm:$0xff]  ;;  %v6304_v56 = vpack.c.bf16 %v288_v42, %v282_v41  ;;  %v287_v60 = vld [vmem:[#allocation7 + $0x5e0] sm:$0xff] }
  0x87   :  { %6223 = vmatpush1.bf16.msra.mxu0 %v6222_v2  ;;  %v245_v2 = vld [vmem:[#allocation7 + $0x490] sm:$0xff]  ;;  %v170_v29 = vld [vmem:[#allocation7 + $0x238] sm:$0xff]  ;;  %v175_v41 = vld [vmem:[#allocation7 + $0x260] sm:$0xff] }
  0x88   :  { %6225 = vmatprep.subr.bf16.mxu0 %v6224_v5  ;;  %v258_v5 = vld [vmem:[#allocation7 + $0x4f8] sm:$0xff]  ;;  %v6294_v14 = vpack.c.bf16 %v251_v3, %v245_v2  ;;  %v281_v59 = vld [vmem:[#allocation7 + $0x5b0] sm:$0xff]  ;;  %v127_v3 = vld [vmem:[#allocation7 + $0xe0] sm:$0xff] }
  0x89   :  { %6283 = vmatpush1.bf16.msra.mxu1 %v8722_v26  ;;  %v6296_v17 = vpack.c.bf16 %v264_v8, %v258_v5  ;;  %v6306_v5 = vpack.c.bf16 %v287_v60, %v281_v59  ;;  %v140_v8 = vld [vmem:[#allocation7 + $0x148] sm:$0xff]  ;;  %v169_v35 = vld [vmem:[#allocation7 + $0x230] sm:$0xff]  ;;  %v182_v39 = vld [vmem:[#allocation7 + $0x298] sm:$0xff] }
  0x8a   :  { %6285 = vmatprep.subr.bf16.mxu1 %v8725_v27  ;;  %v181_v42 = vld [vmem:[#allocation7 + $0x290] sm:$0xff]  ;;  %v536_v59 = vld [vmem:[#allocation9 + $0x20] sm:$0xff] }
  0x8b   :  { %6227 = vmatpush1.bf16.msra.mxu0 %v6226_v16  ;;  %v110_v16 = vld [vmem:[#allocation7 + $0x58] sm:$0xff] }
  0x8c   :  { %6229 = vmatprep.subr.bf16.mxu0 %v6228_v21  ;;  %v263_v21 = vld [vmem:[#allocation7 + $0x520] sm:$0xff]  ;;  %v6308_v25 = vpack.c.bf16 %v110_v16, %v104_v15  ;;  %v145_v15 = vld [vmem:[#allocation7 + $0x170] sm:$0xff] }
  0x8d   :  { %6287 = vmatpush1.bf16.msra.mxu1 %v8728_v44 }
  0x8e   :  { %6289 = vmatprep.subr.bf16.mxu1 %v8731_v45 }
  0x8f   :  { %6231 = vmatpush1.bf16.msra.mxu0 %v6230_v34  ;;  %v6298_v34 = vpack.c.bf16 %v263_v21, %v257_v20  ;;  %v158_v20 = vld [vmem:[#allocation7 + $0x1d8] sm:$0xff] }
  0x90   :  { %6233 = vmatprep.subr.bf16.mxu0 %v6232_v37  ;;  %v6300_v37 = vpack.c.bf16 %v276_v24, %v270_v23  ;;  %v157_v23 = vld [vmem:[#allocation7 + $0x1d0] sm:$0xff] }
  0x91   :  { %6291 = vmatpush1.bf16.msra.mxu1 %v8734_v63 }
  0x92   :  { %6293 = vmatprep.subr.bf16.mxu1 %v6292_v1 }
  0x93   :  { %6235 = vmatpush1.bf16.msra.mxu0 %v6234_v51  ;;  %v115_v51 = vld [vmem:[#allocation7 + $0x80] sm:$0xff] }
  0x94   :  { %6237 = vmatprep.subr.bf16.mxu0 %v6236_v54  ;;  %v128_v54 = vld [vmem:[#allocation7 + $0xe8] sm:$0xff]  ;;  %v6314_v1 = vpack.c.bf16 %v121_v52, %v115_v51  ;;  %v194_v51 = vld [vmem:[#allocation7 + $0x2f8] sm:$0xff] }
  0x95   :  { %6295 = vmatpush1.bf16.msra.mxu1 %v6294_v14  ;;  %v6316_v2 = vpack.c.bf16 %v134_v55, %v128_v54  ;;  %v139_v14 = vld [vmem:[#allocation7 + $0x140] sm:$0xff]  ;;  %v193_v54 = vld [vmem:[#allocation7 + $0x2f0] sm:$0xff] }
  0x96   :  { %6297 = vmatprep.subr.bf16.mxu1 %v6296_v17  ;;  %v6322_v16 = vpack.c.bf16 %v145_v15, %v139_v14  ;;  %v152_v17 = vld [vmem:[#allocation7 + $0x1a8] sm:$0xff]  ;;  %v539_v14 = vld [vmem:[#allocation9 + $0x38] sm:$0xff]  ;;  %v542_v15 = vld [vmem:[#allocation9 + $0x50] sm:$0xff] }
  0x97   :  { %6239 = vmatpush1.bf16.msra.mxu0 %v6238_v4  ;;  %v133_v4 = vld [vmem:[#allocation7 + $0x110] sm:$0xff]  ;;  %v6324_v21 = vpack.c.bf16 %v158_v20, %v152_v17  ;;  %v541_v20 = vld [vmem:[#allocation9 + $0x48] sm:$0xff] }
  0x98   :  { %6241 = vmatprep.subr.bf16.mxu0 %v6240_v9  ;;  %v146_v9 = vld [vmem:[#allocation7 + $0x178] sm:$0xff]  ;;  %v6318_v10 = vpack.c.bf16 %v133_v4, %v127_v3  ;;  %v200_v4 = vld [vmem:[#allocation7 + $0x328] sm:$0xff]  ;;  %v538_v17 = vld [vmem:[#allocation9 + $0x30] sm:$0xff] }
  0x99   :  { %6299 = vmatpush1.bf16.msra.mxu1 %v6298_v34  ;;  %v6320_v11 = vpack.c.bf16 %v146_v9, %v140_v8  ;;  %v163_v34 = vld [vmem:[#allocation7 + $0x200] sm:$0xff] }
  0x9a   :  { %6301 = vmatprep.subr.bf16.mxu1 %v6300_v37  ;;  %v6330_v36 = vpack.c.bf16 %v169_v35, %v163_v34  ;;  %v176_v37 = vld [vmem:[#allocation7 + $0x268] sm:$0xff]  ;;  %v199_v9 = vld [vmem:[#allocation7 + $0x320] sm:$0xff] }
  0x9b   :  { %6243 = vmatpush1.bf16.msra.mxu0 %v6242_v22  ;;  %v151_v22 = vld [vmem:[#allocation7 + $0x1a0] sm:$0xff]  ;;  %v6332_v40 = vpack.c.bf16 %v182_v39, %v176_v37  ;;  %v545_v34 = vld [vmem:[#allocation9 + $0x68] sm:$0xff]  ;;  %v547_v39 = vld [vmem:[#allocation9 + $0x78] sm:$0xff] }
  0x9c   :  { %6309 = vmatprep.subr.bf16.mxu0 %v6308_v25  ;;  %v6326_v24 = vpack.c.bf16 %v157_v23, %v151_v22  ;;  %v164_v25 = vld [vmem:[#allocation7 + $0x208] sm:$0xff]  ;;  %v218_v23 = vld [vmem:[#allocation7 + $0x3b8] sm:$0xff]  ;;  %v548_v35 = vld [vmem:[#allocation9 + $0x80] sm:$0xff] }
  0x9d   :  { %6303 = vmatpush1.bf16.msra.mxu1 %v6302_v53  ;;  %v6328_v30 = vpack.c.bf16 %v170_v29, %v164_v25  ;;  %v187_v53 = vld [vmem:[#allocation7 + $0x2c0] sm:$0xff]  ;;  %v212_v22 = vld [vmem:[#allocation7 + $0x388] sm:$0xff]  ;;  %v217_v29 = vld [vmem:[#allocation7 + $0x3b0] sm:$0xff] }
  0x9e   :  { %356 = vmatmul.mubr.f32.vlgmr.msra.gmra.mrb[0].mxu0 %v8554_v0  ;;  %6305 = vmatprep.subr.bf16.mxu1 %v6304_v56  ;;  %v6338_v55 = vpack.c.bf16 %v193_v54, %v187_v53  ;;  %v533_v56 = vld [vmem:[#allocation9 + $0x8] sm:$0xff]  ;;  %v211_v25 = vld [vmem:[#allocation7 + $0x380] sm:$0xff]  ;;  %v551_v53 = vld [vmem:[#allocation9 + $0x98] sm:$0xff] }
  0x9f   :  { %6311 = vmatpush1.bf16.msra.mxu0 %v6310_v49  ;;  %497 = vmatprep.mubr.f32.mxu0 %v8554_v0  ;;  %v6334_v49 = vpack.c.bf16 %v181_v42, %v175_v41  ;;  %v6372_v60 = vpack.c.bf16 %v536_v59, %v533_v56  ;;  %v544_v37 = vld [vmem:[#allocation9 + $0x60] sm:$0xff]  ;;  %v224_v41 = vld [vmem:[#allocation7 + $0x3e8] sm:$0xff]  ;;  %v230_v42 = vld [vmem:[#allocation7 + $0x418] sm:$0xff] }
  0xa0   :  { %6313 = vmatprep.subr.bf16.mxu0 %v6312_v50  ;;  %v188_v50 = vld [vmem:[#allocation7 + $0x2c8] sm:$0xff]  ;;  %v554_v54 = vld [vmem:[#allocation9 + $0xb0] sm:$0xff] }
  0xa1   :  { %6307 = vmatpush1.bf16.msra.mxu1 %v6306_v5  ;;  %v6336_v52 = vpack.c.bf16 %v194_v51, %v188_v50  ;;  %v206_v5 = vld [vmem:[#allocation7 + $0x358] sm:$0xff]  ;;  %v223_v50 = vld [vmem:[#allocation7 + $0x3e0] sm:$0xff]  ;;  %v229_v51 = vld [vmem:[#allocation7 + $0x410] sm:$0xff] }
  0xa2   :  { %6373 = vmatprep.subr.bf16.mxu1 %v6372_v60  ;;  %v6340_v8 = vpack.c.bf16 %v206_v5, %v200_v4  ;;  %v550_v56 = vld [vmem:[#allocation9 + $0x90] sm:$0xff]  ;;  %v553_v59 = vld [vmem:[#allocation9 + $0xa8] sm:$0xff]  ;;  %v235_v4 = vld [vmem:[#allocation7 + $0x440] sm:$0xff] }
  0xa3   :  { %6315 = vmatpush1.bf16.msra.mxu0 %v6314_v1  ;;  %v532_v1 = vld [vmem:[#allocation9] sm:$0xff]  ;;  %v6386_v60 = vpack.c.bf16 %v553_v59, %v550_v56  ;;  %v241_v5 = vld [vmem:[#allocation7 + $0x470] sm:$0xff]  ;;  %v571_v56 = vld [vmem:[#allocation9 + $0x138] sm:$0xff] }
  0xa4   :  { %6317 = vmatprep.subr.bf16.mxu0 %v6316_v2  ;;  %427 = vmatmul.mubr.f32.vlgmr.msra.gmra.mrb[0].mxu1 %v8554_v0  ;;  %v535_v2 = vld [vmem:[#allocation9 + $0x18] sm:$0xff] }
  0xa5   :  { %644 = vmatprep.mubr.f32.mxu1 %v8554_v0  ;;  %v6374_v3 = vpack.c.bf16 %v535_v2, %v532_v1  ;;  %v236_v1 = vld [vmem:[#allocation7 + $0x448] sm:$0xff]  ;;  %v242_v2 = vld [vmem:[#allocation7 + $0x478] sm:$0xff] }
  0xa7   :  { %6319 = vmatpush1.bf16.msra.mxu0 %v6318_v10  ;;  %v205_v10 = vld [vmem:[#allocation7 + $0x350] sm:$0xff]  ;;  %6375 = vmatpush1.bf16.msra.mxu1 %v6374_v3  ;;  %v8748_v3 = vpack.c.bf16 %v242_v2, %v236_v1  ;;  %v278_v1 = vld [vmem:[#allocation7 + $0x598] sm:$0xff] }
  0xa8   :  { %6321 = vmatprep.subr.bf16.mxu0 %v6320_v11  ;;  %v6342_v11 = vpack.c.bf16 %v205_v10, %v199_v9  ;;  %v557_v9 = vld [vmem:[#allocation9 + $0xc8] sm:$0xff]  ;;  %v560_v10 = vld [vmem:[#allocation9 + $0xe0] sm:$0xff] }
  0xab   :  { %6323 = vmatpush1.bf16.msra.mxu0 %v6322_v16  ;;  %v6376_v16 = vpack.c.bf16 %v542_v15, %v539_v14  ;;  %v556_v14 = vld [vmem:[#allocation9 + $0xc0] sm:$0xff]  ;;  %v559_v15 = vld [vmem:[#allocation9 + $0xd8] sm:$0xff] }
  0xac   :  { %6325 = vmatprep.subr.bf16.mxu0 %v6324_v21  ;;  %v6378_v21 = vpack.c.bf16 %v541_v20, %v538_v17  ;;  %v248_v17 = vld [vmem:[#allocation7 + $0x4a8] sm:$0xff]  ;;  %v254_v20 = vld [vmem:[#allocation7 + $0x4d8] sm:$0xff] }
  0xad   :  { %6377 = vmatprep.subr.bf16.mxu1 %v6376_v16  ;;  %v6390_v16 = vpack.c.bf16 %v559_v15, %v556_v14  ;;  %v574_v15 = vld [vmem:[#allocation9 + $0x150] sm:$0xff] }
  0xae   :  { %6379 = vmatpush1.bf16.msra.mxu1 %v6378_v21  ;;  %v8754_v21 = vpack.c.bf16 %v254_v20, %v248_v17  ;;  %v284_v20 = vld [vmem:[#allocation7 + $0x5c8] sm:$0xff] }
  0xaf   :  { %6327 = vmatpush1.bf16.msra.mxu0 %v6326_v24  ;;  %v6344_v24 = vpack.c.bf16 %v218_v23, %v212_v22  ;;  %v247_v22 = vld [vmem:[#allocation7 + $0x4a0] sm:$0xff]  ;;  %v253_v23 = vld [vmem:[#allocation7 + $0x4d0] sm:$0xff] }
  0xb0   :  { %6329 = vmatprep.subr.bf16.mxu0 %v6328_v30  ;;  %v6346_v30 = vpack.c.bf16 %v217_v29, %v211_v25  ;;  %v563_v25 = vld [vmem:[#allocation9 + $0xf8] sm:$0xff]  ;;  %v566_v29 = vld [vmem:[#allocation9 + $0x110] sm:$0xff] }
  0xb3   :  { %6331 = vmatpush1.bf16.msra.mxu0 %v6330_v36  ;;  %v6380_v36 = vpack.c.bf16 %v548_v35, %v545_v34  ;;  %v562_v34 = vld [vmem:[#allocation9 + $0xf0] sm:$0xff]  ;;  %v565_v35 = vld [vmem:[#allocation9 + $0x108] sm:$0xff] }
  0xb4   :  { %6333 = vmatprep.subr.bf16.mxu0 %v6332_v40  ;;  %v6382_v40 = vpack.c.bf16 %v547_v39, %v544_v37  ;;  %v260_v37 = vld [vmem:[#allocation7 + $0x508] sm:$0xff]  ;;  %v266_v39 = vld [vmem:[#allocation7 + $0x538] sm:$0xff] }
  0xb5   :  { %6381 = vmatprep.subr.bf16.mxu1 %v6380_v36  ;;  %v6394_v36 = vpack.c.bf16 %v565_v35, %v562_v34  ;;  %v8555_v34 = vmov 0.0|0.0   ;;  %v748_v35 = vld [vmem:[#allocation7 + $0x8] sm:$0xff] }
  0xb6   :  { %6383 = vmatpush1.bf16.msra.mxu1 %v6382_v40  ;;  %v8760_v40 = vpack.c.bf16 %v266_v39, %v260_v37  ;;  %v747_v37 = vld [vmem:[#allocation7] sm:$0xff] }
  0xb7   :  { %6335 = vmatpush1.bf16.msra.mxu0 %v6334_v49  ;;  %v8742_v49 = vpack.c.bf16 %v230_v42, %v224_v41  ;;  %v259_v41 = vld [vmem:[#allocation7 + $0x500] sm:$0xff]  ;;  %v265_v42 = vld [vmem:[#allocation7 + $0x530] sm:$0xff] }
  0xb8   :  { %6337 = vmatprep.subr.bf16.mxu0 %v6336_v52  ;;  %v8744_v52 = vpack.c.bf16 %v229_v51, %v223_v50  ;;  %v8762_v50 = vpack.c.bf16 %v265_v42, %v259_v41  ;;  %v569_v51 = vld [vmem:[#allocation9 + $0x128] sm:$0xff]  ;;  %v753_v41 = vld [vmem:[#allocation7 + $0x30] sm:$0xff] }
  0xb9   :  { %v760_v42 = vld [vmem:[#allocation7 + $0x68] sm:$0xff] }
  0xbb   :  { %6339 = vmatpush1.bf16.msra.mxu0 %v6338_v55  ;;  %v6384_v55 = vpack.c.bf16 %v554_v54, %v551_v53  ;;  %v572_v53 = vld [vmem:[#allocation9 + $0x140] sm:$0xff] }
  0xbc   :  { %6341 = vmatprep.subr.bf16.mxu0 %v6340_v8  ;;  %v8750_v8 = vpack.c.bf16 %v241_v5, %v235_v4  ;;  %v6396_v54 = vpack.c.bf16 %v572_v53, %v569_v51  ;;  %v271_v4 = vld [vmem:[#allocation7 + $0x560] sm:$0xff]  ;;  %v277_v5 = vld [vmem:[#allocation7 + $0x590] sm:$0xff]  ;;  %v766_v51 = vld [vmem:[#allocation7 + $0x98] sm:$0xff]  ;;  %v6430_v53 = vpack.c.bf16 %v753_v41, %v747_v37 }
  0xbd   :  { %6385 = vmatprep.subr.bf16.mxu1 %v6384_v55  ;;  %v568_v55 = vld [vmem:[#allocation9 + $0x120] sm:$0xff]  ;;  %v508_v37 = vld [vmem:[#allocation4 + $0x8] sm:$0xff] }
  0xbe   :  { %6387 = vmatpush1.bf16.msra.mxu1 %v6386_v60  ;;  %v6398_v59 = vpack.c.bf16 %v571_v56, %v568_v55  ;;  %v272_v60 = vld [vmem:[#allocation7 + $0x568] sm:$0xff]  ;;  %v759_v55 = vld [vmem:[#allocation7 + $0x60] sm:$0xff]  ;;  %v765_v56 = vld [vmem:[#allocation7 + $0x90] sm:$0xff] }
  0xbf   :  { %6343 = vmatpush1.bf16.msra.mxu0 %v6342_v11  ;;  %v6388_v11 = vpack.c.bf16 %v560_v10, %v557_v9  ;;  %v8766_v2 = vpack.c.bf16 %v278_v1, %v272_v60  ;;  %v8768_v9 = vpack.c.bf16 %v277_v5, %v271_v4  ;;  %v575_v10 = vld [vmem:[#allocation9 + $0x158] sm:$0xff]  ;;  %v772_v60 = vld [vmem:[#allocation7 + $0xc8] sm:$0xff]  ;;  %v771_v4 = vld [vmem:[#allocation7 + $0xc0] sm:$0xff] }
  0xc0   :  { %6345 = vmatprep.subr.bf16.mxu0 %v6344_v24  ;;  %v8756_v24 = vpack.c.bf16 %v253_v23, %v247_v22  ;;  %v290_v22 = vld [vmem:[#allocation7 + $0x5f8] sm:$0xff] }
  0xc1   :  { %6389 = vmatprep.subr.bf16.mxu1 %v6388_v11  ;;  %v578_v11 = vld [vmem:[#allocation9 + $0x170] sm:$0xff]  ;;  %v8772_v23 = vpack.c.bf16 %v290_v22, %v284_v20  ;;  %v778_v1 = vld [vmem:[#allocation7 + $0xf8] sm:$0xff] }
  0xc2   :  { %6391 = vmatpush1.bf16.msra.mxu1 %v6390_v16  ;;  %v6400_v14 = vpack.c.bf16 %v578_v11, %v575_v10  ;;  %v577_v16 = vld [vmem:[#allocation9 + $0x168] sm:$0xff]  ;;  %v6436_v5 = vpack.c.bf16 %v778_v1, %v772_v60  ;;  %v777_v10 = vld [vmem:[#allocation7 + $0xf0] sm:$0xff] }
  0xc3   :  { %6347 = vmatpush1.bf16.msra.mxu0 %v6346_v30  ;;  %v6392_v30 = vpack.c.bf16 %v566_v29, %v563_v25  ;;  %v6402_v17 = vpack.c.bf16 %v577_v16, %v574_v15  ;;  %v283_v25 = vld [vmem:[#allocation7 + $0x5c0] sm:$0xff]  ;;  %v289_v29 = vld [vmem:[#allocation7 + $0x5f0] sm:$0xff]  ;;  %v6438_v11 = vpack.c.bf16 %v777_v10, %v771_v4  ;;  %v790_v15 = vld [vmem:[#allocation7 + $0x158] sm:$0xff] }
  0xc4   :  { %6349 = vmatprep.subr.bf16.mxu0 %v8742_v49  ;;  %v783_v16 = vld [vmem:[#allocation7 + $0x120] sm:$0xff]  ;;  %v789_v20 = vld [vmem:[#allocation7 + $0x150] sm:$0xff] }
  0xc5   :  { %6393 = vmatprep.subr.bf16.mxu1 %v6392_v30  ;;  %v8774_v30 = vpack.c.bf16 %v289_v29, %v283_v25  ;;  %v6442_v22 = vpack.c.bf16 %v789_v20, %v783_v16  ;;  %v507_v25 = vld [vmem:[#allocation4] sm:$0xff]  ;;  %v509_v1 = vld [vmem:[#allocation4 + $0x10] sm:$0xff] }
  0xc6   :  { %6395 = vmatpush1.bf16.msra.mxu1 %v6394_v36  ;;  %v754_v36 = vld [vmem:[#allocation7 + $0x38] sm:$0xff] }
  0xc7   :  { %6351 = vmatpush1.bf16.msra.mxu0 %v8744_v52  ;;  %6397 = vmatprep.subr.bf16.mxu1 %v6396_v54  ;;  %v6428_v39 = vpack.c.bf16 %v754_v36, %v748_v35  ;;  %v6432_v54 = vpack.c.bf16 %v766_v51, %v760_v42 }
  0xc8   :  { %6353 = vmatprep.subr.bf16.mxu0 %v8748_v3 }
  0xca   :  { %6399 = vmatpush1.bf16.msra.mxu1 %v6398_v59  ;;  %v6434_v59 = vpack.c.bf16 %v765_v56, %v759_v55 }
  0xcb   :  { %6355 = vmatpush1.bf16.msra.mxu0 %v8750_v8  ;;  %6401 = vmatprep.subr.bf16.mxu1 %v6400_v14  ;;  %v784_v14 = vld [vmem:[#allocation7 + $0x128] sm:$0xff] }
  0xcc   :  { %6357 = vmatprep.subr.bf16.mxu0 %v8754_v21 }
  0xce   :  { %6403 = vmatpush1.bf16.msra.mxu1 %v6402_v17  ;;  %v6440_v17 = vpack.c.bf16 %v790_v15, %v784_v14  ;;  %v534_v14 = vld [vmem:[#allocation9 + $0x10] sm:$0xff]  ;;  %v537_v15 = vld [vmem:[#allocation9 + $0x28] sm:$0xff] }
  0xcf   :  { %6359 = vmatpush1.bf16.msra.mxu0 %v8756_v24  ;;  %6404 = vmatprep.subr.bf16.mxu1 %v8555_v34 }
  0xd0   :  { %6361 = vmatprep.subr.bf16.mxu0 %v8760_v40 }
  0xd3   :  { %6363 = vmatpush1.bf16.msra.mxu0 %v8762_v50 }
  0xd4   :  { %6365 = vmatprep.subr.bf16.mxu0 %v8766_v2 }
  0xd7   :  { %6367 = vmatpush1.bf16.msra.mxu0 %v8768_v9 }
  0xd8   :  { %6369 = vmatprep.subr.bf16.mxu0 %v8772_v23 }
  0xdb   :  { %6371 = vmatpush1.bf16.msra.mxu0 %v8774_v30 }
  0xdc   :  { %6429 = vmatprep.subr.bf16.mxu0 %v6428_v39 }
  0xde   :  { %498 = vmatmul.mubr.f32.vlgmr.msra.gmra.mrb[2].mxu0 %v8554_v0 }
  0xdf   :  { %6431 = vmatpush1.bf16.msra.mxu0 %v6430_v53 }
  0xe0   :  { %6433 = vmatprep.subr.bf16.mxu0 %v6432_v54 }
  0xe3   :  { %6435 = vmatpush1.bf16.msra.mxu0 %v6434_v59 }
  0xe4   :  { %6437 = vmatprep.subr.bf16.mxu0 %v6436_v5 }
  0xe7   :  { %6439 = vmatpush1.bf16.msra.mxu0 %v6438_v11 }
  0xe8   :  { %6441 = vmatprep.subr.bf16.mxu0 %v6440_v17 }
  0xeb   :  { %6443 = vmatpush1.bf16.msra.mxu0 %v6442_v22  ;;  %v6405_v22 = vpack.c.bf16 %v537_v15, %v534_v14  ;;  %v576_v14 = vld [vmem:[#allocation9 + $0x160] sm:$0xff]  ;;  %v579_v15 = vld [vmem:[#allocation9 + $0x178] sm:$0xff] }
 0x171   :  { %v357_v29 = vpop.f32.mrb[0].mxu0 }
 0x172   :  { %v511_v35 = vadd.f32 %v507_v25, %v357_v29  ;;  %v359_v36 = vpop.f32.mrb[1].mxu0  ;;  %v540_v29 = vld [vmem:[#allocation9 + $0x40] sm:$0xff] }
 0x173   :  { %v518_v41 = vadd.f32 %v508_v37, %v359_v36  ;;  %v546_v37 = vld [vmem:[#allocation9 + $0x70] sm:$0xff] }
 0x174   :  { %v5594_v39 = vmul.f32 -1.442695, %v511_v35  ;;  %v543_v35 = vld [vmem:[#allocation9 + $0x58] sm:$0xff] }
 0x175   :  { %v5595_v42 = vmul.f32 -1.442695, %v518_v41  ;;  %v6408_v36 = vpack.c.bf16 %v543_v35, %v540_v29  ;;  %v850_v29 = vld [vmem:[#allocation7 + $0x338] sm:$0xff] }
 0x176   :  { %8243 = vpow2.f32 %v5594_v39  ;;  %v549_v39 = vld [vmem:[#allocation9 + $0x88] sm:$0xff] }
 0x177   :  { %v428_v51 = vpop.f32.mrb[0].mxu1  ;;  %8245 = vpow2.f32 %v5595_v42  ;;  %v6411_v41 = vpack.c.bf16 %v549_v39, %v546_v37  ;;  %v552_v42 = vld [vmem:[#allocation9 + $0xa0] sm:$0xff]  ;;  %v849_v37 = vld [vmem:[#allocation7 + $0x330] sm:$0xff] }
 0x178   :  { %v8780_v53 = vpop.f32.mrb[1].mxu1 }
 0x180   :  { %v8244_v54 = vpop.eup %8243 }
 0x181   :  { %v515_v55 = vadd.f32 1.0, %v8244_v54  ;;  %v8246_v56 = vpop.eup %8245 }
 0x182   :  { %v522_v59 = vadd.f32 1.0, %v8246_v56  ;;  %v561_v56 = vld [vmem:[#allocation9 + $0xe8] sm:$0xff] }
 0x183   :  { %8247 = vrcp.f32 %v515_v55  ;;  %v558_v55 = vld [vmem:[#allocation9 + $0xd0] sm:$0xff] }
 0x184   :  { %8249 = vrcp.f32 %v522_v59  ;;  %v6417_v59 = vpack.c.bf16 %v561_v56, %v558_v55  ;;  %v861_v55 = vld [vmem:[#allocation7 + $0x390] sm:$0xff] }
 0x18d   :  { %v8248_v60 = vpop.eup %8247 }
 0x18e   :  { %v525_v4 = vmul.f32 %v8248_v60, %v428_v51  ;;  %v8250_v10 = vpop.eup %8249  ;;  %v555_v51 = vld [vmem:[#allocation9 + $0xb8] sm:$0xff]  ;;  %v564_v60 = vld [vmem:[#allocation9 + $0x100] sm:$0xff] }
 0x18f   :  { %v528_v11 = vsub.f32 1.0, %v8250_v10  ;;  %v530_v17 = vmul.f32 0.0, %v8250_v10  ;;  %v6414_v54 = vpack.c.bf16 %v555_v51, %v552_v42  ;;  %v573_v10 = vld [vmem:[#allocation9 + $0x148] sm:$0xff]  ;;  %v862_v42 = vld [vmem:[#allocation7 + $0x398] sm:$0xff] }
 0x190   :  { %v526_v5 = vadd.f32 %v525_v4, %v509_v1  ;;  %v567_v1 = vld [vmem:[#allocation9 + $0x118] sm:$0xff] }
 0x191   :  { %v6420_v4 = vpack.c.bf16 %v567_v1, %v564_v60  ;;  %v874_v60 = vld [vmem:[#allocation7 + $0x3f8] sm:$0xff] }
 0x192   :  { %8251 = vtanh.f32 %v526_v5  ;;  %v570_v5 = vld [vmem:[#allocation9 + $0x130] sm:$0xff] }
 0x19c   :  { %v8252_v16 = vpop.eup %8251 }
 0x19d   :  { %v529_v20 = vmul.f32 %v8252_v16, %v528_v11  ;;  %v6423_v11 = vpack.c.bf16 %v573_v10, %v570_v5  ;;  %v6426_v16 = vpack.c.bf16 %v579_v15, %v576_v14  ;;  %v873_v5 = vld [vmem:[#allocation7 + $0x3f0] sm:$0xff]  ;;  %v886_v14 = vld [vmem:[#allocation7 + $0x458] sm:$0xff] }
 0x19f   :  { %v8782_v25 = vadd.f32 %v530_v17, %v529_v20 }
 0x1a1   :  { %645 = vmatmul.mubr.f32.vlgmr.msra.gmra.mrb[2].mxu1 %v8782_v25 }
 0x1a2   :  { %6406 = vmatpush3.bf16.msra.mxu1 %v6405_v22  ;;  %5844 = vmatprep.mubr.msk.f32.mxu1 %vm8556_vm0, %v8554_v0  ;;  %v844_v22 = vld [vmem:[#allocation7 + $0x308] sm:$0xff] }
 0x1a3   :  { %6407 = vmatprep.subr.bf16.mxu1 %v8555_v34  ;;  %v6460_v35 = vpack.c.bf16 %v850_v29, %v844_v22 }
 0x1a6   :  { %6409 = vmatpush3.bf16.msra.mxu1 %v6408_v36  ;;  %v843_v36 = vld [vmem:[#allocation7 + $0x300] sm:$0xff] }
 0x1a7   :  { %6410 = vmatprep.subr.bf16.mxu1 %v8555_v34  ;;  %v6462_v39 = vpack.c.bf16 %v849_v37, %v843_v36  ;;  %v922_v36 = vld [vmem:[#allocation7 + $0x578] sm:$0xff] }
 0x1aa   :  { %6412 = vmatpush3.bf16.msra.mxu1 %v6411_v41  ;;  %v856_v41 = vld [vmem:[#allocation7 + $0x368] sm:$0xff] }
 0x1ab   :  { %6413 = vmatprep.subr.bf16.mxu1 %v8555_v34  ;;  %v6464_v51 = vpack.c.bf16 %v862_v42, %v856_v41  ;;  %v921_v41 = vld [vmem:[#allocation7 + $0x570] sm:$0xff]  ;;  %v918_v42 = vld [vmem:[#allocation7 + $0x558] sm:$0xff] }
 0x1ae   :  { %6415 = vmatpush3.bf16.msra.mxu1 %v6414_v54  ;;  %v855_v54 = vld [vmem:[#allocation7 + $0x360] sm:$0xff] }
 0x1af   :  { %6416 = vmatprep.subr.bf16.mxu1 %v8555_v34  ;;  %v6466_v56 = vpack.c.bf16 %v861_v55, %v855_v54  ;;  %v924_v54 = vld [vmem:[#allocation7 + $0x588] sm:$0xff]  ;;  %v917_v55 = vld [vmem:[#allocation7 + $0x550] sm:$0xff] }
 0x1b2   :  { %6418 = vmatpush3.bf16.msra.mxu1 %v6417_v59  ;;  %v868_v59 = vld [vmem:[#allocation7 + $0x3c8] sm:$0xff] }
 0x1b3   :  { %6419 = vmatprep.subr.bf16.mxu1 %v8555_v34  ;;  %v6468_v1 = vpack.c.bf16 %v874_v60, %v868_v59  ;;  %v6548_v59 = vpack.c.bf16 %v924_v54, %v918_v42  ;;  %v776_v54 = vld [vmem:[#allocation7 + $0xe8] sm:$0xff] }
 0x1b6   :  { %6421 = vmatpush3.bf16.msra.mxu1 %v6420_v4  ;;  %v867_v4 = vld [vmem:[#allocation7 + $0x3c0] sm:$0xff] }
 0x1b7   :  { %6422 = vmatprep.subr.bf16.mxu1 %v8555_v34  ;;  %v6470_v10 = vpack.c.bf16 %v873_v5, %v867_v4  ;;  %v934_v4 = vld [vmem:[#allocation7 + $0x5d8] sm:$0xff] }
 0x1ba   :  { %6424 = vmatpush3.bf16.msra.mxu1 %v6423_v11  ;;  %v880_v11 = vld [vmem:[#allocation7 + $0x428] sm:$0xff] }
 0x1bb   :  { %6425 = vmatprep.subr.bf16.mxu1 %v8555_v34  ;;  %v6472_v15 = vpack.c.bf16 %v886_v14, %v880_v11  ;;  %v933_v11 = vld [vmem:[#allocation7 + $0x5d0] sm:$0xff]  ;;  %v930_v14 = vld [vmem:[#allocation7 + $0x5b8] sm:$0xff] }
 0x1be   :  { %6427 = vmatpush3.bf16.msra.mxu1 %v6426_v16  ;;  %v879_v16 = vld [vmem:[#allocation7 + $0x420] sm:$0xff] }
 0x1bf   :  { %6493 = vmatprep.subr.bf16.mxu1 %v8666_v28  ;;  %v796_v28 = vld [vmem:[#allocation7 + $0x188] sm:$0xff] }
 0x1c1   :  { %5845 = vmatmul.mubr.f32.vlgmr.msra.gmra.mrb[4].mxu1 %v8782_v25 }
 0x1c2   :  { %6495 = vmatpush1.bf16.msra.mxu1 %v8669_v33  ;;  %v802_v33 = vld [vmem:[#allocation7 + $0x1b8] sm:$0xff] }
 0x1c3   :  { %6497 = vmatprep.subr.bf16.mxu1 %v8671_v38  ;;  %v6444_v38 = vpack.c.bf16 %v802_v33, %v796_v28  ;;  %v885_v28 = vld [vmem:[#allocation7 + $0x450] sm:$0xff] }
 0x1c4   :  { %v6474_v33 = vpack.c.bf16 %v885_v28, %v879_v16  ;;  %v936_v16 = vld [vmem:[#allocation7 + $0x5e8] sm:$0xff]  ;;  %v929_v28 = vld [vmem:[#allocation7 + $0x5b0] sm:$0xff] }
 0x1c5   :  { %6445 = vmatprep.subr.bf16.mxu0 %v6444_v38  ;;  %v892_v38 = vld [vmem:[#allocation7 + $0x488] sm:$0xff] }
 0x1c6   :  { %6499 = vmatpush1.bf16.msra.mxu1 %v8674_v43  ;;  %v795_v43 = vld [vmem:[#allocation7 + $0x180] sm:$0xff] }
 0x1c7   :  { %6501 = vmatprep.subr.bf16.mxu1 %v8677_v48  ;;  %v801_v48 = vld [vmem:[#allocation7 + $0x1b0] sm:$0xff] }
 0x1ca   :  { %6503 = vmatpush1.bf16.msra.mxu1 %v8680_v57  ;;  %v6446_v57 = vpack.c.bf16 %v801_v48, %v795_v43  ;;  %v898_v43 = vld [vmem:[#allocation7 + $0x4b8] sm:$0xff] }
 0x1cb   :  { %6505 = vmatprep.subr.bf16.mxu1 %v8683_v58  ;;  %v8819_v58 = vpop.f32.mrb[2].mxu0  ;;  %v6476_v48 = vpack.c.bf16 %v898_v43, %v892_v38  ;;  %v6552_v38 = vpack.c.bf16 %v936_v16, %v930_v14  ;;  %v787_v14 = vld [vmem:[#allocation7 + $0x140] sm:$0xff]  ;;  %v800_v16 = vld [vmem:[#allocation7 + $0x1a8] sm:$0xff] }
 0x1cc   :  { %6447 = vmatpush1.bf16.msra.mxu0 %v6446_v57  ;;  %v8821_v20 = vpop.f32.mrb[3].mxu0  ;;  %v891_v57 = vld [vmem:[#allocation7 + $0x480] sm:$0xff] }
 0x1ce   :  { %6507 = vmatpush1.bf16.msra.mxu1 %v8686_v6  ;;  %v808_v6 = vld [vmem:[#allocation7 + $0x1e8] sm:$0xff] }
 0x1cf   :  { %6509 = vmatprep.subr.bf16.mxu1 %v8689_v7  ;;  %v814_v7 = vld [vmem:[#allocation7 + $0x218] sm:$0xff] }
 0x1d2   :  { %6511 = vmatpush1.bf16.msra.mxu1 %v8692_v18  ;;  %v6448_v18 = vpack.c.bf16 %v814_v7, %v808_v6  ;;  %v897_v6 = vld [vmem:[#allocation7 + $0x4b0] sm:$0xff]  ;;  %v894_v7 = vld [vmem:[#allocation7 + $0x498] sm:$0xff] }
 0x1d3   :  { %6513 = vmatprep.subr.bf16.mxu1 %v8695_v19  ;;  %v807_v19 = vld [vmem:[#allocation7 + $0x1e0] sm:$0xff] }
 0x1d4   :  { %6449 = vmatprep.subr.bf16.mxu0 %v6448_v18  ;;  %v6478_v18 = vpack.c.bf16 %v897_v6, %v891_v57  ;;  %v758_v57 = vld [vmem:[#allocation7 + $0x58] sm:$0xff] }
 0x1d6   :  { %6515 = vmatpush1.bf16.msra.mxu1 %v8698_v31  ;;  %v813_v31 = vld [vmem:[#allocation7 + $0x210] sm:$0xff] }
 0x1d7   :  { %6517 = vmatprep.subr.bf16.mxu1 %v8701_v32  ;;  %v6450_v32 = vpack.c.bf16 %v813_v31, %v807_v19  ;;  %v900_v19 = vld [vmem:[#allocation7 + $0x4c8] sm:$0xff]  ;;  %v893_v31 = vld [vmem:[#allocation7 + $0x490] sm:$0xff] }
 0x1d9   :  { %6451 = vmatpush1.bf16.msra.mxu0 %v6450_v32  ;;  %v899_v32 = vld [vmem:[#allocation7 + $0x4c0] sm:$0xff] }
 0x1da   :  { %6519 = vmatpush1.bf16.msra.mxu1 %v8704_v46  ;;  %v820_v46 = vld [vmem:[#allocation7 + $0x248] sm:$0xff] }
 0x1db   :  { %6521 = vmatprep.subr.bf16.mxu1 %v8707_v47  ;;  %v826_v47 = vld [vmem:[#allocation7 + $0x278] sm:$0xff] }
 0x1de   :  { %6523 = vmatpush1.bf16.msra.mxu1 %v8710_v61  ;;  %v6452_v61 = vpack.c.bf16 %v826_v47, %v820_v46  ;;  %v6540_v46 = vpack.c.bf16 %v900_v19, %v894_v7  ;;  %v6542_v47 = vpack.c.bf16 %v899_v32, %v893_v31 }
 0x1df   :  { %6525 = vmatprep.subr.bf16.mxu1 %v8713_v62  ;;  %v819_v62 = vld [vmem:[#allocation7 + $0x240] sm:$0xff] }
 0x1e0   :  { %6453 = vmatprep.subr.bf16.mxu0 %v6452_v61  ;;  %v904_v61 = vld [vmem:[#allocation7 + $0x4e8] sm:$0xff] }
 0x1e2   :  { %6527 = vmatpush1.bf16.msra.mxu1 %v8716_v12  ;;  %v825_v12 = vld [vmem:[#allocation7 + $0x270] sm:$0xff] }
 0x1e3   :  { %6529 = vmatprep.subr.bf16.mxu1 %v8719_v13  ;;  %v6454_v13 = vpack.c.bf16 %v825_v12, %v819_v62  ;;  %v910_v62 = vld [vmem:[#allocation7 + $0x518] sm:$0xff] }
 0x1e4   :  { %v6480_v12 = vpack.c.bf16 %v910_v62, %v904_v61 }
 0x1e5   :  { %6455 = vmatpush1.bf16.msra.mxu0 %v6454_v13  ;;  %v903_v13 = vld [vmem:[#allocation7 + $0x4e0] sm:$0xff] }
 0x1e6   :  { %6531 = vmatpush1.bf16.msra.mxu1 %v8722_v26  ;;  %v832_v26 = vld [vmem:[#allocation7 + $0x2a8] sm:$0xff] }
 0x1e7   :  { %6533 = vmatprep.subr.bf16.mxu1 %v8725_v27  ;;  %v838_v27 = vld [vmem:[#allocation7 + $0x2d8] sm:$0xff] }
 0x1ea   :  { %6535 = vmatpush1.bf16.msra.mxu1 %v8728_v44  ;;  %v6456_v44 = vpack.c.bf16 %v838_v27, %v832_v26  ;;  %v909_v26 = vld [vmem:[#allocation7 + $0x510] sm:$0xff]  ;;  %v906_v27 = vld [vmem:[#allocation7 + $0x4f8] sm:$0xff] }
 0x1eb   :  { %6537 = vmatprep.subr.bf16.mxu1 %v8731_v45  ;;  %v831_v45 = vld [vmem:[#allocation7 + $0x2a0] sm:$0xff] }
 0x1ec   :  { %6457 = vmatprep.subr.bf16.mxu0 %v6456_v44  ;;  %v6482_v44 = vpack.c.bf16 %v909_v26, %v903_v13 }
 0x1ee   :  { %6539 = vmatpush1.bf16.msra.mxu1 %v8734_v63  ;;  %v837_v63 = vld [vmem:[#allocation7 + $0x2d0] sm:$0xff] }
 0x1ef   :  { %v6458_v17 = vpack.c.bf16 %v837_v63, %v831_v45  ;;  %6541 = vmatprep.subr.bf16.mxu1 %v6540_v46  ;;  %v912_v45 = vld [vmem:[#allocation7 + $0x528] sm:$0xff]  ;;  %v905_v63 = vld [vmem:[#allocation7 + $0x4f0] sm:$0xff] }
 0x1f0   :  { %v6544_v22 = vpack.c.bf16 %v912_v45, %v906_v27 }
 0x1f1   :  { %6459 = vmatpush1.bf16.msra.mxu0 %v6458_v17  ;;  %v911_v17 = vld [vmem:[#allocation7 + $0x520] sm:$0xff] }
 0x1f2   :  { %6461 = vmatprep.subr.bf16.mxu0 %v6460_v35  ;;  %6543 = vmatpush1.bf16.msra.mxu1 %v6542_v47  ;;  %v6546_v29 = vpack.c.bf16 %v911_v17, %v905_v63  ;;  %v916_v35 = vld [vmem:[#allocation7 + $0x548] sm:$0xff]  ;;  %v751_v17 = vld [vmem:[#allocation7 + $0x20] sm:$0xff] }
 0x1f3   :  { %6545 = vmatprep.subr.bf16.mxu1 %v6544_v22  ;;  %v6484_v37 = vpack.c.bf16 %v922_v36, %v916_v35  ;;  %v757_v22 = vld [vmem:[#allocation7 + $0x50] sm:$0xff]  ;;  %v764_v36 = vld [vmem:[#allocation7 + $0x88] sm:$0xff] }
 0x1f5   :  { %6463 = vmatpush1.bf16.msra.mxu0 %v6462_v39  ;;  %v915_v39 = vld [vmem:[#allocation7 + $0x540] sm:$0xff] }
 0x1f6   :  { %6465 = vmatprep.subr.bf16.mxu0 %v6464_v51  ;;  %6547 = vmatpush1.bf16.msra.mxu1 %v6546_v29  ;;  %v6486_v51 = vpack.c.bf16 %v921_v41, %v915_v39  ;;  %v6558_v41 = vpack.c.bf16 %v757_v22, %v751_v17 }
 0x1f7   :  { %6549 = vmatprep.subr.bf16.mxu1 %v6548_v59 }
 0x1f9   :  { %6467 = vmatpush1.bf16.msra.mxu0 %v6466_v56  ;;  %v923_v56 = vld [vmem:[#allocation7 + $0x580] sm:$0xff] }
 0x1fa   :  { %6469 = vmatprep.subr.bf16.mxu0 %v6468_v1  ;;  %v6550_v60 = vpack.c.bf16 %v923_v56, %v917_v55  ;;  %v928_v1 = vld [vmem:[#allocation7 + $0x5a8] sm:$0xff]  ;;  %v782_v55 = vld [vmem:[#allocation7 + $0x118] sm:$0xff] }
 0x1fb   :  { %v6488_v5 = vpack.c.bf16 %v934_v4, %v928_v1  ;;  %v6564_v59 = vpack.c.bf16 %v782_v55, %v776_v54  ;;  %v781_v1 = vld [vmem:[#allocation7 + $0x110] sm:$0xff]  ;;  %v788_v4 = vld [vmem:[#allocation7 + $0x148] sm:$0xff] }
 0x1fc   :  { %6551 = vmatpush1.bf16.msra.mxu1 %v6550_v60  ;;  %v775_v60 = vld [vmem:[#allocation7 + $0xe0] sm:$0xff] }
 0x1fd   :  { %6471 = vmatpush1.bf16.msra.mxu0 %v6470_v10  ;;  %v927_v10 = vld [vmem:[#allocation7 + $0x5a0] sm:$0xff]  ;;  %6553 = vmatprep.subr.bf16.mxu1 %v6552_v38 }
 0x1fe   :  { %6473 = vmatprep.subr.bf16.mxu0 %v6472_v15  ;;  %v6490_v15 = vpack.c.bf16 %v933_v11, %v927_v10  ;;  %v6566_v10 = vpack.c.bf16 %v781_v1, %v775_v60  ;;  %v1192_v60 = vld [vmem:[#allocation9 + $0x60] sm:$0xff]  ;;  %v1195_v1 = vld [vmem:[#allocation9 + $0x78] sm:$0xff] }
 0x201   :  { %6475 = vmatpush1.bf16.msra.mxu0 %v6474_v33  ;;  %v935_v33 = vld [vmem:[#allocation7 + $0x5e0] sm:$0xff] }
 0x202   :  { %6477 = vmatprep.subr.bf16.mxu0 %v6476_v48  ;;  %v6554_v43 = vpack.c.bf16 %v935_v33, %v929_v28  ;;  %v752_v48 = vld [vmem:[#allocation7 + $0x28] sm:$0xff]  ;;  %v806_v28 = vld [vmem:[#allocation7 + $0x1d8] sm:$0xff] }
 0x203   :  { %v6556_v6 = vpack.c.bf16 %v758_v57, %v752_v48  ;;  %v6572_v38 = vpack.c.bf16 %v806_v28, %v800_v16  ;;  %v805_v48 = vld [vmem:[#allocation7 + $0x1d0] sm:$0xff]  ;;  %v812_v57 = vld [vmem:[#allocation7 + $0x208] sm:$0xff] }
 0x204   :  { %6555 = vmatpush1.bf16.msra.mxu1 %v6554_v43  ;;  %v799_v43 = vld [vmem:[#allocation7 + $0x1a0] sm:$0xff]  ;;  %v1205_v28 = vld [vmem:[#allocation9 + $0xc8] sm:$0xff] }
 0x205   :  { %6479 = vmatpush1.bf16.msra.mxu0 %v6478_v18 }
 0x206   :  { %6481 = vmatprep.subr.bf16.mxu0 %v6480_v12 }
 0x209   :  { %6483 = vmatpush1.bf16.msra.mxu0 %v6482_v44 }
 0x20a   :  { %6485 = vmatprep.subr.bf16.mxu0 %v6484_v37  ;;  %v770_v37 = vld [vmem:[#allocation7 + $0xb8] sm:$0xff] }
 0x20b   :  { %v6560_v42 = vpack.c.bf16 %v770_v37, %v764_v36  ;;  %v860_v36 = vld [vmem:[#allocation7 + $0x388] sm:$0xff]  ;;  %v866_v37 = vld [vmem:[#allocation7 + $0x3b8] sm:$0xff] }
 0x20d   :  { %6487 = vmatpush1.bf16.msra.mxu0 %v6486_v51  ;;  %v763_v51 = vld [vmem:[#allocation7 + $0x80] sm:$0xff] }
 0x20e   :  { %6489 = vmatprep.subr.bf16.mxu0 %v6488_v5  ;;  %v794_v5 = vld [vmem:[#allocation7 + $0x178] sm:$0xff] }
 0x20f   :  { %v6568_v11 = vpack.c.bf16 %v794_v5, %v788_v4  ;;  %v6630_v4 = vpack.c.bf16 %v1195_v1, %v1192_v60  ;;  %v1199_v5 = vld [vmem:[#allocation9 + $0x98] sm:$0xff] }
 0x211   :  { %6491 = vmatpush1.bf16.msra.mxu0 %v6490_v15  ;;  %v793_v15 = vld [vmem:[#allocation7 + $0x170] sm:$0xff] }
 0x212   :  { %6557 = vmatprep.subr.bf16.mxu0 %v6556_v6  ;;  %v6570_v33 = vpack.c.bf16 %v793_v15, %v787_v14  ;;  %v818_v6 = vld [vmem:[#allocation7 + $0x238] sm:$0xff]  ;;  %v1198_v14 = vld [vmem:[#allocation9 + $0x90] sm:$0xff]  ;;  %v1201_v15 = vld [vmem:[#allocation9 + $0xa8] sm:$0xff] }
 0x213   :  { %v6634_v16 = vpack.c.bf16 %v1201_v15, %v1198_v14 }
 0x274   :  { %v646_v7 = vpop.f32.mrb[2].mxu1 }
 0x275   :  { %v721_v18 = vadd.f32 %v646_v7, %v8780_v53  ;;  %v648_v19 = vpop.f32.mrb[3].mxu1  ;;  %v6574_v7 = vpack.c.bf16 %v805_v48, %v799_v43  ;;  %v1204_v43 = vld [vmem:[#allocation9 + $0xc0] sm:$0xff]  ;;  %v1207_v48 = vld [vmem:[#allocation9 + $0xd8] sm:$0xff] }
 0x276   :  { %v728_v31 = vadd.f32 %v648_v19, %v8819_v58  ;;  %v811_v19 = vld [vmem:[#allocation7 + $0x200] sm:$0xff] }
 0x277   :  { %v5596_v32 = vmul.f32 -1.442695, %v721_v18  ;;  %v6576_v18 = vpack.c.bf16 %v818_v6, %v812_v57  ;;  %v6638_v57 = vpack.c.bf16 %v1207_v48, %v1204_v43  ;;  %v1211_v6 = vld [vmem:[#allocation9 + $0xf8] sm:$0xff]  ;;  %v1157_v43 = vld [vmem:[#allocation4 + $0x28] sm:$0xff] }
 0x278   :  { %v5597_v46 = vmul.f32 -1.442695, %v728_v31  ;;  %v817_v31 = vld [vmem:[#allocation7 + $0x230] sm:$0xff] }
 0x279   :  { %8253 = vpow2.f32 %v5596_v32  ;;  %v824_v32 = vld [vmem:[#allocation7 + $0x268] sm:$0xff] }
 0x27a   :  { %8255 = vpow2.f32 %v5597_v46  ;;  %v830_v46 = vld [vmem:[#allocation7 + $0x298] sm:$0xff] }
 0x283   :  { %v8254_v47 = vpop.eup %8253 }
 0x284   :  { %v725_v61 = vadd.f32 1.0, %v8254_v47  ;;  %v8256_v62 = vpop.eup %8255  ;;  %v6578_v47 = vpack.c.bf16 %v817_v31, %v811_v19  ;;  %v1210_v19 = vld [vmem:[#allocation9 + $0xf0] sm:$0xff]  ;;  %v1213_v31 = vld [vmem:[#allocation9 + $0x108] sm:$0xff] }
 0x285   :  { %v732_v12 = vadd.f32 1.0, %v8256_v62  ;;  %v823_v62 = vld [vmem:[#allocation7 + $0x260] sm:$0xff] }
 0x286   :  { %8257 = vrcp.f32 %v725_v61  ;;  %v6580_v61 = vpack.c.bf16 %v830_v46, %v824_v32  ;;  %v6642_v32 = vpack.c.bf16 %v1213_v31, %v1210_v19  ;;  %v1217_v46 = vld [vmem:[#allocation9 + $0x128] sm:$0xff] }
 0x287   :  { %8259 = vrcp.f32 %v732_v12  ;;  %v829_v12 = vld [vmem:[#allocation7 + $0x290] sm:$0xff]  ;;  %v1185_v19 = vld [vmem:[#allocation9 + $0x28] sm:$0xff] }
 0x290   :  { %v8258_v13 = vpop.eup %8257 }
 0x291   :  { %v735_v26 = vmul.f32 %v8258_v13, %v8821_v20  ;;  %v8260_v53 = vpop.eup %8259  ;;  %v769_v20 = vld [vmem:[#allocation7 + $0xb0] sm:$0xff]  ;;  %v836_v13 = vld [vmem:[#allocation7 + $0x2c8] sm:$0xff] }
 0x292   :  { %v738_v63 = vsub.f32 1.0, %v8260_v53  ;;  %v740_v35 = vmul.f32 0.0, %v8260_v53  ;;  %v6562_v56 = vpack.c.bf16 %v769_v20, %v763_v51  ;;  %v841_v53 = vld [vmem:[#allocation7 + $0x2f0] sm:$0xff]  ;;  %v859_v51 = vld [vmem:[#allocation7 + $0x380] sm:$0xff] }
 0x293   :  { %v865_v20 = vld [vmem:[#allocation7 + $0x3b0] sm:$0xff] }
 0x294   :  { %v717_v27 = vpop.f32.mrb[4].mxu1  ;;  %v6594_v54 = vpack.c.bf16 %v865_v20, %v859_v51  ;;  %v1414_v51 = vld [vmem:[#allocation7 + $0x90] sm:$0xff] }
 0x295   :  { %v736_v44 = vadd.f32 %v735_v26, %v717_v27  ;;  %v5846_v45 = vpop.f32.mrb[5].mxu1  ;;  %v842_v26 = vld [vmem:[#allocation7 + $0x2f8] sm:$0xff]  ;;  %v6582_v27 = vpack.c.bf16 %v829_v12, %v823_v62  ;;  %v1216_v62 = vld [vmem:[#allocation9 + $0x120] sm:$0xff] }
 0x296   :  { %v835_v45 = vld [vmem:[#allocation7 + $0x2c0] sm:$0xff]  ;;  %v1219_v12 = vld [vmem:[#allocation9 + $0x138] sm:$0xff] }
 0x297   :  { %8261 = vtanh.f32 %v736_v44  ;;  %v6584_v44 = vpack.c.bf16 %v842_v26, %v836_v13  ;;  %v6586_v17 = vpack.c.bf16 %v841_v53, %v835_v45  ;;  %v6646_v13 = vpack.c.bf16 %v1219_v12, %v1216_v62  ;;  %v1223_v26 = vld [vmem:[#allocation9 + $0x158] sm:$0xff]  ;;  %v1222_v45 = vld [vmem:[#allocation9 + $0x150] sm:$0xff]  ;;  %v1225_v53 = vld [vmem:[#allocation9 + $0x168] sm:$0xff] }
 0x298   :  { %v1188_v62 = vld [vmem:[#allocation9 + $0x40] sm:$0xff]  ;;  %v1191_v12 = vld [vmem:[#allocation9 + $0x58] sm:$0xff] }
 0x2a1   :  { %v8262_v58 = vpop.eup %8261 }
 0x2a2   :  { %v739_v29 = vmul.f32 %v8262_v58, %v738_v63  ;;  %v848_v63 = vld [vmem:[#allocation7 + $0x328] sm:$0xff]  ;;  %v854_v58 = vld [vmem:[#allocation7 + $0x358] sm:$0xff] }
 0x2a3   :  { %v6588_v22 = vpack.c.bf16 %v854_v58, %v848_v63  ;;  %v6650_v63 = vpack.c.bf16 %v1225_v53, %v1222_v45  ;;  %v1397_v58 = vld [vmem:[#allocation7 + $0x8] sm:$0xff]  ;;  %v1203_v45 = vld [vmem:[#allocation9 + $0xb8] sm:$0xff] }
 0x2a4   :  { %v8826_v39 = vadd.f32 %v740_v35, %v739_v29  ;;  %v847_v29 = vld [vmem:[#allocation7 + $0x320] sm:$0xff]  ;;  %v853_v35 = vld [vmem:[#allocation7 + $0x350] sm:$0xff] }
 0x2a6   :  { %1003 = vmatprep.mubr.f32.mxu0 %v8826_v39  ;;  %1074 = vmatprep.mubr.f32.mxu1 %v8826_v39 }
 0x2a7   :  { %1004 = vmatmul.mubr.f32.vlgmr.msra.gmra.mrb[4].mxu0 %v8782_v25  ;;  %1075 = vmatmul.mubr.f32.vlgmr.msra.gmra.mrb[6].mxu1 %v8782_v25 }
 0x2a8   :  { %6559 = vmatpush1.bf16.msra.mxu0 %v6558_v41  ;;  %1145 = vmatprep.mubr.f32.mxu0 %v8826_v39  ;;  %v6590_v41 = vpack.c.bf16 %v853_v35, %v847_v29  ;;  %v1402_v35 = vld [vmem:[#allocation7 + $0x30] sm:$0xff] }
 0x2a9   :  { %6561 = vmatprep.subr.bf16.mxu0 %v6560_v42  ;;  %1292 = vmatprep.mubr.f32.mxu1 %v8554_v0  ;;  %v6592_v42 = vpack.c.bf16 %v866_v37, %v860_v36  ;;  %v1409_v37 = vld [vmem:[#allocation7 + $0x68] sm:$0xff] }
 0x2ac   :  { %6563 = vmatpush1.bf16.msra.mxu0 %v6562_v56  ;;  %v1189_v56 = vld [vmem:[#allocation9 + $0x48] sm:$0xff] }
 0x2ad   :  { %6565 = vmatprep.subr.bf16.mxu0 %v6564_v59 }
 0x2b0   :  { %6567 = vmatpush1.bf16.msra.mxu0 %v6566_v10  ;;  %v1202_v10 = vld [vmem:[#allocation9 + $0xb0] sm:$0xff] }
 0x2b1   :  { %6569 = vmatprep.subr.bf16.mxu0 %v6568_v11  ;;  %v6632_v11 = vpack.c.bf16 %v1202_v10, %v1199_v5 }
 0x2b4   :  { %6571 = vmatpush1.bf16.msra.mxu0 %v6570_v33  ;;  %v1208_v33 = vld [vmem:[#allocation9 + $0xe0] sm:$0xff] }
 0x2b5   :  { %6573 = vmatprep.subr.bf16.mxu0 %v6572_v38  ;;  %v6636_v38 = vpack.c.bf16 %v1208_v33, %v1205_v28 }
 0x2b8   :  { %6575 = vmatpush1.bf16.msra.mxu0 %v6574_v7  ;;  %v1214_v7 = vld [vmem:[#allocation9 + $0x110] sm:$0xff] }
 0x2b9   :  { %6577 = vmatprep.subr.bf16.mxu0 %v6576_v18  ;;  %v6640_v18 = vpack.c.bf16 %v1214_v7, %v1211_v6 }
 0x2bc   :  { %6579 = vmatpush1.bf16.msra.mxu0 %v6578_v47  ;;  %v1220_v47 = vld [vmem:[#allocation9 + $0x140] sm:$0xff] }
 0x2bd   :  { %6581 = vmatprep.subr.bf16.mxu0 %v6580_v61  ;;  %v6644_v61 = vpack.c.bf16 %v1220_v47, %v1217_v46 }
 0x2c0   :  { %6583 = vmatpush1.bf16.msra.mxu0 %v6582_v27  ;;  %v1226_v27 = vld [vmem:[#allocation9 + $0x170] sm:$0xff] }
 0x2c1   :  { %6585 = vmatprep.subr.bf16.mxu0 %v6584_v44  ;;  %v6648_v44 = vpack.c.bf16 %v1226_v27, %v1223_v26  ;;  %v1194_v26 = vld [vmem:[#allocation9 + $0x70] sm:$0xff]  ;;  %v1197_v27 = vld [vmem:[#allocation9 + $0x88] sm:$0xff] }
 0x2c4   :  { %6587 = vmatpush1.bf16.msra.mxu0 %v6586_v17  ;;  %v1403_v17 = vld [vmem:[#allocation7 + $0x38] sm:$0xff] }
 0x2c5   :  { %6589 = vmatprep.subr.bf16.mxu0 %v6588_v22  ;;  %v1396_v22 = vld [vmem:[#allocation7] sm:$0xff]  ;;  %v6676_v29 = vpack.c.bf16 %v1403_v17, %v1397_v58  ;;  %v1209_v58 = vld [vmem:[#allocation9 + $0xe8] sm:$0xff] }
 0x2c6   :  { %v6678_v36 = vpack.c.bf16 %v1402_v35, %v1396_v22  ;;  %v1212_v22 = vld [vmem:[#allocation9 + $0x100] sm:$0xff] }
 0x2c8   :  { %6591 = vmatpush1.bf16.msra.mxu0 %v6590_v41  ;;  %v1415_v41 = vld [vmem:[#allocation7 + $0x98] sm:$0xff] }
 0x2c9   :  { %6593 = vmatprep.subr.bf16.mxu0 %v6592_v42  ;;  %v1408_v42 = vld [vmem:[#allocation7 + $0x60] sm:$0xff]  ;;  %v6680_v20 = vpack.c.bf16 %v1415_v41, %v1409_v37  ;;  %v1218_v41 = vld [vmem:[#allocation9 + $0x130] sm:$0xff] }
 0x2cc   :  { %6595 = vmatpush1.bf16.msra.mxu0 %v6594_v54  ;;  %v6682_v54 = vpack.c.bf16 %v1414_v51, %v1408_v42  ;;  %v1221_v42 = vld [vmem:[#allocation9 + $0x148] sm:$0xff] }
 0x2cd   :  { %6597 = vmatprep.subr.bf16.mxu0 %v8742_v49  ;;  %v1181_v49 = vld [vmem:[#allocation9 + $0x8] sm:$0xff]  ;;  %v6671_v51 = vpack.c.bf16 %v1221_v42, %v1218_v41  ;;  %v1468_v41 = vld [vmem:[#allocation7 + $0x240] sm:$0xff]  ;;  %v1474_v42 = vld [vmem:[#allocation7 + $0x270] sm:$0xff] }
 0x2d0   :  { %6599 = vmatpush1.bf16.msra.mxu0 %v8744_v52  ;;  %v1184_v52 = vld [vmem:[#allocation9 + $0x20] sm:$0xff] }
 0x2d1   :  { %6601 = vmatprep.subr.bf16.mxu0 %v8748_v3  ;;  %v6620_v3 = vpack.c.bf16 %v1184_v52, %v1181_v49  ;;  %v1421_v49 = vld [vmem:[#allocation7 + $0xc8] sm:$0xff]  ;;  %v1427_v52 = vld [vmem:[#allocation7 + $0xf8] sm:$0xff] }
 0x2d3   :  { %6621 = vmatprep.subr.bf16.mxu1 %v6620_v3  ;;  %v6684_v3 = vpack.c.bf16 %v1427_v52, %v1421_v49  ;;  %v1399_v49 = vld [vmem:[#allocation7 + $0x18] sm:$0xff]  ;;  %v1405_v52 = vld [vmem:[#allocation7 + $0x48] sm:$0xff] }
 0x2d4   :  { %6603 = vmatpush1.bf16.msra.mxu0 %v8750_v8  ;;  %v1180_v8 = vld [vmem:[#allocation9] sm:$0xff] }
 0x2d5   :  { %6605 = vmatprep.subr.bf16.mxu0 %v8754_v21  ;;  %v1183_v21 = vld [vmem:[#allocation9 + $0x18] sm:$0xff] }
 0x2d8   :  { %6607 = vmatpush1.bf16.msra.mxu0 %v8756_v24  ;;  %v6622_v24 = vpack.c.bf16 %v1183_v21, %v1180_v8  ;;  %v1420_v8 = vld [vmem:[#allocation7 + $0xc0] sm:$0xff]  ;;  %v1426_v21 = vld [vmem:[#allocation7 + $0xf0] sm:$0xff] }
 0x2d9   :  { %6609 = vmatprep.subr.bf16.mxu0 %v8760_v40  ;;  %v1187_v40 = vld [vmem:[#allocation9 + $0x38] sm:$0xff] }
 0x2da   :  { %6623 = vmatpush1.bf16.msra.mxu1 %v6622_v24  ;;  %v6686_v24 = vpack.c.bf16 %v1426_v21, %v1420_v8  ;;  %v6740_v8 = vpack.c.bf16 %v1405_v52, %v1399_v49  ;;  %v1398_v21 = vld [vmem:[#allocation7 + $0x10] sm:$0xff]  ;;  %v1476_v52 = vld [vmem:[#allocation7 + $0x280] sm:$0xff] }
 0x2db   :  { %v1470_v49 = vld [vmem:[#allocation7 + $0x250] sm:$0xff] }
 0x2dc   :  { %6611 = vmatpush1.bf16.msra.mxu0 %v8762_v50  ;;  %v1190_v50 = vld [vmem:[#allocation9 + $0x50] sm:$0xff] }
 0x2dd   :  { %6613 = vmatprep.subr.bf16.mxu0 %v8766_v2  ;;  %v6624_v55 = vpack.c.bf16 %v1190_v50, %v1187_v40  ;;  %v1186_v2 = vld [vmem:[#allocation9 + $0x30] sm:$0xff]  ;;  %v1433_v40 = vld [vmem:[#allocation7 + $0x128] sm:$0xff]  ;;  %v1439_v50 = vld [vmem:[#allocation7 + $0x158] sm:$0xff] }
 0x2df   :  { %6625 = vmatprep.subr.bf16.mxu1 %v6624_v55  ;;  %v1432_v55 = vld [vmem:[#allocation7 + $0x120] sm:$0xff] }
 0x2e0   :  { %6615 = vmatpush1.bf16.msra.mxu0 %v8768_v9  ;;  %v6626_v9 = vpack.c.bf16 %v1189_v56, %v1186_v2  ;;  %v6688_v2 = vpack.c.bf16 %v1439_v50, %v1433_v40  ;;  %v1438_v56 = vld [vmem:[#allocation7 + $0x150] sm:$0xff]  ;;  %v1411_v40 = vld [vmem:[#allocation7 + $0x78] sm:$0xff]  ;;  %v1417_v50 = vld [vmem:[#allocation7 + $0xa8] sm:$0xff] }
 0x2e1   :  { %6617 = vmatprep.subr.bf16.mxu0 %v8772_v23  ;;  %v1193_v23 = vld [vmem:[#allocation9 + $0x68] sm:$0xff] }
 0x2e2   :  { %6627 = vmatpush1.bf16.msra.mxu1 %v6626_v9  ;;  %v6690_v9 = vpack.c.bf16 %v1438_v56, %v1432_v55  ;;  %v1410_v56 = vld [vmem:[#allocation7 + $0x70] sm:$0xff] }
 0x2e4   :  { %6619 = vmatpush1.bf16.msra.mxu0 %v8774_v30  ;;  %v1196_v30 = vld [vmem:[#allocation9 + $0x80] sm:$0xff] }
 0x2e5   :  { %v6628_v59 = vpack.c.bf16 %v1196_v30, %v1193_v23  ;;  %6677 = vmatprep.subr.bf16.mxu0 %v6676_v29  ;;  %v1155_v23 = vld [vmem:[#allocation4 + $0x18] sm:$0xff] }
 0x2e6   :  { %v1215_v29 = vld [vmem:[#allocation9 + $0x118] sm:$0xff] }
 0x2e7   :  { %1146 = vmatmul.mubr.f32.vlgmr.msra.gmra.mrb[6].mxu0 %v8782_v25  ;;  %6629 = vmatprep.subr.bf16.mxu1 %v6628_v59  ;;  %v6668_v37 = vpack.c.bf16 %v1215_v29, %v1212_v22  ;;  %v1469_v22 = vld [vmem:[#allocation7 + $0x248] sm:$0xff]  ;;  %v1475_v29 = vld [vmem:[#allocation7 + $0x278] sm:$0xff] }
 0x2e8   :  { %6631 = vmatpush1.bf16.msra.mxu1 %v6630_v4  ;;  %6679 = vmatpush1.bf16.msra.mxu0 %v6678_v36  ;;  %v1156_v4 = vld [vmem:[#allocation4 + $0x20] sm:$0xff] }
 0x2e9   :  { %6633 = vmatprep.subr.bf16.mxu1 %v6632_v11  ;;  %6681 = vmatprep.subr.bf16.mxu0 %v6680_v20  ;;  %v1224_v20 = vld [vmem:[#allocation9 + $0x160] sm:$0xff] }
 0x2ec   :  { %6635 = vmatpush1.bf16.msra.mxu1 %v6634_v16  ;;  %6683 = vmatpush1.bf16.msra.mxu0 %v6682_v54  ;;  %v1227_v54 = vld [vmem:[#allocation9 + $0x178] sm:$0xff] }
 0x2ed   :  { %6637 = vmatprep.subr.bf16.mxu1 %v6636_v38  ;;  %6685 = vmatprep.subr.bf16.mxu0 %v6684_v3  ;;  %v6674_v3 = vpack.c.bf16 %v1227_v54, %v1224_v20  ;;  %v6702_v20 = vpack.c.bf16 %v1474_v42, %v1468_v41  ;;  %v1477_v54 = vld [vmem:[#allocation7 + $0x288] sm:$0xff]  ;;  %v1535_v41 = vld [vmem:[#allocation7 + $0x458] sm:$0xff] }
 0x2f0   :  { %6639 = vmatpush1.bf16.msra.mxu1 %v6638_v57  ;;  %6687 = vmatpush1.bf16.msra.mxu0 %v6686_v24  ;;  %v1404_v24 = vld [vmem:[#allocation7 + $0x40] sm:$0xff] }
 0x2f1   :  { %6641 = vmatprep.subr.bf16.mxu1 %v6640_v18  ;;  %6689 = vmatprep.subr.bf16.mxu0 %v6688_v2  ;;  %v1182_v18 = vld [vmem:[#allocation9 + $0x10] sm:$0xff]  ;;  %v6742_v55 = vpack.c.bf16 %v1404_v24, %v1398_v21  ;;  %v6744_v2 = vpack.c.bf16 %v1417_v50, %v1411_v40  ;;  %v1481_v21 = vld [vmem:[#allocation7 + $0x2a8] sm:$0xff]  ;;  %v1487_v24 = vld [vmem:[#allocation7 + $0x2d8] sm:$0xff] }
 0x2f2   :  { %v6653_v47 = vpack.c.bf16 %v1185_v19, %v1182_v18  ;;  %v1453_v19 = vld [vmem:[#allocation7 + $0x1c8] sm:$0xff]  ;;  %v6704_v40 = vpack.c.bf16 %v1487_v24, %v1481_v21  ;;  %v1480_v50 = vld [vmem:[#allocation7 + $0x2a0] sm:$0xff]  ;;  %v1530_v21 = vld [vmem:[#allocation7 + $0x430] sm:$0xff] }
 0x2f3   :  { %v1536_v24 = vld [vmem:[#allocation7 + $0x460] sm:$0xff] }
 0x2f4   :  { %6643 = vmatpush1.bf16.msra.mxu1 %v6642_v32  ;;  %6691 = vmatpush1.bf16.msra.mxu0 %v6690_v9  ;;  %v1416_v9 = vld [vmem:[#allocation7 + $0xa0] sm:$0xff] }
 0x2f5   :  { %6645 = vmatprep.subr.bf16.mxu1 %v6644_v61 }
 0x2f8   :  { %6647 = vmatpush1.bf16.msra.mxu1 %v6646_v13  ;;  %v6656_v13 = vpack.c.bf16 %v1191_v12, %v1188_v62  ;;  %v1457_v62 = vld [vmem:[#allocation7 + $0x1e8] sm:$0xff]  ;;  %v1463_v12 = vld [vmem:[#allocation7 + $0x218] sm:$0xff] }
 0x2f9   :  { %6649 = vmatprep.subr.bf16.mxu1 %v6648_v44  ;;  %v6659_v44 = vpack.c.bf16 %v1197_v27, %v1194_v26  ;;  %v1456_v26 = vld [vmem:[#allocation7 + $0x1e0] sm:$0xff]  ;;  %v1462_v27 = vld [vmem:[#allocation7 + $0x210] sm:$0xff] }
 0x2fc   :  { %6651 = vmatpush1.bf16.msra.mxu1 %v6650_v63  ;;  %v1206_v63 = vld [vmem:[#allocation9 + $0xd0] sm:$0xff] }
 0x2fd   :  { %6652 = vmatprep.subr.bf16.mxu1 %v8555_v34  ;;  %v6665_v17 = vpack.c.bf16 %v1209_v58, %v1206_v63  ;;  %v1464_v63 = vld [vmem:[#allocation7 + $0x220] sm:$0xff] }
 0x37a   :  { %v1005_v30 = vpop.f32.mrb[4].mxu0  ;;  %v1076_v59 = vpop.f32.mrb[6].mxu1 }
 0x37b   :  { %v1159_v60 = vadd.f32 %v1155_v23, %v1005_v30  ;;  %v1007_v1 = vpop.f32.mrb[5].mxu0  ;;  %v8848_v5 = vpop.f32.mrb[7].mxu1  ;;  %v1423_v23 = vld [vmem:[#allocation7 + $0xd8] sm:$0xff]  ;;  %v1429_v30 = vld [vmem:[#allocation7 + $0x108] sm:$0xff] }
 0x37c   :  { %v1166_v11 = vadd.f32 %v1156_v4, %v1007_v1  ;;  %v1422_v1 = vld [vmem:[#allocation7 + $0xd0] sm:$0xff]  ;;  %v1428_v4 = vld [vmem:[#allocation7 + $0x100] sm:$0xff] }
 0x37d   :  { %v5598_v10 = vmul.f32 -1.442695, %v1159_v60  ;;  %v6748_v60 = vpack.c.bf16 %v1429_v30, %v1423_v23  ;;  %v1482_v23 = vld [vmem:[#allocation7 + $0x2b0] sm:$0xff]  ;;  %v1488_v30 = vld [vmem:[#allocation7 + $0x2e0] sm:$0xff] }
 0x37e   :  { %v5599_v14 = vmul.f32 -1.442695, %v1166_v11  ;;  %v1441_v11 = vld [vmem:[#allocation7 + $0x168] sm:$0xff] }
 0x37f   :  { %8263 = vpow2.f32 %v5598_v10  ;;  %v1435_v10 = vld [vmem:[#allocation7 + $0x138] sm:$0xff] }
 0x380   :  { %8265 = vpow2.f32 %v5599_v14  ;;  %v6750_v14 = vpack.c.bf16 %v1428_v4, %v1422_v1  ;;  %v1493_v1 = vld [vmem:[#allocation7 + $0x308] sm:$0xff]  ;;  %v1499_v4 = vld [vmem:[#allocation7 + $0x338] sm:$0xff] }
 0x389   :  { %v8264_v15 = vpop.eup %8263 }
 0x38a   :  { %v1163_v16 = vadd.f32 1.0, %v8264_v15  ;;  %v8266_v28 = vpop.eup %8265  ;;  %v6752_v15 = vpack.c.bf16 %v1441_v11, %v1435_v10  ;;  %v6708_v10 = vpack.c.bf16 %v1499_v4, %v1493_v1  ;;  %v1492_v11 = vld [vmem:[#allocation7 + $0x300] sm:$0xff] }
 0x38b   :  { %v1170_v33 = vadd.f32 1.0, %v8266_v28  ;;  %v1440_v28 = vld [vmem:[#allocation7 + $0x160] sm:$0xff] }
 0x38c   :  { %8267 = vrcp.f32 %v1163_v16  ;;  %v1434_v16 = vld [vmem:[#allocation7 + $0x130] sm:$0xff]  ;;  %v1548_v1 = vld [vmem:[#allocation7 + $0x4c0] sm:$0xff] }
 0x38d   :  { %8269 = vrcp.f32 %v1170_v33  ;;  %v6754_v33 = vpack.c.bf16 %v1440_v28, %v1434_v16  ;;  %v1501_v28 = vld [vmem:[#allocation7 + $0x348] sm:$0xff] }
 0x396   :  { %v8268_v38 = vpop.eup %8267 }
 0x397   :  { %v1173_v48 = vmul.f32 %v8268_v38, %v1076_v59  ;;  %v8270_v6 = vpop.eup %8269  ;;  %v6746_v59 = vpack.c.bf16 %v1416_v9, %v1410_v56  ;;  %v1445_v38 = vld [vmem:[#allocation7 + $0x188] sm:$0xff] }
 0x398   :  { %v1176_v7 = vsub.f32 1.0, %v8270_v6  ;;  %v1178_v46 = vmul.f32 %v8270_v6, %v8782_v25  ;;  %v1200_v25 = vld [vmem:[#allocation9 + $0xa0] sm:$0xff]  ;;  %v1450_v6 = vld [vmem:[#allocation7 + $0x1b0] sm:$0xff]  ;;  %v1489_v9 = vld [vmem:[#allocation7 + $0x2e8] sm:$0xff] }
 0x399   :  { %v1174_v57 = vadd.f32 %v1173_v48, %v1157_v43  ;;  %v6662_v53 = vpack.c.bf16 %v1203_v45, %v1200_v25  ;;  %v1451_v43 = vld [vmem:[#allocation7 + $0x1b8] sm:$0xff]  ;;  %v6698_v25 = vpack.c.bf16 %v1462_v27, %v1456_v26  ;;  %v1465_v45 = vld [vmem:[#allocation7 + $0x228] sm:$0xff] }
 0x39a   :  { %v6692_v48 = vpack.c.bf16 %v1451_v43, %v1445_v38  ;;  %v1500_v38 = vld [vmem:[#allocation7 + $0x340] sm:$0xff]  ;;  %v1523_v27 = vld [vmem:[#allocation7 + $0x3f8] sm:$0xff] }
 0x39b   :  { %8271 = vtanh.f32 %v1174_v57  ;;  %v1444_v57 = vld [vmem:[#allocation7 + $0x180] sm:$0xff] }
 0x39c   :  { %v6694_v18 = vpack.c.bf16 %v1450_v6, %v1444_v57  ;;  %6693 = vmatprep.subr.bf16.mxu0 %v6692_v48  ;;  %v1505_v57 = vld [vmem:[#allocation7 + $0x368] sm:$0xff]  ;;  %v1511_v6 = vld [vmem:[#allocation7 + $0x398] sm:$0xff] }
 0x39e   :  { %6695 = vmatpush1.bf16.msra.mxu0 %v6694_v18  ;;  %v6712_v18 = vpack.c.bf16 %v1511_v6, %v1505_v57  ;;  %v1560_v57 = vld [vmem:[#allocation7 + $0x520] sm:$0xff] }
 0x3a5   :  { %v8272_v31 = vpop.eup %8271 }
 0x3a6   :  { %v1177_v32 = vmul.f32 %v8272_v31, %v1176_v7  ;;  %v1447_v7 = vld [vmem:[#allocation7 + $0x198] sm:$0xff]  ;;  %v1446_v31 = vld [vmem:[#allocation7 + $0x190] sm:$0xff] }
 0x3a8   :  { %v8851_v61 = vadd.f32 %v1178_v46, %v1177_v32  ;;  %v1452_v32 = vld [vmem:[#allocation7 + $0x1c0] sm:$0xff]  ;;  %v6756_v46 = vpack.c.bf16 %v1453_v19, %v1447_v7  ;;  %v1510_v19 = vld [vmem:[#allocation7 + $0x390] sm:$0xff] }
 0x3a9   :  { %v1504_v7 = vld [vmem:[#allocation7 + $0x360] sm:$0xff] }
 0x3aa   :  { %1293 = vmatmul.mubr.f32.vlgmr.msra.gmra.mrb[8].mxu1 %v8851_v61 }
 0x3ab   :  { %6654 = vmatpush3.bf16.msra.mxu1 %v6653_v47  ;;  %5879 = vmatprep.mubr.msk.f32.mxu1 %vm8556_vm0, %v8554_v0  ;;  %v6758_v47 = vpack.c.bf16 %v1452_v32, %v1446_v31  ;;  %v1507_v31 = vld [vmem:[#allocation7 + $0x378] sm:$0xff]  ;;  %v1513_v32 = vld [vmem:[#allocation7 + $0x3a8] sm:$0xff] }
 0x3ac   :  { %6655 = vmatprep.subr.bf16.mxu1 %v8555_v34 }
 0x3af   :  { %6657 = vmatpush3.bf16.msra.mxu1 %v6656_v13  ;;  %v6696_v13 = vpack.c.bf16 %v1463_v12, %v1457_v62  ;;  %v1506_v62 = vld [vmem:[#allocation7 + $0x370] sm:$0xff]  ;;  %v1512_v12 = vld [vmem:[#allocation7 + $0x3a0] sm:$0xff] }
 0x3b0   :  { %6658 = vmatprep.subr.bf16.mxu1 %v8555_v34  ;;  %v6778_v26 = vpack.c.bf16 %v1512_v12, %v1506_v62  ;;  %v1573_v12 = vld [vmem:[#allocation7 + $0x588] sm:$0xff] }
 0x3b1   :  { %6697 = vmatprep.subr.bf16.mxu0 %v6696_v13  ;;  %v1517_v13 = vld [vmem:[#allocation7 + $0x3c8] sm:$0xff] }
 0x3b2   :  { %6699 = vmatpush1.bf16.msra.mxu0 %v6698_v25  ;;  %v1522_v25 = vld [vmem:[#allocation7 + $0x3f0] sm:$0xff] }
 0x3b3   :  { %6660 = vmatpush3.bf16.msra.mxu1 %v6659_v44  ;;  %v1459_v44 = vld [vmem:[#allocation7 + $0x1f8] sm:$0xff] }
 0x3b4   :  { %6661 = vmatprep.subr.bf16.mxu1 %v8555_v34  ;;  %v6760_v58 = vpack.c.bf16 %v1465_v45, %v1459_v44  ;;  %v1516_v44 = vld [vmem:[#allocation7 + $0x3c0] sm:$0xff]  ;;  %v6716_v45 = vpack.c.bf16 %v1523_v27, %v1517_v13  ;;  %v1566_v13 = vld [vmem:[#allocation7 + $0x550] sm:$0xff] }
 0x3b7   :  { %6663 = vmatpush3.bf16.msra.mxu1 %v6662_v53  ;;  %v1458_v53 = vld [vmem:[#allocation7 + $0x1f0] sm:$0xff] }
 0x3b8   :  { %6664 = vmatprep.subr.bf16.mxu1 %v8555_v34 }
 0x3ba   :  { %v8860_v35 = vpop.f32.mrb[6].mxu0 }
 0x3bb   :  { %v8862_v36 = vpop.f32.mrb[7].mxu0  ;;  %6666 = vmatpush3.bf16.msra.mxu1 %v6665_v17  ;;  %v6762_v17 = vpack.c.bf16 %v1464_v63, %v1458_v53  ;;  %v6718_v53 = vpack.c.bf16 %v1522_v25, %v1516_v44  ;;  %v1519_v63 = vld [vmem:[#allocation7 + $0x3d8] sm:$0xff]  ;;  %v1577_v25 = vld [vmem:[#allocation7 + $0x5a8] sm:$0xff] }
 0x3bc   :  { %6667 = vmatprep.subr.bf16.mxu1 %v8555_v34 }
 0x3bf   :  { %6669 = vmatpush3.bf16.msra.mxu1 %v6668_v37  ;;  %v6700_v37 = vpack.c.bf16 %v1475_v29, %v1469_v22  ;;  %v1524_v29 = vld [vmem:[#allocation7 + $0x400] sm:$0xff] }
 0x3c0   :  { %6670 = vmatprep.subr.bf16.mxu1 %v8555_v34 }
 0x3c1   :  { %6701 = vmatprep.subr.bf16.mxu0 %v6700_v37  ;;  %v1529_v37 = vld [vmem:[#allocation7 + $0x428] sm:$0xff] }
 0x3c2   :  { %6703 = vmatpush1.bf16.msra.mxu0 %v6702_v20  ;;  %v1528_v20 = vld [vmem:[#allocation7 + $0x420] sm:$0xff] }
 0x3c3   :  { %6672 = vmatpush3.bf16.msra.mxu1 %v6671_v51  ;;  %v1471_v51 = vld [vmem:[#allocation7 + $0x258] sm:$0xff]  ;;  %6705 = vmatprep.subr.bf16.mxu0 %v6704_v40  ;;  %v6786_v40 = vpack.c.bf16 %v1536_v24, %v1530_v21 }
 0x3c4   :  { %6673 = vmatprep.subr.bf16.mxu1 %v8555_v34 }
 0x3c7   :  { %6675 = vmatpush3.bf16.msra.mxu1 %v6674_v3  ;;  %v6764_v3 = vpack.c.bf16 %v1477_v54, %v1471_v51  ;;  %v6720_v51 = vpack.c.bf16 %v1535_v41, %v1529_v37  ;;  %v1534_v54 = vld [vmem:[#allocation7 + $0x450] sm:$0xff]  ;;  %v1584_v41 = vld [vmem:[#allocation7 + $0x5e0] sm:$0xff] }
 0x3c8   :  { %6741 = vmatprep.subr.bf16.mxu1 %v6740_v8  ;;  %v6766_v8 = vpack.c.bf16 %v1476_v52, %v1470_v49  ;;  %v1531_v49 = vld [vmem:[#allocation7 + $0x438] sm:$0xff]  ;;  %v1537_v52 = vld [vmem:[#allocation7 + $0x468] sm:$0xff]  ;;  %v1578_v37 = vld [vmem:[#allocation7 + $0x5b0] sm:$0xff] }
 0x3ca   :  { %5880 = vmatmul.mubr.f32.vlgmr.msra.gmra.mrb[10].mxu1 %v8851_v61 }
 0x3cb   :  { %6743 = vmatpush1.bf16.msra.mxu1 %v6742_v55  ;;  %v1486_v55 = vld [vmem:[#allocation7 + $0x2d0] sm:$0xff] }
 0x3cc   :  { %6745 = vmatprep.subr.bf16.mxu1 %v6744_v2  ;;  %v1483_v2 = vld [vmem:[#allocation7 + $0x2b8] sm:$0xff]  ;;  %v6706_v56 = vpack.c.bf16 %v1486_v55, %v1480_v50  ;;  %v1541_v50 = vld [vmem:[#allocation7 + $0x488] sm:$0xff] }
 0x3cd   :  { %v1547_v55 = vld [vmem:[#allocation7 + $0x4b8] sm:$0xff] }
 0x3ce   :  { %6707 = vmatpush1.bf16.msra.mxu0 %v6706_v56  ;;  %v1540_v56 = vld [vmem:[#allocation7 + $0x480] sm:$0xff] }
 0x3cf   :  { %6747 = vmatpush1.bf16.msra.mxu1 %v6746_v59  ;;  %v6768_v59 = vpack.c.bf16 %v1489_v9, %v1483_v2  ;;  %6709 = vmatprep.subr.bf16.mxu0 %v6708_v10  ;;  %v6724_v2 = vpack.c.bf16 %v1547_v55, %v1541_v50  ;;  %v1546_v9 = vld [vmem:[#allocation7 + $0x4b0] sm:$0xff] }
 0x3d0   :  { %6749 = vmatprep.subr.bf16.mxu1 %v6748_v60  ;;  %v6770_v60 = vpack.c.bf16 %v1488_v30, %v1482_v23  ;;  %v1543_v23 = vld [vmem:[#allocation7 + $0x498] sm:$0xff]  ;;  %v6726_v30 = vpack.c.bf16 %v1546_v9, %v1540_v56 }
 0x3d3   :  { %6751 = vmatpush1.bf16.msra.mxu1 %v6750_v14  ;;  %v1498_v14 = vld [vmem:[#allocation7 + $0x330] sm:$0xff] }
 0x3d4   :  { %6753 = vmatprep.subr.bf16.mxu1 %v6752_v15  ;;  %v1495_v15 = vld [vmem:[#allocation7 + $0x318] sm:$0xff]  ;;  %v6710_v16 = vpack.c.bf16 %v1498_v14, %v1492_v11  ;;  %v1553_v11 = vld [vmem:[#allocation7 + $0x4e8] sm:$0xff] }
 0x3d5   :  { %v6772_v43 = vpack.c.bf16 %v1501_v28, %v1495_v15  ;;  %v1559_v14 = vld [vmem:[#allocation7 + $0x518] sm:$0xff]  ;;  %v1558_v28 = vld [vmem:[#allocation7 + $0x510] sm:$0xff] }
 0x3d6   :  { %6711 = vmatpush1.bf16.msra.mxu0 %v6710_v16  ;;  %v6728_v15 = vpack.c.bf16 %v1559_v14, %v1553_v11  ;;  %v1552_v16 = vld [vmem:[#allocation7 + $0x4e0] sm:$0xff] }
 0x3d7   :  { %6755 = vmatpush1.bf16.msra.mxu1 %v6754_v33  ;;  %v1494_v33 = vld [vmem:[#allocation7 + $0x310] sm:$0xff]  ;;  %6713 = vmatprep.subr.bf16.mxu0 %v6712_v18  ;;  %v1565_v18 = vld [vmem:[#allocation7 + $0x548] sm:$0xff] }
 0x3d8   :  { %6757 = vmatprep.subr.bf16.mxu1 %v6756_v46  ;;  %v6774_v48 = vpack.c.bf16 %v1500_v38, %v1494_v33  ;;  %v6714_v46 = vpack.c.bf16 %v1510_v19, %v1504_v7  ;;  %v1555_v33 = vld [vmem:[#allocation7 + $0x4f8] sm:$0xff]  ;;  %v6730_v38 = vpack.c.bf16 %v1558_v28, %v1552_v16 }
 0x3d9   :  { %v1571_v19 = vld [vmem:[#allocation7 + $0x578] sm:$0xff] }
 0x3da   :  { %6715 = vmatpush1.bf16.msra.mxu0 %v6714_v46  ;;  %v1570_v46 = vld [vmem:[#allocation7 + $0x570] sm:$0xff]  ;;  %v1419_v16 = vld [vmem:[#allocation7 + $0xb8] sm:$0xff] }
 0x3db   :  { %6759 = vmatpush1.bf16.msra.mxu1 %v6758_v47  ;;  %v6776_v47 = vpack.c.bf16 %v1513_v32, %v1507_v31  ;;  %6717 = vmatprep.subr.bf16.mxu0 %v6716_v45  ;;  %v6732_v31 = vpack.c.bf16 %v1571_v19, %v1565_v18  ;;  %v1564_v32 = vld [vmem:[#allocation7 + $0x540] sm:$0xff]  ;;  %v1583_v45 = vld [vmem:[#allocation7 + $0x5d8] sm:$0xff]  ;;  %v1430_v19 = vld [vmem:[#allocation7 + $0x110] sm:$0xff] }
 0x3dc   :  { %6761 = vmatprep.subr.bf16.mxu1 %v6760_v58  ;;  %v1525_v58 = vld [vmem:[#allocation7 + $0x408] sm:$0xff]  ;;  %v6734_v62 = vpack.c.bf16 %v1570_v46, %v1564_v32  ;;  %v1424_v18 = vld [vmem:[#allocation7 + $0xe0] sm:$0xff]  ;;  %v1443_v32 = vld [vmem:[#allocation7 + $0x178] sm:$0xff] }
 0x3dd   :  { %v6780_v22 = vpack.c.bf16 %v1525_v58, %v1519_v63  ;;  %v1576_v63 = vld [vmem:[#allocation7 + $0x5a0] sm:$0xff]  ;;  %v1582_v58 = vld [vmem:[#allocation7 + $0x5d0] sm:$0xff]  ;;  %v6814_v46 = vpack.c.bf16 %v1430_v19, %v1424_v18 }
 0x3de   :  { %6719 = vmatpush1.bf16.msra.mxu0 %v6718_v53  ;;  %v6736_v53 = vpack.c.bf16 %v1583_v45, %v1577_v25  ;;  %v1448_v25 = vld [vmem:[#allocation7 + $0x1a0] sm:$0xff]  ;;  %v1454_v45 = vld [vmem:[#allocation7 + $0x1d0] sm:$0xff] }
 0x3df   :  { %6763 = vmatpush1.bf16.msra.mxu1 %v6762_v17  ;;  %v1518_v17 = vld [vmem:[#allocation7 + $0x3d0] sm:$0xff]  ;;  %6721 = vmatprep.subr.bf16.mxu0 %v6720_v51  ;;  %v6802_v51 = vpack.c.bf16 %v1584_v41, %v1578_v37  ;;  %v1473_v37 = vld [vmem:[#allocation7 + $0x268] sm:$0xff]  ;;  %v1479_v41 = vld [vmem:[#allocation7 + $0x298] sm:$0xff] }
 0x3e0   :  { %6765 = vmatprep.subr.bf16.mxu1 %v6764_v3  ;;  %v6782_v42 = vpack.c.bf16 %v1524_v29, %v1518_v17  ;;  %v6722_v3 = vpack.c.bf16 %v1534_v54, %v1528_v20  ;;  %v1579_v17 = vld [vmem:[#allocation7 + $0x5b8] sm:$0xff]  ;;  %v1585_v29 = vld [vmem:[#allocation7 + $0x5e8] sm:$0xff]  ;;  %v1544_v19 = vld [vmem:[#allocation7 + $0x4a0] sm:$0xff] }
 0x3e1   :  { %v1401_v20 = vld [vmem:[#allocation7 + $0x28] sm:$0xff]  ;;  %v1407_v54 = vld [vmem:[#allocation7 + $0x58] sm:$0xff] }
 0x3e2   :  { %6723 = vmatpush1.bf16.msra.mxu0 %v6722_v3 }
 0x3e3   :  { %6767 = vmatpush1.bf16.msra.mxu1 %v6766_v8  ;;  %v6784_v8 = vpack.c.bf16 %v1537_v52, %v1531_v49  ;;  %6725 = vmatprep.subr.bf16.mxu0 %v6724_v2  ;;  %v6804_v49 = vpack.c.bf16 %v1407_v54, %v1401_v20  ;;  %v1472_v20 = vld [vmem:[#allocation7 + $0x260] sm:$0xff]  ;;  %v1478_v54 = vld [vmem:[#allocation7 + $0x290] sm:$0xff] }
 0x3e4   :  { %6769 = vmatprep.subr.bf16.mxu1 %v6768_v59  ;;  %v1549_v59 = vld [vmem:[#allocation7 + $0x4c8] sm:$0xff] }
 0x3e5   :  { %v6788_v4 = vpack.c.bf16 %v1549_v59, %v1543_v23 }
 0x3e6   :  { %6727 = vmatpush1.bf16.msra.mxu0 %v6726_v30 }
 0x3e7   :  { %6771 = vmatpush1.bf16.msra.mxu1 %v6770_v60  ;;  %v1542_v60 = vld [vmem:[#allocation7 + $0x490] sm:$0xff]  ;;  %6729 = vmatprep.subr.bf16.mxu0 %v6728_v15  ;;  %v1413_v15 = vld [vmem:[#allocation7 + $0x88] sm:$0xff] }
 0x3e8   :  { %6773 = vmatprep.subr.bf16.mxu1 %v6772_v43  ;;  %v6790_v10 = vpack.c.bf16 %v1548_v1, %v1542_v60  ;;  %v1561_v43 = vld [vmem:[#allocation7 + $0x528] sm:$0xff] }
 0x3e9   :  { %v6792_v6 = vpack.c.bf16 %v1561_v43, %v1555_v33  ;;  %v1418_v43 = vld [vmem:[#allocation7 + $0xb0] sm:$0xff] }
 0x3ea   :  { %6731 = vmatpush1.bf16.msra.mxu0 %v6730_v38  ;;  %v6808_v38 = vpack.c.bf16 %v1419_v16, %v1413_v15  ;;  %v1526_v15 = vld [vmem:[#allocation7 + $0x410] sm:$0xff]  ;;  %v1533_v16 = vld [vmem:[#allocation7 + $0x448] sm:$0xff] }
 0x3eb   :  { %6775 = vmatpush1.bf16.msra.mxu1 %v6774_v48  ;;  %v1554_v48 = vld [vmem:[#allocation7 + $0x4f0] sm:$0xff]  ;;  %6733 = vmatprep.subr.bf16.mxu0 %v6732_v31  ;;  %v1437_v31 = vld [vmem:[#allocation7 + $0x148] sm:$0xff] }
 0x3ec   :  { %6777 = vmatprep.subr.bf16.mxu1 %v6776_v47  ;;  %v6794_v7 = vpack.c.bf16 %v1560_v57, %v1554_v48  ;;  %v1567_v47 = vld [vmem:[#allocation7 + $0x558] sm:$0xff]  ;;  %v1425_v48 = vld [vmem:[#allocation7 + $0xe8] sm:$0xff] }
 0x3ed   :  { %v6796_v27 = vpack.c.bf16 %v1573_v12, %v1567_v47  ;;  %v1431_v57 = vld [vmem:[#allocation7 + $0x118] sm:$0xff]  ;;  %v6816_v47 = vpack.c.bf16 %v1443_v32, %v1437_v31  ;;  %v1442_v12 = vld [vmem:[#allocation7 + $0x170] sm:$0xff]  ;;  %v1557_v32 = vld [vmem:[#allocation7 + $0x508] sm:$0xff] }
 0x3ee   :  { %6735 = vmatpush1.bf16.msra.mxu0 %v6734_v62  ;;  %v1436_v62 = vld [vmem:[#allocation7 + $0x140] sm:$0xff]  ;;  %v1550_v31 = vld [vmem:[#allocation7 + $0x4d0] sm:$0xff] }
 0x3ef   :  { %6779 = vmatpush1.bf16.msra.mxu1 %v6778_v26  ;;  %v1572_v26 = vld [vmem:[#allocation7 + $0x580] sm:$0xff]  ;;  %6737 = vmatprep.subr.bf16.mxu0 %v6736_v53  ;;  %v1461_v53 = vld [vmem:[#allocation7 + $0x208] sm:$0xff] }
 0x3f0   :  { %6781 = vmatprep.subr.bf16.mxu1 %v6780_v22  ;;  %v6798_v44 = vpack.c.bf16 %v1572_v26, %v1566_v13  ;;  %v6738_v22 = vpack.c.bf16 %v1582_v58, %v1576_v63  ;;  %v1449_v13 = vld [vmem:[#allocation7 + $0x1a8] sm:$0xff]  ;;  %v1455_v26 = vld [vmem:[#allocation7 + $0x1d8] sm:$0xff]  ;;  %v6822_v58 = vpack.c.bf16 %v1454_v45, %v1448_v25  ;;  %v1568_v45 = vld [vmem:[#allocation7 + $0x560] sm:$0xff] }
 0x3f1   :  { %v1467_v63 = vld [vmem:[#allocation7 + $0x238] sm:$0xff] }
 0x3f2   :  { %6739 = vmatpush1.bf16.msra.mxu0 %v6738_v22  ;;  %v1460_v22 = vld [vmem:[#allocation7 + $0x200] sm:$0xff] }
 0x3f3   :  { %6783 = vmatpush1.bf16.msra.mxu1 %v6782_v42  ;;  %v6800_v42 = vpack.c.bf16 %v1585_v29, %v1579_v17  ;;  %6805 = vmatprep.subr.bf16.mxu0 %v6804_v49  ;;  %v6824_v17 = vpack.c.bf16 %v1467_v63, %v1461_v53  ;;  %v1466_v29 = vld [vmem:[#allocation7 + $0x230] sm:$0xff]  ;;  %v1485_v49 = vld [vmem:[#allocation7 + $0x2c8] sm:$0xff] }
 0x3f4   :  { %6785 = vmatprep.subr.bf16.mxu1 %v6784_v8  ;;  %v1574_v53 = vld [vmem:[#allocation7 + $0x590] sm:$0xff]  ;;  %v1581_v63 = vld [vmem:[#allocation7 + $0x5c8] sm:$0xff] }
 0x3f7   :  { %6787 = vmatpush1.bf16.msra.mxu1 %v6786_v40 }
 0x3f8   :  { %6789 = vmatprep.subr.bf16.mxu1 %v6788_v4  ;;  %v1400_v4 = vld [vmem:[#allocation7 + $0x20] sm:$0xff] }
 0x3fb   :  { %6791 = vmatpush1.bf16.msra.mxu1 %v6790_v10  ;;  %v1406_v10 = vld [vmem:[#allocation7 + $0x50] sm:$0xff] }
 0x3fc   :  { %6793 = vmatprep.subr.bf16.mxu1 %v6792_v6  ;;  %v6806_v33 = vpack.c.bf16 %v1406_v10, %v1400_v4  ;;  %v1527_v4 = vld [vmem:[#allocation7 + $0x418] sm:$0xff] }
 0x3ff   :  { %6795 = vmatpush1.bf16.msra.mxu1 %v6794_v7  ;;  %v6812_v7 = vpack.c.bf16 %v1431_v57, %v1425_v48  ;;  %v1538_v48 = vld [vmem:[#allocation7 + $0x470] sm:$0xff]  ;;  %v1545_v57 = vld [vmem:[#allocation7 + $0x4a8] sm:$0xff] }
 0x400   :  { %6797 = vmatprep.subr.bf16.mxu1 %v6796_v27  ;;  %v6818_v27 = vpack.c.bf16 %v1442_v12, %v1436_v62  ;;  %v1556_v12 = vld [vmem:[#allocation7 + $0x500] sm:$0xff] }
 0x403   :  { %6799 = vmatpush1.bf16.msra.mxu1 %v6798_v44  ;;  %v6820_v44 = vpack.c.bf16 %v1455_v26, %v1449_v13  ;;  %v1562_v13 = vld [vmem:[#allocation7 + $0x530] sm:$0xff]  ;;  %v1569_v26 = vld [vmem:[#allocation7 + $0x568] sm:$0xff] }
 0x404   :  { %6801 = vmatprep.subr.bf16.mxu1 %v6800_v42  ;;  %v6826_v42 = vpack.c.bf16 %v1466_v29, %v1460_v22  ;;  %v1580_v29 = vld [vmem:[#allocation7 + $0x5c0] sm:$0xff] }
 0x407   :  { %6803 = vmatpush1.bf16.msra.mxu1 %v6802_v51  ;;  %v6828_v51 = vpack.c.bf16 %v1479_v41, %v1473_v37  ;;  %v1586_v37 = vld [vmem:[#allocation7 + $0x5f0] sm:$0xff] }
 0x408   :  { %v6866_v41 = vpack.c.bf16 %v1586_v37, %v1580_v29  ;;  %v2057_v29 = vld [vmem:[#allocation7 + $0x60] sm:$0xff]  ;;  %v2063_v37 = vld [vmem:[#allocation7 + $0x90] sm:$0xff] }
 0x47d   :  { %v1294_v52 = vpop.f32.mrb[8].mxu1 }
 0x47e   :  { %v1369_v3 = vadd.f32 %v1294_v52, %v8848_v5  ;;  %v1296_v8 = vpop.f32.mrb[9].mxu1  ;;  %v1491_v52 = vld [vmem:[#allocation7 + $0x2f8] sm:$0xff] }
 0x47f   :  { %v1376_v21 = vadd.f32 %v1296_v8, %v8860_v35  ;;  %v6832_v8 = vpack.c.bf16 %v1491_v52, %v1485_v49  ;;  %v1832_v49 = vld [vmem:[#allocation9 + $0x18] sm:$0xff] }
 0x480   :  { %v5600_v24 = vmul.f32 -1.442695, %v1369_v3  ;;  %v6830_v3 = vpack.c.bf16 %v1478_v54, %v1472_v20  ;;  %v1829_v54 = vld [vmem:[#allocation9] sm:$0xff] }
 0x481   :  { %v5601_v40 = vmul.f32 -1.442695, %v1376_v21  ;;  %v1484_v21 = vld [vmem:[#allocation7 + $0x2c0] sm:$0xff]  ;;  %v6870_v52 = vpack.c.bf16 %v1832_v49, %v1829_v54 }
 0x482   :  { %8273 = vpow2.f32 %v5600_v24  ;;  %v1490_v24 = vld [vmem:[#allocation7 + $0x2f0] sm:$0xff]  ;;  %v2069_v49 = vld [vmem:[#allocation7 + $0xc0] sm:$0xff] }
 0x483   :  { %8275 = vpow2.f32 %v5601_v40  ;;  %v1497_v40 = vld [vmem:[#allocation7 + $0x328] sm:$0xff] }
 0x48c   :  { %v8274_v50 = vpop.eup %8273 }
 0x48d   :  { %v1373_v55 = vadd.f32 1.0, %v8274_v50  ;;  %v8276_v2 = vpop.eup %8275  ;;  %v1503_v50 = vld [vmem:[#allocation7 + $0x358] sm:$0xff] }
 0x48e   :  { %v1380_v56 = vadd.f32 1.0, %v8276_v2  ;;  %v6836_v2 = vpack.c.bf16 %v1503_v50, %v1497_v40  ;;  %v1838_v40 = vld [vmem:[#allocation9 + $0x48] sm:$0xff] }
 0x48f   :  { %8277 = vrcp.f32 %v1373_v55  ;;  %v6834_v55 = vpack.c.bf16 %v1490_v24, %v1484_v21  ;;  %v1835_v24 = vld [vmem:[#allocation9 + $0x30] sm:$0xff] }
 0x490   :  { %8279 = vrcp.f32 %v1380_v56  ;;  %v1496_v56 = vld [vmem:[#allocation7 + $0x320] sm:$0xff]  ;;  %v6874_v50 = vpack.c.bf16 %v1838_v40, %v1835_v24 }
 0x491   :  { %v2081_v24 = vld [vmem:[#allocation7 + $0x120] sm:$0xff] }
 0x499   :  { %v8278_v9 = vpop.eup %8277 }
 0x49a   :  { %v1383_v23 = vmul.f32 %v8278_v9, %v8862_v36  ;;  %v8280_v5 = vpop.eup %8279  ;;  %v1412_v36 = vld [vmem:[#allocation7 + $0x80] sm:$0xff]  ;;  %v1502_v9 = vld [vmem:[#allocation7 + $0x350] sm:$0xff] }
 0x49b   :  { %v1386_v1 = vsub.f32 1.0, %v8280_v5  ;;  %v1388_v14 = vmul.f32 %v8280_v5, %v8826_v39  ;;  %v6810_v6 = vpack.c.bf16 %v1418_v43, %v1412_v36  ;;  %v1508_v5 = vld [vmem:[#allocation7 + $0x380] sm:$0xff] }
 0x49c   :  { %v1532_v43 = vld [vmem:[#allocation7 + $0x440] sm:$0xff] }
 0x49d   :  { %v1365_v30 = vpop.f32.mrb[10].mxu1 }
 0x49e   :  { %v1384_v59 = vadd.f32 %v1383_v23, %v1365_v30  ;;  %v5881_v60 = vpop.f32.mrb[11].mxu1  ;;  %v1509_v23 = vld [vmem:[#allocation7 + $0x388] sm:$0xff]  ;;  %v1515_v30 = vld [vmem:[#allocation7 + $0x3b8] sm:$0xff] }
 0x49f   :  { %v6840_v60 = vpack.c.bf16 %v1515_v30, %v1509_v23  ;;  %v1844_v23 = vld [vmem:[#allocation9 + $0x78] sm:$0xff] }
 0x4a0   :  { %8281 = vtanh.f32 %v1384_v59  ;;  %v6838_v59 = vpack.c.bf16 %v1502_v9, %v1496_v56  ;;  %v1841_v9 = vld [vmem:[#allocation9 + $0x60] sm:$0xff] }
 0x4a1   :  { %v6878_v30 = vpack.c.bf16 %v1844_v23, %v1841_v9 }
 0x4aa   :  { %v8282_v35 = vpop.eup %8281 }
 0x4ab   :  { %v1387_v11 = vmul.f32 %v8282_v35, %v1386_v1  ;;  %v1514_v1 = vld [vmem:[#allocation7 + $0x3b0] sm:$0xff]  ;;  %v1521_v35 = vld [vmem:[#allocation7 + $0x3e8] sm:$0xff] }
 0x4ac   :  { %v6842_v10 = vpack.c.bf16 %v1514_v1, %v1508_v5  ;;  %v1847_v1 = vld [vmem:[#allocation9 + $0x90] sm:$0xff] }
 0x4ad   :  { %v8872_v28 = vadd.f32 %v1388_v14, %v1387_v11  ;;  %v6844_v11 = vpack.c.bf16 %v1527_v4, %v1521_v35  ;;  %v1520_v14 = vld [vmem:[#allocation7 + $0x3e0] sm:$0xff]  ;;  %v1850_v35 = vld [vmem:[#allocation9 + $0xa8] sm:$0xff] }
 0x4ae   :  { %v6882_v4 = vpack.c.bf16 %v1850_v35, %v1847_v1 }
 0x4af   :  { %1652 = vmatprep.mubr.f32.mxu0 %v8872_v28  ;;  %1723 = vmatprep.mubr.f32.mxu1 %v8872_v28 }
 0x4b0   :  { %1653 = vmatmul.mubr.f32.vlgmr.msra.gmra.mrb[8].mxu0 %v8851_v61  ;;  %1724 = vmatmul.mubr.f32.vlgmr.msra.gmra.mrb[12].mxu1 %v8851_v61 }
 0x4b1   :  { %6807 = vmatpush1.bf16.msra.mxu0 %v6806_v33  ;;  %1794 = vmatprep.mubr.f32.mxu0 %v8872_v28  ;;  %v1539_v33 = vld [vmem:[#allocation7 + $0x478] sm:$0xff] }
 0x4b2   :  { %6809 = vmatprep.subr.bf16.mxu0 %v6808_v38  ;;  %1941 = vmatprep.mubr.f32.mxu1 %v8554_v0  ;;  %v6846_v38 = vpack.c.bf16 %v1526_v15, %v1520_v14  ;;  %v6848_v36 = vpack.c.bf16 %v1539_v33, %v1533_v16  ;;  %v1853_v15 = vld [vmem:[#allocation9 + $0xc0] sm:$0xff]  ;;  %v1856_v16 = vld [vmem:[#allocation9 + $0xd8] sm:$0xff] }
 0x4b3   :  { %v6886_v33 = vpack.c.bf16 %v1856_v16, %v1853_v15  ;;  %v1806_v16 = vld [vmem:[#allocation4 + $0x40] sm:$0xff] }
 0x4b5   :  { %6811 = vmatpush1.bf16.msra.mxu0 %v6810_v6  ;;  %v1551_v6 = vld [vmem:[#allocation7 + $0x4d8] sm:$0xff] }
 0x4b6   :  { %6813 = vmatprep.subr.bf16.mxu0 %v6812_v7  ;;  %v6850_v7 = vpack.c.bf16 %v1538_v48, %v1532_v43  ;;  %v6852_v18 = vpack.c.bf16 %v1551_v6, %v1545_v57  ;;  %v1859_v48 = vld [vmem:[#allocation9 + $0xf0] sm:$0xff]  ;;  %v1862_v57 = vld [vmem:[#allocation9 + $0x108] sm:$0xff] }
 0x4b7   :  { %v6890_v6 = vpack.c.bf16 %v1862_v57, %v1859_v48  ;;  %v1831_v48 = vld [vmem:[#allocation9 + $0x10] sm:$0xff]  ;;  %v1834_v57 = vld [vmem:[#allocation9 + $0x28] sm:$0xff] }
 0x4b9   :  { %6815 = vmatpush1.bf16.msra.mxu0 %v6814_v46  ;;  %v1563_v46 = vld [vmem:[#allocation7 + $0x538] sm:$0xff] }
 0x4ba   :  { %6817 = vmatprep.subr.bf16.mxu0 %v6816_v47  ;;  %v6854_v47 = vpack.c.bf16 %v1550_v31, %v1544_v19  ;;  %v6856_v62 = vpack.c.bf16 %v1563_v46, %v1557_v32  ;;  %v1865_v31 = vld [vmem:[#allocation9 + $0x120] sm:$0xff]  ;;  %v1868_v32 = vld [vmem:[#allocation9 + $0x138] sm:$0xff] }
 0x4bb   :  { %v6894_v46 = vpack.c.bf16 %v1868_v32, %v1865_v31  ;;  %v1837_v32 = vld [vmem:[#allocation9 + $0x40] sm:$0xff] }
 0x4bd   :  { %6819 = vmatpush1.bf16.msra.mxu0 %v6818_v27  ;;  %v1575_v27 = vld [vmem:[#allocation7 + $0x598] sm:$0xff] }
 0x4be   :  { %6821 = vmatprep.subr.bf16.mxu0 %v6820_v44  ;;  %v6858_v44 = vpack.c.bf16 %v1562_v13, %v1556_v12  ;;  %v6860_v25 = vpack.c.bf16 %v1575_v27, %v1569_v26  ;;  %v1871_v13 = vld [vmem:[#allocation9 + $0x150] sm:$0xff]  ;;  %v1874_v26 = vld [vmem:[#allocation9 + $0x168] sm:$0xff] }
 0x4bf   :  { %v6898_v27 = vpack.c.bf16 %v1874_v26, %v1871_v13  ;;  %v1852_v26 = vld [vmem:[#allocation9 + $0xb8] sm:$0xff] }
 0x4c1   :  { %6823 = vmatpush1.bf16.msra.mxu0 %v6822_v58  ;;  %v1587_v58 = vld [vmem:[#allocation7 + $0x5f8] sm:$0xff] }
 0x4c2   :  { %6825 = vmatprep.subr.bf16.mxu0 %v6824_v17  ;;  %v6862_v17 = vpack.c.bf16 %v1574_v53, %v1568_v45  ;;  %v6864_v22 = vpack.c.bf16 %v1587_v58, %v1581_v63  ;;  %v2045_v45 = vld [vmem:[#allocation7] sm:$0xff]  ;;  %v2051_v63 = vld [vmem:[#allocation7 + $0x30] sm:$0xff] }
 0x4c3   :  { %v6926_v58 = vpack.c.bf16 %v2051_v63, %v2045_v45  ;;  %v1864_v63 = vld [vmem:[#allocation9 + $0x118] sm:$0xff] }
 0x4c5   :  { %6827 = vmatpush1.bf16.msra.mxu0 %v6826_v42  ;;  %v1830_v42 = vld [vmem:[#allocation9 + $0x8] sm:$0xff] }
 0x4c6   :  { %6829 = vmatprep.subr.bf16.mxu0 %v6828_v51  ;;  %v1833_v51 = vld [vmem:[#allocation9 + $0x20] sm:$0xff] }
 0x4c7   :  { %v6868_v20 = vpack.c.bf16 %v1833_v51, %v1830_v42  ;;  %v6930_v42 = vpack.c.bf16 %v2063_v37, %v2057_v29  ;;  %v2070_v51 = vld [vmem:[#allocation7 + $0xc8] sm:$0xff]  ;;  %v1867_v29 = vld [vmem:[#allocation9 + $0x130] sm:$0xff] }
 0x4c8   :  { %v1870_v37 = vld [vmem:[#allocation9 + $0x148] sm:$0xff] }
 0x4c9   :  { %6831 = vmatpush1.bf16.msra.mxu0 %v6830_v3  ;;  %6869 = vmatprep.subr.bf16.mxu1 %v6868_v20  ;;  %v1836_v3 = vld [vmem:[#allocation9 + $0x38] sm:$0xff] }
 0x4ca   :  { %6833 = vmatprep.subr.bf16.mxu0 %v6832_v8  ;;  %6871 = vmatpush1.bf16.msra.mxu1 %v6870_v52  ;;  %v1839_v8 = vld [vmem:[#allocation9 + $0x50] sm:$0xff]  ;;  %v2076_v20 = vld [vmem:[#allocation7 + $0xf8] sm:$0xff] }
 0x4cb   :  { %v6872_v21 = vpack.c.bf16 %v1839_v8, %v1836_v3  ;;  %v6932_v54 = vpack.c.bf16 %v2076_v20, %v2070_v51  ;;  %v2075_v52 = vld [vmem:[#allocation7 + $0xf0] sm:$0xff]  ;;  %v2082_v8 = vld [vmem:[#allocation7 + $0x128] sm:$0xff]  ;;  %v1876_v51 = vld [vmem:[#allocation9 + $0x178] sm:$0xff] }
 0x4cc   :  { %v6934_v3 = vpack.c.bf16 %v2075_v52, %v2069_v49  ;;  %v2048_v20 = vld [vmem:[#allocation7 + $0x18] sm:$0xff] }
 0x4cd   :  { %6835 = vmatpush1.bf16.msra.mxu0 %v6834_v55  ;;  %6873 = vmatprep.subr.bf16.mxu1 %v6872_v21  ;;  %v1842_v55 = vld [vmem:[#allocation9 + $0x68] sm:$0xff]  ;;  %v2088_v21 = vld [vmem:[#allocation7 + $0x158] sm:$0xff] }
 0x4ce   :  { %6837 = vmatprep.subr.bf16.mxu0 %v6836_v2  ;;  %6875 = vmatpush1.bf16.msra.mxu1 %v6874_v50  ;;  %v1845_v2 = vld [vmem:[#allocation9 + $0x80] sm:$0xff]  ;;  %v6936_v40 = vpack.c.bf16 %v2088_v21, %v2082_v8  ;;  %v2087_v50 = vld [vmem:[#allocation7 + $0x150] sm:$0xff]  ;;  %v2060_v21 = vld [vmem:[#allocation7 + $0x78] sm:$0xff] }
 0x4cf   :  { %v6876_v56 = vpack.c.bf16 %v1845_v2, %v1842_v55  ;;  %v6938_v55 = vpack.c.bf16 %v2087_v50, %v2081_v24  ;;  %v1804_v2 = vld [vmem:[#allocation4 + $0x30] sm:$0xff]  ;;  %v2053_v8 = vld [vmem:[#allocation7 + $0x40] sm:$0xff]  ;;  %v2066_v24 = vld [vmem:[#allocation7 + $0xa8] sm:$0xff] }
 0x4d0   :  { %v6992_v50 = vpack.c.bf16 %v2066_v24, %v2060_v21  ;;  %v2136_v21 = vld [vmem:[#allocation7 + $0x2d8] sm:$0xff] }
 0x4d1   :  { %6839 = vmatpush1.bf16.msra.mxu0 %v6838_v59  ;;  %6877 = vmatprep.subr.bf16.mxu1 %v6876_v56  ;;  %v1848_v59 = vld [vmem:[#allocation9 + $0x98] sm:$0xff] }
 0x4d2   :  { %6841 = vmatprep.subr.bf16.mxu0 %v6840_v60  ;;  %6879 = vmatpush1.bf16.msra.mxu1 %v6878_v30  ;;  %v1851_v60 = vld [vmem:[#allocation9 + $0xb0] sm:$0xff] }
 0x4d3   :  { %v6880_v5 = vpack.c.bf16 %v1851_v60, %v1848_v59  ;;  %v1805_v59 = vld [vmem:[#allocation4 + $0x38] sm:$0xff] }
 0x4d5   :  { %6843 = vmatpush1.bf16.msra.mxu0 %v6842_v10  ;;  %6881 = vmatprep.subr.bf16.mxu1 %v6880_v5  ;;  %v1854_v10 = vld [vmem:[#allocation9 + $0xc8] sm:$0xff] }
 0x4d6   :  { %6845 = vmatprep.subr.bf16.mxu0 %v6844_v11  ;;  %6883 = vmatpush1.bf16.msra.mxu1 %v6882_v4  ;;  %v1857_v11 = vld [vmem:[#allocation9 + $0xe0] sm:$0xff] }
 0x4d7   :  { %v6884_v14 = vpack.c.bf16 %v1857_v11, %v1854_v10 }
 0x4d9   :  { %6847 = vmatpush1.bf16.msra.mxu0 %v6846_v38  ;;  %6885 = vmatprep.subr.bf16.mxu1 %v6884_v14  ;;  %v1860_v38 = vld [vmem:[#allocation9 + $0xf8] sm:$0xff] }
 0x4da   :  { %6849 = vmatprep.subr.bf16.mxu0 %v6848_v36  ;;  %6887 = vmatpush1.bf16.msra.mxu1 %v6886_v33  ;;  %v1863_v36 = vld [vmem:[#allocation9 + $0x110] sm:$0xff] }
 0x4db   :  { %v6888_v43 = vpack.c.bf16 %v1863_v36, %v1860_v38 }
 0x4dd   :  { %6851 = vmatpush1.bf16.msra.mxu0 %v6850_v7  ;;  %6889 = vmatprep.subr.bf16.mxu1 %v6888_v43  ;;  %v1866_v7 = vld [vmem:[#allocation9 + $0x128] sm:$0xff] }
 0x4de   :  { %6853 = vmatprep.subr.bf16.mxu0 %v6852_v18  ;;  %6891 = vmatpush1.bf16.msra.mxu1 %v6890_v6  ;;  %v1869_v18 = vld [vmem:[#allocation9 + $0x140] sm:$0xff] }
 0x4df   :  { %v6892_v19 = vpack.c.bf16 %v1869_v18, %v1866_v7 }
 0x4e1   :  { %6855 = vmatpush1.bf16.msra.mxu0 %v6854_v47  ;;  %6893 = vmatprep.subr.bf16.mxu1 %v6892_v19  ;;  %v1872_v47 = vld [vmem:[#allocation9 + $0x158] sm:$0xff]  ;;  %v6901_v19 = vpack.c.bf16 %v1834_v57, %v1831_v48 }
 0x4e2   :  { %6857 = vmatprep.subr.bf16.mxu0 %v6856_v62  ;;  %6895 = vmatpush1.bf16.msra.mxu1 %v6894_v46  ;;  %v1875_v62 = vld [vmem:[#allocation9 + $0x170] sm:$0xff]  ;;  %v1840_v46 = vld [vmem:[#allocation9 + $0x58] sm:$0xff] }
 0x4e3   :  { %v6896_v12 = vpack.c.bf16 %v1875_v62, %v1872_v47  ;;  %v6904_v47 = vpack.c.bf16 %v1840_v46, %v1837_v32  ;;  %v1843_v62 = vld [vmem:[#allocation9 + $0x70] sm:$0xff]  ;;  %v2096_v48 = vld [vmem:[#allocation7 + $0x198] sm:$0xff]  ;;  %v2106_v46 = vld [vmem:[#allocation7 + $0x1e8] sm:$0xff] }
 0x4e5   :  { %6859 = vmatpush1.bf16.msra.mxu0 %v6858_v44  ;;  %6897 = vmatprep.subr.bf16.mxu1 %v6896_v12  ;;  %v2046_v44 = vld [vmem:[#allocation7 + $0x8] sm:$0xff] }
 0x4e6   :  { %6861 = vmatprep.subr.bf16.mxu0 %v6860_v25  ;;  %6899 = vmatpush1.bf16.msra.mxu1 %v6898_v27  ;;  %v2052_v25 = vld [vmem:[#allocation7 + $0x38] sm:$0xff]  ;;  %v1846_v12 = vld [vmem:[#allocation9 + $0x88] sm:$0xff] }
 0x4e7   :  { %6900 = vmatprep.subr.bf16.mxu1 %v8555_v34  ;;  %v6924_v53 = vpack.c.bf16 %v2052_v25, %v2046_v44  ;;  %v6907_v13 = vpack.c.bf16 %v1846_v12, %v1843_v62  ;;  %v1855_v44 = vld [vmem:[#allocation9 + $0xd0] sm:$0xff]  ;;  %v1858_v25 = vld [vmem:[#allocation9 + $0xe8] sm:$0xff]  ;;  %v2105_v12 = vld [vmem:[#allocation7 + $0x1e0] sm:$0xff] }
 0x4e8   :  { %v6913_v45 = vpack.c.bf16 %v1858_v25, %v1855_v44  ;;  %v2107_v44 = vld [vmem:[#allocation7 + $0x1f0] sm:$0xff]  ;;  %v2113_v25 = vld [vmem:[#allocation7 + $0x220] sm:$0xff] }
 0x4e9   :  { %6863 = vmatpush1.bf16.msra.mxu0 %v6862_v17  ;;  %v2058_v17 = vld [vmem:[#allocation7 + $0x68] sm:$0xff] }
 0x4ea   :  { %6865 = vmatprep.subr.bf16.mxu0 %v6864_v22  ;;  %v2064_v22 = vld [vmem:[#allocation7 + $0x98] sm:$0xff] }
 0x4ed   :  { %6867 = vmatpush1.bf16.msra.mxu0 %v6866_v41  ;;  %v6928_v41 = vpack.c.bf16 %v2064_v22, %v2058_v17 }
 0x4ee   :  { %6925 = vmatprep.subr.bf16.mxu0 %v6924_v53  ;;  %v1861_v53 = vld [vmem:[#allocation9 + $0x100] sm:$0xff] }
 0x4ef   :  { %v6916_v22 = vpack.c.bf16 %v1864_v63, %v1861_v53  ;;  %v7010_v53 = vpack.c.bf16 %v2113_v25, %v2107_v44  ;;  %v2118_v63 = vld [vmem:[#allocation7 + $0x248] sm:$0xff] }
 0x4f0   :  { %1795 = vmatmul.mubr.f32.vlgmr.msra.gmra.mrb[10].mxu0 %v8851_v61 }
 0x4f1   :  { %6927 = vmatpush1.bf16.msra.mxu0 %v6926_v58 }
 0x4f2   :  { %6929 = vmatprep.subr.bf16.mxu0 %v6928_v41  ;;  %v6919_v41 = vpack.c.bf16 %v1870_v37, %v1867_v29  ;;  %v2117_v37 = vld [vmem:[#allocation7 + $0x240] sm:$0xff] }
 0x4f5   :  { %6931 = vmatpush1.bf16.msra.mxu0 %v6930_v42  ;;  %v1873_v42 = vld [vmem:[#allocation9 + $0x160] sm:$0xff] }
 0x4f6   :  { %6933 = vmatprep.subr.bf16.mxu0 %v6932_v54  ;;  %v2054_v54 = vld [vmem:[#allocation7 + $0x48] sm:$0xff]  ;;  %v6922_v49 = vpack.c.bf16 %v1876_v51, %v1873_v42  ;;  %v2120_v42 = vld [vmem:[#allocation7 + $0x258] sm:$0xff] }
 0x4f7   :  { %v6988_v52 = vpack.c.bf16 %v2054_v54, %v2048_v20  ;;  %v2126_v20 = vld [vmem:[#allocation7 + $0x288] sm:$0xff]  ;;  %v2119_v54 = vld [vmem:[#allocation7 + $0x250] sm:$0xff] }
 0x4f9   :  { %6935 = vmatpush1.bf16.msra.mxu0 %v6934_v3  ;;  %v2047_v3 = vld [vmem:[#allocation7 + $0x10] sm:$0xff] }
 0x4fa   :  { %6937 = vmatprep.subr.bf16.mxu0 %v6936_v40  ;;  %v6990_v40 = vpack.c.bf16 %v2053_v8, %v2047_v3  ;;  %v2130_v8 = vld [vmem:[#allocation7 + $0x2a8] sm:$0xff] }
 0x4fb   :  { %v6952_v24 = vpack.c.bf16 %v2136_v21, %v2130_v8  ;;  %v2179_v21 = vld [vmem:[#allocation7 + $0x430] sm:$0xff] }
 0x4fd   :  { %6939 = vmatpush1.bf16.msra.mxu0 %v6938_v55  ;;  %v2059_v55 = vld [vmem:[#allocation7 + $0x70] sm:$0xff] }
 0x583   :  { %v1654_v56 = vpop.f32.mrb[8].mxu0  ;;  %v1725_v9 = vpop.f32.mrb[12].mxu1 }
 0x584   :  { %v1808_v23 = vadd.f32 %v1804_v2, %v1654_v56  ;;  %v1656_v30 = vpop.f32.mrb[9].mxu0  ;;  %v8882_v60 = vpop.f32.mrb[13].mxu1  ;;  %v2065_v2 = vld [vmem:[#allocation7 + $0xa0] sm:$0xff]  ;;  %v2072_v56 = vld [vmem:[#allocation7 + $0xd8] sm:$0xff] }
 0x585   :  { %v1815_v1 = vadd.f32 %v1805_v59, %v1656_v30  ;;  %v2071_v59 = vld [vmem:[#allocation7 + $0xd0] sm:$0xff] }
 0x586   :  { %v5602_v5 = vmul.f32 -1.442695, %v1808_v23  ;;  %v6994_v23 = vpack.c.bf16 %v2065_v2, %v2059_v55  ;;  %v2132_v55 = vld [vmem:[#allocation7 + $0x2b8] sm:$0xff] }
 0x587   :  { %v5603_v35 = vmul.f32 -1.442695, %v1815_v1  ;;  %v2084_v1 = vld [vmem:[#allocation7 + $0x138] sm:$0xff] }
 0x588   :  { %8283 = vpow2.f32 %v5602_v5  ;;  %v2077_v5 = vld [vmem:[#allocation7 + $0x100] sm:$0xff] }
 0x589   :  { %8285 = vpow2.f32 %v5603_v35  ;;  %v2090_v35 = vld [vmem:[#allocation7 + $0x168] sm:$0xff] }
 0x592   :  { %v8284_v4 = vpop.eup %8283 }
 0x593   :  { %v1812_v10 = vadd.f32 1.0, %v8284_v4  ;;  %v8286_v11 = vpop.eup %8285  ;;  %v6998_v4 = vpack.c.bf16 %v2077_v5, %v2071_v59  ;;  %v2142_v5 = vld [vmem:[#allocation7 + $0x308] sm:$0xff] }
 0x594   :  { %v1819_v14 = vadd.f32 1.0, %v8286_v11  ;;  %v2083_v11 = vld [vmem:[#allocation7 + $0x130] sm:$0xff] }
 0x595   :  { %8287 = vrcp.f32 %v1812_v10  ;;  %v7000_v10 = vpack.c.bf16 %v2090_v35, %v2084_v1  ;;  %v2148_v1 = vld [vmem:[#allocation7 + $0x338] sm:$0xff] }
 0x596   :  { %8289 = vrcp.f32 %v1819_v14  ;;  %v2089_v14 = vld [vmem:[#allocation7 + $0x160] sm:$0xff]  ;;  %v6956_v35 = vpack.c.bf16 %v2148_v1, %v2142_v5  ;;  %v2191_v5 = vld [vmem:[#allocation7 + $0x490] sm:$0xff] }
 0x597   :  { %v2197_v1 = vld [vmem:[#allocation7 + $0x4c0] sm:$0xff] }
 0x59f   :  { %v8288_v15 = vpop.eup %8287 }
 0x5a0   :  { %v1822_v33 = vmul.f32 %v8288_v15, %v1725_v9  ;;  %v8290_v36 = vpop.eup %8289  ;;  %v2078_v9 = vld [vmem:[#allocation7 + $0x108] sm:$0xff]  ;;  %v7002_v15 = vpack.c.bf16 %v2089_v14, %v2083_v11  ;;  %v2144_v11 = vld [vmem:[#allocation7 + $0x318] sm:$0xff] }
 0x5a1   :  { %v1825_v43 = vsub.f32 1.0, %v8290_v36  ;;  %v1827_v18 = vmul.f32 %v8290_v36, %v8851_v61  ;;  %v1849_v61 = vld [vmem:[#allocation9 + $0xa0] sm:$0xff]  ;;  %v6996_v30 = vpack.c.bf16 %v2078_v9, %v2072_v56  ;;  %v2138_v56 = vld [vmem:[#allocation7 + $0x2e8] sm:$0xff]  ;;  %v2131_v9 = vld [vmem:[#allocation7 + $0x2b0] sm:$0xff] }
 0x5a2   :  { %v1823_v38 = vadd.f32 %v1822_v33, %v1806_v16  ;;  %v6910_v27 = vpack.c.bf16 %v1852_v26, %v1849_v61  ;;  %v2094_v16 = vld [vmem:[#allocation7 + $0x188] sm:$0xff]  ;;  %v2100_v33 = vld [vmem:[#allocation7 + $0x1b8] sm:$0xff]  ;;  %v2093_v36 = vld [vmem:[#allocation7 + $0x180] sm:$0xff] }
 0x5a3   :  { %v2108_v61 = vld [vmem:[#allocation7 + $0x1f8] sm:$0xff] }
 0x5a4   :  { %8291 = vtanh.f32 %v1823_v38  ;;  %v6940_v38 = vpack.c.bf16 %v2100_v33, %v2094_v16  ;;  %v2143_v16 = vld [vmem:[#allocation7 + $0x310] sm:$0xff]  ;;  %v2149_v33 = vld [vmem:[#allocation7 + $0x340] sm:$0xff] }
 0x5a6   :  { %6941 = vmatprep.subr.bf16.mxu0 %v6940_v38 }
 0x5ae   :  { %v8292_v6 = vpop.eup %8291 }
 0x5af   :  { %v1826_v7 = vmul.f32 %v8292_v6, %v1825_v43  ;;  %v2099_v43 = vld [vmem:[#allocation7 + $0x1b0] sm:$0xff]  ;;  %v2102_v6 = vld [vmem:[#allocation7 + $0x1c8] sm:$0xff] }
 0x5b0   :  { %v6942_v57 = vpack.c.bf16 %v2099_v43, %v2093_v36  ;;  %v7022_v36 = vpack.c.bf16 %v2149_v33, %v2143_v16  ;;  %v2154_v43 = vld [vmem:[#allocation7 + $0x368] sm:$0xff]  ;;  %v2207_v16 = vld [vmem:[#allocation7 + $0x510] sm:$0xff]  ;;  %v2204_v33 = vld [vmem:[#allocation7 + $0x4f8] sm:$0xff] }
 0x5b1   :  { %v8885_v31 = vadd.f32 %v1827_v18, %v1826_v7  ;;  %v2095_v7 = vld [vmem:[#allocation7 + $0x190] sm:$0xff]  ;;  %v2101_v18 = vld [vmem:[#allocation7 + $0x1c0] sm:$0xff] }
 0x5b2   :  { %v7006_v32 = vpack.c.bf16 %v2101_v18, %v2095_v7  ;;  %6943 = vmatpush1.bf16.msra.mxu0 %v6942_v57  ;;  %v2153_v57 = vld [vmem:[#allocation7 + $0x360] sm:$0xff]  ;;  %v2159_v7 = vld [vmem:[#allocation7 + $0x390] sm:$0xff]  ;;  %v2156_v18 = vld [vmem:[#allocation7 + $0x378] sm:$0xff] }
 0x5b3   :  { %1942 = vmatmul.mubr.f32.vlgmr.msra.gmra.mrb[14].mxu1 %v8885_v31 }
 0x5b4   :  { %6902 = vmatpush3.bf16.msra.mxu1 %v6901_v19  ;;  %5914 = vmatprep.mubr.msk.f32.mxu1 %vm8556_vm0, %v8554_v0  ;;  %v7004_v19 = vpack.c.bf16 %v2102_v6, %v2096_v48  ;;  %v2160_v48 = vld [vmem:[#allocation7 + $0x398] sm:$0xff] }
 0x5b5   :  { %6903 = vmatprep.subr.bf16.mxu1 %v8555_v34  ;;  %v6960_v6 = vpack.c.bf16 %v2160_v48, %v2154_v43  ;;  %v2203_v43 = vld [vmem:[#allocation7 + $0x4f0] sm:$0xff]  ;;  %v2209_v48 = vld [vmem:[#allocation7 + $0x520] sm:$0xff] }
 0x5b8   :  { %6905 = vmatpush3.bf16.msra.mxu1 %v6904_v47  ;;  %v2112_v47 = vld [vmem:[#allocation7 + $0x218] sm:$0xff] }
 0x5b9   :  { %6906 = vmatprep.subr.bf16.mxu1 %v8555_v34  ;;  %v6944_v62 = vpack.c.bf16 %v2112_v47, %v2106_v46  ;;  %v2155_v47 = vld [vmem:[#allocation7 + $0x370] sm:$0xff] }
 0x5bb   :  { %6945 = vmatprep.subr.bf16.mxu0 %v6944_v62  ;;  %v2161_v62 = vld [vmem:[#allocation7 + $0x3a0] sm:$0xff] }
 0x5bc   :  { %6908 = vmatpush3.bf16.msra.mxu1 %v6907_v13  ;;  %v2111_v13 = vld [vmem:[#allocation7 + $0x210] sm:$0xff] }
 0x5bd   :  { %6909 = vmatprep.subr.bf16.mxu1 %v8555_v34  ;;  %v6946_v26 = vpack.c.bf16 %v2111_v13, %v2105_v12  ;;  %v2166_v12 = vld [vmem:[#allocation7 + $0x3c8] sm:$0xff]  ;;  %v7026_v13 = vpack.c.bf16 %v2161_v62, %v2155_v47  ;;  %v2216_v47 = vld [vmem:[#allocation7 + $0x558] sm:$0xff] }
 0x5bf   :  { %6947 = vmatpush1.bf16.msra.mxu0 %v6946_v26  ;;  %v2165_v26 = vld [vmem:[#allocation7 + $0x3c0] sm:$0xff] }
 0x5c0   :  { %6911 = vmatpush3.bf16.msra.mxu1 %v6910_v27  ;;  %v2114_v27 = vld [vmem:[#allocation7 + $0x228] sm:$0xff] }
 0x5c1   :  { %6912 = vmatprep.subr.bf16.mxu1 %v8555_v34 }
 0x5c3   :  { %v8894_v58 = vpop.f32.mrb[10].mxu0 }
 0x5c4   :  { %v8896_v17 = vpop.f32.mrb[11].mxu0  ;;  %6914 = vmatpush3.bf16.msra.mxu1 %v6913_v45  ;;  %v7008_v45 = vpack.c.bf16 %v2114_v27, %v2108_v61  ;;  %v2172_v61 = vld [vmem:[#allocation7 + $0x3f8] sm:$0xff]  ;;  %v2171_v27 = vld [vmem:[#allocation7 + $0x3f0] sm:$0xff] }
 0x5c5   :  { %6915 = vmatprep.subr.bf16.mxu1 %v8555_v34  ;;  %v6964_v44 = vpack.c.bf16 %v2172_v61, %v2166_v12  ;;  %v6966_v25 = vpack.c.bf16 %v2171_v27, %v2165_v26  ;;  %v2222_v12 = vld [vmem:[#allocation7 + $0x588] sm:$0xff]  ;;  %v2221_v61 = vld [vmem:[#allocation7 + $0x580] sm:$0xff] }
 0x5c6   :  { %v7044_v26 = vpack.c.bf16 %v2222_v12, %v2216_v47  ;;  %v2085_v12 = vld [vmem:[#allocation7 + $0x140] sm:$0xff] }
 0x5c8   :  { %6917 = vmatpush3.bf16.msra.mxu1 %v6916_v22  ;;  %v2124_v22 = vld [vmem:[#allocation7 + $0x278] sm:$0xff] }
 0x5c9   :  { %6918 = vmatprep.subr.bf16.mxu1 %v8555_v34  ;;  %v6948_v29 = vpack.c.bf16 %v2124_v22, %v2118_v63  ;;  %v2167_v63 = vld [vmem:[#allocation7 + $0x3d0] sm:$0xff] }
 0x5cb   :  { %6949 = vmatprep.subr.bf16.mxu0 %v6948_v29  ;;  %v2173_v29 = vld [vmem:[#allocation7 + $0x400] sm:$0xff] }
 0x5cc   :  { %6920 = vmatpush3.bf16.msra.mxu1 %v6919_v41  ;;  %v2123_v41 = vld [vmem:[#allocation7 + $0x270] sm:$0xff] }
 0x5cd   :  { %6921 = vmatprep.subr.bf16.mxu1 %v8555_v34  ;;  %v6950_v51 = vpack.c.bf16 %v2123_v41, %v2117_v37  ;;  %v2178_v37 = vld [vmem:[#allocation7 + $0x428] sm:$0xff]  ;;  %v2184_v41 = vld [vmem:[#allocation7 + $0x458] sm:$0xff] }
 0x5cf   :  { %6951 = vmatpush1.bf16.msra.mxu0 %v6950_v51  ;;  %v6968_v51 = vpack.c.bf16 %v2184_v41, %v2178_v37  ;;  %v2234_v37 = vld [vmem:[#allocation7 + $0x5e8] sm:$0xff]  ;;  %v2227_v41 = vld [vmem:[#allocation7 + $0x5b0] sm:$0xff] }
 0x5d0   :  { %6923 = vmatpush3.bf16.msra.mxu1 %v6922_v49  ;;  %v2125_v49 = vld [vmem:[#allocation7 + $0x280] sm:$0xff]  ;;  %6953 = vmatprep.subr.bf16.mxu0 %v6952_v24 }
 0x5d1   :  { %6989 = vmatprep.subr.bf16.mxu1 %v6988_v52  ;;  %v7012_v52 = vpack.c.bf16 %v2126_v20, %v2120_v42  ;;  %v7014_v3 = vpack.c.bf16 %v2125_v49, %v2119_v54  ;;  %v7030_v42 = vpack.c.bf16 %v2173_v29, %v2167_v63  ;;  %v2177_v20 = vld [vmem:[#allocation7 + $0x420] sm:$0xff]  ;;  %v2183_v54 = vld [vmem:[#allocation7 + $0x450] sm:$0xff]  ;;  %v2180_v49 = vld [vmem:[#allocation7 + $0x438] sm:$0xff] }
 0x5d2   :  { %v2185_v24 = vld [vmem:[#allocation7 + $0x460] sm:$0xff]  ;;  %v2231_v63 = vld [vmem:[#allocation7 + $0x5d0] sm:$0xff] }
 0x5d3   :  { %5915 = vmatmul.mubr.f32.vlgmr.msra.gmra.mrb[16].mxu1 %v8885_v31 }
 0x5d4   :  { %6991 = vmatpush1.bf16.msra.mxu1 %v6990_v40  ;;  %v2129_v40 = vld [vmem:[#allocation7 + $0x2a0] sm:$0xff] }
 0x5d5   :  { %6993 = vmatprep.subr.bf16.mxu1 %v6992_v50  ;;  %v2135_v50 = vld [vmem:[#allocation7 + $0x2d0] sm:$0xff] }
 0x5d6   :  { %v6954_v2 = vpack.c.bf16 %v2135_v50, %v2129_v40  ;;  %v7034_v40 = vpack.c.bf16 %v2185_v24, %v2179_v21  ;;  %v2190_v50 = vld [vmem:[#allocation7 + $0x488] sm:$0xff] }
 0x5d8   :  { %6995 = vmatpush1.bf16.msra.mxu1 %v6994_v23  ;;  %v2137_v23 = vld [vmem:[#allocation7 + $0x2e0] sm:$0xff]  ;;  %6955 = vmatpush1.bf16.msra.mxu0 %v6954_v2 }
 0x5d9   :  { %6997 = vmatprep.subr.bf16.mxu1 %v6996_v30  ;;  %v7016_v30 = vpack.c.bf16 %v2138_v56, %v2132_v55  ;;  %v7018_v59 = vpack.c.bf16 %v2137_v23, %v2131_v9  ;;  %6957 = vmatprep.subr.bf16.mxu0 %v6956_v35  ;;  %v2196_v55 = vld [vmem:[#allocation7 + $0x4b8] sm:$0xff]  ;;  %v2189_v56 = vld [vmem:[#allocation7 + $0x480] sm:$0xff]  ;;  %v2195_v9 = vld [vmem:[#allocation7 + $0x4b0] sm:$0xff] }
 0x5da   :  { %v6972_v2 = vpack.c.bf16 %v2196_v55, %v2190_v50  ;;  %v2192_v23 = vld [vmem:[#allocation7 + $0x498] sm:$0xff] }
 0x5dc   :  { %6999 = vmatpush1.bf16.msra.mxu1 %v6998_v4  ;;  %v2141_v4 = vld [vmem:[#allocation7 + $0x300] sm:$0xff] }
 0x5dd   :  { %7001 = vmatprep.subr.bf16.mxu1 %v7000_v10  ;;  %v2147_v10 = vld [vmem:[#allocation7 + $0x330] sm:$0xff] }
 0x5de   :  { %v6958_v14 = vpack.c.bf16 %v2147_v10, %v2141_v4  ;;  %v7038_v4 = vpack.c.bf16 %v2197_v1, %v2191_v5  ;;  %v2202_v10 = vld [vmem:[#allocation7 + $0x4e8] sm:$0xff] }
 0x5e0   :  { %7003 = vmatpush1.bf16.msra.mxu1 %v7002_v15  ;;  %v2150_v15 = vld [vmem:[#allocation7 + $0x348] sm:$0xff]  ;;  %6959 = vmatpush1.bf16.msra.mxu0 %v6958_v14 }
 0x5e1   :  { %7005 = vmatprep.subr.bf16.mxu1 %v7004_v19  ;;  %v7020_v38 = vpack.c.bf16 %v2150_v15, %v2144_v11  ;;  %v2162_v19 = vld [vmem:[#allocation7 + $0x3a8] sm:$0xff]  ;;  %6961 = vmatprep.subr.bf16.mxu0 %v6960_v6  ;;  %v2208_v11 = vld [vmem:[#allocation7 + $0x518] sm:$0xff]  ;;  %v2201_v15 = vld [vmem:[#allocation7 + $0x4e0] sm:$0xff]  ;;  %v7042_v6 = vpack.c.bf16 %v2209_v48, %v2203_v43 }
 0x5e2   :  { %v7024_v46 = vpack.c.bf16 %v2162_v19, %v2156_v18  ;;  %v6976_v14 = vpack.c.bf16 %v2208_v11, %v2202_v10  ;;  %v2220_v18 = vld [vmem:[#allocation7 + $0x578] sm:$0xff]  ;;  %v2055_v10 = vld [vmem:[#allocation7 + $0x50] sm:$0xff]  ;;  %v2074_v48 = vld [vmem:[#allocation7 + $0xe8] sm:$0xff] }
 0x5e3   :  { %v2067_v43 = vld [vmem:[#allocation7 + $0xb0] sm:$0xff] }
 0x5e4   :  { %7007 = vmatpush1.bf16.msra.mxu1 %v7006_v32  ;;  %v6962_v32 = vpack.c.bf16 %v2159_v7, %v2153_v57  ;;  %v2214_v7 = vld [vmem:[#allocation7 + $0x548] sm:$0xff] }
 0x5e5   :  { %7009 = vmatprep.subr.bf16.mxu1 %v7008_v45  ;;  %v2168_v45 = vld [vmem:[#allocation7 + $0x3d8] sm:$0xff]  ;;  %v6980_v19 = vpack.c.bf16 %v2220_v18, %v2214_v7  ;;  %v2073_v18 = vld [vmem:[#allocation7 + $0xe0] sm:$0xff] }
 0x5e6   :  { %6963 = vmatpush1.bf16.msra.mxu0 %v6962_v32  ;;  %v2213_v32 = vld [vmem:[#allocation7 + $0x540] sm:$0xff] }
 0x5e7   :  { %6965 = vmatprep.subr.bf16.mxu0 %v6964_v44  ;;  %v2226_v44 = vld [vmem:[#allocation7 + $0x5a8] sm:$0xff] }
 0x5e8   :  { %7011 = vmatpush1.bf16.msra.mxu1 %v7010_v53  ;;  %v2174_v53 = vld [vmem:[#allocation7 + $0x408] sm:$0xff] }
 0x5e9   :  { %7013 = vmatprep.subr.bf16.mxu1 %v7012_v52  ;;  %v7028_v22 = vpack.c.bf16 %v2174_v53, %v2168_v45  ;;  %v2186_v52 = vld [vmem:[#allocation7 + $0x468] sm:$0xff]  ;;  %v2225_v53 = vld [vmem:[#allocation7 + $0x5a0] sm:$0xff] }
 0x5ea   :  { %6967 = vmatpush1.bf16.msra.mxu0 %v6966_v25  ;;  %v7032_v8 = vpack.c.bf16 %v2186_v52, %v2180_v49  ;;  %v2232_v25 = vld [vmem:[#allocation7 + $0x5d8] sm:$0xff]  ;;  %v6986_v29 = vpack.c.bf16 %v2231_v63, %v2225_v53  ;;  %v2110_v53 = vld [vmem:[#allocation7 + $0x208] sm:$0xff] }
 0x5eb   :  { %6969 = vmatprep.subr.bf16.mxu0 %v6968_v51  ;;  %v6984_v45 = vpack.c.bf16 %v2232_v25, %v2226_v44  ;;  %v2056_v49 = vld [vmem:[#allocation7 + $0x58] sm:$0xff]  ;;  %v2097_v25 = vld [vmem:[#allocation7 + $0x1a0] sm:$0xff] }
 0x5ec   :  { %7015 = vmatpush1.bf16.msra.mxu1 %v7014_v3  ;;  %v6970_v3 = vpack.c.bf16 %v2183_v54, %v2177_v20  ;;  %v2050_v54 = vld [vmem:[#allocation7 + $0x28] sm:$0xff]  ;;  %v2116_v63 = vld [vmem:[#allocation7 + $0x238] sm:$0xff] }
 0x5ed   :  { %7017 = vmatprep.subr.bf16.mxu1 %v7016_v30  ;;  %v6974_v30 = vpack.c.bf16 %v2195_v9, %v2189_v56  ;;  %v7052_v52 = vpack.c.bf16 %v2056_v49, %v2050_v54  ;;  %v2121_v49 = vld [vmem:[#allocation7 + $0x260] sm:$0xff] }
 0x5ee   :  { %6971 = vmatpush1.bf16.msra.mxu0 %v6970_v3 }
 0x5ef   :  { %6973 = vmatprep.subr.bf16.mxu0 %v6972_v2 }
 0x5f0   :  { %7019 = vmatpush1.bf16.msra.mxu1 %v7018_v59  ;;  %v2198_v59 = vld [vmem:[#allocation7 + $0x4c8] sm:$0xff] }
 0x5f1   :  { %7021 = vmatprep.subr.bf16.mxu1 %v7020_v38  ;;  %v7036_v35 = vpack.c.bf16 %v2198_v59, %v2192_v23  ;;  %v6978_v38 = vpack.c.bf16 %v2207_v16, %v2201_v15  ;;  %v2062_v15 = vld [vmem:[#allocation7 + $0x88] sm:$0xff]  ;;  %v2068_v16 = vld [vmem:[#allocation7 + $0xb8] sm:$0xff] }
 0x5f2   :  { %6975 = vmatpush1.bf16.msra.mxu0 %v6974_v30 }
 0x5f3   :  { %6977 = vmatprep.subr.bf16.mxu0 %v6976_v14 }
 0x5f4   :  { %7023 = vmatpush1.bf16.msra.mxu1 %v7022_v36  ;;  %v2210_v36 = vld [vmem:[#allocation7 + $0x528] sm:$0xff] }
 0x5f5   :  { %7025 = vmatprep.subr.bf16.mxu1 %v7024_v46  ;;  %v7040_v57 = vpack.c.bf16 %v2210_v36, %v2204_v33  ;;  %v2219_v46 = vld [vmem:[#allocation7 + $0x570] sm:$0xff]  ;;  %v7056_v36 = vpack.c.bf16 %v2068_v16, %v2062_v15  ;;  %v2169_v15 = vld [vmem:[#allocation7 + $0x3e0] sm:$0xff] }
 0x5f6   :  { %6979 = vmatpush1.bf16.msra.mxu0 %v6978_v38  ;;  %v6982_v62 = vpack.c.bf16 %v2219_v46, %v2213_v32  ;;  %v2086_v32 = vld [vmem:[#allocation7 + $0x148] sm:$0xff]  ;;  %v2092_v46 = vld [vmem:[#allocation7 + $0x178] sm:$0xff]  ;;  %v2175_v16 = vld [vmem:[#allocation7 + $0x410] sm:$0xff] }
 0x5f7   :  { %6981 = vmatprep.subr.bf16.mxu0 %v6980_v19  ;;  %v2079_v19 = vld [vmem:[#allocation7 + $0x110] sm:$0xff] }
 0x5f8   :  { %7027 = vmatpush1.bf16.msra.mxu1 %v7026_v13  ;;  %v2215_v13 = vld [vmem:[#allocation7 + $0x550] sm:$0xff]  ;;  %v7062_v47 = vpack.c.bf16 %v2079_v19, %v2073_v18 }
 0x5f9   :  { %7029 = vmatprep.subr.bf16.mxu1 %v7028_v22  ;;  %v7046_v27 = vpack.c.bf16 %v2221_v61, %v2215_v13  ;;  %v2228_v22 = vld [vmem:[#allocation7 + $0x5b8] sm:$0xff]  ;;  %v2091_v13 = vld [vmem:[#allocation7 + $0x170] sm:$0xff]  ;;  %v2098_v61 = vld [vmem:[#allocation7 + $0x1a8] sm:$0xff] }
 0x5fa   :  { %6983 = vmatpush1.bf16.msra.mxu0 %v6982_v62  ;;  %v7048_v51 = vpack.c.bf16 %v2234_v37, %v2228_v22  ;;  %v7064_v62 = vpack.c.bf16 %v2092_v46, %v2086_v32  ;;  %v2109_v37 = vld [vmem:[#allocation7 + $0x200] sm:$0xff]  ;;  %v2199_v46 = vld [vmem:[#allocation7 + $0x4d0] sm:$0xff] }
 0x5fb   :  { %6985 = vmatprep.subr.bf16.mxu0 %v6984_v45  ;;  %v2103_v45 = vld [vmem:[#allocation7 + $0x1d0] sm:$0xff]  ;;  %v2193_v32 = vld [vmem:[#allocation7 + $0x4a0] sm:$0xff] }
 0x5fc   :  { %7031 = vmatpush1.bf16.msra.mxu1 %v7030_v42  ;;  %v2233_v42 = vld [vmem:[#allocation7 + $0x5e0] sm:$0xff]  ;;  %v7070_v22 = vpack.c.bf16 %v2103_v45, %v2097_v25 }
 0x5fd   :  { %7033 = vmatprep.subr.bf16.mxu1 %v7032_v8  ;;  %v7050_v20 = vpack.c.bf16 %v2233_v42, %v2227_v41  ;;  %v2115_v41 = vld [vmem:[#allocation7 + $0x230] sm:$0xff]  ;;  %v2122_v42 = vld [vmem:[#allocation7 + $0x268] sm:$0xff] }
 0x5fe   :  { %6987 = vmatpush1.bf16.msra.mxu0 %v6986_v29  ;;  %v7072_v29 = vpack.c.bf16 %v2116_v63, %v2110_v53  ;;  %v2217_v53 = vld [vmem:[#allocation7 + $0x560] sm:$0xff]  ;;  %v2223_v63 = vld [vmem:[#allocation7 + $0x590] sm:$0xff] }
 0x5ff   :  { %7053 = vmatprep.subr.bf16.mxu0 %v7052_v52  ;;  %v2127_v52 = vld [vmem:[#allocation7 + $0x290] sm:$0xff] }
 0x600   :  { %7035 = vmatpush1.bf16.msra.mxu1 %v7034_v40 }
 0x601   :  { %7037 = vmatprep.subr.bf16.mxu1 %v7036_v35 }
 0x604   :  { %7039 = vmatpush1.bf16.msra.mxu1 %v7038_v4  ;;  %v2049_v4 = vld [vmem:[#allocation7 + $0x20] sm:$0xff] }
 0x605   :  { %7041 = vmatprep.subr.bf16.mxu1 %v7040_v57  ;;  %v7054_v38 = vpack.c.bf16 %v2055_v10, %v2049_v4  ;;  %v2080_v57 = vld [vmem:[#allocation7 + $0x118] sm:$0xff]  ;;  %v2170_v4 = vld [vmem:[#allocation7 + $0x3e8] sm:$0xff] }
 0x606   :  { %v7060_v7 = vpack.c.bf16 %v2080_v57, %v2074_v48  ;;  %v2176_v10 = vld [vmem:[#allocation7 + $0x418] sm:$0xff]  ;;  %v2181_v48 = vld [vmem:[#allocation7 + $0x440] sm:$0xff]  ;;  %v2187_v57 = vld [vmem:[#allocation7 + $0x470] sm:$0xff] }
 0x607   :  { %v7098_v18 = vpack.c.bf16 %v2187_v57, %v2181_v48  ;;  %v2512_v48 = vld [vmem:[#allocation9 + $0x110] sm:$0xff] }
 0x608   :  { %7043 = vmatpush1.bf16.msra.mxu1 %v7042_v6 }
 0x609   :  { %7045 = vmatprep.subr.bf16.mxu1 %v7044_v26  ;;  %v2104_v26 = vld [vmem:[#allocation7 + $0x1d8] sm:$0xff] }
 0x60a   :  { %v7068_v44 = vpack.c.bf16 %v2104_v26, %v2098_v61  ;;  %v2205_v61 = vld [vmem:[#allocation7 + $0x500] sm:$0xff]  ;;  %v2211_v26 = vld [vmem:[#allocation7 + $0x530] sm:$0xff] }
 0x60b   :  { %v7106_v25 = vpack.c.bf16 %v2211_v26, %v2205_v61  ;;  %v2524_v61 = vld [vmem:[#allocation9 + $0x170] sm:$0xff] }
 0x60c   :  { %7047 = vmatpush1.bf16.msra.mxu1 %v7046_v27  ;;  %v7066_v27 = vpack.c.bf16 %v2091_v13, %v2085_v12  ;;  %v7102_v12 = vpack.c.bf16 %v2199_v46, %v2193_v32  ;;  %v2518_v32 = vld [vmem:[#allocation9 + $0x140] sm:$0xff] }
 0x60d   :  { %7049 = vmatprep.subr.bf16.mxu1 %v7048_v51  ;;  %v2128_v51 = vld [vmem:[#allocation7 + $0x298] sm:$0xff] }
 0x60e   :  { %v7076_v54 = vpack.c.bf16 %v2128_v51, %v2122_v42  ;;  %v2229_v42 = vld [vmem:[#allocation7 + $0x5c0] sm:$0xff]  ;;  %v2235_v51 = vld [vmem:[#allocation7 + $0x5f0] sm:$0xff] }
 0x610   :  { %7051 = vmatpush1.bf16.msra.mxu1 %v7050_v20  ;;  %v7074_v20 = vpack.c.bf16 %v2115_v41, %v2109_v37  ;;  %v7110_v37 = vpack.c.bf16 %v2223_v63, %v2217_v53  ;;  %v2701_v53 = vld [vmem:[#allocation7 + $0x38] sm:$0xff]  ;;  %v2694_v63 = vld [vmem:[#allocation7] sm:$0xff] }
 0x686   :  { %v1943_v3 = vpop.f32.mrb[14].mxu1 }
 0x687   :  { %v2018_v8 = vadd.f32 %v1943_v3, %v8882_v60  ;;  %v1945_v21 = vpop.f32.mrb[15].mxu1  ;;  %v2134_v3 = vld [vmem:[#allocation7 + $0x2c8] sm:$0xff] }
 0x688   :  { %v2025_v24 = vadd.f32 %v1945_v21, %v8894_v58  ;;  %v7078_v21 = vpack.c.bf16 %v2127_v52, %v2121_v49  ;;  %v2482_v49 = vld [vmem:[#allocation9 + $0x20] sm:$0xff] }
 0x689   :  { %v5604_v40 = vmul.f32 -1.442695, %v2018_v8  ;;  %v2140_v8 = vld [vmem:[#allocation7 + $0x2f8] sm:$0xff] }
 0x68a   :  { %v5605_v50 = vmul.f32 -1.442695, %v2025_v24  ;;  %v7080_v24 = vpack.c.bf16 %v2140_v8, %v2134_v3  ;;  %v2478_v3 = vld [vmem:[#allocation9] sm:$0xff]  ;;  %v2481_v8 = vld [vmem:[#allocation9 + $0x18] sm:$0xff] }
 0x68b   :  { %8293 = vpow2.f32 %v5604_v40  ;;  %v2133_v40 = vld [vmem:[#allocation7 + $0x2c0] sm:$0xff] }
 0x68c   :  { %8295 = vpow2.f32 %v5605_v50  ;;  %v2139_v50 = vld [vmem:[#allocation7 + $0x2f0] sm:$0xff] }
 0x695   :  { %v8294_v55 = vpop.eup %8293 }
 0x696   :  { %v2022_v2 = vadd.f32 1.0, %v8294_v55  ;;  %v8296_v56 = vpop.eup %8295  ;;  %v2146_v55 = vld [vmem:[#allocation7 + $0x328] sm:$0xff] }
 0x697   :  { %v2029_v9 = vadd.f32 1.0, %v8296_v56  ;;  %v7082_v56 = vpack.c.bf16 %v2139_v50, %v2133_v40  ;;  %v2488_v40 = vld [vmem:[#allocation9 + $0x50] sm:$0xff] }
 0x698   :  { %8297 = vrcp.f32 %v2022_v2  ;;  %v2152_v2 = vld [vmem:[#allocation7 + $0x358] sm:$0xff] }
 0x699   :  { %8299 = vrcp.f32 %v2029_v9  ;;  %v7084_v9 = vpack.c.bf16 %v2152_v2, %v2146_v55  ;;  %v2484_v55 = vld [vmem:[#allocation9 + $0x30] sm:$0xff]  ;;  %v2487_v2 = vld [vmem:[#allocation9 + $0x48] sm:$0xff] }
 0x6a2   :  { %v8298_v23 = vpop.eup %8297 }
 0x6a3   :  { %v2032_v30 = vmul.f32 %v8298_v23, %v8896_v17  ;;  %v8300_v60 = vpop.eup %8299  ;;  %v2061_v17 = vld [vmem:[#allocation7 + $0x80] sm:$0xff] }
 0x6a4   :  { %v2035_v35 = vsub.f32 1.0, %v8300_v60  ;;  %v2037_v14 = vmul.f32 %v8300_v60, %v8872_v28  ;;  %v7058_v6 = vpack.c.bf16 %v2067_v43, %v2061_v17  ;;  %v2145_v23 = vld [vmem:[#allocation7 + $0x320] sm:$0xff]  ;;  %v7094_v17 = vpack.c.bf16 %v2175_v16, %v2169_v15 }
 0x6a5   :  { %v2506_v15 = vld [vmem:[#allocation9 + $0xe0] sm:$0xff] }
 0x6a6   :  { %v2014_v59 = vpop.f32.mrb[16].mxu1 }
 0x6a7   :  { %v2033_v5 = vadd.f32 %v2032_v30, %v2014_v59  ;;  %v5916_v1 = vpop.f32.mrb[17].mxu1  ;;  %v2151_v30 = vld [vmem:[#allocation7 + $0x350] sm:$0xff]  ;;  %v2158_v59 = vld [vmem:[#allocation7 + $0x388] sm:$0xff] }
 0x6a8   :  { %v7086_v1 = vpack.c.bf16 %v2151_v30, %v2145_v23  ;;  %v2494_v23 = vld [vmem:[#allocation9 + $0x80] sm:$0xff] }
 0x6a9   :  { %8301 = vtanh.f32 %v2033_v5  ;;  %v2164_v5 = vld [vmem:[#allocation7 + $0x3b8] sm:$0xff] }
 0x6aa   :  { %v7088_v60 = vpack.c.bf16 %v2164_v5, %v2158_v59  ;;  %v2490_v59 = vld [vmem:[#allocation9 + $0x60] sm:$0xff]  ;;  %v2493_v5 = vld [vmem:[#allocation9 + $0x78] sm:$0xff] }
 0x6b3   :  { %v8302_v58 = vpop.eup %8301 }
 0x6b4   :  { %v2036_v11 = vmul.f32 %v8302_v58, %v2035_v35  ;;  %v2157_v35 = vld [vmem:[#allocation7 + $0x380] sm:$0xff]  ;;  %v2163_v58 = vld [vmem:[#allocation7 + $0x3b0] sm:$0xff] }
 0x6b6   :  { %v8906_v33 = vadd.f32 %v2037_v14, %v2036_v11  ;;  %v7090_v11 = vpack.c.bf16 %v2163_v58, %v2157_v35  ;;  %v7092_v14 = vpack.c.bf16 %v2176_v10, %v2170_v4  ;;  %v2500_v35 = vld [vmem:[#allocation9 + $0xb0] sm:$0xff]  ;;  %v2499_v10 = vld [vmem:[#allocation9 + $0xa8] sm:$0xff] }
 0x6b7   :  { %v2496_v4 = vld [vmem:[#allocation9 + $0x90] sm:$0xff] }
 0x6b8   :  { %2301 = vmatprep.mubr.f32.mxu0 %v8906_v33  ;;  %2372 = vmatprep.mubr.f32.mxu1 %v8906_v33 }
 0x6b9   :  { %2302 = vmatmul.mubr.f32.vlgmr.msra.gmra.mrb[12].mxu0 %v8885_v31  ;;  %2373 = vmatmul.mubr.f32.vlgmr.msra.gmra.mrb[18].mxu1 %v8885_v31 }
 0x6ba   :  { %7055 = vmatpush1.bf16.msra.mxu0 %v7054_v38  ;;  %2443 = vmatprep.mubr.f32.mxu0 %v8906_v33  ;;  %v2182_v38 = vld [vmem:[#allocation7 + $0x448] sm:$0xff] }
 0x6bb   :  { %7057 = vmatprep.subr.bf16.mxu0 %v7056_v36  ;;  %2590 = vmatprep.mubr.f32.mxu1 %v8554_v0  ;;  %v2188_v36 = vld [vmem:[#allocation7 + $0x478] sm:$0xff] }
 0x6bc   :  { %v7096_v43 = vpack.c.bf16 %v2188_v36, %v2182_v38  ;;  %v2502_v38 = vld [vmem:[#allocation9 + $0xc0] sm:$0xff]  ;;  %v2505_v36 = vld [vmem:[#allocation9 + $0xd8] sm:$0xff] }
 0x6be   :  { %7059 = vmatpush1.bf16.msra.mxu0 %v7058_v6  ;;  %v2194_v6 = vld [vmem:[#allocation7 + $0x4a8] sm:$0xff] }
 0x6bf   :  { %7061 = vmatprep.subr.bf16.mxu0 %v7060_v7  ;;  %v2200_v7 = vld [vmem:[#allocation7 + $0x4d8] sm:$0xff] }
 0x6c0   :  { %v7100_v19 = vpack.c.bf16 %v2200_v7, %v2194_v6  ;;  %v2508_v6 = vld [vmem:[#allocation9 + $0xf0] sm:$0xff]  ;;  %v2511_v7 = vld [vmem:[#allocation9 + $0x108] sm:$0xff] }
 0x6c2   :  { %7063 = vmatpush1.bf16.msra.mxu0 %v7062_v47  ;;  %v2206_v47 = vld [vmem:[#allocation7 + $0x508] sm:$0xff] }
 0x6c3   :  { %7065 = vmatprep.subr.bf16.mxu0 %v7064_v62  ;;  %v2212_v62 = vld [vmem:[#allocation7 + $0x538] sm:$0xff] }
 0x6c4   :  { %v7104_v13 = vpack.c.bf16 %v2212_v62, %v2206_v47  ;;  %v2514_v47 = vld [vmem:[#allocation9 + $0x120] sm:$0xff]  ;;  %v2517_v62 = vld [vmem:[#allocation9 + $0x138] sm:$0xff] }
 0x6c6   :  { %7067 = vmatpush1.bf16.msra.mxu0 %v7066_v27  ;;  %v2218_v27 = vld [vmem:[#allocation7 + $0x568] sm:$0xff] }
 0x6c7   :  { %7069 = vmatprep.subr.bf16.mxu0 %v7068_v44  ;;  %v2224_v44 = vld [vmem:[#allocation7 + $0x598] sm:$0xff] }
 0x6c8   :  { %v7108_v45 = vpack.c.bf16 %v2224_v44, %v2218_v27  ;;  %v2520_v27 = vld [vmem:[#allocation9 + $0x150] sm:$0xff]  ;;  %v2523_v44 = vld [vmem:[#allocation9 + $0x168] sm:$0xff] }
 0x6ca   :  { %7071 = vmatpush1.bf16.msra.mxu0 %v7070_v22  ;;  %v2230_v22 = vld [vmem:[#allocation7 + $0x5c8] sm:$0xff] }
 0x6cb   :  { %7073 = vmatprep.subr.bf16.mxu0 %v7072_v29  ;;  %v2236_v29 = vld [vmem:[#allocation7 + $0x5f8] sm:$0xff] }
 0x6cc   :  { %v7112_v41 = vpack.c.bf16 %v2236_v29, %v2230_v22  ;;  %v2700_v29 = vld [vmem:[#allocation7 + $0x30] sm:$0xff] }
 0x6ce   :  { %7075 = vmatpush1.bf16.msra.mxu0 %v7074_v20  ;;  %v7114_v20 = vpack.c.bf16 %v2235_v51, %v2229_v42  ;;  %v2713_v42 = vld [vmem:[#allocation7 + $0x98] sm:$0xff]  ;;  %v2706_v51 = vld [vmem:[#allocation7 + $0x60] sm:$0xff] }
 0x6cf   :  { %7077 = vmatprep.subr.bf16.mxu0 %v7076_v54  ;;  %v2479_v54 = vld [vmem:[#allocation9 + $0x8] sm:$0xff] }
 0x6d0   :  { %v7116_v52 = vpack.c.bf16 %v2482_v49, %v2479_v54 }
 0x6d2   :  { %7079 = vmatpush1.bf16.msra.mxu0 %v7078_v21  ;;  %v7118_v21 = vpack.c.bf16 %v2481_v8, %v2478_v3  ;;  %7117 = vmatprep.subr.bf16.mxu1 %v7116_v52  ;;  %v2719_v52 = vld [vmem:[#allocation7 + $0xc8] sm:$0xff]  ;;  %v2725_v3 = vld [vmem:[#allocation7 + $0xf8] sm:$0xff] }
 0x6d3   :  { %7081 = vmatprep.subr.bf16.mxu0 %v7080_v24  ;;  %v2485_v24 = vld [vmem:[#allocation9 + $0x38] sm:$0xff]  ;;  %v7180_v8 = vpack.c.bf16 %v2725_v3, %v2719_v52  ;;  %v2522_v52 = vld [vmem:[#allocation9 + $0x160] sm:$0xff] }
 0x6d4   :  { %7119 = vmatpush1.bf16.msra.mxu1 %v7118_v21  ;;  %v7120_v50 = vpack.c.bf16 %v2488_v40, %v2485_v24  ;;  %v2718_v21 = vld [vmem:[#allocation7 + $0xc0] sm:$0xff]  ;;  %v2724_v24 = vld [vmem:[#allocation7 + $0xf0] sm:$0xff]  ;;  %v2525_v3 = vld [vmem:[#allocation9 + $0x178] sm:$0xff] }
 0x6d5   :  { %v7182_v40 = vpack.c.bf16 %v2724_v24, %v2718_v21  ;;  %v2703_v21 = vld [vmem:[#allocation7 + $0x48] sm:$0xff]  ;;  %v7170_v24 = vpack.c.bf16 %v2525_v3, %v2522_v52  ;;  %v2772_v52 = vld [vmem:[#allocation7 + $0x270] sm:$0xff]  ;;  %v2769_v3 = vld [vmem:[#allocation7 + $0x258] sm:$0xff] }
 0x6d6   :  { %7083 = vmatpush1.bf16.msra.mxu0 %v7082_v56  ;;  %v7122_v56 = vpack.c.bf16 %v2487_v2, %v2484_v55  ;;  %7121 = vmatprep.subr.bf16.mxu1 %v7120_v50  ;;  %v2731_v50 = vld [vmem:[#allocation7 + $0x128] sm:$0xff]  ;;  %v2737_v55 = vld [vmem:[#allocation7 + $0x158] sm:$0xff]  ;;  %v2730_v2 = vld [vmem:[#allocation7 + $0x120] sm:$0xff] }
 0x6d7   :  { %7085 = vmatprep.subr.bf16.mxu0 %v7084_v9  ;;  %v2491_v9 = vld [vmem:[#allocation9 + $0x68] sm:$0xff] }
 0x6d8   :  { %7123 = vmatpush1.bf16.msra.mxu1 %v7122_v56  ;;  %v7124_v30 = vpack.c.bf16 %v2494_v23, %v2491_v9  ;;  %v7184_v56 = vpack.c.bf16 %v2737_v55, %v2731_v50  ;;  %v2736_v9 = vld [vmem:[#allocation7 + $0x150] sm:$0xff]  ;;  %v2702_v55 = vld [vmem:[#allocation7 + $0x40] sm:$0xff] }
 0x6d9   :  { %v7186_v23 = vpack.c.bf16 %v2736_v9, %v2730_v2  ;;  %v2696_v50 = vld [vmem:[#allocation7 + $0x10] sm:$0xff]  ;;  %v2709_v2 = vld [vmem:[#allocation7 + $0x78] sm:$0xff] }
 0x6da   :  { %7087 = vmatpush1.bf16.msra.mxu0 %v7086_v1  ;;  %v7126_v1 = vpack.c.bf16 %v2493_v5, %v2490_v59  ;;  %7125 = vmatprep.subr.bf16.mxu1 %v7124_v30  ;;  %v2453_v30 = vld [vmem:[#allocation4 + $0x48] sm:$0xff]  ;;  %v7238_v9 = vpack.c.bf16 %v2702_v55, %v2696_v50 }
 0x6db   :  { %7089 = vmatprep.subr.bf16.mxu0 %v7088_v60  ;;  %v2497_v60 = vld [vmem:[#allocation9 + $0x98] sm:$0xff] }
 0x6dc   :  { %7127 = vmatpush1.bf16.msra.mxu1 %v7126_v1  ;;  %v7128_v58 = vpack.c.bf16 %v2500_v35, %v2497_v60  ;;  %v2454_v35 = vld [vmem:[#allocation4 + $0x50] sm:$0xff] }
 0x6de   :  { %7091 = vmatpush1.bf16.msra.mxu0 %v7090_v11  ;;  %v7130_v11 = vpack.c.bf16 %v2499_v10, %v2496_v4  ;;  %7129 = vmatprep.subr.bf16.mxu1 %v7128_v58 }
 0x6df   :  { %7093 = vmatprep.subr.bf16.mxu0 %v7092_v14  ;;  %v2503_v14 = vld [vmem:[#allocation9 + $0xc8] sm:$0xff] }
 0x6e0   :  { %7131 = vmatpush1.bf16.msra.mxu1 %v7130_v11  ;;  %v7132_v16 = vpack.c.bf16 %v2506_v15, %v2503_v14 }
 0x6e2   :  { %7095 = vmatpush1.bf16.msra.mxu0 %v7094_v17  ;;  %v7134_v17 = vpack.c.bf16 %v2505_v36, %v2502_v38  ;;  %7133 = vmatprep.subr.bf16.mxu1 %v7132_v16 }
 0x6e3   :  { %7097 = vmatprep.subr.bf16.mxu0 %v7096_v43  ;;  %v2509_v43 = vld [vmem:[#allocation9 + $0xf8] sm:$0xff] }
 0x6e4   :  { %7135 = vmatpush1.bf16.msra.mxu1 %v7134_v17  ;;  %v7136_v57 = vpack.c.bf16 %v2512_v48, %v2509_v43  ;;  %v2455_v17 = vld [vmem:[#allocation4 + $0x58] sm:$0xff] }
 0x6e6   :  { %7099 = vmatpush1.bf16.msra.mxu0 %v7098_v18  ;;  %v7138_v18 = vpack.c.bf16 %v2511_v7, %v2508_v6  ;;  %7137 = vmatprep.subr.bf16.mxu1 %v7136_v57  ;;  %v2480_v7 = vld [vmem:[#allocation9 + $0x10] sm:$0xff] }
 0x6e7   :  { %7101 = vmatprep.subr.bf16.mxu0 %v7100_v19  ;;  %v2515_v19 = vld [vmem:[#allocation9 + $0x128] sm:$0xff] }
 0x6e8   :  { %7139 = vmatpush1.bf16.msra.mxu1 %v7138_v18  ;;  %v7140_v46 = vpack.c.bf16 %v2518_v32, %v2515_v19  ;;  %v2483_v18 = vld [vmem:[#allocation9 + $0x28] sm:$0xff] }
 0x6ea   :  { %7103 = vmatpush1.bf16.msra.mxu0 %v7102_v12  ;;  %v7142_v12 = vpack.c.bf16 %v2517_v62, %v2514_v47  ;;  %7141 = vmatprep.subr.bf16.mxu1 %v7140_v46  ;;  %v7149_v47 = vpack.c.bf16 %v2483_v18, %v2480_v7  ;;  %v2748_v7 = vld [vmem:[#allocation7 + $0x1b0] sm:$0xff]  ;;  %v2745_v18 = vld [vmem:[#allocation7 + $0x198] sm:$0xff] }
 0x6eb   :  { %7105 = vmatprep.subr.bf16.mxu0 %v7104_v13  ;;  %v2521_v13 = vld [vmem:[#allocation9 + $0x158] sm:$0xff] }
 0x6ec   :  { %7143 = vmatpush1.bf16.msra.mxu1 %v7142_v12  ;;  %v7144_v26 = vpack.c.bf16 %v2524_v61, %v2521_v13  ;;  %v2486_v12 = vld [vmem:[#allocation9 + $0x40] sm:$0xff]  ;;  %v2489_v13 = vld [vmem:[#allocation9 + $0x58] sm:$0xff] }
 0x6ed   :  { %v7152_v61 = vpack.c.bf16 %v2489_v13, %v2486_v12 }
 0x6ee   :  { %7107 = vmatpush1.bf16.msra.mxu0 %v7106_v25  ;;  %v7146_v25 = vpack.c.bf16 %v2523_v44, %v2520_v27  ;;  %7145 = vmatprep.subr.bf16.mxu1 %v7144_v26  ;;  %v2492_v26 = vld [vmem:[#allocation9 + $0x70] sm:$0xff]  ;;  %v2495_v27 = vld [vmem:[#allocation9 + $0x88] sm:$0xff] }
 0x6ef   :  { %7109 = vmatprep.subr.bf16.mxu0 %v7108_v45  ;;  %v2695_v45 = vld [vmem:[#allocation7 + $0x8] sm:$0xff]  ;;  %v7155_v44 = vpack.c.bf16 %v2495_v27, %v2492_v26  ;;  %v2761_v26 = vld [vmem:[#allocation7 + $0x218] sm:$0xff] }
 0x6f0   :  { %7147 = vmatpush1.bf16.msra.mxu1 %v7146_v25  ;;  %v7172_v22 = vpack.c.bf16 %v2701_v53, %v2695_v45  ;;  %v2501_v25 = vld [vmem:[#allocation9 + $0xb8] sm:$0xff]  ;;  %v2504_v53 = vld [vmem:[#allocation9 + $0xd0] sm:$0xff] }
 0x6f1   :  { %7148 = vmatprep.subr.bf16.mxu1 %v8555_v34 }
 0x6f2   :  { %7111 = vmatpush1.bf16.msra.mxu0 %v7110_v37  ;;  %v7174_v37 = vpack.c.bf16 %v2700_v29, %v2694_v63  ;;  %v2507_v63 = vld [vmem:[#allocation9 + $0xe8] sm:$0xff]  ;;  %v2510_v29 = vld [vmem:[#allocation9 + $0x100] sm:$0xff] }
 0x6f3   :  { %7113 = vmatprep.subr.bf16.mxu0 %v7112_v41  ;;  %v2707_v41 = vld [vmem:[#allocation7 + $0x68] sm:$0xff] }
 0x6f4   :  { %v7176_v54 = vpack.c.bf16 %v2713_v42, %v2707_v41 }
 0x6f6   :  { %7115 = vmatpush1.bf16.msra.mxu0 %v7114_v20  ;;  %v2712_v20 = vld [vmem:[#allocation7 + $0x90] sm:$0xff] }
 0x6f7   :  { %7173 = vmatprep.subr.bf16.mxu0 %v7172_v22  ;;  %v7178_v49 = vpack.c.bf16 %v2712_v20, %v2706_v51  ;;  %v7161_v22 = vpack.c.bf16 %v2507_v63, %v2504_v53  ;;  %v2516_v20 = vld [vmem:[#allocation9 + $0x130] sm:$0xff]  ;;  %v2763_v53 = vld [vmem:[#allocation7 + $0x228] sm:$0xff] }
 0x6f8   :  { %v2756_v63 = vld [vmem:[#allocation7 + $0x1f0] sm:$0xff] }
 0x6f9   :  { %2444 = vmatmul.mubr.f32.vlgmr.msra.gmra.mrb[14].mxu0 %v8885_v31 }
 0x6fa   :  { %7175 = vmatpush1.bf16.msra.mxu0 %v7174_v37  ;;  %v2513_v37 = vld [vmem:[#allocation9 + $0x118] sm:$0xff] }
 0x6fb   :  { %7177 = vmatprep.subr.bf16.mxu0 %v7176_v54  ;;  %v7164_v51 = vpack.c.bf16 %v2513_v37, %v2510_v29  ;;  %v2519_v54 = vld [vmem:[#allocation9 + $0x148] sm:$0xff] }
 0x6fe   :  { %7179 = vmatpush1.bf16.msra.mxu0 %v7178_v49  ;;  %v7167_v49 = vpack.c.bf16 %v2519_v54, %v2516_v20  ;;  %v2773_v20 = vld [vmem:[#allocation7 + $0x278] sm:$0xff] }
 0x6ff   :  { %7181 = vmatprep.subr.bf16.mxu0 %v7180_v8  ;;  %v2697_v8 = vld [vmem:[#allocation7 + $0x18] sm:$0xff] }
 0x702   :  { %7183 = vmatpush1.bf16.msra.mxu0 %v7182_v40  ;;  %v7236_v40 = vpack.c.bf16 %v2703_v21, %v2697_v8  ;;  %v2775_v21 = vld [vmem:[#allocation7 + $0x288] sm:$0xff] }
 0x703   :  { %7185 = vmatprep.subr.bf16.mxu0 %v7184_v56  ;;  %v2715_v56 = vld [vmem:[#allocation7 + $0xa8] sm:$0xff]  ;;  %v7260_v50 = vpack.c.bf16 %v2775_v21, %v2769_v3  ;;  %v2833_v3 = vld [vmem:[#allocation7 + $0x458] sm:$0xff] }
 0x706   :  { %7187 = vmatpush1.bf16.msra.mxu0 %v7186_v23  ;;  %v7240_v23 = vpack.c.bf16 %v2715_v56, %v2709_v2  ;;  %v2779_v2 = vld [vmem:[#allocation7 + $0x2a8] sm:$0xff]  ;;  %v2785_v56 = vld [vmem:[#allocation7 + $0x2d8] sm:$0xff] }
 0x78c   :  { %v2303_v59 = vpop.f32.mrb[12].mxu0  ;;  %v2374_v5 = vpop.f32.mrb[18].mxu1 }
 0x78d   :  { %v2457_v1 = vadd.f32 %v2453_v30, %v2303_v59  ;;  %v2305_v60 = vpop.f32.mrb[13].mxu0  ;;  %v8916_v58 = vpop.f32.mrb[19].mxu1  ;;  %v2708_v30 = vld [vmem:[#allocation7 + $0x70] sm:$0xff]  ;;  %v2714_v59 = vld [vmem:[#allocation7 + $0xa0] sm:$0xff] }
 0x78e   :  { %v2464_v10 = vadd.f32 %v2454_v35, %v2305_v60  ;;  %v7242_v60 = vpack.c.bf16 %v2714_v59, %v2708_v30  ;;  %v2784_v30 = vld [vmem:[#allocation7 + $0x2d0] sm:$0xff]  ;;  %v2781_v59 = vld [vmem:[#allocation7 + $0x2b8] sm:$0xff] }
 0x78f   :  { %v5606_v4 = vmul.f32 -1.442695, %v2457_v1  ;;  %v2727_v1 = vld [vmem:[#allocation7 + $0x108] sm:$0xff] }
 0x790   :  { %v5607_v11 = vmul.f32 -1.442695, %v2464_v10  ;;  %v2726_v10 = vld [vmem:[#allocation7 + $0x100] sm:$0xff] }
 0x791   :  { %8303 = vpow2.f32 %v5606_v4  ;;  %v2720_v4 = vld [vmem:[#allocation7 + $0xd0] sm:$0xff] }
 0x792   :  { %8305 = vpow2.f32 %v5607_v11  ;;  %v2733_v11 = vld [vmem:[#allocation7 + $0x138] sm:$0xff] }
 0x79b   :  { %v8304_v14 = vpop.eup %8303 }
 0x79c   :  { %v2461_v15 = vadd.f32 1.0, %v8304_v14  ;;  %v8306_v16 = vpop.eup %8305  ;;  %v2739_v14 = vld [vmem:[#allocation7 + $0x168] sm:$0xff] }
 0x79d   :  { %v2468_v38 = vadd.f32 1.0, %v8306_v16  ;;  %v7248_v16 = vpack.c.bf16 %v2739_v14, %v2733_v11  ;;  %v2791_v11 = vld [vmem:[#allocation7 + $0x308] sm:$0xff]  ;;  %v2797_v14 = vld [vmem:[#allocation7 + $0x338] sm:$0xff] }
 0x79e   :  { %8307 = vrcp.f32 %v2461_v15  ;;  %v7246_v15 = vpack.c.bf16 %v2726_v10, %v2720_v4 }
 0x79f   :  { %8309 = vrcp.f32 %v2468_v38  ;;  %v2732_v38 = vld [vmem:[#allocation7 + $0x130] sm:$0xff] }
 0x7a8   :  { %v8308_v36 = vpop.eup %8307 }
 0x7a9   :  { %v2471_v43 = vmul.f32 %v8308_v36, %v2374_v5  ;;  %v8310_v57 = vpop.eup %8309  ;;  %v2721_v5 = vld [vmem:[#allocation7 + $0xd8] sm:$0xff]  ;;  %v2738_v36 = vld [vmem:[#allocation7 + $0x160] sm:$0xff] }
 0x7aa   :  { %v2474_v6 = vsub.f32 1.0, %v8310_v57  ;;  %v2476_v46 = vmul.f32 %v8310_v57, %v8885_v31  ;;  %v2498_v31 = vld [vmem:[#allocation9 + $0xa0] sm:$0xff]  ;;  %v7244_v35 = vpack.c.bf16 %v2727_v1, %v2721_v5  ;;  %v2787_v1 = vld [vmem:[#allocation7 + $0x2e8] sm:$0xff] }
 0x7ab   :  { %v2472_v48 = vadd.f32 %v2471_v43, %v2455_v17  ;;  %v7158_v45 = vpack.c.bf16 %v2501_v25, %v2498_v31  ;;  %v7250_v17 = vpack.c.bf16 %v2738_v36, %v2732_v38  ;;  %v2743_v43 = vld [vmem:[#allocation7 + $0x188] sm:$0xff]  ;;  %v2760_v31 = vld [vmem:[#allocation7 + $0x210] sm:$0xff]  ;;  %v2757_v25 = vld [vmem:[#allocation7 + $0x1f8] sm:$0xff]  ;;  %v7264_v4 = vpack.c.bf16 %v2787_v1, %v2781_v59 }
 0x7ac   :  { %v7256_v29 = vpack.c.bf16 %v2763_v53, %v2757_v25  ;;  %v2796_v38 = vld [vmem:[#allocation7 + $0x330] sm:$0xff]  ;;  %v2793_v36 = vld [vmem:[#allocation7 + $0x318] sm:$0xff]  ;;  %v2814_v53 = vld [vmem:[#allocation7 + $0x3c0] sm:$0xff] }
 0x7ad   :  { %8311 = vtanh.f32 %v2472_v48  ;;  %v2749_v48 = vld [vmem:[#allocation7 + $0x1b8] sm:$0xff]  ;;  %v2839_v59 = vld [vmem:[#allocation7 + $0x488] sm:$0xff] }
 0x7ae   :  { %v7188_v57 = vpack.c.bf16 %v2749_v48, %v2743_v43  ;;  %v2799_v43 = vld [vmem:[#allocation7 + $0x348] sm:$0xff]  ;;  %v2792_v48 = vld [vmem:[#allocation7 + $0x310] sm:$0xff] }
 0x7b0   :  { %7189 = vmatprep.subr.bf16.mxu0 %v7188_v57  ;;  %v2798_v57 = vld [vmem:[#allocation7 + $0x340] sm:$0xff] }
 0x7b7   :  { %v8312_v19 = vpop.eup %8311 }
 0x7b8   :  { %v2475_v32 = vmul.f32 %v8312_v19, %v2474_v6  ;;  %v2742_v6 = vld [vmem:[#allocation7 + $0x180] sm:$0xff] }
 0x7b9   :  { %v7190_v19 = vpack.c.bf16 %v2748_v7, %v2742_v6  ;;  %v7268_v6 = vpack.c.bf16 %v2799_v43, %v2793_v36  ;;  %v7270_v7 = vpack.c.bf16 %v2798_v57, %v2792_v48  ;;  %v2851_v36 = vld [vmem:[#allocation7 + $0x4e8] sm:$0xff]  ;;  %v2850_v48 = vld [vmem:[#allocation7 + $0x4e0] sm:$0xff]  ;;  %v2856_v57 = vld [vmem:[#allocation7 + $0x510] sm:$0xff] }
 0x7ba   :  { %v8919_v62 = vadd.f32 %v2476_v46, %v2475_v32  ;;  %v2751_v32 = vld [vmem:[#allocation7 + $0x1c8] sm:$0xff]  ;;  %v2744_v46 = vld [vmem:[#allocation7 + $0x190] sm:$0xff] }
 0x7bb   :  { %v7252_v12 = vpack.c.bf16 %v2751_v32, %v2745_v18  ;;  %7191 = vmatpush1.bf16.msra.mxu0 %v7190_v19  ;;  %v2803_v18 = vld [vmem:[#allocation7 + $0x368] sm:$0xff]  ;;  %v2809_v19 = vld [vmem:[#allocation7 + $0x398] sm:$0xff]  ;;  %v2802_v32 = vld [vmem:[#allocation7 + $0x360] sm:$0xff] }
 0x7bc   :  { %2591 = vmatmul.mubr.f32.vlgmr.msra.gmra.mrb[20].mxu1 %v8919_v62 }
 0x7bd   :  { %7150 = vmatpush3.bf16.msra.mxu1 %v7149_v47  ;;  %5949 = vmatprep.mubr.msk.f32.mxu1 %vm8556_vm0, %v8554_v0  ;;  %v2750_v47 = vld [vmem:[#allocation7 + $0x1c0] sm:$0xff] }
 0x7be   :  { %7151 = vmatprep.subr.bf16.mxu1 %v8555_v34  ;;  %v7254_v13 = vpack.c.bf16 %v2750_v47, %v2744_v46  ;;  %v7208_v46 = vpack.c.bf16 %v2809_v19, %v2803_v18  ;;  %v2808_v47 = vld [vmem:[#allocation7 + $0x390] sm:$0xff]  ;;  %v2859_v18 = vld [vmem:[#allocation7 + $0x528] sm:$0xff] }
 0x7bf   :  { %v2852_v19 = vld [vmem:[#allocation7 + $0x4f0] sm:$0xff] }
 0x7c1   :  { %7153 = vmatpush3.bf16.msra.mxu1 %v7152_v61  ;;  %v2755_v61 = vld [vmem:[#allocation7 + $0x1e8] sm:$0xff] }
 0x7c2   :  { %7154 = vmatprep.subr.bf16.mxu1 %v8555_v34  ;;  %v7192_v27 = vpack.c.bf16 %v2761_v26, %v2755_v61  ;;  %v7210_v61 = vpack.c.bf16 %v2808_v47, %v2802_v32  ;;  %v2858_v32 = vld [vmem:[#allocation7 + $0x520] sm:$0xff] }
 0x7c3   :  { %v7290_v47 = vpack.c.bf16 %v2858_v32, %v2852_v19  ;;  %v2716_v32 = vld [vmem:[#allocation7 + $0xb0] sm:$0xff] }
 0x7c4   :  { %7193 = vmatprep.subr.bf16.mxu0 %v7192_v27  ;;  %v2804_v27 = vld [vmem:[#allocation7 + $0x370] sm:$0xff] }
 0x7c5   :  { %7156 = vmatpush3.bf16.msra.mxu1 %v7155_v44  ;;  %v2754_v44 = vld [vmem:[#allocation7 + $0x1e0] sm:$0xff] }
 0x7c6   :  { %7157 = vmatprep.subr.bf16.mxu1 %v8555_v34 }
 0x7c9   :  { %7159 = vmatpush3.bf16.msra.mxu1 %v7158_v45  ;;  %v7194_v45 = vpack.c.bf16 %v2760_v31, %v2754_v44  ;;  %v2810_v44 = vld [vmem:[#allocation7 + $0x3a0] sm:$0xff]  ;;  %v2815_v31 = vld [vmem:[#allocation7 + $0x3c8] sm:$0xff] }
 0x7ca   :  { %7160 = vmatprep.subr.bf16.mxu1 %v8555_v34  ;;  %v7274_v25 = vpack.c.bf16 %v2810_v44, %v2804_v27  ;;  %v2868_v27 = vld [vmem:[#allocation7 + $0x570] sm:$0xff]  ;;  %v2865_v44 = vld [vmem:[#allocation7 + $0x558] sm:$0xff] }
 0x7cb   :  { %7195 = vmatpush1.bf16.msra.mxu0 %v7194_v45  ;;  %v2821_v45 = vld [vmem:[#allocation7 + $0x3f8] sm:$0xff] }
 0x7cc   :  { %v8928_v41 = vpop.f32.mrb[14].mxu0 }
 0x7cd   :  { %v8930_v42 = vpop.f32.mrb[15].mxu0  ;;  %7162 = vmatpush3.bf16.msra.mxu1 %v7161_v22  ;;  %v2762_v22 = vld [vmem:[#allocation7 + $0x220] sm:$0xff] }
 0x7ce   :  { %7163 = vmatprep.subr.bf16.mxu1 %v8555_v34  ;;  %v7258_v37 = vpack.c.bf16 %v2762_v22, %v2756_v63  ;;  %v2820_v63 = vld [vmem:[#allocation7 + $0x3f0] sm:$0xff]  ;;  %v7212_v22 = vpack.c.bf16 %v2821_v45, %v2815_v31 }
 0x7cf   :  { %v2864_v45 = vld [vmem:[#allocation7 + $0x550] sm:$0xff] }
 0x7d1   :  { %7165 = vmatpush3.bf16.msra.mxu1 %v7164_v51  ;;  %v2767_v51 = vld [vmem:[#allocation7 + $0x248] sm:$0xff] }
 0x7d2   :  { %7166 = vmatprep.subr.bf16.mxu1 %v8555_v34  ;;  %v7196_v54 = vpack.c.bf16 %v2773_v20, %v2767_v51  ;;  %v2823_v51 = vld [vmem:[#allocation7 + $0x408] sm:$0xff]  ;;  %v2816_v20 = vld [vmem:[#allocation7 + $0x3d0] sm:$0xff] }
 0x7d4   :  { %7197 = vmatprep.subr.bf16.mxu0 %v7196_v54 }
 0x7d5   :  { %7168 = vmatpush3.bf16.msra.mxu1 %v7167_v49  ;;  %v2766_v49 = vld [vmem:[#allocation7 + $0x240] sm:$0xff] }
 0x7d6   :  { %7169 = vmatprep.subr.bf16.mxu1 %v8555_v34  ;;  %v7198_v8 = vpack.c.bf16 %v2772_v52, %v2766_v49  ;;  %v2822_v49 = vld [vmem:[#allocation7 + $0x400] sm:$0xff]  ;;  %v2827_v52 = vld [vmem:[#allocation7 + $0x428] sm:$0xff] }
 0x7d7   :  { %v7216_v21 = vpack.c.bf16 %v2833_v3, %v2827_v52  ;;  %v2883_v3 = vld [vmem:[#allocation7 + $0x5e8] sm:$0xff] }
 0x7d8   :  { %7199 = vmatpush1.bf16.msra.mxu0 %v7198_v8  ;;  %v7278_v8 = vpack.c.bf16 %v2822_v49, %v2816_v20  ;;  %v2874_v20 = vld [vmem:[#allocation7 + $0x5a0] sm:$0xff]  ;;  %v2877_v49 = vld [vmem:[#allocation7 + $0x5b8] sm:$0xff] }
 0x7d9   :  { %7171 = vmatpush3.bf16.msra.mxu1 %v7170_v24  ;;  %v2768_v24 = vld [vmem:[#allocation7 + $0x250] sm:$0xff] }
 0x7da   :  { %7237 = vmatprep.subr.bf16.mxu1 %v7236_v40  ;;  %v2774_v40 = vld [vmem:[#allocation7 + $0x280] sm:$0xff] }
 0x7db   :  { %v7262_v55 = vpack.c.bf16 %v2774_v40, %v2768_v24  ;;  %v2826_v24 = vld [vmem:[#allocation7 + $0x420] sm:$0xff]  ;;  %v2832_v40 = vld [vmem:[#allocation7 + $0x450] sm:$0xff] }
 0x7dc   :  { %5950 = vmatmul.mubr.f32.vlgmr.msra.gmra.mrb[22].mxu1 %v8919_v62 }
 0x7dd   :  { %7239 = vmatpush1.bf16.msra.mxu1 %v7238_v9  ;;  %v7200_v9 = vpack.c.bf16 %v2785_v56, %v2779_v2  ;;  %v7218_v2 = vpack.c.bf16 %v2832_v40, %v2826_v24  ;;  %v7296_v24 = vpack.c.bf16 %v2883_v3, %v2877_v49  ;;  %v2765_v49 = vld [vmem:[#allocation7 + $0x238] sm:$0xff] }
 0x7de   :  { %7241 = vmatprep.subr.bf16.mxu1 %v7240_v23  ;;  %v2778_v23 = vld [vmem:[#allocation7 + $0x2a0] sm:$0xff] }
 0x7df   :  { %v7202_v5 = vpack.c.bf16 %v2784_v30, %v2778_v23  ;;  %7201 = vmatprep.subr.bf16.mxu0 %v7200_v9  ;;  %v2828_v9 = vld [vmem:[#allocation7 + $0x430] sm:$0xff]  ;;  %v2834_v23 = vld [vmem:[#allocation7 + $0x460] sm:$0xff] }
 0x7e0   :  { %v7282_v30 = vpack.c.bf16 %v2834_v23, %v2828_v9 }
 0x7e1   :  { %7243 = vmatpush1.bf16.msra.mxu1 %v7242_v60  ;;  %v2780_v60 = vld [vmem:[#allocation7 + $0x2b0] sm:$0xff]  ;;  %7203 = vmatpush1.bf16.msra.mxu0 %v7202_v5  ;;  %v2845_v5 = vld [vmem:[#allocation7 + $0x4b8] sm:$0xff] }
 0x7e2   :  { %7245 = vmatprep.subr.bf16.mxu1 %v7244_v35  ;;  %v2786_v35 = vld [vmem:[#allocation7 + $0x2e0] sm:$0xff]  ;;  %v7220_v1 = vpack.c.bf16 %v2845_v5, %v2839_v59 }
 0x7e3   :  { %v7266_v10 = vpack.c.bf16 %v2786_v35, %v2780_v60  ;;  %v2838_v60 = vld [vmem:[#allocation7 + $0x480] sm:$0xff]  ;;  %v2844_v35 = vld [vmem:[#allocation7 + $0x4b0] sm:$0xff] }
 0x7e5   :  { %7247 = vmatpush1.bf16.msra.mxu1 %v7246_v15  ;;  %v7204_v15 = vpack.c.bf16 %v2797_v14, %v2791_v11  ;;  %v2847_v11 = vld [vmem:[#allocation7 + $0x4c8] sm:$0xff]  ;;  %v2840_v14 = vld [vmem:[#allocation7 + $0x490] sm:$0xff] }
 0x7e6   :  { %7249 = vmatprep.subr.bf16.mxu1 %v7248_v16  ;;  %v2790_v16 = vld [vmem:[#allocation7 + $0x300] sm:$0xff] }
 0x7e7   :  { %7205 = vmatprep.subr.bf16.mxu0 %v7204_v15  ;;  %v2846_v15 = vld [vmem:[#allocation7 + $0x4c0] sm:$0xff] }
 0x7e9   :  { %7251 = vmatpush1.bf16.msra.mxu1 %v7250_v17  ;;  %v7206_v17 = vpack.c.bf16 %v2796_v38, %v2790_v16  ;;  %v7286_v38 = vpack.c.bf16 %v2846_v15, %v2840_v14 }
 0x7ea   :  { %7253 = vmatprep.subr.bf16.mxu1 %v7252_v12  ;;  %v2805_v12 = vld [vmem:[#allocation7 + $0x378] sm:$0xff] }
 0x7eb   :  { %7207 = vmatpush1.bf16.msra.mxu0 %v7206_v17  ;;  %v2857_v17 = vld [vmem:[#allocation7 + $0x518] sm:$0xff] }
 0x7ec   :  { %7209 = vmatprep.subr.bf16.mxu0 %v7208_v46  ;;  %v7224_v43 = vpack.c.bf16 %v2857_v17, %v2851_v36  ;;  %v2698_v36 = vld [vmem:[#allocation7 + $0x20] sm:$0xff]  ;;  %v2704_v17 = vld [vmem:[#allocation7 + $0x50] sm:$0xff] }
 0x7ed   :  { %7255 = vmatpush1.bf16.msra.mxu1 %v7254_v13  ;;  %v2811_v13 = vld [vmem:[#allocation7 + $0x3a8] sm:$0xff] }
 0x7ee   :  { %7257 = vmatprep.subr.bf16.mxu1 %v7256_v29  ;;  %v7272_v26 = vpack.c.bf16 %v2811_v13, %v2805_v12  ;;  %v7214_v29 = vpack.c.bf16 %v2820_v63, %v2814_v53  ;;  %v2863_v12 = vld [vmem:[#allocation7 + $0x548] sm:$0xff]  ;;  %v2869_v13 = vld [vmem:[#allocation7 + $0x578] sm:$0xff]  ;;  %v2870_v53 = vld [vmem:[#allocation7 + $0x580] sm:$0xff] }
 0x7ef   :  { %7211 = vmatpush1.bf16.msra.mxu0 %v7210_v61  ;;  %v7228_v61 = vpack.c.bf16 %v2869_v13, %v2863_v12 }
 0x7f0   :  { %7213 = vmatprep.subr.bf16.mxu0 %v7212_v22  ;;  %v7294_v22 = vpack.c.bf16 %v2870_v53, %v2864_v45  ;;  %v2734_v45 = vld [vmem:[#allocation7 + $0x140] sm:$0xff]  ;;  %v2740_v53 = vld [vmem:[#allocation7 + $0x170] sm:$0xff] }
 0x7f1   :  { %7259 = vmatpush1.bf16.msra.mxu1 %v7258_v37  ;;  %v2817_v37 = vld [vmem:[#allocation7 + $0x3d8] sm:$0xff] }
 0x7f2   :  { %7261 = vmatprep.subr.bf16.mxu1 %v7260_v50  ;;  %v7276_v54 = vpack.c.bf16 %v2823_v51, %v2817_v37  ;;  %v2829_v50 = vld [vmem:[#allocation7 + $0x438] sm:$0xff] }
 0x7f3   :  { %7215 = vmatpush1.bf16.msra.mxu0 %v7214_v29  ;;  %v2875_v29 = vld [vmem:[#allocation7 + $0x5a8] sm:$0xff]  ;;  %v2881_v37 = vld [vmem:[#allocation7 + $0x5d8] sm:$0xff] }
 0x7f4   :  { %7217 = vmatprep.subr.bf16.mxu0 %v7216_v21  ;;  %v7232_v51 = vpack.c.bf16 %v2881_v37, %v2875_v29  ;;  %v2882_v21 = vld [vmem:[#allocation7 + $0x5e0] sm:$0xff]  ;;  %v7314_v29 = vpack.c.bf16 %v2740_v53, %v2734_v45  ;;  %v2861_v45 = vld [vmem:[#allocation7 + $0x538] sm:$0xff] }
 0x7f5   :  { %7263 = vmatpush1.bf16.msra.mxu1 %v7262_v55  ;;  %v2835_v55 = vld [vmem:[#allocation7 + $0x468] sm:$0xff] }
 0x7f6   :  { %7265 = vmatprep.subr.bf16.mxu1 %v7264_v4  ;;  %v7280_v56 = vpack.c.bf16 %v2835_v55, %v2829_v50  ;;  %v2841_v4 = vld [vmem:[#allocation7 + $0x498] sm:$0xff]  ;;  %v2699_v50 = vld [vmem:[#allocation7 + $0x28] sm:$0xff] }
 0x7f7   :  { %7219 = vmatpush1.bf16.msra.mxu0 %v7218_v2  ;;  %v7284_v16 = vpack.c.bf16 %v2847_v11, %v2841_v4  ;;  %v2705_v55 = vld [vmem:[#allocation7 + $0x58] sm:$0xff] }
 0x7f8   :  { %7221 = vmatprep.subr.bf16.mxu0 %v7220_v1  ;;  %v7300_v2 = vpack.c.bf16 %v2705_v55, %v2699_v50 }
 0x7f9   :  { %7267 = vmatpush1.bf16.msra.mxu1 %v7266_v10  ;;  %v7222_v10 = vpack.c.bf16 %v2844_v35, %v2838_v60 }
 0x7fa   :  { %7269 = vmatprep.subr.bf16.mxu1 %v7268_v6  ;;  %v2853_v6 = vld [vmem:[#allocation7 + $0x4f8] sm:$0xff] }
 0x7fb   :  { %7223 = vmatpush1.bf16.msra.mxu0 %v7222_v10  ;;  %v7288_v46 = vpack.c.bf16 %v2859_v18, %v2853_v6  ;;  %v2717_v6 = vld [vmem:[#allocation7 + $0xb8] sm:$0xff]  ;;  %v7302_v18 = vpack.c.bf16 %v2704_v17, %v2698_v36  ;;  %v2812_v36 = vld [vmem:[#allocation7 + $0x3b0] sm:$0xff]  ;;  %v2819_v17 = vld [vmem:[#allocation7 + $0x3e8] sm:$0xff] }
 0x7fc   :  { %7225 = vmatprep.subr.bf16.mxu0 %v7224_v43 }
 0x7fd   :  { %7271 = vmatpush1.bf16.msra.mxu1 %v7270_v7  ;;  %v7226_v7 = vpack.c.bf16 %v2856_v57, %v2850_v48  ;;  %v2711_v57 = vld [vmem:[#allocation7 + $0x88] sm:$0xff] }
 0x7fe   :  { %7273 = vmatprep.subr.bf16.mxu1 %v7272_v26  ;;  %v2862_v26 = vld [vmem:[#allocation7 + $0x540] sm:$0xff]  ;;  %v7304_v19 = vpack.c.bf16 %v2717_v6, %v2711_v57 }
 0x7ff   :  { %7227 = vmatpush1.bf16.msra.mxu0 %v7226_v7  ;;  %v7230_v31 = vpack.c.bf16 %v2868_v27, %v2862_v26  ;;  %v2728_v26 = vld [vmem:[#allocation7 + $0x110] sm:$0xff]  ;;  %v2735_v27 = vld [vmem:[#allocation7 + $0x148] sm:$0xff]  ;;  %v2818_v6 = vld [vmem:[#allocation7 + $0x3e0] sm:$0xff] }
 0x800   :  { %7229 = vmatprep.subr.bf16.mxu0 %v7228_v61  ;;  %v2722_v61 = vld [vmem:[#allocation7 + $0xe0] sm:$0xff] }
 0x801   :  { %7275 = vmatpush1.bf16.msra.mxu1 %v7274_v25  ;;  %v2871_v25 = vld [vmem:[#allocation7 + $0x588] sm:$0xff] }
 0x802   :  { %7277 = vmatprep.subr.bf16.mxu1 %v7276_v54  ;;  %v7292_v63 = vpack.c.bf16 %v2871_v25, %v2865_v44  ;;  %v2880_v54 = vld [vmem:[#allocation7 + $0x5d0] sm:$0xff]  ;;  %v2741_v44 = vld [vmem:[#allocation7 + $0x178] sm:$0xff] }
 0x803   :  { %7231 = vmatpush1.bf16.msra.mxu0 %v7230_v31  ;;  %v7234_v52 = vpack.c.bf16 %v2880_v54, %v2874_v20  ;;  %v7310_v31 = vpack.c.bf16 %v2728_v26, %v2722_v61  ;;  %v7312_v25 = vpack.c.bf16 %v2741_v44, %v2735_v27  ;;  %v2752_v20 = vld [vmem:[#allocation7 + $0x1d0] sm:$0xff]  ;;  %v2759_v54 = vld [vmem:[#allocation7 + $0x208] sm:$0xff]  ;;  %v2849_v61 = vld [vmem:[#allocation7 + $0x4d8] sm:$0xff] }
 0x804   :  { %7233 = vmatprep.subr.bf16.mxu0 %v7232_v51  ;;  %v2746_v51 = vld [vmem:[#allocation7 + $0x1a0] sm:$0xff]  ;;  %v7320_v3 = vpack.c.bf16 %v2765_v49, %v2759_v54 }
 0x805   :  { %7279 = vmatpush1.bf16.msra.mxu1 %v7278_v8  ;;  %v2876_v8 = vld [vmem:[#allocation7 + $0x5b0] sm:$0xff]  ;;  %v2842_v44 = vld [vmem:[#allocation7 + $0x4a0] sm:$0xff] }
 0x806   :  { %7281 = vmatprep.subr.bf16.mxu1 %v7280_v56  ;;  %v7298_v40 = vpack.c.bf16 %v2882_v21, %v2876_v8  ;;  %v2758_v8 = vld [vmem:[#allocation7 + $0x200] sm:$0xff]  ;;  %v2764_v21 = vld [vmem:[#allocation7 + $0x230] sm:$0xff] }
 0x807   :  { %7235 = vmatpush1.bf16.msra.mxu0 %v7234_v52  ;;  %v7318_v52 = vpack.c.bf16 %v2752_v20, %v2746_v51  ;;  %v7322_v50 = vpack.c.bf16 %v2764_v21, %v2758_v8  ;;  %v2873_v51 = vld [vmem:[#allocation7 + $0x598] sm:$0xff]  ;;  %v2866_v49 = vld [vmem:[#allocation7 + $0x560] sm:$0xff] }
 0x808   :  { %7301 = vmatprep.subr.bf16.mxu0 %v7300_v2  ;;  %v2770_v2 = vld [vmem:[#allocation7 + $0x260] sm:$0xff]  ;;  %v2885_v8 = vld [vmem:[#allocation7 + $0x5f8] sm:$0xff] }
 0x809   :  { %7283 = vmatpush1.bf16.msra.mxu1 %v7282_v30 }
 0x80a   :  { %7285 = vmatprep.subr.bf16.mxu1 %v7284_v16 }
 0x80d   :  { %7287 = vmatpush1.bf16.msra.mxu1 %v7286_v38 }
 0x80e   :  { %7289 = vmatprep.subr.bf16.mxu1 %v7288_v46  ;;  %v2723_v46 = vld [vmem:[#allocation7 + $0xe8] sm:$0xff] }
 0x811   :  { %7291 = vmatpush1.bf16.msra.mxu1 %v7290_v47  ;;  %v2729_v47 = vld [vmem:[#allocation7 + $0x118] sm:$0xff] }
 0x812   :  { %7293 = vmatprep.subr.bf16.mxu1 %v7292_v63  ;;  %v7308_v13 = vpack.c.bf16 %v2729_v47, %v2723_v46  ;;  %v2747_v63 = vld [vmem:[#allocation7 + $0x1a8] sm:$0xff]  ;;  %v2830_v47 = vld [vmem:[#allocation7 + $0x440] sm:$0xff] }
 0x815   :  { %7295 = vmatpush1.bf16.msra.mxu1 %v7294_v22  ;;  %v2753_v22 = vld [vmem:[#allocation7 + $0x1d8] sm:$0xff] }
 0x816   :  { %7297 = vmatprep.subr.bf16.mxu1 %v7296_v24  ;;  %v7316_v37 = vpack.c.bf16 %v2753_v22, %v2747_v63  ;;  %v2771_v24 = vld [vmem:[#allocation7 + $0x268] sm:$0xff]  ;;  %v2854_v22 = vld [vmem:[#allocation7 + $0x500] sm:$0xff] }
 0x819   :  { %7299 = vmatpush1.bf16.msra.mxu1 %v7298_v40  ;;  %v2777_v40 = vld [vmem:[#allocation7 + $0x298] sm:$0xff] }
 0x81a   :  { %v7324_v55 = vpack.c.bf16 %v2777_v40, %v2771_v24  ;;  %v2878_v40 = vld [vmem:[#allocation7 + $0x5c0] sm:$0xff] }
 0x88f   :  { %v2592_v56 = vpop.f32.mrb[20].mxu1 }
 0x890   :  { %v2667_v9 = vadd.f32 %v2592_v56, %v8916_v58  ;;  %v2594_v23 = vpop.f32.mrb[21].mxu1  ;;  %v2776_v56 = vld [vmem:[#allocation7 + $0x290] sm:$0xff] }
 0x891   :  { %v2674_v30 = vadd.f32 %v2594_v23, %v8928_v41  ;;  %v2789_v23 = vld [vmem:[#allocation7 + $0x2f8] sm:$0xff] }
 0x892   :  { %v5608_v59 = vmul.f32 -1.442695, %v2667_v9  ;;  %v2783_v9 = vld [vmem:[#allocation7 + $0x2c8] sm:$0xff] }
 0x893   :  { %v5609_v5 = vmul.f32 -1.442695, %v2674_v30  ;;  %v7326_v30 = vpack.c.bf16 %v2776_v56, %v2770_v2  ;;  %v3128_v2 = vld [vmem:[#allocation9 + $0x8] sm:$0xff]  ;;  %v3131_v56 = vld [vmem:[#allocation9 + $0x20] sm:$0xff] }
 0x894   :  { %8313 = vpow2.f32 %v5608_v59  ;;  %v7328_v59 = vpack.c.bf16 %v2789_v23, %v2783_v9  ;;  %v7364_v9 = vpack.c.bf16 %v3131_v56, %v3128_v2  ;;  %v3127_v23 = vld [vmem:[#allocation9] sm:$0xff]  ;;  %v3361_v2 = vld [vmem:[#allocation7 + $0x90] sm:$0xff] }
 0x895   :  { %8315 = vpow2.f32 %v5609_v5  ;;  %v2782_v5 = vld [vmem:[#allocation7 + $0x2c0] sm:$0xff] }
 0x896   :  { %7365 = vmatprep.subr.bf16.mxu1 %v7364_v9 }
 0x89e   :  { %v8314_v1 = vpop.eup %8313 }
 0x89f   :  { %v2671_v60 = vadd.f32 1.0, %v8314_v1  ;;  %v8316_v35 = vpop.eup %8315  ;;  %v2788_v1 = vld [vmem:[#allocation7 + $0x2f0] sm:$0xff] }
 0x8a0   :  { %v2678_v4 = vadd.f32 1.0, %v8316_v35  ;;  %v2801_v35 = vld [vmem:[#allocation7 + $0x358] sm:$0xff] }
 0x8a1   :  { %8317 = vrcp.f32 %v2671_v60  ;;  %v2795_v60 = vld [vmem:[#allocation7 + $0x328] sm:$0xff] }
 0x8a2   :  { %8319 = vrcp.f32 %v2678_v4  ;;  %v7330_v4 = vpack.c.bf16 %v2788_v1, %v2782_v5  ;;  %v3134_v5 = vld [vmem:[#allocation9 + $0x38] sm:$0xff]  ;;  %v3137_v1 = vld [vmem:[#allocation9 + $0x50] sm:$0xff] }
 0x8ab   :  { %v8318_v10 = vpop.eup %8317 }
 0x8ac   :  { %v2681_v11 = vmul.f32 %v8318_v10, %v8930_v42  ;;  %v8320_v58 = vpop.eup %8319  ;;  %v2710_v42 = vld [vmem:[#allocation7 + $0x80] sm:$0xff]  ;;  %v7332_v10 = vpack.c.bf16 %v2801_v35, %v2795_v60  ;;  %v7368_v60 = vpack.c.bf16 %v3137_v1, %v3134_v5  ;;  %v3133_v35 = vld [vmem:[#allocation9 + $0x30] sm:$0xff] }
 0x8ad   :  { %v2684_v38 = vsub.f32 1.0, %v8320_v58  ;;  %v2686_v48 = vmul.f32 %v8320_v58, %v8906_v33  ;;  %v7306_v12 = vpack.c.bf16 %v2716_v32, %v2710_v42  ;;  %v2837_v42 = vld [vmem:[#allocation7 + $0x478] sm:$0xff]  ;;  %v3367_v5 = vld [vmem:[#allocation7 + $0xc0] sm:$0xff]  ;;  %v3373_v1 = vld [vmem:[#allocation7 + $0xf0] sm:$0xff] }
 0x8af   :  { %v2663_v14 = vpop.f32.mrb[22].mxu1 }
 0x8b0   :  { %v2682_v15 = vadd.f32 %v2681_v11, %v2663_v14  ;;  %v5951_v16 = vpop.f32.mrb[23].mxu1  ;;  %v2794_v11 = vld [vmem:[#allocation7 + $0x320] sm:$0xff]  ;;  %v2800_v14 = vld [vmem:[#allocation7 + $0x350] sm:$0xff] }
 0x8b1   :  { %v2813_v16 = vld [vmem:[#allocation7 + $0x3b8] sm:$0xff]  ;;  %v7334_v58 = vpack.c.bf16 %v2800_v14, %v2794_v11  ;;  %v3140_v11 = vld [vmem:[#allocation9 + $0x68] sm:$0xff]  ;;  %v3143_v14 = vld [vmem:[#allocation9 + $0x80] sm:$0xff] }
 0x8b2   :  { %8321 = vtanh.f32 %v2682_v15  ;;  %v2807_v15 = vld [vmem:[#allocation7 + $0x388] sm:$0xff] }
 0x8bc   :  { %v8322_v41 = vpop.eup %8321 }
 0x8bd   :  { %v2685_v43 = vmul.f32 %v8322_v41, %v2684_v38  ;;  %v7336_v38 = vpack.c.bf16 %v2813_v16, %v2807_v15  ;;  %v2806_v41 = vld [vmem:[#allocation7 + $0x380] sm:$0xff]  ;;  %v7372_v15 = vpack.c.bf16 %v3143_v14, %v3140_v11  ;;  %v3385_v14 = vld [vmem:[#allocation7 + $0x150] sm:$0xff] }
 0x8be   :  { %v3139_v16 = vld [vmem:[#allocation9 + $0x60] sm:$0xff] }
 0x8bf   :  { %v8940_v7 = vadd.f32 %v2686_v48, %v2685_v43  ;;  %v2825_v43 = vld [vmem:[#allocation7 + $0x418] sm:$0xff]  ;;  %v7338_v48 = vpack.c.bf16 %v2812_v36, %v2806_v41  ;;  %v3149_v36 = vld [vmem:[#allocation9 + $0xb0] sm:$0xff] }
 0x8c0   :  { %v7340_v57 = vpack.c.bf16 %v2825_v43, %v2819_v17  ;;  %v3146_v41 = vld [vmem:[#allocation9 + $0x98] sm:$0xff]  ;;  %v3145_v43 = vld [vmem:[#allocation9 + $0x90] sm:$0xff] }
 0x8c1   :  { %2950 = vmatprep.mubr.f32.mxu0 %v8940_v7  ;;  %3021 = vmatprep.mubr.f32.mxu1 %v8940_v7  ;;  %v7376_v17 = vpack.c.bf16 %v3149_v36, %v3146_v41 }
 0x8c2   :  { %2951 = vmatmul.mubr.f32.vlgmr.msra.gmra.mrb[16].mxu0 %v8919_v62  ;;  %3022 = vmatmul.mubr.f32.vlgmr.msra.gmra.mrb[24].mxu1 %v8919_v62 }
 0x8c3   :  { %7303 = vmatpush1.bf16.msra.mxu0 %v7302_v18  ;;  %3092 = vmatprep.mubr.f32.mxu0 %v8940_v7  ;;  %v2824_v18 = vld [vmem:[#allocation7 + $0x410] sm:$0xff] }
 0x8c4   :  { %7305 = vmatprep.subr.bf16.mxu0 %v7304_v19  ;;  %3239 = vmatprep.mubr.f32.mxu1 %v8554_v0  ;;  %v2831_v19 = vld [vmem:[#allocation7 + $0x448] sm:$0xff]  ;;  %v7342_v32 = vpack.c.bf16 %v2824_v18, %v2818_v6  ;;  %v3155_v18 = vld [vmem:[#allocation9 + $0xe0] sm:$0xff] }
 0x8c5   :  { %v7344_v46 = vpack.c.bf16 %v2837_v42, %v2831_v19  ;;  %v3152_v6 = vld [vmem:[#allocation9 + $0xc8] sm:$0xff]  ;;  %v3151_v42 = vld [vmem:[#allocation9 + $0xc0] sm:$0xff] }
 0x8c6   :  { %v7380_v19 = vpack.c.bf16 %v3155_v18, %v3152_v6 }
 0x8c7   :  { %7307 = vmatpush1.bf16.msra.mxu0 %v7306_v12  ;;  %v2836_v12 = vld [vmem:[#allocation7 + $0x470] sm:$0xff] }
 0x8c8   :  { %7309 = vmatprep.subr.bf16.mxu0 %v7308_v13  ;;  %v2843_v13 = vld [vmem:[#allocation7 + $0x4a8] sm:$0xff]  ;;  %v7346_v26 = vpack.c.bf16 %v2836_v12, %v2830_v47  ;;  %v3158_v47 = vld [vmem:[#allocation9 + $0xf8] sm:$0xff]  ;;  %v3161_v12 = vld [vmem:[#allocation9 + $0x110] sm:$0xff] }
 0x8c9   :  { %v7348_v27 = vpack.c.bf16 %v2849_v61, %v2843_v13  ;;  %v7384_v13 = vpack.c.bf16 %v3161_v12, %v3158_v47  ;;  %v3157_v61 = vld [vmem:[#allocation9 + $0xf0] sm:$0xff] }
 0x8ca   :  { %v3104_v47 = vld [vmem:[#allocation4 + $0x70] sm:$0xff] }
 0x8cb   :  { %7311 = vmatpush1.bf16.msra.mxu0 %v7310_v31  ;;  %v2848_v31 = vld [vmem:[#allocation7 + $0x4d0] sm:$0xff] }
 0x8cc   :  { %7313 = vmatprep.subr.bf16.mxu0 %v7312_v25  ;;  %v2855_v25 = vld [vmem:[#allocation7 + $0x508] sm:$0xff]  ;;  %v7350_v53 = vpack.c.bf16 %v2848_v31, %v2842_v44  ;;  %v3167_v31 = vld [vmem:[#allocation9 + $0x140] sm:$0xff] }
 0x8cd   :  { %v7352_v63 = vpack.c.bf16 %v2861_v45, %v2855_v25  ;;  %v3164_v44 = vld [vmem:[#allocation9 + $0x128] sm:$0xff]  ;;  %v3163_v45 = vld [vmem:[#allocation9 + $0x120] sm:$0xff] }
 0x8ce   :  { %v7388_v25 = vpack.c.bf16 %v3167_v31, %v3164_v44  ;;  %v3132_v44 = vld [vmem:[#allocation9 + $0x28] sm:$0xff] }
 0x8cf   :  { %7315 = vmatpush1.bf16.msra.mxu0 %v7314_v29  ;;  %v2860_v29 = vld [vmem:[#allocation7 + $0x530] sm:$0xff] }
 0x8d0   :  { %7317 = vmatprep.subr.bf16.mxu0 %v7316_v37  ;;  %v2867_v37 = vld [vmem:[#allocation7 + $0x568] sm:$0xff]  ;;  %v7354_v20 = vpack.c.bf16 %v2860_v29, %v2854_v22  ;;  %v3170_v22 = vld [vmem:[#allocation9 + $0x158] sm:$0xff]  ;;  %v3173_v29 = vld [vmem:[#allocation9 + $0x170] sm:$0xff] }
 0x8d1   :  { %v7356_v54 = vpack.c.bf16 %v2873_v51, %v2867_v37  ;;  %v7392_v37 = vpack.c.bf16 %v3173_v29, %v3170_v22  ;;  %v3169_v51 = vld [vmem:[#allocation9 + $0x150] sm:$0xff]  ;;  %v3135_v22 = vld [vmem:[#allocation9 + $0x40] sm:$0xff]  ;;  %v3138_v29 = vld [vmem:[#allocation9 + $0x58] sm:$0xff] }
 0x8d3   :  { %7319 = vmatpush1.bf16.msra.mxu0 %v7318_v52  ;;  %v2872_v52 = vld [vmem:[#allocation7 + $0x590] sm:$0xff] }
 0x8d4   :  { %7321 = vmatprep.subr.bf16.mxu0 %v7320_v3  ;;  %v2879_v3 = vld [vmem:[#allocation7 + $0x5c8] sm:$0xff]  ;;  %v7358_v21 = vpack.c.bf16 %v2872_v52, %v2866_v49  ;;  %v3350_v52 = vld [vmem:[#allocation7 + $0x38] sm:$0xff] }
 0x8d5   :  { %v7360_v24 = vpack.c.bf16 %v2885_v8, %v2879_v3  ;;  %v3344_v49 = vld [vmem:[#allocation7 + $0x8] sm:$0xff]  ;;  %v3343_v3 = vld [vmem:[#allocation7] sm:$0xff] }
 0x8d6   :  { %v7420_v8 = vpack.c.bf16 %v3350_v52, %v3344_v49  ;;  %v3150_v49 = vld [vmem:[#allocation9 + $0xb8] sm:$0xff] }
 0x8d7   :  { %7323 = vmatpush1.bf16.msra.mxu0 %v7322_v50  ;;  %v2884_v50 = vld [vmem:[#allocation7 + $0x5f0] sm:$0xff] }
 0x8d8   :  { %7325 = vmatprep.subr.bf16.mxu0 %v7324_v55  ;;  %v7362_v55 = vpack.c.bf16 %v2884_v50, %v2878_v40  ;;  %v3356_v40 = vld [vmem:[#allocation7 + $0x68] sm:$0xff]  ;;  %v3362_v50 = vld [vmem:[#allocation7 + $0x98] sm:$0xff] }
 0x8d9   :  { %v7424_v56 = vpack.c.bf16 %v3362_v50, %v3356_v40  ;;  %v3162_v40 = vld [vmem:[#allocation9 + $0x118] sm:$0xff] }
 0x8db   :  { %7327 = vmatpush1.bf16.msra.mxu0 %v7326_v30  ;;  %v3130_v30 = vld [vmem:[#allocation9 + $0x18] sm:$0xff] }
 0x8dc   :  { %7329 = vmatprep.subr.bf16.mxu0 %v7328_v59  ;;  %v7366_v59 = vpack.c.bf16 %v3130_v30, %v3127_v23  ;;  %v3368_v23 = vld [vmem:[#allocation7 + $0xc8] sm:$0xff]  ;;  %v3374_v30 = vld [vmem:[#allocation7 + $0xf8] sm:$0xff] }
 0x8de   :  { %7367 = vmatpush1.bf16.msra.mxu1 %v7366_v59  ;;  %v7428_v59 = vpack.c.bf16 %v3374_v30, %v3368_v23  ;;  %v3171_v30 = vld [vmem:[#allocation9 + $0x160] sm:$0xff] }
 0x8df   :  { %7331 = vmatpush1.bf16.msra.mxu0 %v7330_v4  ;;  %v3136_v4 = vld [vmem:[#allocation9 + $0x48] sm:$0xff]  ;;  %7369 = vmatprep.subr.bf16.mxu1 %v7368_v60  ;;  %v7430_v60 = vpack.c.bf16 %v3373_v1, %v3367_v5  ;;  %v3346_v5 = vld [vmem:[#allocation7 + $0x18] sm:$0xff] }
 0x8e0   :  { %7333 = vmatprep.subr.bf16.mxu0 %v7332_v10  ;;  %v7370_v10 = vpack.c.bf16 %v3136_v4, %v3133_v35  ;;  %v3380_v35 = vld [vmem:[#allocation7 + $0x128] sm:$0xff]  ;;  %v3386_v4 = vld [vmem:[#allocation7 + $0x158] sm:$0xff] }
 0x8e1   :  { %v7432_v11 = vpack.c.bf16 %v3386_v4, %v3380_v35  ;;  %v3352_v1 = vld [vmem:[#allocation7 + $0x48] sm:$0xff]  ;;  %v3345_v4 = vld [vmem:[#allocation7 + $0x10] sm:$0xff] }
 0x8e2   :  { %7371 = vmatpush1.bf16.msra.mxu1 %v7370_v10  ;;  %v3379_v10 = vld [vmem:[#allocation7 + $0x120] sm:$0xff]  ;;  %v7484_v35 = vpack.c.bf16 %v3352_v1, %v3346_v5  ;;  %v3418_v5 = vld [vmem:[#allocation7 + $0x258] sm:$0xff] }
 0x8e3   :  { %7335 = vmatpush1.bf16.msra.mxu0 %v7334_v58  ;;  %v3142_v58 = vld [vmem:[#allocation9 + $0x78] sm:$0xff]  ;;  %7373 = vmatprep.subr.bf16.mxu1 %v7372_v15  ;;  %v7434_v15 = vpack.c.bf16 %v3385_v14, %v3379_v10  ;;  %v3351_v10 = vld [vmem:[#allocation7 + $0x40] sm:$0xff]  ;;  %v3364_v14 = vld [vmem:[#allocation7 + $0xa8] sm:$0xff] }
 0x8e4   :  { %7337 = vmatprep.subr.bf16.mxu0 %v7336_v38  ;;  %v7374_v38 = vpack.c.bf16 %v3142_v58, %v3139_v16  ;;  %v3102_v16 = vld [vmem:[#allocation4 + $0x60] sm:$0xff] }
 0x8e6   :  { %7375 = vmatpush1.bf16.msra.mxu1 %v7374_v38 }
 0x8e7   :  { %7339 = vmatpush1.bf16.msra.mxu0 %v7338_v48  ;;  %v3148_v48 = vld [vmem:[#allocation9 + $0xa8] sm:$0xff]  ;;  %7377 = vmatprep.subr.bf16.mxu1 %v7376_v17 }
 0x8e8   :  { %7341 = vmatprep.subr.bf16.mxu0 %v7340_v57  ;;  %v7378_v57 = vpack.c.bf16 %v3148_v48, %v3145_v43  ;;  %v3103_v17 = vld [vmem:[#allocation4 + $0x68] sm:$0xff] }
 0x8ea   :  { %7379 = vmatpush1.bf16.msra.mxu1 %v7378_v57 }
 0x8eb   :  { %7343 = vmatpush1.bf16.msra.mxu0 %v7342_v32  ;;  %v3154_v32 = vld [vmem:[#allocation9 + $0xd8] sm:$0xff]  ;;  %7381 = vmatprep.subr.bf16.mxu1 %v7380_v19 }
 0x8ec   :  { %7345 = vmatprep.subr.bf16.mxu0 %v7344_v46  ;;  %v7382_v46 = vpack.c.bf16 %v3154_v32, %v3151_v42 }
 0x8ee   :  { %7383 = vmatpush1.bf16.msra.mxu1 %v7382_v46 }
 0x8ef   :  { %7347 = vmatpush1.bf16.msra.mxu0 %v7346_v26  ;;  %v3160_v26 = vld [vmem:[#allocation9 + $0x108] sm:$0xff]  ;;  %7385 = vmatprep.subr.bf16.mxu1 %v7384_v13 }
 0x8f0   :  { %7349 = vmatprep.subr.bf16.mxu0 %v7348_v27  ;;  %v7386_v27 = vpack.c.bf16 %v3160_v26, %v3157_v61 }
 0x8f2   :  { %7387 = vmatpush1.bf16.msra.mxu1 %v7386_v27  ;;  %v3129_v27 = vld [vmem:[#allocation9 + $0x10] sm:$0xff] }
 0x8f3   :  { %7351 = vmatpush1.bf16.msra.mxu0 %v7350_v53  ;;  %v3166_v53 = vld [vmem:[#allocation9 + $0x138] sm:$0xff]  ;;  %7389 = vmatprep.subr.bf16.mxu1 %v7388_v25 }
 0x8f4   :  { %7353 = vmatprep.subr.bf16.mxu0 %v7352_v63  ;;  %v7390_v63 = vpack.c.bf16 %v3166_v53, %v3163_v45  ;;  %v7397_v53 = vpack.c.bf16 %v3132_v44, %v3129_v27  ;;  %v3391_v27 = vld [vmem:[#allocation7 + $0x180] sm:$0xff]  ;;  %v3397_v44 = vld [vmem:[#allocation7 + $0x1b0] sm:$0xff] }
 0x8f6   :  { %7391 = vmatpush1.bf16.msra.mxu1 %v7390_v63 }
 0x8f7   :  { %7355 = vmatpush1.bf16.msra.mxu0 %v7354_v20  ;;  %v3172_v20 = vld [vmem:[#allocation9 + $0x168] sm:$0xff]  ;;  %7393 = vmatprep.subr.bf16.mxu1 %v7392_v37  ;;  %v7400_v37 = vpack.c.bf16 %v3138_v29, %v3135_v22  ;;  %v3399_v22 = vld [vmem:[#allocation7 + $0x1c0] sm:$0xff] }
 0x8f8   :  { %7357 = vmatprep.subr.bf16.mxu0 %v7356_v54  ;;  %v7394_v54 = vpack.c.bf16 %v3172_v20, %v3169_v51  ;;  %v3141_v51 = vld [vmem:[#allocation9 + $0x70] sm:$0xff]  ;;  %v3144_v20 = vld [vmem:[#allocation9 + $0x88] sm:$0xff] }
 0x8fa   :  { %7395 = vmatpush1.bf16.msra.mxu1 %v7394_v54  ;;  %v7403_v54 = vpack.c.bf16 %v3144_v20, %v3141_v51  ;;  %v3404_v51 = vld [vmem:[#allocation7 + $0x1e8] sm:$0xff]  ;;  %v3410_v20 = vld [vmem:[#allocation7 + $0x218] sm:$0xff] }
 0x8fb   :  { %7359 = vmatpush1.bf16.msra.mxu0 %v7358_v21  ;;  %7396 = vmatprep.subr.bf16.mxu1 %v8555_v34  ;;  %v3349_v21 = vld [vmem:[#allocation7 + $0x30] sm:$0xff] }
 0x8fc   :  { %7361 = vmatprep.subr.bf16.mxu0 %v7360_v24  ;;  %v7422_v24 = vpack.c.bf16 %v3349_v21, %v3343_v3  ;;  %v3153_v3 = vld [vmem:[#allocation9 + $0xd0] sm:$0xff] }
 0x8ff   :  { %7363 = vmatpush1.bf16.msra.mxu0 %v7362_v55  ;;  %v3355_v55 = vld [vmem:[#allocation7 + $0x60] sm:$0xff] }
 0x900   :  { %7421 = vmatprep.subr.bf16.mxu0 %v7420_v8  ;;  %v7426_v9 = vpack.c.bf16 %v3361_v2, %v3355_v55  ;;  %v3156_v8 = vld [vmem:[#allocation9 + $0xe8] sm:$0xff] }
 0x901   :  { %v7409_v21 = vpack.c.bf16 %v3156_v8, %v3153_v3  ;;  %v3412_v8 = vld [vmem:[#allocation7 + $0x228] sm:$0xff] }
 0x902   :  { %3093 = vmatmul.mubr.f32.vlgmr.msra.gmra.mrb[18].mxu0 %v8919_v62 }
 0x903   :  { %7423 = vmatpush1.bf16.msra.mxu0 %v7422_v24  ;;  %v3159_v24 = vld [vmem:[#allocation9 + $0x100] sm:$0xff] }
 0x904   :  { %7425 = vmatprep.subr.bf16.mxu0 %v7424_v56  ;;  %v7412_v2 = vpack.c.bf16 %v3162_v40, %v3159_v24  ;;  %v3165_v56 = vld [vmem:[#allocation9 + $0x130] sm:$0xff]  ;;  %v3411_v24 = vld [vmem:[#allocation7 + $0x220] sm:$0xff] }
 0x907   :  { %7427 = vmatpush1.bf16.msra.mxu0 %v7426_v9  ;;  %v3168_v9 = vld [vmem:[#allocation9 + $0x148] sm:$0xff] }
 0x908   :  { %7429 = vmatprep.subr.bf16.mxu0 %v7428_v59  ;;  %v7415_v23 = vpack.c.bf16 %v3168_v9, %v3165_v56  ;;  %v3174_v59 = vld [vmem:[#allocation9 + $0x178] sm:$0xff]  ;;  %v3416_v56 = vld [vmem:[#allocation7 + $0x248] sm:$0xff] }
 0x909   :  { %v3422_v9 = vld [vmem:[#allocation7 + $0x278] sm:$0xff] }
 0x90b   :  { %7431 = vmatpush1.bf16.msra.mxu0 %v7430_v60  ;;  %v7418_v60 = vpack.c.bf16 %v3174_v59, %v3171_v30  ;;  %v3415_v30 = vld [vmem:[#allocation7 + $0x240] sm:$0xff]  ;;  %v3421_v59 = vld [vmem:[#allocation7 + $0x270] sm:$0xff] }
 0x90c   :  { %7433 = vmatprep.subr.bf16.mxu0 %v7432_v11  ;;  %v3358_v11 = vld [vmem:[#allocation7 + $0x78] sm:$0xff]  ;;  %v7446_v1 = vpack.c.bf16 %v3421_v59, %v3415_v30  ;;  %v3471_v59 = vld [vmem:[#allocation7 + $0x400] sm:$0xff] }
 0x90f   :  { %7435 = vmatpush1.bf16.msra.mxu0 %v7434_v15  ;;  %v7486_v15 = vpack.c.bf16 %v3351_v10, %v3345_v4  ;;  %v3423_v4 = vld [vmem:[#allocation7 + $0x280] sm:$0xff] }
 0x995   :  { %v2952_v58 = vpop.f32.mrb[16].mxu0  ;;  %v3023_v38 = vpop.f32.mrb[24].mxu1 }
 0x996   :  { %v3106_v41 = vadd.f32 %v3102_v16, %v2952_v58  ;;  %v2954_v36 = vpop.f32.mrb[17].mxu0  ;;  %v8950_v43 = vpop.f32.mrb[25].mxu1  ;;  %v7488_v16 = vpack.c.bf16 %v3364_v14, %v3358_v11  ;;  %v3357_v58 = vld [vmem:[#allocation7 + $0x70] sm:$0xff]  ;;  %v3428_v14 = vld [vmem:[#allocation7 + $0x2a8] sm:$0xff] }
 0x997   :  { %v3113_v57 = vadd.f32 %v3103_v17, %v2954_v36  ;;  %v3376_v36 = vld [vmem:[#allocation7 + $0x108] sm:$0xff] }
 0x998   :  { %v5610_v48 = vmul.f32 -1.442695, %v3106_v41  ;;  %v3370_v41 = vld [vmem:[#allocation7 + $0xd8] sm:$0xff] }
 0x999   :  { %v5611_v6 = vmul.f32 -1.442695, %v3113_v57  ;;  %v3369_v57 = vld [vmem:[#allocation7 + $0xd0] sm:$0xff] }
 0x99a   :  { %8323 = vpow2.f32 %v5610_v48  ;;  %v7492_v48 = vpack.c.bf16 %v3376_v36, %v3370_v41  ;;  %v3430_v41 = vld [vmem:[#allocation7 + $0x2b8] sm:$0xff] }
 0x99b   :  { %8325 = vpow2.f32 %v5611_v6  ;;  %v3375_v6 = vld [vmem:[#allocation7 + $0x100] sm:$0xff] }
 0x9a4   :  { %v8324_v18 = vpop.eup %8323 }
 0x9a5   :  { %v3110_v19 = vadd.f32 1.0, %v8324_v18  ;;  %v8326_v42 = vpop.eup %8325  ;;  %v3382_v18 = vld [vmem:[#allocation7 + $0x138] sm:$0xff] }
 0x9a6   :  { %v3117_v32 = vadd.f32 1.0, %v8326_v42  ;;  %v7494_v42 = vpack.c.bf16 %v3375_v6, %v3369_v57  ;;  %v3435_v57 = vld [vmem:[#allocation7 + $0x2e0] sm:$0xff] }
 0x9a7   :  { %8327 = vrcp.f32 %v3110_v19  ;;  %v3388_v19 = vld [vmem:[#allocation7 + $0x168] sm:$0xff] }
 0x9a8   :  { %8329 = vrcp.f32 %v3117_v32  ;;  %v7496_v32 = vpack.c.bf16 %v3388_v19, %v3382_v18  ;;  %v3440_v19 = vld [vmem:[#allocation7 + $0x308] sm:$0xff] }
 0x9b1   :  { %v8328_v46 = vpop.eup %8327 }
 0x9b2   :  { %v3120_v12 = vmul.f32 %v8328_v46, %v3023_v38  ;;  %v8330_v61 = vpop.eup %8329  ;;  %v3363_v38 = vld [vmem:[#allocation7 + $0xa0] sm:$0xff]  ;;  %v3381_v46 = vld [vmem:[#allocation7 + $0x130] sm:$0xff] }
 0x9b3   :  { %v3123_v26 = vsub.f32 1.0, %v8330_v61  ;;  %v3125_v45 = vmul.f32 %v8330_v61, %v8919_v62  ;;  %v3147_v62 = vld [vmem:[#allocation9 + $0xa0] sm:$0xff]  ;;  %v7490_v17 = vpack.c.bf16 %v3363_v38, %v3357_v58  ;;  %v3398_v61 = vld [vmem:[#allocation7 + $0x1b8] sm:$0xff]  ;;  %v3433_v38 = vld [vmem:[#allocation7 + $0x2d0] sm:$0xff] }
 0x9b4   :  { %v3121_v13 = vadd.f32 %v3120_v12, %v3104_v47  ;;  %v7406_v52 = vpack.c.bf16 %v3150_v49, %v3147_v62  ;;  %v3387_v47 = vld [vmem:[#allocation7 + $0x160] sm:$0xff]  ;;  %v3409_v49 = vld [vmem:[#allocation7 + $0x210] sm:$0xff] }
 0x9b5   :  { %v7498_v12 = vpack.c.bf16 %v3387_v47, %v3381_v46  ;;  %v3403_v62 = vld [vmem:[#allocation7 + $0x1e0] sm:$0xff]  ;;  %v3445_v47 = vld [vmem:[#allocation7 + $0x330] sm:$0xff] }
 0x9b6   :  { %8331 = vtanh.f32 %v3121_v13  ;;  %v3392_v13 = vld [vmem:[#allocation7 + $0x188] sm:$0xff]  ;;  %v7442_v3 = vpack.c.bf16 %v3409_v49, %v3403_v62  ;;  %v3427_v58 = vld [vmem:[#allocation7 + $0x2a0] sm:$0xff]  ;;  %v3453_v62 = vld [vmem:[#allocation7 + $0x370] sm:$0xff] }
 0x9b7   :  { %v7450_v36 = vpack.c.bf16 %v3433_v38, %v3427_v58  ;;  %v3439_v46 = vld [vmem:[#allocation7 + $0x300] sm:$0xff]  ;;  %v3477_v58 = vld [vmem:[#allocation7 + $0x430] sm:$0xff] }
 0x9b8   :  { %v3459_v49 = vld [vmem:[#allocation7 + $0x3a0] sm:$0xff] }
 0x9b9   :  { %v3483_v38 = vld [vmem:[#allocation7 + $0x460] sm:$0xff] }
 0x9c0   :  { %v8332_v31 = vpop.eup %8331 }
 0x9c1   :  { %v3124_v25 = vmul.f32 %v8332_v31, %v3123_v26  ;;  %v7436_v26 = vpack.c.bf16 %v3398_v61, %v3392_v13  ;;  %v3394_v31 = vld [vmem:[#allocation7 + $0x198] sm:$0xff]  ;;  %v7454_v13 = vpack.c.bf16 %v3445_v47, %v3439_v46  ;;  %v3448_v61 = vld [vmem:[#allocation7 + $0x348] sm:$0xff]  ;;  %v3495_v46 = vld [vmem:[#allocation7 + $0x4c0] sm:$0xff] }
 0x9c3   :  { %v8953_v63 = vadd.f32 %v3125_v45, %v3124_v25  ;;  %v7438_v25 = vpack.c.bf16 %v3397_v44, %v3391_v27  ;;  %v3400_v45 = vld [vmem:[#allocation7 + $0x1c8] sm:$0xff]  ;;  %7437 = vmatprep.subr.bf16.mxu0 %v7436_v26  ;;  %v3441_v26 = vld [vmem:[#allocation7 + $0x310] sm:$0xff]  ;;  %v3447_v27 = vld [vmem:[#allocation7 + $0x340] sm:$0xff] }
 0x9c4   :  { %v7500_v29 = vpack.c.bf16 %v3400_v45, %v3394_v31  ;;  %v7518_v31 = vpack.c.bf16 %v3447_v27, %v3441_v26  ;;  %v3458_v45 = vld [vmem:[#allocation7 + $0x398] sm:$0xff]  ;;  %v3499_v27 = vld [vmem:[#allocation7 + $0x4e0] sm:$0xff] }
 0x9c5   :  { %3240 = vmatmul.mubr.f32.vlgmr.msra.gmra.mrb[26].mxu1 %v8953_v63  ;;  %7439 = vmatpush1.bf16.msra.mxu0 %v7438_v25  ;;  %v3452_v25 = vld [vmem:[#allocation7 + $0x368] sm:$0xff] }
 0x9c6   :  { %7398 = vmatpush3.bf16.msra.mxu1 %v7397_v53  ;;  %5984 = vmatprep.mubr.msk.f32.mxu1 %vm8556_vm0, %v8554_v0  ;;  %v3393_v53 = vld [vmem:[#allocation7 + $0x190] sm:$0xff] }
 0x9c7   :  { %7399 = vmatprep.subr.bf16.mxu1 %v8555_v34 }
 0x9ca   :  { %7401 = vmatpush3.bf16.msra.mxu1 %v7400_v37  ;;  %v7502_v37 = vpack.c.bf16 %v3399_v22, %v3393_v53  ;;  %v3451_v53 = vld [vmem:[#allocation7 + $0x360] sm:$0xff]  ;;  %v7456_v22 = vpack.c.bf16 %v3458_v45, %v3452_v25  ;;  %v3508_v45 = vld [vmem:[#allocation7 + $0x528] sm:$0xff] }
 0x9cb   :  { %7402 = vmatprep.subr.bf16.mxu1 %v8555_v34 }
 0x9ce   :  { %7404 = vmatpush3.bf16.msra.mxu1 %v7403_v54  ;;  %v7440_v54 = vpack.c.bf16 %v3410_v20, %v3404_v51  ;;  %v3460_v51 = vld [vmem:[#allocation7 + $0x3a8] sm:$0xff] }
 0x9cf   :  { %7405 = vmatprep.subr.bf16.mxu1 %v8555_v34 }
 0x9d0   :  { %7441 = vmatprep.subr.bf16.mxu0 %v7440_v54 }
 0x9d1   :  { %7443 = vmatpush1.bf16.msra.mxu0 %v7442_v3  ;;  %v7522_v3 = vpack.c.bf16 %v3459_v49, %v3453_v62  ;;  %v3511_v62 = vld [vmem:[#allocation7 + $0x540] sm:$0xff]  ;;  %v3517_v49 = vld [vmem:[#allocation7 + $0x570] sm:$0xff] }
 0x9d2   :  { %7407 = vmatpush3.bf16.msra.mxu1 %v7406_v52  ;;  %v3406_v52 = vld [vmem:[#allocation7 + $0x1f8] sm:$0xff] }
 0x9d3   :  { %7408 = vmatprep.subr.bf16.mxu1 %v8555_v34  ;;  %v7504_v40 = vpack.c.bf16 %v3412_v8, %v3406_v52  ;;  %v3464_v52 = vld [vmem:[#allocation7 + $0x3c8] sm:$0xff]  ;;  %v3470_v8 = vld [vmem:[#allocation7 + $0x3f8] sm:$0xff] }
 0x9d5   :  { %v8962_v50 = vpop.f32.mrb[18].mxu0 }
 0x9d6   :  { %v8964_v55 = vpop.f32.mrb[19].mxu0  ;;  %7410 = vmatpush3.bf16.msra.mxu1 %v7409_v21  ;;  %v3405_v21 = vld [vmem:[#allocation7 + $0x1f0] sm:$0xff] }
 0x9d7   :  { %7411 = vmatprep.subr.bf16.mxu1 %v8555_v34 }
 0x9da   :  { %7413 = vmatpush3.bf16.msra.mxu1 %v7412_v2  ;;  %v7506_v2 = vpack.c.bf16 %v3411_v24, %v3405_v21  ;;  %v3463_v21 = vld [vmem:[#allocation7 + $0x3c0] sm:$0xff]  ;;  %v3469_v24 = vld [vmem:[#allocation7 + $0x3f0] sm:$0xff] }
 0x9db   :  { %7414 = vmatprep.subr.bf16.mxu1 %v8555_v34 }
 0x9de   :  { %7416 = vmatpush3.bf16.msra.mxu1 %v7415_v23  ;;  %v7444_v23 = vpack.c.bf16 %v3422_v9, %v3416_v56  ;;  %v3466_v56 = vld [vmem:[#allocation7 + $0x3d8] sm:$0xff]  ;;  %v3472_v9 = vld [vmem:[#allocation7 + $0x408] sm:$0xff] }
 0x9df   :  { %7417 = vmatprep.subr.bf16.mxu1 %v8555_v34  ;;  %v7524_v30 = vpack.c.bf16 %v3472_v9, %v3466_v56  ;;  %v3524_v56 = vld [vmem:[#allocation7 + $0x5a8] sm:$0xff]  ;;  %v3530_v9 = vld [vmem:[#allocation7 + $0x5d8] sm:$0xff] }
 0x9e0   :  { %7445 = vmatprep.subr.bf16.mxu0 %v7444_v23  ;;  %v3465_v23 = vld [vmem:[#allocation7 + $0x3d0] sm:$0xff] }
 0x9e1   :  { %7447 = vmatpush1.bf16.msra.mxu0 %v7446_v1  ;;  %v3482_v1 = vld [vmem:[#allocation7 + $0x458] sm:$0xff] }
 0x9e2   :  { %7419 = vmatpush3.bf16.msra.mxu1 %v7418_v60  ;;  %v3424_v60 = vld [vmem:[#allocation7 + $0x288] sm:$0xff] }
 0x9e3   :  { %7485 = vmatprep.subr.bf16.mxu1 %v7484_v35  ;;  %v3417_v35 = vld [vmem:[#allocation7 + $0x250] sm:$0xff]  ;;  %v7508_v10 = vpack.c.bf16 %v3424_v60, %v3418_v5  ;;  %v3476_v5 = vld [vmem:[#allocation7 + $0x428] sm:$0xff]  ;;  %v7526_v60 = vpack.c.bf16 %v3471_v59, %v3465_v23  ;;  %v7480_v23 = vpack.c.bf16 %v3530_v9, %v3524_v56  ;;  %v3402_v56 = vld [vmem:[#allocation7 + $0x1d8] sm:$0xff] }
 0x9e4   :  { %v7510_v11 = vpack.c.bf16 %v3423_v4, %v3417_v35  ;;  %v7464_v35 = vpack.c.bf16 %v3482_v1, %v3476_v5  ;;  %v3475_v4 = vld [vmem:[#allocation7 + $0x420] sm:$0xff]  ;;  %v3529_v59 = vld [vmem:[#allocation7 + $0x5d0] sm:$0xff]  ;;  %v3526_v5 = vld [vmem:[#allocation7 + $0x5b8] sm:$0xff] }
 0x9e5   :  { %5985 = vmatmul.mubr.f32.vlgmr.msra.gmra.mrb[28].mxu1 %v8953_v63 }
 0x9e6   :  { %7487 = vmatpush1.bf16.msra.mxu1 %v7486_v15  ;;  %v3434_v15 = vld [vmem:[#allocation7 + $0x2d8] sm:$0xff] }
 0x9e7   :  { %7489 = vmatprep.subr.bf16.mxu1 %v7488_v16  ;;  %v7448_v16 = vpack.c.bf16 %v3434_v15, %v3428_v14  ;;  %v3484_v14 = vld [vmem:[#allocation7 + $0x468] sm:$0xff] }
 0x9e9   :  { %7449 = vmatprep.subr.bf16.mxu0 %v7448_v16 }
 0x9ea   :  { %7491 = vmatpush1.bf16.msra.mxu1 %v7490_v17  ;;  %v3436_v17 = vld [vmem:[#allocation7 + $0x2e8] sm:$0xff]  ;;  %7451 = vmatpush1.bf16.msra.mxu0 %v7450_v36 }
 0x9eb   :  { %7493 = vmatprep.subr.bf16.mxu1 %v7492_v48  ;;  %v3429_v48 = vld [vmem:[#allocation7 + $0x2b0] sm:$0xff]  ;;  %v7512_v6 = vpack.c.bf16 %v3436_v17, %v3430_v41  ;;  %v7530_v41 = vpack.c.bf16 %v3483_v38, %v3477_v58  ;;  %v3488_v36 = vld [vmem:[#allocation7 + $0x488] sm:$0xff]  ;;  %v3494_v17 = vld [vmem:[#allocation7 + $0x4b8] sm:$0xff] }
 0x9ec   :  { %v7514_v18 = vpack.c.bf16 %v3435_v57, %v3429_v48  ;;  %v7468_v48 = vpack.c.bf16 %v3494_v17, %v3488_v36  ;;  %v3487_v57 = vld [vmem:[#allocation7 + $0x480] sm:$0xff] }
 0x9ee   :  { %7495 = vmatpush1.bf16.msra.mxu1 %v7494_v42  ;;  %v3446_v42 = vld [vmem:[#allocation7 + $0x338] sm:$0xff] }
 0x9ef   :  { %7497 = vmatprep.subr.bf16.mxu1 %v7496_v32  ;;  %v7452_v32 = vpack.c.bf16 %v3446_v42, %v3440_v19  ;;  %v3496_v42 = vld [vmem:[#allocation7 + $0x4c8] sm:$0xff] }
 0x9f1   :  { %7453 = vmatprep.subr.bf16.mxu0 %v7452_v32  ;;  %v3489_v32 = vld [vmem:[#allocation7 + $0x490] sm:$0xff] }
 0x9f2   :  { %7499 = vmatpush1.bf16.msra.mxu1 %v7498_v12  ;;  %v3442_v12 = vld [vmem:[#allocation7 + $0x318] sm:$0xff]  ;;  %7455 = vmatpush1.bf16.msra.mxu0 %v7454_v13  ;;  %v3500_v13 = vld [vmem:[#allocation7 + $0x4e8] sm:$0xff] }
 0x9f3   :  { %7501 = vmatprep.subr.bf16.mxu1 %v7500_v29  ;;  %v7516_v44 = vpack.c.bf16 %v3448_v61, %v3442_v12  ;;  %v3457_v29 = vld [vmem:[#allocation7 + $0x390] sm:$0xff]  ;;  %7457 = vmatprep.subr.bf16.mxu0 %v7456_v22  ;;  %v7534_v12 = vpack.c.bf16 %v3495_v46, %v3489_v32  ;;  %v3506_v61 = vld [vmem:[#allocation7 + $0x518] sm:$0xff]  ;;  %v3507_v22 = vld [vmem:[#allocation7 + $0x520] sm:$0xff] }
 0x9f4   :  { %v7458_v20 = vpack.c.bf16 %v3457_v29, %v3451_v53  ;;  %v7472_v26 = vpack.c.bf16 %v3506_v61, %v3500_v13  ;;  %v3501_v53 = vld [vmem:[#allocation7 + $0x4f0] sm:$0xff]  ;;  %v3347_v61 = vld [vmem:[#allocation7 + $0x20] sm:$0xff] }
 0x9f6   :  { %7503 = vmatpush1.bf16.msra.mxu1 %v7502_v37  ;;  %v3454_v37 = vld [vmem:[#allocation7 + $0x378] sm:$0xff]  ;;  %7459 = vmatpush1.bf16.msra.mxu0 %v7458_v20 }
 0x9f7   :  { %7505 = vmatprep.subr.bf16.mxu1 %v7504_v40  ;;  %v7520_v54 = vpack.c.bf16 %v3460_v51, %v3454_v37  ;;  %v7460_v40 = vpack.c.bf16 %v3470_v8, %v3464_v52  ;;  %v7538_v37 = vpack.c.bf16 %v3507_v22, %v3501_v53  ;;  %v3512_v51 = vld [vmem:[#allocation7 + $0x548] sm:$0xff]  ;;  %v3518_v20 = vld [vmem:[#allocation7 + $0x578] sm:$0xff] }
 0x9f8   :  { %v3514_v52 = vld [vmem:[#allocation7 + $0x558] sm:$0xff]  ;;  %v3520_v8 = vld [vmem:[#allocation7 + $0x588] sm:$0xff] }
 0x9f9   :  { %7461 = vmatprep.subr.bf16.mxu0 %v7460_v40  ;;  %v7540_v40 = vpack.c.bf16 %v3520_v8, %v3514_v52  ;;  %v3384_v52 = vld [vmem:[#allocation7 + $0x148] sm:$0xff] }
 0x9fa   :  { %7507 = vmatpush1.bf16.msra.mxu1 %v7506_v2  ;;  %v7462_v2 = vpack.c.bf16 %v3469_v24, %v3463_v21  ;;  %v3513_v21 = vld [vmem:[#allocation7 + $0x550] sm:$0xff]  ;;  %v3519_v24 = vld [vmem:[#allocation7 + $0x580] sm:$0xff] }
 0x9fb   :  { %7509 = vmatprep.subr.bf16.mxu1 %v7508_v10  ;;  %v3481_v10 = vld [vmem:[#allocation7 + $0x450] sm:$0xff] }
 0x9fc   :  { %7463 = vmatpush1.bf16.msra.mxu0 %v7462_v2  ;;  %v7466_v15 = vpack.c.bf16 %v3481_v10, %v3475_v4  ;;  %v7542_v2 = vpack.c.bf16 %v3519_v24, %v3513_v21  ;;  %v3531_v4 = vld [vmem:[#allocation7 + $0x5e0] sm:$0xff] }
 0x9fd   :  { %7465 = vmatprep.subr.bf16.mxu0 %v7464_v35  ;;  %v3525_v35 = vld [vmem:[#allocation7 + $0x5b0] sm:$0xff]  ;;  %v3383_v24 = vld [vmem:[#allocation7 + $0x140] sm:$0xff] }
 0x9fe   :  { %7511 = vmatpush1.bf16.msra.mxu1 %v7510_v11  ;;  %v3478_v11 = vld [vmem:[#allocation7 + $0x438] sm:$0xff] }
 0x9ff   :  { %7513 = vmatprep.subr.bf16.mxu1 %v7512_v6  ;;  %v7528_v16 = vpack.c.bf16 %v3484_v14, %v3478_v11  ;;  %v3493_v6 = vld [vmem:[#allocation7 + $0x4b0] sm:$0xff]  ;;  %v7546_v11 = vpack.c.bf16 %v3531_v4, %v3525_v35  ;;  %v3348_v14 = vld [vmem:[#allocation7 + $0x28] sm:$0xff]  ;;  %v3407_v4 = vld [vmem:[#allocation7 + $0x200] sm:$0xff] }
 0xa00   :  { %7467 = vmatpush1.bf16.msra.mxu0 %v7466_v15  ;;  %v7470_v19 = vpack.c.bf16 %v3493_v6, %v3487_v57  ;;  %v3354_v15 = vld [vmem:[#allocation7 + $0x58] sm:$0xff] }
 0xa01   :  { %7469 = vmatprep.subr.bf16.mxu0 %v7468_v48 }
 0xa02   :  { %7515 = vmatpush1.bf16.msra.mxu1 %v7514_v18  ;;  %v3490_v18 = vld [vmem:[#allocation7 + $0x498] sm:$0xff] }
 0xa03   :  { %7517 = vmatprep.subr.bf16.mxu1 %v7516_v44  ;;  %v7532_v47 = vpack.c.bf16 %v3496_v42, %v3490_v18  ;;  %v3505_v44 = vld [vmem:[#allocation7 + $0x510] sm:$0xff] }
 0xa04   :  { %7471 = vmatpush1.bf16.msra.mxu0 %v7470_v19  ;;  %v7474_v25 = vpack.c.bf16 %v3505_v44, %v3499_v27 }
 0xa05   :  { %7473 = vmatprep.subr.bf16.mxu0 %v7472_v26  ;;  %v3353_v26 = vld [vmem:[#allocation7 + $0x50] sm:$0xff] }
 0xa06   :  { %7519 = vmatpush1.bf16.msra.mxu1 %v7518_v31  ;;  %v3502_v31 = vld [vmem:[#allocation7 + $0x4f8] sm:$0xff]  ;;  %v7550_v53 = vpack.c.bf16 %v3353_v26, %v3347_v61  ;;  %v3455_v61 = vld [vmem:[#allocation7 + $0x380] sm:$0xff]  ;;  %v3461_v26 = vld [vmem:[#allocation7 + $0x3b0] sm:$0xff] }
 0xa07   :  { %7521 = vmatprep.subr.bf16.mxu1 %v7520_v54  ;;  %v7536_v29 = vpack.c.bf16 %v3508_v45, %v3502_v31  ;;  %v7476_v54 = vpack.c.bf16 %v3518_v20, %v3512_v51  ;;  %v3360_v31 = vld [vmem:[#allocation7 + $0x88] sm:$0xff]  ;;  %v3378_v51 = vld [vmem:[#allocation7 + $0x118] sm:$0xff] }
 0xa08   :  { %7475 = vmatpush1.bf16.msra.mxu0 %v7474_v25  ;;  %v3366_v25 = vld [vmem:[#allocation7 + $0xb8] sm:$0xff] }
 0xa09   :  { %7477 = vmatprep.subr.bf16.mxu0 %v7476_v54  ;;  %v7552_v22 = vpack.c.bf16 %v3366_v25, %v3360_v31  ;;  %v7586_v31 = vpack.c.bf16 %v3461_v26, %v3455_v61  ;;  %v3795_v26 = vld [vmem:[#allocation9 + $0x98] sm:$0xff] }
 0xa0a   :  { %7523 = vmatpush1.bf16.msra.mxu1 %v7522_v3  ;;  %v7478_v3 = vpack.c.bf16 %v3517_v49, %v3511_v62  ;;  %v3371_v62 = vld [vmem:[#allocation7 + $0xe0] sm:$0xff]  ;;  %v3377_v49 = vld [vmem:[#allocation7 + $0x110] sm:$0xff] }
 0xa0b   :  { %7525 = vmatprep.subr.bf16.mxu1 %v7524_v30  ;;  %v3523_v30 = vld [vmem:[#allocation7 + $0x5a0] sm:$0xff]  ;;  %v7558_v8 = vpack.c.bf16 %v3377_v49, %v3371_v62  ;;  %v3492_v62 = vld [vmem:[#allocation7 + $0x4a8] sm:$0xff]  ;;  %v3498_v49 = vld [vmem:[#allocation7 + $0x4d8] sm:$0xff] }
 0xa0c   :  { %7479 = vmatpush1.bf16.msra.mxu0 %v7478_v3  ;;  %v7482_v1 = vpack.c.bf16 %v3529_v59, %v3523_v30  ;;  %v3390_v3 = vld [vmem:[#allocation7 + $0x178] sm:$0xff]  ;;  %v3395_v30 = vld [vmem:[#allocation7 + $0x1a0] sm:$0xff]  ;;  %v3401_v59 = vld [vmem:[#allocation7 + $0x1d0] sm:$0xff] }
 0xa0d   :  { %7481 = vmatprep.subr.bf16.mxu0 %v7480_v23  ;;  %v7560_v21 = vpack.c.bf16 %v3390_v3, %v3384_v52  ;;  %v7596_v3 = vpack.c.bf16 %v3498_v49, %v3492_v62  ;;  %v3810_v62 = vld [vmem:[#allocation9 + $0x110] sm:$0xff] }
 0xa0e   :  { %7527 = vmatpush1.bf16.msra.mxu1 %v7526_v60  ;;  %v3532_v60 = vld [vmem:[#allocation7 + $0x5e8] sm:$0xff] }
 0xa0f   :  { %7529 = vmatprep.subr.bf16.mxu1 %v7528_v16  ;;  %v7544_v10 = vpack.c.bf16 %v3532_v60, %v3526_v5  ;;  %v7548_v16 = vpack.c.bf16 %v3354_v15, %v3348_v14  ;;  %v3408_v5 = vld [vmem:[#allocation7 + $0x208] sm:$0xff]  ;;  %v7566_v60 = vpack.c.bf16 %v3401_v59, %v3395_v30  ;;  %v3426_v14 = vld [vmem:[#allocation7 + $0x298] sm:$0xff] }
 0xa10   :  { %7483 = vmatpush1.bf16.msra.mxu0 %v7482_v1  ;;  %v3414_v1 = vld [vmem:[#allocation7 + $0x238] sm:$0xff]  ;;  %v3516_v30 = vld [vmem:[#allocation7 + $0x568] sm:$0xff] }
 0xa11   :  { %7549 = vmatprep.subr.bf16.mxu0 %v7548_v16  ;;  %v7568_v35 = vpack.c.bf16 %v3414_v1, %v3408_v5  ;;  %v3522_v59 = vld [vmem:[#allocation7 + $0x598] sm:$0xff] }
 0xa12   :  { %7531 = vmatpush1.bf16.msra.mxu1 %v7530_v41  ;;  %v7604_v1 = vpack.c.bf16 %v3522_v59, %v3516_v30  ;;  %v3822_v30 = vld [vmem:[#allocation9 + $0x170] sm:$0xff] }
 0xa13   :  { %7533 = vmatprep.subr.bf16.mxu1 %v7532_v47 }
 0xa16   :  { %7535 = vmatpush1.bf16.msra.mxu1 %v7534_v12 }
 0xa17   :  { %7537 = vmatprep.subr.bf16.mxu1 %v7536_v29  ;;  %v3365_v29 = vld [vmem:[#allocation7 + $0xb0] sm:$0xff] }
 0xa1a   :  { %7539 = vmatpush1.bf16.msra.mxu1 %v7538_v37  ;;  %v3372_v37 = vld [vmem:[#allocation7 + $0xe8] sm:$0xff] }
 0xa1b   :  { %7541 = vmatprep.subr.bf16.mxu1 %v7540_v40  ;;  %v7556_v54 = vpack.c.bf16 %v3378_v51, %v3372_v37  ;;  %v3389_v40 = vld [vmem:[#allocation7 + $0x170] sm:$0xff] }
 0xa1c   :  { %v7562_v9 = vpack.c.bf16 %v3389_v40, %v3383_v24  ;;  %v3504_v24 = vld [vmem:[#allocation7 + $0x508] sm:$0xff]  ;;  %v3510_v40 = vld [vmem:[#allocation7 + $0x538] sm:$0xff] }
 0xa1e   :  { %7543 = vmatpush1.bf16.msra.mxu1 %v7542_v2  ;;  %v3396_v2 = vld [vmem:[#allocation7 + $0x1a8] sm:$0xff] }
 0xa1f   :  { %7545 = vmatprep.subr.bf16.mxu1 %v7544_v10  ;;  %v7564_v23 = vpack.c.bf16 %v3402_v56, %v3396_v2  ;;  %v3413_v10 = vld [vmem:[#allocation7 + $0x230] sm:$0xff]  ;;  %v7600_v56 = vpack.c.bf16 %v3510_v40, %v3504_v24  ;;  %v3816_v24 = vld [vmem:[#allocation9 + $0x140] sm:$0xff] }
 0xa20   :  { %v7570_v15 = vpack.c.bf16 %v3413_v10, %v3407_v4  ;;  %v3528_v4 = vld [vmem:[#allocation7 + $0x5c8] sm:$0xff]  ;;  %v3534_v10 = vld [vmem:[#allocation7 + $0x5f8] sm:$0xff] }
 0xa22   :  { %7547 = vmatpush1.bf16.msra.mxu1 %v7546_v11  ;;  %v3420_v11 = vld [vmem:[#allocation7 + $0x268] sm:$0xff] }
 0xa23   :  { %v7572_v16 = vpack.c.bf16 %v3426_v14, %v3420_v11  ;;  %v7608_v14 = vpack.c.bf16 %v3534_v10, %v3528_v4  ;;  %v3999_v4 = vld [vmem:[#allocation7 + $0x38] sm:$0xff]  ;;  %v3992_v10 = vld [vmem:[#allocation7] sm:$0xff] }
 0xa98   :  { %v3241_v58 = vpop.f32.mrb[26].mxu1 }
 0xa99   :  { %v3316_v38 = vadd.f32 %v3241_v58, %v8950_v43  ;;  %v3243_v41 = vpop.f32.mrb[27].mxu1  ;;  %v3419_v58 = vld [vmem:[#allocation7 + $0x260] sm:$0xff] }
 0xa9a   :  { %v3323_v36 = vadd.f32 %v3243_v41, %v8962_v50  ;;  %v3432_v41 = vld [vmem:[#allocation7 + $0x2c8] sm:$0xff] }
 0xa9b   :  { %v5612_v17 = vmul.f32 -1.442695, %v3316_v38  ;;  %v3425_v38 = vld [vmem:[#allocation7 + $0x290] sm:$0xff] }
 0xa9c   :  { %v5613_v48 = vmul.f32 -1.442695, %v3323_v36  ;;  %v3438_v36 = vld [vmem:[#allocation7 + $0x2f8] sm:$0xff] }
 0xa9d   :  { %8333 = vpow2.f32 %v5612_v17  ;;  %v7574_v17 = vpack.c.bf16 %v3425_v38, %v3419_v58  ;;  %v3777_v38 = vld [vmem:[#allocation9 + $0x8] sm:$0xff] }
 0xa9e   :  { %8335 = vpow2.f32 %v5613_v48  ;;  %v7576_v48 = vpack.c.bf16 %v3438_v36, %v3432_v41  ;;  %v3780_v41 = vld [vmem:[#allocation9 + $0x20] sm:$0xff] }
 0xa9f   :  { %v7612_v36 = vpack.c.bf16 %v3780_v41, %v3777_v38  ;;  %v4004_v38 = vld [vmem:[#allocation7 + $0x60] sm:$0xff]  ;;  %v4010_v41 = vld [vmem:[#allocation7 + $0x90] sm:$0xff] }
 0xaa1   :  { %7613 = vmatprep.subr.bf16.mxu1 %v7612_v36 }
 0xaa7   :  { %v8334_v57 = vpop.eup %8333 }
 0xaa8   :  { %v3320_v6 = vadd.f32 1.0, %v8334_v57  ;;  %v8336_v18 = vpop.eup %8335  ;;  %v3431_v57 = vld [vmem:[#allocation7 + $0x2c0] sm:$0xff] }
 0xaa9   :  { %v3327_v19 = vadd.f32 1.0, %v8336_v18  ;;  %v3444_v18 = vld [vmem:[#allocation7 + $0x328] sm:$0xff] }
 0xaaa   :  { %8337 = vrcp.f32 %v3320_v6  ;;  %v3437_v6 = vld [vmem:[#allocation7 + $0x2f0] sm:$0xff] }
 0xaab   :  { %8339 = vrcp.f32 %v3327_v19  ;;  %v3450_v19 = vld [vmem:[#allocation7 + $0x358] sm:$0xff] }
 0xab4   :  { %v8338_v42 = vpop.eup %8337 }
 0xab5   :  { %v3330_v32 = vmul.f32 %v8338_v42, %v8964_v55  ;;  %v8340_v43 = vpop.eup %8339  ;;  %v3359_v55 = vld [vmem:[#allocation7 + $0x80] sm:$0xff]  ;;  %v7578_v42 = vpack.c.bf16 %v3437_v6, %v3431_v57  ;;  %v3783_v6 = vld [vmem:[#allocation9 + $0x38] sm:$0xff] }
 0xab6   :  { %v3333_v13 = vsub.f32 1.0, %v8340_v43  ;;  %v3335_v44 = vmul.f32 %v8340_v43, %v8940_v7  ;;  %v7554_v20 = vpack.c.bf16 %v3365_v29, %v3359_v55  ;;  %v3462_v43 = vld [vmem:[#allocation7 + $0x3b8] sm:$0xff]  ;;  %v3480_v55 = vld [vmem:[#allocation7 + $0x448] sm:$0xff] }
 0xab7   :  { %v3486_v29 = vld [vmem:[#allocation7 + $0x478] sm:$0xff] }
 0xab8   :  { %v3312_v46 = vpop.f32.mrb[28].mxu1  ;;  %v7592_v51 = vpack.c.bf16 %v3486_v29, %v3480_v55  ;;  %v3804_v55 = vld [vmem:[#allocation9 + $0xe0] sm:$0xff] }
 0xab9   :  { %v3331_v47 = vadd.f32 %v3330_v32, %v3312_v46  ;;  %v5986_v12 = vpop.f32.mrb[29].mxu1  ;;  %v7580_v32 = vpack.c.bf16 %v3450_v19, %v3444_v18  ;;  %v3443_v46 = vld [vmem:[#allocation7 + $0x320] sm:$0xff]  ;;  %v3786_v18 = vld [vmem:[#allocation9 + $0x50] sm:$0xff] }
 0xaba   :  { %v3456_v12 = vld [vmem:[#allocation7 + $0x388] sm:$0xff]  ;;  %v7616_v19 = vpack.c.bf16 %v3786_v18, %v3783_v6  ;;  %v4016_v18 = vld [vmem:[#allocation7 + $0xc0] sm:$0xff] }
 0xabb   :  { %8341 = vtanh.f32 %v3331_v47  ;;  %v3449_v47 = vld [vmem:[#allocation7 + $0x350] sm:$0xff] }
 0xac5   :  { %v8342_v50 = vpop.eup %8341 }
 0xac6   :  { %v3334_v27 = vmul.f32 %v8342_v50, %v3333_v13  ;;  %v7582_v13 = vpack.c.bf16 %v3449_v47, %v3443_v46  ;;  %v7584_v50 = vpack.c.bf16 %v3462_v43, %v3456_v12  ;;  %v3789_v47 = vld [vmem:[#allocation9 + $0x68] sm:$0xff]  ;;  %v3792_v12 = vld [vmem:[#allocation9 + $0x80] sm:$0xff] }
 0xac7   :  { %v7620_v43 = vpack.c.bf16 %v3792_v12, %v3789_v47  ;;  %v4028_v47 = vld [vmem:[#allocation7 + $0x120] sm:$0xff] }
 0xac8   :  { %v8974_v45 = vadd.f32 %v3335_v44, %v3334_v27  ;;  %v3468_v27 = vld [vmem:[#allocation7 + $0x3e8] sm:$0xff]  ;;  %v3474_v44 = vld [vmem:[#allocation7 + $0x418] sm:$0xff] }
 0xac9   :  { %v7588_v25 = vpack.c.bf16 %v3474_v44, %v3468_v27  ;;  %v3798_v27 = vld [vmem:[#allocation9 + $0xb0] sm:$0xff] }
 0xaca   :  { %3599 = vmatprep.mubr.f32.mxu0 %v8974_v45  ;;  %3670 = vmatprep.mubr.f32.mxu1 %v8974_v45  ;;  %v7624_v44 = vpack.c.bf16 %v3798_v27, %v3795_v26 }
 0xacb   :  { %3600 = vmatmul.mubr.f32.vlgmr.msra.gmra.mrb[20].mxu0 %v8953_v63  ;;  %3671 = vmatmul.mubr.f32.vlgmr.msra.gmra.mrb[30].mxu1 %v8953_v63 }
 0xacc   :  { %7551 = vmatpush1.bf16.msra.mxu0 %v7550_v53  ;;  %3741 = vmatprep.mubr.f32.mxu0 %v8974_v45  ;;  %v3467_v53 = vld [vmem:[#allocation7 + $0x3e0] sm:$0xff] }
 0xacd   :  { %7553 = vmatprep.subr.bf16.mxu0 %v7552_v22  ;;  %3888 = vmatprep.mubr.f32.mxu1 %v8554_v0  ;;  %v3473_v22 = vld [vmem:[#allocation7 + $0x410] sm:$0xff] }
 0xace   :  { %v7590_v37 = vpack.c.bf16 %v3473_v22, %v3467_v53  ;;  %v3801_v22 = vld [vmem:[#allocation9 + $0xc8] sm:$0xff] }
 0xacf   :  { %v7628_v29 = vpack.c.bf16 %v3804_v55, %v3801_v22 }
 0xad0   :  { %7555 = vmatpush1.bf16.msra.mxu0 %v7554_v20  ;;  %v3479_v20 = vld [vmem:[#allocation7 + $0x440] sm:$0xff] }
 0xad1   :  { %7557 = vmatprep.subr.bf16.mxu0 %v7556_v54  ;;  %v3485_v54 = vld [vmem:[#allocation7 + $0x470] sm:$0xff] }
 0xad2   :  { %v7594_v52 = vpack.c.bf16 %v3485_v54, %v3479_v20  ;;  %v3807_v54 = vld [vmem:[#allocation9 + $0xf8] sm:$0xff] }
 0xad3   :  { %v7632_v49 = vpack.c.bf16 %v3810_v62, %v3807_v54  ;;  %v3753_v62 = vld [vmem:[#allocation4 + $0x88] sm:$0xff] }
 0xad4   :  { %7559 = vmatpush1.bf16.msra.mxu0 %v7558_v8  ;;  %v3491_v8 = vld [vmem:[#allocation7 + $0x4a0] sm:$0xff] }
 0xad5   :  { %7561 = vmatprep.subr.bf16.mxu0 %v7560_v21  ;;  %v3497_v21 = vld [vmem:[#allocation7 + $0x4d0] sm:$0xff] }
 0xad6   :  { %v7598_v2 = vpack.c.bf16 %v3497_v21, %v3491_v8  ;;  %v3813_v21 = vld [vmem:[#allocation9 + $0x128] sm:$0xff] }
 0xad7   :  { %v7636_v40 = vpack.c.bf16 %v3816_v24, %v3813_v21  ;;  %v3778_v21 = vld [vmem:[#allocation9 + $0x10] sm:$0xff]  ;;  %v3781_v24 = vld [vmem:[#allocation9 + $0x28] sm:$0xff] }
 0xad8   :  { %7563 = vmatpush1.bf16.msra.mxu0 %v7562_v9  ;;  %v3503_v9 = vld [vmem:[#allocation7 + $0x500] sm:$0xff] }
 0xad9   :  { %7565 = vmatprep.subr.bf16.mxu0 %v7564_v23  ;;  %v3509_v23 = vld [vmem:[#allocation7 + $0x530] sm:$0xff] }
 0xada   :  { %v7602_v5 = vpack.c.bf16 %v3509_v23, %v3503_v9  ;;  %v3819_v23 = vld [vmem:[#allocation9 + $0x158] sm:$0xff] }
 0xadb   :  { %v7640_v59 = vpack.c.bf16 %v3822_v30, %v3819_v23  ;;  %v3784_v30 = vld [vmem:[#allocation9 + $0x40] sm:$0xff] }
 0xadc   :  { %7567 = vmatpush1.bf16.msra.mxu0 %v7566_v60  ;;  %v3515_v60 = vld [vmem:[#allocation7 + $0x560] sm:$0xff] }
 0xadd   :  { %7569 = vmatprep.subr.bf16.mxu0 %v7568_v35  ;;  %v3521_v35 = vld [vmem:[#allocation7 + $0x590] sm:$0xff] }
 0xade   :  { %v7606_v11 = vpack.c.bf16 %v3521_v35, %v3515_v60  ;;  %v3993_v35 = vld [vmem:[#allocation7 + $0x8] sm:$0xff] }
 0xae0   :  { %7571 = vmatpush1.bf16.msra.mxu0 %v7570_v15  ;;  %v3527_v15 = vld [vmem:[#allocation7 + $0x5c0] sm:$0xff] }
 0xae1   :  { %7573 = vmatprep.subr.bf16.mxu0 %v7572_v16  ;;  %v3533_v16 = vld [vmem:[#allocation7 + $0x5f0] sm:$0xff] }
 0xae2   :  { %v7610_v58 = vpack.c.bf16 %v3533_v16, %v3527_v15  ;;  %v4005_v16 = vld [vmem:[#allocation7 + $0x68] sm:$0xff] }
 0xae4   :  { %7575 = vmatpush1.bf16.msra.mxu0 %v7574_v17  ;;  %v3776_v17 = vld [vmem:[#allocation9] sm:$0xff] }
 0xae5   :  { %7577 = vmatprep.subr.bf16.mxu0 %v7576_v48  ;;  %v3779_v48 = vld [vmem:[#allocation9 + $0x18] sm:$0xff] }
 0xae6   :  { %v7614_v57 = vpack.c.bf16 %v3779_v48, %v3776_v17  ;;  %v7674_v17 = vpack.c.bf16 %v4010_v41, %v4004_v38  ;;  %v4017_v48 = vld [vmem:[#allocation7 + $0xc8] sm:$0xff] }
 0xae8   :  { %7579 = vmatpush1.bf16.msra.mxu0 %v7578_v42  ;;  %7615 = vmatpush1.bf16.msra.mxu1 %v7614_v57  ;;  %v3782_v42 = vld [vmem:[#allocation9 + $0x30] sm:$0xff]  ;;  %v4023_v57 = vld [vmem:[#allocation7 + $0xf8] sm:$0xff] }
 0xae9   :  { %7581 = vmatprep.subr.bf16.mxu0 %v7580_v32  ;;  %v3785_v32 = vld [vmem:[#allocation9 + $0x48] sm:$0xff]  ;;  %7617 = vmatprep.subr.bf16.mxu1 %v7616_v19  ;;  %v7676_v6 = vpack.c.bf16 %v4023_v57, %v4017_v48  ;;  %v4022_v19 = vld [vmem:[#allocation7 + $0xf0] sm:$0xff] }
 0xaea   :  { %v7618_v46 = vpack.c.bf16 %v3785_v32, %v3782_v42  ;;  %v7678_v42 = vpack.c.bf16 %v4022_v19, %v4016_v18  ;;  %v4029_v32 = vld [vmem:[#allocation7 + $0x128] sm:$0xff]  ;;  %v3823_v18 = vld [vmem:[#allocation9 + $0x178] sm:$0xff] }
 0xaeb   :  { %v3817_v48 = vld [vmem:[#allocation9 + $0x148] sm:$0xff]  ;;  %v3995_v19 = vld [vmem:[#allocation7 + $0x18] sm:$0xff] }
 0xaec   :  { %7583 = vmatpush1.bf16.msra.mxu0 %v7582_v13  ;;  %7619 = vmatpush1.bf16.msra.mxu1 %v7618_v46  ;;  %v3788_v13 = vld [vmem:[#allocation9 + $0x60] sm:$0xff]  ;;  %v4035_v46 = vld [vmem:[#allocation7 + $0x158] sm:$0xff] }
 0xaed   :  { %7585 = vmatprep.subr.bf16.mxu0 %v7584_v50  ;;  %v3791_v50 = vld [vmem:[#allocation9 + $0x78] sm:$0xff]  ;;  %7621 = vmatprep.subr.bf16.mxu1 %v7620_v43  ;;  %v7680_v12 = vpack.c.bf16 %v4035_v46, %v4029_v32  ;;  %v4034_v43 = vld [vmem:[#allocation7 + $0x150] sm:$0xff] }
 0xaee   :  { %v7622_v61 = vpack.c.bf16 %v3791_v50, %v3788_v13  ;;  %v7682_v13 = vpack.c.bf16 %v4034_v43, %v4028_v47  ;;  %v3751_v50 = vld [vmem:[#allocation4 + $0x78] sm:$0xff]  ;;  %v3994_v47 = vld [vmem:[#allocation7 + $0x10] sm:$0xff] }
 0xaef   :  { %v4007_v43 = vld [vmem:[#allocation7 + $0x78] sm:$0xff] }
 0xaf0   :  { %7587 = vmatpush1.bf16.msra.mxu0 %v7586_v31  ;;  %7623 = vmatpush1.bf16.msra.mxu1 %v7622_v61  ;;  %v3794_v31 = vld [vmem:[#allocation9 + $0x90] sm:$0xff] }
 0xaf1   :  { %7589 = vmatprep.subr.bf16.mxu0 %v7588_v25  ;;  %v3797_v25 = vld [vmem:[#allocation9 + $0xa8] sm:$0xff]  ;;  %7625 = vmatprep.subr.bf16.mxu1 %v7624_v44 }
 0xaf2   :  { %v7626_v53 = vpack.c.bf16 %v3797_v25, %v3794_v31  ;;  %v3752_v31 = vld [vmem:[#allocation4 + $0x80] sm:$0xff] }
 0xaf4   :  { %7591 = vmatpush1.bf16.msra.mxu0 %v7590_v37  ;;  %7627 = vmatpush1.bf16.msra.mxu1 %v7626_v53  ;;  %v3800_v37 = vld [vmem:[#allocation9 + $0xc0] sm:$0xff] }
 0xaf5   :  { %7593 = vmatprep.subr.bf16.mxu0 %v7592_v51  ;;  %v3803_v51 = vld [vmem:[#allocation9 + $0xd8] sm:$0xff]  ;;  %7629 = vmatprep.subr.bf16.mxu1 %v7628_v29 }
 0xaf6   :  { %v7630_v20 = vpack.c.bf16 %v3803_v51, %v3800_v37 }
 0xaf8   :  { %7595 = vmatpush1.bf16.msra.mxu0 %v7594_v52  ;;  %7631 = vmatpush1.bf16.msra.mxu1 %v7630_v20  ;;  %v3806_v52 = vld [vmem:[#allocation9 + $0xf0] sm:$0xff] }
 0xaf9   :  { %7597 = vmatprep.subr.bf16.mxu0 %v7596_v3  ;;  %v3809_v3 = vld [vmem:[#allocation9 + $0x108] sm:$0xff]  ;;  %7633 = vmatprep.subr.bf16.mxu1 %v7632_v49 }
 0xafa   :  { %v7634_v8 = vpack.c.bf16 %v3809_v3, %v3806_v52 }
 0xafc   :  { %7599 = vmatpush1.bf16.msra.mxu0 %v7598_v2  ;;  %7635 = vmatpush1.bf16.msra.mxu1 %v7634_v8  ;;  %v3812_v2 = vld [vmem:[#allocation9 + $0x120] sm:$0xff] }
 0xafd   :  { %7601 = vmatprep.subr.bf16.mxu0 %v7600_v56  ;;  %v3815_v56 = vld [vmem:[#allocation9 + $0x138] sm:$0xff]  ;;  %7637 = vmatprep.subr.bf16.mxu1 %v7636_v40 }
 0xafe   :  { %v7638_v9 = vpack.c.bf16 %v3815_v56, %v3812_v2 }
 0xb00   :  { %7603 = vmatpush1.bf16.msra.mxu0 %v7602_v5  ;;  %7639 = vmatpush1.bf16.msra.mxu1 %v7638_v9  ;;  %v3818_v5 = vld [vmem:[#allocation9 + $0x150] sm:$0xff]  ;;  %v7645_v9 = vpack.c.bf16 %v3781_v24, %v3778_v21  ;;  %v4040_v24 = vld [vmem:[#allocation7 + $0x180] sm:$0xff] }
 0xb01   :  { %7605 = vmatprep.subr.bf16.mxu0 %v7604_v1  ;;  %v3821_v1 = vld [vmem:[#allocation9 + $0x168] sm:$0xff]  ;;  %7641 = vmatprep.subr.bf16.mxu1 %v7640_v59  ;;  %v3787_v59 = vld [vmem:[#allocation9 + $0x58] sm:$0xff] }
 0xb02   :  { %v7642_v60 = vpack.c.bf16 %v3821_v1, %v3818_v5  ;;  %v7648_v5 = vpack.c.bf16 %v3787_v59, %v3784_v30  ;;  %v3790_v1 = vld [vmem:[#allocation9 + $0x70] sm:$0xff]  ;;  %v4048_v59 = vld [vmem:[#allocation7 + $0x1c0] sm:$0xff] }
 0xb03   :  { %v4042_v30 = vld [vmem:[#allocation7 + $0x190] sm:$0xff] }
 0xb04   :  { %7607 = vmatpush1.bf16.msra.mxu0 %v7606_v11  ;;  %7643 = vmatpush1.bf16.msra.mxu1 %v7642_v60  ;;  %v7668_v11 = vpack.c.bf16 %v3999_v4, %v3993_v35  ;;  %v3793_v60 = vld [vmem:[#allocation9 + $0x88] sm:$0xff]  ;;  %v3799_v4 = vld [vmem:[#allocation9 + $0xb8] sm:$0xff] }
 0xb05   :  { %7609 = vmatprep.subr.bf16.mxu0 %v7608_v14  ;;  %7644 = vmatprep.subr.bf16.mxu1 %v8555_v34  ;;  %v3998_v14 = vld [vmem:[#allocation7 + $0x30] sm:$0xff]  ;;  %v7651_v35 = vpack.c.bf16 %v3793_v60, %v3790_v1  ;;  %v7750_v1 = vpack.c.bf16 %v4048_v59, %v4042_v30  ;;  %v4053_v60 = vld [vmem:[#allocation7 + $0x1e8] sm:$0xff]  ;;  %v4107_v30 = vld [vmem:[#allocation7 + $0x398] sm:$0xff] }
 0xb06   :  { %v7670_v15 = vpack.c.bf16 %v3998_v14, %v3992_v10  ;;  %v3805_v14 = vld [vmem:[#allocation9 + $0xe8] sm:$0xff]  ;;  %v4100_v59 = vld [vmem:[#allocation7 + $0x360] sm:$0xff] }
 0xb08   :  { %7611 = vmatpush1.bf16.msra.mxu0 %v7610_v58  ;;  %v4011_v58 = vld [vmem:[#allocation7 + $0x98] sm:$0xff] }
 0xb09   :  { %7669 = vmatprep.subr.bf16.mxu0 %v7668_v11  ;;  %v7672_v36 = vpack.c.bf16 %v4011_v58, %v4005_v16  ;;  %v3802_v11 = vld [vmem:[#allocation9 + $0xd0] sm:$0xff]  ;;  %v3808_v16 = vld [vmem:[#allocation9 + $0x100] sm:$0xff]  ;;  %v3811_v58 = vld [vmem:[#allocation9 + $0x118] sm:$0xff] }
 0xb0b   :  { %3742 = vmatmul.mubr.f32.vlgmr.msra.gmra.mrb[22].mxu0 %v8953_v63 }
 0xb0c   :  { %7671 = vmatpush1.bf16.msra.mxu0 %v7670_v15  ;;  %v7657_v15 = vpack.c.bf16 %v3805_v14, %v3802_v11  ;;  %v4055_v11 = vld [vmem:[#allocation7 + $0x1f8] sm:$0xff] }
 0xb0d   :  { %7673 = vmatprep.subr.bf16.mxu0 %v7672_v36  ;;  %v7660_v36 = vpack.c.bf16 %v3811_v58, %v3808_v16  ;;  %v4054_v16 = vld [vmem:[#allocation7 + $0x1f0] sm:$0xff]  ;;  %v4060_v58 = vld [vmem:[#allocation7 + $0x220] sm:$0xff] }
 0xb10   :  { %7675 = vmatpush1.bf16.msra.mxu0 %v7674_v17  ;;  %v3814_v17 = vld [vmem:[#allocation9 + $0x130] sm:$0xff] }
 0xb11   :  { %7677 = vmatprep.subr.bf16.mxu0 %v7676_v6  ;;  %v7663_v57 = vpack.c.bf16 %v3817_v48, %v3814_v17  ;;  %v3820_v6 = vld [vmem:[#allocation9 + $0x160] sm:$0xff]  ;;  %v7754_v17 = vpack.c.bf16 %v4060_v58, %v4054_v16  ;;  %v4065_v48 = vld [vmem:[#allocation7 + $0x248] sm:$0xff]  ;;  %v4119_v16 = vld [vmem:[#allocation7 + $0x3f8] sm:$0xff] }
 0xb12   :  { %v7666_v32 = vpack.c.bf16 %v3823_v18, %v3820_v6  ;;  %v4064_v18 = vld [vmem:[#allocation7 + $0x240] sm:$0xff] }
 0xb13   :  { %v4112_v58 = vld [vmem:[#allocation7 + $0x3c0] sm:$0xff] }
 0xb14   :  { %7679 = vmatpush1.bf16.msra.mxu0 %v7678_v42  ;;  %v4001_v42 = vld [vmem:[#allocation7 + $0x48] sm:$0xff] }
 0xb15   :  { %7681 = vmatprep.subr.bf16.mxu0 %v7680_v12  ;;  %v7732_v46 = vpack.c.bf16 %v4001_v42, %v3995_v19  ;;  %v4000_v12 = vld [vmem:[#allocation7 + $0x40] sm:$0xff]  ;;  %v4070_v19 = vld [vmem:[#allocation7 + $0x270] sm:$0xff]  ;;  %v4067_v42 = vld [vmem:[#allocation7 + $0x258] sm:$0xff] }
 0xb18   :  { %7683 = vmatpush1.bf16.msra.mxu0 %v7682_v13  ;;  %v4013_v13 = vld [vmem:[#allocation7 + $0xa8] sm:$0xff] }
 0xb9e   :  { %v3601_v61 = vpop.f32.mrb[20].mxu0  ;;  %v3672_v26 = vpop.f32.mrb[30].mxu1 }
 0xb9f   :  { %v3755_v27 = vadd.f32 %v3751_v50, %v3601_v61  ;;  %v3603_v44 = vpop.f32.mrb[21].mxu0  ;;  %v8984_v25 = vpop.f32.mrb[31].mxu1  ;;  %v7734_v50 = vpack.c.bf16 %v4000_v12, %v3994_v47  ;;  %v7736_v61 = vpack.c.bf16 %v4013_v13, %v4007_v43  ;;  %v4066_v47 = vld [vmem:[#allocation7 + $0x250] sm:$0xff]  ;;  %v4072_v12 = vld [vmem:[#allocation7 + $0x280] sm:$0xff] }
 0xba0   :  { %v3762_v22 = vadd.f32 %v3752_v31, %v3603_v44  ;;  %v4019_v44 = vld [vmem:[#allocation7 + $0xd8] sm:$0xff]  ;;  %v4025_v31 = vld [vmem:[#allocation7 + $0x108] sm:$0xff]  ;;  %v7758_v13 = vpack.c.bf16 %v4072_v12, %v4066_v47 }
 0xba1   :  { %v5614_v53 = vmul.f32 -1.442695, %v3755_v27  ;;  %v4012_v27 = vld [vmem:[#allocation7 + $0xa0] sm:$0xff] }
 0xba2   :  { %v5615_v55 = vmul.f32 -1.442695, %v3762_v22  ;;  %v7740_v22 = vpack.c.bf16 %v4025_v31, %v4019_v44  ;;  %v4082_v44 = vld [vmem:[#allocation7 + $0x2d0] sm:$0xff]  ;;  %v4079_v31 = vld [vmem:[#allocation7 + $0x2b8] sm:$0xff] }
 0xba3   :  { %8343 = vpow2.f32 %v5614_v53 }
 0xba4   :  { %8345 = vpow2.f32 %v5615_v55  ;;  %v4018_v55 = vld [vmem:[#allocation7 + $0xd0] sm:$0xff] }
 0xbad   :  { %v8344_v29 = vpop.eup %8343 }
 0xbae   :  { %v3759_v37 = vadd.f32 1.0, %v8344_v29  ;;  %v8346_v51 = vpop.eup %8345  ;;  %v4024_v29 = vld [vmem:[#allocation7 + $0x100] sm:$0xff] }
 0xbaf   :  { %v3766_v20 = vadd.f32 1.0, %v8346_v51  ;;  %v4037_v51 = vld [vmem:[#allocation7 + $0x168] sm:$0xff] }
 0xbb0   :  { %8347 = vrcp.f32 %v3759_v37  ;;  %v4031_v37 = vld [vmem:[#allocation7 + $0x138] sm:$0xff] }
 0xbb1   :  { %8349 = vrcp.f32 %v3766_v20  ;;  %v7742_v20 = vpack.c.bf16 %v4024_v29, %v4018_v55  ;;  %v4078_v55 = vld [vmem:[#allocation7 + $0x2b0] sm:$0xff]  ;;  %v4084_v29 = vld [vmem:[#allocation7 + $0x2e0] sm:$0xff] }
 0xbba   :  { %v8348_v54 = vpop.eup %8347 }
 0xbbb   :  { %v3769_v49 = vmul.f32 %v8348_v54, %v3672_v26  ;;  %v8350_v3 = vpop.eup %8349  ;;  %v4006_v26 = vld [vmem:[#allocation7 + $0x70] sm:$0xff]  ;;  %v7744_v54 = vpack.c.bf16 %v4037_v51, %v4031_v37  ;;  %v7762_v51 = vpack.c.bf16 %v4084_v29, %v4078_v55  ;;  %v4143_v55 = vld [vmem:[#allocation7 + $0x4b8] sm:$0xff] }
 0xbbc   :  { %v3772_v8 = vsub.f32 1.0, %v8350_v3  ;;  %v3774_v56 = vmul.f32 %v8350_v3, %v8953_v63  ;;  %v3796_v63 = vld [vmem:[#allocation9 + $0xa0] sm:$0xff]  ;;  %v7738_v53 = vpack.c.bf16 %v4012_v27, %v4006_v26  ;;  %v4041_v3 = vld [vmem:[#allocation7 + $0x188] sm:$0xff] }
 0xbbd   :  { %v3770_v52 = vadd.f32 %v3769_v49, %v3753_v62  ;;  %v7654_v10 = vpack.c.bf16 %v3799_v4, %v3796_v63  ;;  %v4030_v62 = vld [vmem:[#allocation7 + $0x130] sm:$0xff]  ;;  %v4036_v49 = vld [vmem:[#allocation7 + $0x160] sm:$0xff] }
 0xbbe   :  { %v4052_v4 = vld [vmem:[#allocation7 + $0x1e0] sm:$0xff] }
 0xbbf   :  { %8351 = vtanh.f32 %v3770_v52  ;;  %v7746_v52 = vpack.c.bf16 %v4036_v49, %v4030_v62  ;;  %v4076_v27 = vld [vmem:[#allocation7 + $0x2a0] sm:$0xff] }
 0xbc0   :  { %v4088_v49 = vld [vmem:[#allocation7 + $0x300] sm:$0xff] }
 0xbc9   :  { %v8352_v40 = vpop.eup %8351 }
 0xbca   :  { %v3773_v2 = vmul.f32 %v8352_v40, %v3772_v8  ;;  %v4047_v8 = vld [vmem:[#allocation7 + $0x1b8] sm:$0xff]  ;;  %v4046_v40 = vld [vmem:[#allocation7 + $0x1b0] sm:$0xff] }
 0xbcb   :  { %v7684_v21 = vpack.c.bf16 %v4047_v8, %v4041_v3  ;;  %v4091_v3 = vld [vmem:[#allocation7 + $0x318] sm:$0xff] }
 0xbcc   :  { %v8987_v23 = vadd.f32 %v3774_v56, %v3773_v2  ;;  %v4043_v2 = vld [vmem:[#allocation7 + $0x198] sm:$0xff]  ;;  %v7686_v56 = vpack.c.bf16 %v4046_v40, %v4040_v24  ;;  %v4090_v24 = vld [vmem:[#allocation7 + $0x310] sm:$0xff]  ;;  %v4096_v40 = vld [vmem:[#allocation7 + $0x340] sm:$0xff] }
 0xbcd   :  { %7685 = vmatprep.subr.bf16.mxu0 %v7684_v21  ;;  %v4097_v21 = vld [vmem:[#allocation7 + $0x348] sm:$0xff] }
 0xbce   :  { %3889 = vmatmul.mubr.f32.vlgmr.msra.gmra.mrb[32].mxu1 %v8987_v23  ;;  %7687 = vmatpush1.bf16.msra.mxu0 %v7686_v56  ;;  %v7766_v56 = vpack.c.bf16 %v4096_v40, %v4090_v24  ;;  %v4155_v24 = vld [vmem:[#allocation7 + $0x518] sm:$0xff] }
 0xbcf   :  { %7646 = vmatpush3.bf16.msra.mxu1 %v7645_v9  ;;  %6019 = vmatprep.mubr.msk.f32.mxu1 %vm8556_vm0, %v8554_v0  ;;  %v4049_v9 = vld [vmem:[#allocation7 + $0x1c8] sm:$0xff] }
 0xbd0   :  { %7647 = vmatprep.subr.bf16.mxu1 %v8555_v34 }
 0xbd3   :  { %7649 = vmatpush3.bf16.msra.mxu1 %v7648_v5  ;;  %v7748_v5 = vpack.c.bf16 %v4049_v9, %v4043_v2  ;;  %v7764_v2 = vpack.c.bf16 %v4097_v21, %v4091_v3  ;;  %v4101_v9 = vld [vmem:[#allocation7 + $0x368] sm:$0xff] }
 0xbd4   :  { %7650 = vmatprep.subr.bf16.mxu1 %v8555_v34  ;;  %v4149_v21 = vld [vmem:[#allocation7 + $0x4e8] sm:$0xff] }
 0xbd5   :  { %v7720_v40 = vpack.c.bf16 %v4155_v24, %v4149_v21 }
 0xbd7   :  { %7652 = vmatpush3.bf16.msra.mxu1 %v7651_v35  ;;  %v4059_v35 = vld [vmem:[#allocation7 + $0x218] sm:$0xff] }
 0xbd8   :  { %7653 = vmatprep.subr.bf16.mxu1 %v8555_v34  ;;  %v7688_v63 = vpack.c.bf16 %v4059_v35, %v4053_v60  ;;  %v4103_v60 = vld [vmem:[#allocation7 + $0x378] sm:$0xff]  ;;  %v4109_v35 = vld [vmem:[#allocation7 + $0x3a8] sm:$0xff] }
 0xbda   :  { %7689 = vmatprep.subr.bf16.mxu0 %v7688_v63 }
 0xbdb   :  { %7655 = vmatpush3.bf16.msra.mxu1 %v7654_v10  ;;  %v4058_v10 = vld [vmem:[#allocation7 + $0x210] sm:$0xff] }
 0xbdc   :  { %7656 = vmatprep.subr.bf16.mxu1 %v8555_v34  ;;  %v7690_v14 = vpack.c.bf16 %v4058_v10, %v4052_v4  ;;  %v7768_v4 = vpack.c.bf16 %v4109_v35, %v4103_v60  ;;  %v4102_v10 = vld [vmem:[#allocation7 + $0x370] sm:$0xff] }
 0xbde   :  { %v8996_v38 = vpop.f32.mrb[22].mxu0  ;;  %7691 = vmatpush1.bf16.msra.mxu0 %v7690_v14  ;;  %v4113_v14 = vld [vmem:[#allocation7 + $0x3c8] sm:$0xff] }
 0xbdf   :  { %v8998_v41 = vpop.f32.mrb[23].mxu0  ;;  %7658 = vmatpush3.bf16.msra.mxu1 %v7657_v15  ;;  %v4061_v15 = vld [vmem:[#allocation7 + $0x228] sm:$0xff] }
 0xbe0   :  { %7659 = vmatprep.subr.bf16.mxu1 %v8555_v34 }
 0xbe3   :  { %7661 = vmatpush3.bf16.msra.mxu1 %v7660_v36  ;;  %v7752_v36 = vpack.c.bf16 %v4061_v15, %v4055_v11  ;;  %v4108_v11 = vld [vmem:[#allocation7 + $0x3a0] sm:$0xff] }
 0xbe4   :  { %7662 = vmatprep.subr.bf16.mxu1 %v8555_v34  ;;  %v7770_v15 = vpack.c.bf16 %v4108_v11, %v4102_v10  ;;  %v4160_v11 = vld [vmem:[#allocation7 + $0x540] sm:$0xff] }
 0xbe7   :  { %7664 = vmatpush3.bf16.msra.mxu1 %v7663_v57  ;;  %v4071_v57 = vld [vmem:[#allocation7 + $0x278] sm:$0xff] }
 0xbe8   :  { %7665 = vmatprep.subr.bf16.mxu1 %v8555_v34  ;;  %v7692_v6 = vpack.c.bf16 %v4071_v57, %v4065_v48  ;;  %v4115_v57 = vld [vmem:[#allocation7 + $0x3d8] sm:$0xff] }
 0xbea   :  { %7693 = vmatprep.subr.bf16.mxu0 %v7692_v6  ;;  %v4121_v6 = vld [vmem:[#allocation7 + $0x408] sm:$0xff] }
 0xbeb   :  { %7667 = vmatpush3.bf16.msra.mxu1 %v7666_v32  ;;  %v7694_v32 = vpack.c.bf16 %v4070_v19, %v4064_v18  ;;  %v4114_v18 = vld [vmem:[#allocation7 + $0x3d0] sm:$0xff]  ;;  %v7772_v19 = vpack.c.bf16 %v4121_v6, %v4115_v57  ;;  %v4173_v6 = vld [vmem:[#allocation7 + $0x5a8] sm:$0xff] }
 0xbec   :  { %7733 = vmatprep.subr.bf16.mxu1 %v7732_v46  ;;  %v4073_v46 = vld [vmem:[#allocation7 + $0x288] sm:$0xff] }
 0xbed   :  { %v7756_v43 = vpack.c.bf16 %v4073_v46, %v4067_v42  ;;  %7695 = vmatpush1.bf16.msra.mxu0 %v7694_v32  ;;  %v4120_v42 = vld [vmem:[#allocation7 + $0x400] sm:$0xff]  ;;  %v4125_v32 = vld [vmem:[#allocation7 + $0x428] sm:$0xff]  ;;  %v4131_v46 = vld [vmem:[#allocation7 + $0x458] sm:$0xff] }
 0xbee   :  { %6020 = vmatmul.mubr.f32.vlgmr.msra.gmra.mrb[34].mxu1 %v8987_v23  ;;  %v7774_v47 = vpack.c.bf16 %v4120_v42, %v4114_v18  ;;  %v7712_v12 = vpack.c.bf16 %v4131_v46, %v4125_v32  ;;  %v4179_v18 = vld [vmem:[#allocation7 + $0x5d8] sm:$0xff]  ;;  %v4172_v42 = vld [vmem:[#allocation7 + $0x5a0] sm:$0xff]  ;;  %v4178_v32 = vld [vmem:[#allocation7 + $0x5d0] sm:$0xff] }
 0xbef   :  { %7735 = vmatpush1.bf16.msra.mxu1 %v7734_v50  ;;  %v4077_v50 = vld [vmem:[#allocation7 + $0x2a8] sm:$0xff]  ;;  %v4175_v46 = vld [vmem:[#allocation7 + $0x5b8] sm:$0xff] }
 0xbf0   :  { %7737 = vmatprep.subr.bf16.mxu1 %v7736_v61  ;;  %v4083_v61 = vld [vmem:[#allocation7 + $0x2d8] sm:$0xff] }
 0xbf1   :  { %v7696_v26 = vpack.c.bf16 %v4083_v61, %v4077_v50  ;;  %v4127_v50 = vld [vmem:[#allocation7 + $0x438] sm:$0xff]  ;;  %v4133_v61 = vld [vmem:[#allocation7 + $0x468] sm:$0xff] }
 0xbf3   :  { %7739 = vmatpush1.bf16.msra.mxu1 %v7738_v53  ;;  %v7698_v53 = vpack.c.bf16 %v4082_v44, %v4076_v27  ;;  %7697 = vmatprep.subr.bf16.mxu0 %v7696_v26  ;;  %v7776_v27 = vpack.c.bf16 %v4133_v61, %v4127_v50  ;;  %v4126_v44 = vld [vmem:[#allocation7 + $0x430] sm:$0xff] }
 0xbf4   :  { %7741 = vmatprep.subr.bf16.mxu1 %v7740_v22  ;;  %v4085_v22 = vld [vmem:[#allocation7 + $0x2e8] sm:$0xff] }
 0xbf5   :  { %v7760_v37 = vpack.c.bf16 %v4085_v22, %v4079_v31  ;;  %7699 = vmatpush1.bf16.msra.mxu0 %v7698_v53  ;;  %v4132_v31 = vld [vmem:[#allocation7 + $0x460] sm:$0xff]  ;;  %v4137_v22 = vld [vmem:[#allocation7 + $0x488] sm:$0xff] }
 0xbf6   :  { %v7778_v53 = vpack.c.bf16 %v4132_v31, %v4126_v44  ;;  %v7716_v29 = vpack.c.bf16 %v4143_v55, %v4137_v22 }
 0xbf7   :  { %7743 = vmatpush1.bf16.msra.mxu1 %v7742_v20  ;;  %v4089_v20 = vld [vmem:[#allocation7 + $0x308] sm:$0xff] }
 0xbf8   :  { %7745 = vmatprep.subr.bf16.mxu1 %v7744_v54  ;;  %v4095_v54 = vld [vmem:[#allocation7 + $0x338] sm:$0xff] }
 0xbf9   :  { %v7700_v62 = vpack.c.bf16 %v4095_v54, %v4089_v20  ;;  %v4139_v20 = vld [vmem:[#allocation7 + $0x498] sm:$0xff] }
 0xbfb   :  { %7747 = vmatpush1.bf16.msra.mxu1 %v7746_v52  ;;  %v4094_v52 = vld [vmem:[#allocation7 + $0x330] sm:$0xff]  ;;  %7701 = vmatprep.subr.bf16.mxu0 %v7700_v62  ;;  %v4145_v62 = vld [vmem:[#allocation7 + $0x4c8] sm:$0xff] }
 0xbfc   :  { %7749 = vmatprep.subr.bf16.mxu1 %v7748_v5  ;;  %v7702_v8 = vpack.c.bf16 %v4094_v52, %v4088_v49  ;;  %v7704_v5 = vpack.c.bf16 %v4107_v30, %v4101_v9  ;;  %v4138_v49 = vld [vmem:[#allocation7 + $0x490] sm:$0xff]  ;;  %v4144_v52 = vld [vmem:[#allocation7 + $0x4c0] sm:$0xff]  ;;  %v7780_v3 = vpack.c.bf16 %v4145_v62, %v4139_v20  ;;  %v4151_v9 = vld [vmem:[#allocation7 + $0x4f8] sm:$0xff] }
 0xbfe   :  { %7703 = vmatpush1.bf16.msra.mxu0 %v7702_v8  ;;  %v7782_v8 = vpack.c.bf16 %v4144_v52, %v4138_v49 }
 0xbff   :  { %7751 = vmatpush1.bf16.msra.mxu1 %v7750_v1  ;;  %v4106_v1 = vld [vmem:[#allocation7 + $0x390] sm:$0xff]  ;;  %7705 = vmatprep.subr.bf16.mxu0 %v7704_v5 }
 0xc00   :  { %7753 = vmatprep.subr.bf16.mxu1 %v7752_v36  ;;  %v7706_v63 = vpack.c.bf16 %v4106_v1, %v4100_v59  ;;  %v4118_v36 = vld [vmem:[#allocation7 + $0x3f0] sm:$0xff]  ;;  %v4157_v59 = vld [vmem:[#allocation7 + $0x528] sm:$0xff]  ;;  %v4156_v1 = vld [vmem:[#allocation7 + $0x520] sm:$0xff] }
 0xc01   :  { %v7710_v48 = vpack.c.bf16 %v4118_v36, %v4112_v58  ;;  %v4150_v5 = vld [vmem:[#allocation7 + $0x4f0] sm:$0xff]  ;;  %v7784_v60 = vpack.c.bf16 %v4157_v59, %v4151_v9  ;;  %v4169_v58 = vld [vmem:[#allocation7 + $0x588] sm:$0xff]  ;;  %v4015_v59 = vld [vmem:[#allocation7 + $0xb8] sm:$0xff] }
 0xc02   :  { %7707 = vmatpush1.bf16.msra.mxu0 %v7706_v63  ;;  %v7786_v35 = vpack.c.bf16 %v4156_v1, %v4150_v5  ;;  %v4161_v63 = vld [vmem:[#allocation7 + $0x548] sm:$0xff]  ;;  %v4162_v36 = vld [vmem:[#allocation7 + $0x550] sm:$0xff] }
 0xc03   :  { %7755 = vmatpush1.bf16.msra.mxu1 %v7754_v17  ;;  %v7708_v17 = vpack.c.bf16 %v4119_v16, %v4113_v14  ;;  %v4166_v14 = vld [vmem:[#allocation7 + $0x570] sm:$0xff] }
 0xc04   :  { %7757 = vmatprep.subr.bf16.mxu1 %v7756_v43  ;;  %v4124_v43 = vld [vmem:[#allocation7 + $0x420] sm:$0xff]  ;;  %v7726_v16 = vpack.c.bf16 %v4166_v14, %v4160_v11 }
 0xc05   :  { %7709 = vmatprep.subr.bf16.mxu0 %v7708_v17  ;;  %v4168_v17 = vld [vmem:[#allocation7 + $0x580] sm:$0xff] }
 0xc06   :  { %7711 = vmatpush1.bf16.msra.mxu0 %v7710_v48  ;;  %v7790_v57 = vpack.c.bf16 %v4168_v17, %v4162_v36  ;;  %v4020_v14 = vld [vmem:[#allocation7 + $0xe0] sm:$0xff] }
 0xc07   :  { %7759 = vmatpush1.bf16.msra.mxu1 %v7758_v13  ;;  %v4130_v13 = vld [vmem:[#allocation7 + $0x450] sm:$0xff]  ;;  %7713 = vmatprep.subr.bf16.mxu0 %v7712_v12  ;;  %v4181_v12 = vld [vmem:[#allocation7 + $0x5e8] sm:$0xff] }
 0xc08   :  { %7761 = vmatprep.subr.bf16.mxu1 %v7760_v37  ;;  %v7714_v26 = vpack.c.bf16 %v4130_v13, %v4124_v43  ;;  %v4136_v37 = vld [vmem:[#allocation7 + $0x480] sm:$0xff]  ;;  %v4174_v43 = vld [vmem:[#allocation7 + $0x5b0] sm:$0xff]  ;;  %v7792_v50 = vpack.c.bf16 %v4181_v12, %v4175_v46  ;;  %v4063_v12 = vld [vmem:[#allocation7 + $0x238] sm:$0xff] }
 0xc09   :  { %v4180_v13 = vld [vmem:[#allocation7 + $0x5e0] sm:$0xff]  ;;  %v4050_v46 = vld [vmem:[#allocation7 + $0x1d0] sm:$0xff] }
 0xc0a   :  { %7715 = vmatpush1.bf16.msra.mxu0 %v7714_v26  ;;  %v7794_v61 = vpack.c.bf16 %v4180_v13, %v4174_v43  ;;  %v3997_v26 = vld [vmem:[#allocation7 + $0x28] sm:$0xff] }
 0xc0b   :  { %7763 = vmatpush1.bf16.msra.mxu1 %v7762_v51  ;;  %v4142_v51 = vld [vmem:[#allocation7 + $0x4b0] sm:$0xff]  ;;  %7717 = vmatprep.subr.bf16.mxu0 %v7716_v29 }
 0xc0c   :  { %7765 = vmatprep.subr.bf16.mxu1 %v7764_v2  ;;  %v7718_v54 = vpack.c.bf16 %v4142_v51, %v4136_v37  ;;  %v4148_v2 = vld [vmem:[#allocation7 + $0x4e0] sm:$0xff] }
 0xc0e   :  { %7719 = vmatpush1.bf16.msra.mxu0 %v7718_v54 }
 0xc0f   :  { %7767 = vmatpush1.bf16.msra.mxu1 %v7766_v56  ;;  %v4154_v56 = vld [vmem:[#allocation7 + $0x510] sm:$0xff]  ;;  %7721 = vmatprep.subr.bf16.mxu0 %v7720_v40  ;;  %v3996_v40 = vld [vmem:[#allocation7 + $0x20] sm:$0xff] }
 0xc10   :  { %7769 = vmatprep.subr.bf16.mxu1 %v7768_v4  ;;  %v7722_v30 = vpack.c.bf16 %v4154_v56, %v4148_v2  ;;  %v4167_v4 = vld [vmem:[#allocation7 + $0x578] sm:$0xff]  ;;  %v4002_v2 = vld [vmem:[#allocation7 + $0x50] sm:$0xff] }
 0xc11   :  { %v7724_v10 = vpack.c.bf16 %v4167_v4, %v4161_v63  ;;  %v7798_v1 = vpack.c.bf16 %v4002_v2, %v3996_v40  ;;  %v4021_v63 = vld [vmem:[#allocation7 + $0xe8] sm:$0xff]  ;;  %v4027_v4 = vld [vmem:[#allocation7 + $0x118] sm:$0xff]  ;;  %v4104_v2 = vld [vmem:[#allocation7 + $0x380] sm:$0xff] }
 0xc12   :  { %7723 = vmatpush1.bf16.msra.mxu0 %v7722_v30  ;;  %v4009_v30 = vld [vmem:[#allocation7 + $0x88] sm:$0xff]  ;;  %v7804_v11 = vpack.c.bf16 %v4027_v4, %v4021_v63  ;;  %v4135_v63 = vld [vmem:[#allocation7 + $0x478] sm:$0xff] }
 0xc13   :  { %7771 = vmatpush1.bf16.msra.mxu1 %v7770_v15  ;;  %v4163_v15 = vld [vmem:[#allocation7 + $0x558] sm:$0xff]  ;;  %7725 = vmatprep.subr.bf16.mxu0 %v7724_v10 }
 0xc14   :  { %7773 = vmatprep.subr.bf16.mxu1 %v7772_v19  ;;  %v7788_v48 = vpack.c.bf16 %v4169_v58, %v4163_v15  ;;  %v7728_v19 = vpack.c.bf16 %v4179_v18, %v4173_v6  ;;  %v4026_v15 = vld [vmem:[#allocation7 + $0x110] sm:$0xff]  ;;  %v4039_v58 = vld [vmem:[#allocation7 + $0x178] sm:$0xff]  ;;  %v4045_v6 = vld [vmem:[#allocation7 + $0x1a8] sm:$0xff] }
 0xc15   :  { %v7806_v36 = vpack.c.bf16 %v4026_v15, %v4020_v14  ;;  %v4051_v18 = vld [vmem:[#allocation7 + $0x1d8] sm:$0xff]  ;;  %v4134_v14 = vld [vmem:[#allocation7 + $0x470] sm:$0xff]  ;;  %v4141_v15 = vld [vmem:[#allocation7 + $0x4a8] sm:$0xff] }
 0xc16   :  { %7727 = vmatpush1.bf16.msra.mxu0 %v7726_v16  ;;  %v4033_v16 = vld [vmem:[#allocation7 + $0x148] sm:$0xff] }
 0xc17   :  { %7775 = vmatpush1.bf16.msra.mxu1 %v7774_v47  ;;  %v7730_v47 = vpack.c.bf16 %v4178_v32, %v4172_v42  ;;  %7729 = vmatprep.subr.bf16.mxu0 %v7728_v19  ;;  %v7808_v17 = vpack.c.bf16 %v4039_v58, %v4033_v16  ;;  %v7812_v42 = vpack.c.bf16 %v4051_v18, %v4045_v6  ;;  %v4044_v32 = vld [vmem:[#allocation7 + $0x1a0] sm:$0xff]  ;;  %v4147_v16 = vld [vmem:[#allocation7 + $0x4d8] sm:$0xff] }
 0xc18   :  { %7777 = vmatprep.subr.bf16.mxu1 %v7776_v27  ;;  %v4003_v27 = vld [vmem:[#allocation7 + $0x58] sm:$0xff]  ;;  %v7814_v43 = vpack.c.bf16 %v4050_v46, %v4044_v32  ;;  %v4158_v32 = vld [vmem:[#allocation7 + $0x530] sm:$0xff]  ;;  %v4165_v46 = vld [vmem:[#allocation7 + $0x568] sm:$0xff] }
 0xc19   :  { %v7796_v44 = vpack.c.bf16 %v4003_v27, %v3997_v26  ;;  %v4069_v26 = vld [vmem:[#allocation7 + $0x268] sm:$0xff]  ;;  %v4075_v27 = vld [vmem:[#allocation7 + $0x298] sm:$0xff] }
 0xc1a   :  { %7731 = vmatpush1.bf16.msra.mxu0 %v7730_v47  ;;  %v4057_v47 = vld [vmem:[#allocation7 + $0x208] sm:$0xff]  ;;  %v4159_v6 = vld [vmem:[#allocation7 + $0x538] sm:$0xff] }
 0xc1b   :  { %7779 = vmatpush1.bf16.msra.mxu1 %v7778_v53  ;;  %7797 = vmatprep.subr.bf16.mxu0 %v7796_v44  ;;  %v7816_v13 = vpack.c.bf16 %v4063_v12, %v4057_v47  ;;  %v4171_v47 = vld [vmem:[#allocation7 + $0x598] sm:$0xff] }
 0xc1c   :  { %7781 = vmatprep.subr.bf16.mxu1 %v7780_v3 }
 0xc1f   :  { %7783 = vmatpush1.bf16.msra.mxu1 %v7782_v8 }
 0xc20   :  { %7785 = vmatprep.subr.bf16.mxu1 %v7784_v60  ;;  %v7800_v60 = vpack.c.bf16 %v4015_v59, %v4009_v30  ;;  %v4123_v30 = vld [vmem:[#allocation7 + $0x418] sm:$0xff] }
 0xc23   :  { %7787 = vmatpush1.bf16.msra.mxu1 %v7786_v35  ;;  %v4014_v35 = vld [vmem:[#allocation7 + $0xb0] sm:$0xff] }
 0xc24   :  { %7789 = vmatprep.subr.bf16.mxu1 %v7788_v48  ;;  %v4032_v48 = vld [vmem:[#allocation7 + $0x140] sm:$0xff] }
 0xc27   :  { %7791 = vmatpush1.bf16.msra.mxu1 %v7790_v57  ;;  %v4038_v57 = vld [vmem:[#allocation7 + $0x170] sm:$0xff] }
 0xc28   :  { %7793 = vmatprep.subr.bf16.mxu1 %v7792_v50  ;;  %v7810_v19 = vpack.c.bf16 %v4038_v57, %v4032_v48  ;;  %v4056_v50 = vld [vmem:[#allocation7 + $0x200] sm:$0xff]  ;;  %v4146_v48 = vld [vmem:[#allocation7 + $0x4d0] sm:$0xff]  ;;  %v4153_v57 = vld [vmem:[#allocation7 + $0x508] sm:$0xff] }
 0xc2b   :  { %7795 = vmatpush1.bf16.msra.mxu1 %v7794_v61  ;;  %v4062_v61 = vld [vmem:[#allocation7 + $0x230] sm:$0xff] }
 0xc2c   :  { %v7818_v44 = vpack.c.bf16 %v4062_v61, %v4056_v50  ;;  %v4170_v50 = vld [vmem:[#allocation7 + $0x590] sm:$0xff]  ;;  %v4177_v61 = vld [vmem:[#allocation7 + $0x5c8] sm:$0xff] }
 0xca1   :  { %v3890_v31 = vpop.f32.mrb[32].mxu1 }
 0xca2   :  { %v3965_v53 = vadd.f32 %v3890_v31, %v8984_v25  ;;  %v3892_v22 = vpop.f32.mrb[33].mxu1  ;;  %v7820_v31 = vpack.c.bf16 %v4075_v27, %v4069_v26  ;;  %v4183_v26 = vld [vmem:[#allocation7 + $0x5f8] sm:$0xff] }
 0xca3   :  { %v3972_v55 = vadd.f32 %v3892_v22, %v8996_v38  ;;  %v4074_v22 = vld [vmem:[#allocation7 + $0x290] sm:$0xff] }
 0xca4   :  { %v5616_v29 = vmul.f32 -1.442695, %v3965_v53  ;;  %v4068_v53 = vld [vmem:[#allocation7 + $0x260] sm:$0xff] }
 0xca5   :  { %v5617_v37 = vmul.f32 -1.442695, %v3972_v55  ;;  %v4081_v55 = vld [vmem:[#allocation7 + $0x2c8] sm:$0xff] }
 0xca6   :  { %8353 = vpow2.f32 %v5616_v29  ;;  %v4087_v29 = vld [vmem:[#allocation7 + $0x2f8] sm:$0xff] }
 0xca7   :  { %8355 = vpow2.f32 %v5617_v37  ;;  %v7822_v37 = vpack.c.bf16 %v4074_v22, %v4068_v53  ;;  %v4182_v53 = vld [vmem:[#allocation7 + $0x5f0] sm:$0xff] }
 0xcb0   :  { %v8354_v51 = vpop.eup %8353 }
 0xcb1   :  { %v3969_v20 = vadd.f32 1.0, %v8354_v51  ;;  %v8356_v54 = vpop.eup %8355  ;;  %v7824_v51 = vpack.c.bf16 %v4087_v29, %v4081_v55  ;;  %v4426_v55 = vld [vmem:[#allocation9 + $0x8] sm:$0xff]  ;;  %v4429_v29 = vld [vmem:[#allocation9 + $0x20] sm:$0xff] }
 0xcb2   :  { %v3976_v62 = vadd.f32 1.0, %v8356_v54  ;;  %v4086_v54 = vld [vmem:[#allocation7 + $0x2f0] sm:$0xff] }
 0xcb3   :  { %8357 = vrcp.f32 %v3969_v20  ;;  %v4080_v20 = vld [vmem:[#allocation7 + $0x2c0] sm:$0xff] }
 0xcb4   :  { %8359 = vrcp.f32 %v3976_v62  ;;  %v4093_v62 = vld [vmem:[#allocation7 + $0x328] sm:$0xff] }
 0xcbd   :  { %v8358_v49 = vpop.eup %8357 }
 0xcbe   :  { %v3979_v52 = vmul.f32 %v8358_v49, %v8998_v41  ;;  %v8360_v25 = vpop.eup %8359  ;;  %v4008_v41 = vld [vmem:[#allocation7 + $0x80] sm:$0xff]  ;;  %v4099_v49 = vld [vmem:[#allocation7 + $0x358] sm:$0xff] }
 0xcbf   :  { %v3982_v24 = vsub.f32 1.0, %v8360_v25  ;;  %v3984_v9 = vmul.f32 %v8360_v25, %v8974_v45  ;;  %v7802_v10 = vpack.c.bf16 %v4014_v35, %v4008_v41  ;;  %v4105_v25 = vld [vmem:[#allocation7 + $0x388] sm:$0xff]  ;;  %v4122_v41 = vld [vmem:[#allocation7 + $0x410] sm:$0xff] }
 0xcc0   :  { %v4129_v35 = vld [vmem:[#allocation7 + $0x448] sm:$0xff] }
 0xcc1   :  { %v3961_v3 = vpop.f32.mrb[34].mxu1 }
 0xcc2   :  { %v3980_v8 = vadd.f32 %v3979_v52, %v3961_v3  ;;  %v6021_v21 = vpop.f32.mrb[35].mxu1  ;;  %v7826_v52 = vpack.c.bf16 %v4086_v54, %v4080_v20  ;;  %v7828_v3 = vpack.c.bf16 %v4099_v49, %v4093_v62  ;;  %v4428_v20 = vld [vmem:[#allocation9 + $0x18] sm:$0xff]  ;;  %v4435_v49 = vld [vmem:[#allocation9 + $0x50] sm:$0xff] }
 0xcc3   :  { %v4098_v21 = vld [vmem:[#allocation7 + $0x350] sm:$0xff]  ;;  %v4432_v62 = vld [vmem:[#allocation9 + $0x38] sm:$0xff] }
 0xcc4   :  { %8361 = vtanh.f32 %v3980_v8  ;;  %v4092_v8 = vld [vmem:[#allocation7 + $0x320] sm:$0xff] }
 0xcce   :  { %v8362_v38 = vpop.eup %8361 }
 0xccf   :  { %v3983_v56 = vmul.f32 %v8362_v38, %v3982_v24  ;;  %v4111_v24 = vld [vmem:[#allocation7 + $0x3b8] sm:$0xff]  ;;  %v7830_v38 = vpack.c.bf16 %v4098_v21, %v4092_v8  ;;  %v4434_v8 = vld [vmem:[#allocation9 + $0x48] sm:$0xff] }
 0xcd0   :  { %v7832_v40 = vpack.c.bf16 %v4111_v24, %v4105_v25  ;;  %v4438_v25 = vld [vmem:[#allocation9 + $0x68] sm:$0xff]  ;;  %v4441_v24 = vld [vmem:[#allocation9 + $0x80] sm:$0xff] }
 0xcd1   :  { %v9008_v5 = vadd.f32 %v3984_v9, %v3983_v56  ;;  %v4110_v56 = vld [vmem:[#allocation7 + $0x3b0] sm:$0xff]  ;;  %v4117_v9 = vld [vmem:[#allocation7 + $0x3e8] sm:$0xff] }
 0xcd2   :  { %v7834_v59 = vpack.c.bf16 %v4110_v56, %v4104_v2  ;;  %v4440_v2 = vld [vmem:[#allocation9 + $0x78] sm:$0xff] }
 0xcd3   :  { %4248 = vmatprep.mubr.f32.mxu0 %v9008_v5  ;;  %4319 = vmatprep.mubr.f32.mxu1 %v9008_v5 }
 0xcd4   :  { %4249 = vmatmul.mubr.f32.vlgmr.msra.gmra.mrb[24].mxu0 %v8987_v23  ;;  %4320 = vmatmul.mubr.f32.vlgmr.msra.gmra.mrb[36].mxu1 %v8987_v23 }
 0xcd5   :  { %7799 = vmatpush1.bf16.msra.mxu0 %v7798_v1  ;;  %4390 = vmatprep.mubr.f32.mxu0 %v9008_v5  ;;  %v7836_v1 = vpack.c.bf16 %v4123_v30, %v4117_v9  ;;  %v4444_v9 = vld [vmem:[#allocation9 + $0x98] sm:$0xff]  ;;  %v4447_v30 = vld [vmem:[#allocation9 + $0xb0] sm:$0xff] }
 0xcd6   :  { %7801 = vmatprep.subr.bf16.mxu0 %v7800_v60  ;;  %4537 = vmatprep.mubr.f32.mxu1 %v8554_v0  ;;  %v4116_v60 = vld [vmem:[#allocation7 + $0x3e0] sm:$0xff] }
 0xcd7   :  { %v7838_v4 = vpack.c.bf16 %v4122_v41, %v4116_v60  ;;  %v4446_v60 = vld [vmem:[#allocation9 + $0xa8] sm:$0xff] }
 0xcd9   :  { %7803 = vmatpush1.bf16.msra.mxu0 %v7802_v10  ;;  %v7840_v10 = vpack.c.bf16 %v4135_v63, %v4129_v35  ;;  %v4450_v35 = vld [vmem:[#allocation9 + $0xc8] sm:$0xff]  ;;  %v4453_v63 = vld [vmem:[#allocation9 + $0xe0] sm:$0xff] }
 0xcda   :  { %7805 = vmatprep.subr.bf16.mxu0 %v7804_v11  ;;  %v4128_v11 = vld [vmem:[#allocation7 + $0x440] sm:$0xff] }
 0xcdb   :  { %v7842_v58 = vpack.c.bf16 %v4134_v14, %v4128_v11  ;;  %v4452_v11 = vld [vmem:[#allocation9 + $0xd8] sm:$0xff] }
 0xcdd   :  { %7807 = vmatpush1.bf16.msra.mxu0 %v7806_v36  ;;  %v7844_v36 = vpack.c.bf16 %v4147_v16, %v4141_v15  ;;  %v4456_v15 = vld [vmem:[#allocation9 + $0xf8] sm:$0xff]  ;;  %v4459_v16 = vld [vmem:[#allocation9 + $0x110] sm:$0xff] }
 0xcde   :  { %7809 = vmatprep.subr.bf16.mxu0 %v7808_v17  ;;  %v4140_v17 = vld [vmem:[#allocation7 + $0x4a0] sm:$0xff] }
 0xcdf   :  { %v7846_v18 = vpack.c.bf16 %v4146_v48, %v4140_v17  ;;  %v4458_v17 = vld [vmem:[#allocation9 + $0x108] sm:$0xff] }
 0xce1   :  { %7811 = vmatpush1.bf16.msra.mxu0 %v7810_v19  ;;  %v7848_v19 = vpack.c.bf16 %v4159_v6, %v4153_v57  ;;  %v4462_v57 = vld [vmem:[#allocation9 + $0x128] sm:$0xff]  ;;  %v4465_v6 = vld [vmem:[#allocation9 + $0x140] sm:$0xff] }
 0xce2   :  { %7813 = vmatprep.subr.bf16.mxu0 %v7812_v42  ;;  %v4152_v42 = vld [vmem:[#allocation7 + $0x500] sm:$0xff] }
 0xce3   :  { %v7850_v12 = vpack.c.bf16 %v4158_v32, %v4152_v42  ;;  %v4464_v42 = vld [vmem:[#allocation9 + $0x138] sm:$0xff] }
 0xce5   :  { %7815 = vmatpush1.bf16.msra.mxu0 %v7814_v43  ;;  %v7852_v43 = vpack.c.bf16 %v4171_v47, %v4165_v46  ;;  %v4468_v46 = vld [vmem:[#allocation9 + $0x158] sm:$0xff]  ;;  %v4471_v47 = vld [vmem:[#allocation9 + $0x170] sm:$0xff] }
 0xce6   :  { %7817 = vmatprep.subr.bf16.mxu0 %v7816_v13  ;;  %v4164_v13 = vld [vmem:[#allocation7 + $0x560] sm:$0xff] }
 0xce7   :  { %v7854_v27 = vpack.c.bf16 %v4170_v50, %v4164_v13  ;;  %v4470_v13 = vld [vmem:[#allocation9 + $0x168] sm:$0xff] }
 0xce9   :  { %7819 = vmatpush1.bf16.msra.mxu0 %v7818_v44  ;;  %v7856_v44 = vpack.c.bf16 %v4183_v26, %v4177_v61  ;;  %v4642_v61 = vld [vmem:[#allocation7 + $0x8] sm:$0xff]  ;;  %v4648_v26 = vld [vmem:[#allocation7 + $0x38] sm:$0xff] }
 0xcea   :  { %7821 = vmatprep.subr.bf16.mxu0 %v7820_v31  ;;  %v4176_v31 = vld [vmem:[#allocation7 + $0x5c0] sm:$0xff] }
 0xceb   :  { %v7858_v22 = vpack.c.bf16 %v4182_v53, %v4176_v31  ;;  %v4647_v31 = vld [vmem:[#allocation7 + $0x30] sm:$0xff] }
 0xced   :  { %7823 = vmatpush1.bf16.msra.mxu0 %v7822_v37  ;;  %v7860_v37 = vpack.c.bf16 %v4429_v29, %v4426_v55  ;;  %v4660_v55 = vld [vmem:[#allocation7 + $0x98] sm:$0xff]  ;;  %v4653_v29 = vld [vmem:[#allocation7 + $0x60] sm:$0xff] }
 0xcee   :  { %7825 = vmatprep.subr.bf16.mxu0 %v7824_v51  ;;  %v4425_v51 = vld [vmem:[#allocation9] sm:$0xff] }
 0xcef   :  { %v7862_v54 = vpack.c.bf16 %v4428_v20, %v4425_v51  ;;  %7861 = vmatprep.subr.bf16.mxu1 %v7860_v37  ;;  %v4659_v37 = vld [vmem:[#allocation7 + $0x90] sm:$0xff] }
 0xcf0   :  { %v7922_v20 = vpack.c.bf16 %v4659_v37, %v4653_v29  ;;  %v4460_v29 = vld [vmem:[#allocation9 + $0x118] sm:$0xff] }
 0xcf1   :  { %7827 = vmatpush1.bf16.msra.mxu0 %v7826_v52  ;;  %7863 = vmatpush1.bf16.msra.mxu1 %v7862_v54  ;;  %v7864_v52 = vpack.c.bf16 %v4435_v49, %v4432_v62  ;;  %v4666_v54 = vld [vmem:[#allocation7 + $0xc8] sm:$0xff]  ;;  %v4672_v62 = vld [vmem:[#allocation7 + $0xf8] sm:$0xff] }
 0xcf2   :  { %7829 = vmatprep.subr.bf16.mxu0 %v7828_v3  ;;  %v4431_v3 = vld [vmem:[#allocation9 + $0x30] sm:$0xff]  ;;  %v7924_v49 = vpack.c.bf16 %v4672_v62, %v4666_v54  ;;  %v4466_v62 = vld [vmem:[#allocation9 + $0x148] sm:$0xff] }
 0xcf3   :  { %v7866_v21 = vpack.c.bf16 %v4434_v8, %v4431_v3  ;;  %7865 = vmatprep.subr.bf16.mxu1 %v7864_v52  ;;  %v4665_v52 = vld [vmem:[#allocation7 + $0xc0] sm:$0xff]  ;;  %v4671_v3 = vld [vmem:[#allocation7 + $0xf0] sm:$0xff] }
 0xcf4   :  { %v7926_v8 = vpack.c.bf16 %v4671_v3, %v4665_v52  ;;  %v4463_v54 = vld [vmem:[#allocation9 + $0x130] sm:$0xff]  ;;  %v4469_v52 = vld [vmem:[#allocation9 + $0x160] sm:$0xff]  ;;  %v4472_v3 = vld [vmem:[#allocation9 + $0x178] sm:$0xff] }
 0xcf5   :  { %7831 = vmatpush1.bf16.msra.mxu0 %v7830_v38  ;;  %7867 = vmatpush1.bf16.msra.mxu1 %v7866_v21  ;;  %v7868_v38 = vpack.c.bf16 %v4441_v24, %v4438_v25  ;;  %v4678_v21 = vld [vmem:[#allocation7 + $0x128] sm:$0xff]  ;;  %v4684_v25 = vld [vmem:[#allocation7 + $0x158] sm:$0xff]  ;;  %v4677_v24 = vld [vmem:[#allocation7 + $0x120] sm:$0xff] }
 0xcf6   :  { %7833 = vmatprep.subr.bf16.mxu0 %v7832_v40  ;;  %v4437_v40 = vld [vmem:[#allocation9 + $0x60] sm:$0xff] }
 0xcf7   :  { %v7870_v56 = vpack.c.bf16 %v4440_v2, %v4437_v40  ;;  %7869 = vmatprep.subr.bf16.mxu1 %v7868_v38  ;;  %v7928_v38 = vpack.c.bf16 %v4684_v25, %v4678_v21  ;;  %v4683_v40 = vld [vmem:[#allocation7 + $0x150] sm:$0xff]  ;;  %v4650_v21 = vld [vmem:[#allocation7 + $0x48] sm:$0xff]  ;;  %v7914_v25 = vpack.c.bf16 %v4472_v3, %v4469_v52  ;;  %v4720_v52 = vld [vmem:[#allocation7 + $0x278] sm:$0xff] }
 0xcf8   :  { %v7930_v2 = vpack.c.bf16 %v4683_v40, %v4677_v24  ;;  %v4649_v40 = vld [vmem:[#allocation7 + $0x40] sm:$0xff] }
 0xcf9   :  { %7835 = vmatpush1.bf16.msra.mxu0 %v7834_v59  ;;  %7871 = vmatpush1.bf16.msra.mxu1 %v7870_v56  ;;  %v7872_v59 = vpack.c.bf16 %v4447_v30, %v4444_v9  ;;  %v4400_v56 = vld [vmem:[#allocation4 + $0x90] sm:$0xff] }
 0xcfa   :  { %7837 = vmatprep.subr.bf16.mxu0 %v7836_v1  ;;  %v4443_v1 = vld [vmem:[#allocation9 + $0x90] sm:$0xff] }
 0xcfb   :  { %v7874_v41 = vpack.c.bf16 %v4446_v60, %v4443_v1  ;;  %7873 = vmatprep.subr.bf16.mxu1 %v7872_v59  ;;  %v4401_v60 = vld [vmem:[#allocation4 + $0x98] sm:$0xff] }
 0xcfd   :  { %7839 = vmatpush1.bf16.msra.mxu0 %v7838_v4  ;;  %7875 = vmatpush1.bf16.msra.mxu1 %v7874_v41  ;;  %v7876_v4 = vpack.c.bf16 %v4453_v63, %v4450_v35 }
 0xcfe   :  { %7841 = vmatprep.subr.bf16.mxu0 %v7840_v10  ;;  %v4449_v10 = vld [vmem:[#allocation9 + $0xc0] sm:$0xff] }
 0xcff   :  { %v7878_v14 = vpack.c.bf16 %v4452_v11, %v4449_v10  ;;  %7877 = vmatprep.subr.bf16.mxu1 %v7876_v4 }
 0xd01   :  { %7843 = vmatpush1.bf16.msra.mxu0 %v7842_v58  ;;  %7879 = vmatpush1.bf16.msra.mxu1 %v7878_v14  ;;  %v7880_v58 = vpack.c.bf16 %v4459_v16, %v4456_v15 }
 0xd02   :  { %7845 = vmatprep.subr.bf16.mxu0 %v7844_v36  ;;  %v4455_v36 = vld [vmem:[#allocation9 + $0xf0] sm:$0xff] }
 0xd03   :  { %v7882_v48 = vpack.c.bf16 %v4458_v17, %v4455_v36  ;;  %7881 = vmatprep.subr.bf16.mxu1 %v7880_v58  ;;  %v4402_v58 = vld [vmem:[#allocation4 + $0xa0] sm:$0xff] }
 0xd05   :  { %7847 = vmatpush1.bf16.msra.mxu0 %v7846_v18  ;;  %7883 = vmatpush1.bf16.msra.mxu1 %v7882_v48  ;;  %v7884_v18 = vpack.c.bf16 %v4465_v6, %v4462_v57  ;;  %v4427_v6 = vld [vmem:[#allocation9 + $0x10] sm:$0xff] }
 0xd06   :  { %7849 = vmatprep.subr.bf16.mxu0 %v7848_v19  ;;  %v4461_v19 = vld [vmem:[#allocation9 + $0x120] sm:$0xff] }
 0xd07   :  { %v7886_v32 = vpack.c.bf16 %v4464_v42, %v4461_v19  ;;  %7885 = vmatprep.subr.bf16.mxu1 %v7884_v18  ;;  %v4430_v18 = vld [vmem:[#allocation9 + $0x28] sm:$0xff] }
 0xd09   :  { %7851 = vmatpush1.bf16.msra.mxu0 %v7850_v12  ;;  %7887 = vmatpush1.bf16.msra.mxu1 %v7886_v32  ;;  %v7888_v12 = vpack.c.bf16 %v4471_v47, %v4468_v46  ;;  %v7893_v46 = vpack.c.bf16 %v4430_v18, %v4427_v6  ;;  %v4696_v6 = vld [vmem:[#allocation7 + $0x1b8] sm:$0xff] }
 0xd0a   :  { %7853 = vmatprep.subr.bf16.mxu0 %v7852_v43  ;;  %v4467_v43 = vld [vmem:[#allocation9 + $0x150] sm:$0xff] }
 0xd0b   :  { %v7890_v50 = vpack.c.bf16 %v4470_v13, %v4467_v43  ;;  %7889 = vmatprep.subr.bf16.mxu1 %v7888_v12  ;;  %v4433_v12 = vld [vmem:[#allocation9 + $0x40] sm:$0xff]  ;;  %v4436_v43 = vld [vmem:[#allocation9 + $0x58] sm:$0xff] }
 0xd0c   :  { %v7896_v13 = vpack.c.bf16 %v4436_v43, %v4433_v12  ;;  %v4698_v12 = vld [vmem:[#allocation7 + $0x1c8] sm:$0xff]  ;;  %v4691_v43 = vld [vmem:[#allocation7 + $0x190] sm:$0xff] }
 0xd0d   :  { %7855 = vmatpush1.bf16.msra.mxu0 %v7854_v27  ;;  %7891 = vmatpush1.bf16.msra.mxu1 %v7890_v50  ;;  %v4641_v27 = vld [vmem:[#allocation7] sm:$0xff]  ;;  %v4439_v50 = vld [vmem:[#allocation9 + $0x70] sm:$0xff] }
 0xd0e   :  { %7857 = vmatprep.subr.bf16.mxu0 %v7856_v44  ;;  %7892 = vmatprep.subr.bf16.mxu1 %v8555_v34  ;;  %v7916_v44 = vpack.c.bf16 %v4648_v26, %v4642_v61  ;;  %v7918_v53 = vpack.c.bf16 %v4647_v31, %v4641_v27  ;;  %v4442_v61 = vld [vmem:[#allocation9 + $0x88] sm:$0xff]  ;;  %v4448_v27 = vld [vmem:[#allocation9 + $0xb8] sm:$0xff]  ;;  %v4451_v31 = vld [vmem:[#allocation9 + $0xd0] sm:$0xff] }
 0xd0f   :  { %v7899_v26 = vpack.c.bf16 %v4442_v61, %v4439_v50 }
 0xd11   :  { %7859 = vmatpush1.bf16.msra.mxu0 %v7858_v22  ;;  %v4654_v22 = vld [vmem:[#allocation7 + $0x68] sm:$0xff] }
 0xd12   :  { %7917 = vmatprep.subr.bf16.mxu0 %v7916_v44  ;;  %v7920_v51 = vpack.c.bf16 %v4660_v55, %v4654_v22  ;;  %v4457_v55 = vld [vmem:[#allocation9 + $0x100] sm:$0xff] }
 0xd14   :  { %4391 = vmatmul.mubr.f32.vlgmr.msra.gmra.mrb[26].mxu0 %v8987_v23 }
 0xd15   :  { %7919 = vmatpush1.bf16.msra.mxu0 %v7918_v53  ;;  %v4454_v53 = vld [vmem:[#allocation9 + $0xe8] sm:$0xff] }
 0xd16   :  { %7921 = vmatprep.subr.bf16.mxu0 %v7920_v51  ;;  %v7905_v22 = vpack.c.bf16 %v4454_v53, %v4451_v31  ;;  %v4707_v31 = vld [vmem:[#allocation7 + $0x210] sm:$0xff]  ;;  %v4704_v53 = vld [vmem:[#allocation7 + $0x1f8] sm:$0xff] }
 0xd19   :  { %7923 = vmatpush1.bf16.msra.mxu0 %v7922_v20  ;;  %v7908_v20 = vpack.c.bf16 %v4460_v29, %v4457_v55  ;;  %v4710_v55 = vld [vmem:[#allocation7 + $0x228] sm:$0xff]  ;;  %v4703_v29 = vld [vmem:[#allocation7 + $0x1f0] sm:$0xff] }
 0xd1a   :  { %7925 = vmatprep.subr.bf16.mxu0 %v7924_v49  ;;  %v7911_v49 = vpack.c.bf16 %v4466_v62, %v4463_v54  ;;  %v8000_v54 = vpack.c.bf16 %v4710_v55, %v4704_v53  ;;  %v4751_v53 = vld [vmem:[#allocation7 + $0x370] sm:$0xff]  ;;  %v4762_v55 = vld [vmem:[#allocation7 + $0x3c8] sm:$0xff] }
 0xd1d   :  { %7927 = vmatpush1.bf16.msra.mxu0 %v7926_v8  ;;  %v4644_v8 = vld [vmem:[#allocation7 + $0x18] sm:$0xff] }
 0xd1e   :  { %7929 = vmatprep.subr.bf16.mxu0 %v7928_v38  ;;  %v7980_v24 = vpack.c.bf16 %v4650_v21, %v4644_v8  ;;  %v4643_v38 = vld [vmem:[#allocation7 + $0x10] sm:$0xff]  ;;  %v4713_v8 = vld [vmem:[#allocation7 + $0x240] sm:$0xff] }
 0xd1f   :  { %v4719_v21 = vld [vmem:[#allocation7 + $0x270] sm:$0xff] }
 0xd21   :  { %7931 = vmatpush1.bf16.msra.mxu0 %v7930_v2  ;;  %v4656_v2 = vld [vmem:[#allocation7 + $0x78] sm:$0xff] }
 0xda7   :  { %v4250_v9 = vpop.f32.mrb[24].mxu0  ;;  %v4321_v30 = vpop.f32.mrb[36].mxu1 }
 0xda8   :  { %v4404_v59 = vadd.f32 %v4400_v56, %v4250_v9  ;;  %v4252_v1 = vpop.f32.mrb[25].mxu0  ;;  %v9018_v41 = vpop.f32.mrb[37].mxu1  ;;  %v4662_v56 = vld [vmem:[#allocation7 + $0xa8] sm:$0xff]  ;;  %v7982_v9 = vpack.c.bf16 %v4649_v40, %v4643_v38  ;;  %v4715_v40 = vld [vmem:[#allocation7 + $0x250] sm:$0xff] }
 0xda9   :  { %v4411_v63 = vadd.f32 %v4401_v60, %v4252_v1  ;;  %v4661_v1 = vld [vmem:[#allocation7 + $0xa0] sm:$0xff]  ;;  %v4668_v60 = vld [vmem:[#allocation7 + $0xd8] sm:$0xff]  ;;  %v4722_v38 = vld [vmem:[#allocation7 + $0x288] sm:$0xff] }
 0xdaa   :  { %v5618_v35 = vmul.f32 -1.442695, %v4404_v59  ;;  %v4655_v59 = vld [vmem:[#allocation7 + $0x70] sm:$0xff] }
 0xdab   :  { %v5619_v4 = vmul.f32 -1.442695, %v4411_v63  ;;  %v7986_v63 = vpack.c.bf16 %v4661_v1, %v4655_v59  ;;  %v4732_v59 = vld [vmem:[#allocation7 + $0x2d8] sm:$0xff] }
 0xdac   :  { %8363 = vpow2.f32 %v5618_v35  ;;  %v4674_v35 = vld [vmem:[#allocation7 + $0x108] sm:$0xff] }
 0xdad   :  { %8365 = vpow2.f32 %v5619_v4  ;;  %v7988_v4 = vpack.c.bf16 %v4674_v35, %v4668_v60  ;;  %v4725_v60 = vld [vmem:[#allocation7 + $0x2a0] sm:$0xff]  ;;  %v4731_v35 = vld [vmem:[#allocation7 + $0x2d0] sm:$0xff] }
 0xdb6   :  { %v8364_v10 = vpop.eup %8363 }
 0xdb7   :  { %v4408_v11 = vadd.f32 1.0, %v8364_v10  ;;  %v8366_v14 = vpop.eup %8365  ;;  %v4667_v10 = vld [vmem:[#allocation7 + $0xd0] sm:$0xff] }
 0xdb8   :  { %v4415_v15 = vadd.f32 1.0, %v8366_v14  ;;  %v4680_v14 = vld [vmem:[#allocation7 + $0x138] sm:$0xff] }
 0xdb9   :  { %8367 = vrcp.f32 %v4408_v11  ;;  %v4673_v11 = vld [vmem:[#allocation7 + $0x100] sm:$0xff] }
 0xdba   :  { %8369 = vrcp.f32 %v4415_v15  ;;  %v4686_v15 = vld [vmem:[#allocation7 + $0x168] sm:$0xff] }
 0xdc3   :  { %v8368_v16 = vpop.eup %8367 }
 0xdc4   :  { %v4418_v36 = vmul.f32 %v8368_v16, %v4321_v30  ;;  %v8370_v48 = vpop.eup %8369  ;;  %v7984_v30 = vpack.c.bf16 %v4662_v56, %v4656_v2  ;;  %v7990_v16 = vpack.c.bf16 %v4673_v11, %v4667_v10  ;;  %v4721_v2 = vld [vmem:[#allocation7 + $0x280] sm:$0xff]  ;;  %v4734_v10 = vld [vmem:[#allocation7 + $0x2e8] sm:$0xff]  ;;  %v4727_v11 = vld [vmem:[#allocation7 + $0x2b0] sm:$0xff] }
 0xdc5   :  { %v4421_v57 = vsub.f32 1.0, %v8370_v48  ;;  %v4423_v32 = vmul.f32 %v8370_v48, %v8987_v23  ;;  %v4445_v23 = vld [vmem:[#allocation9 + $0xa0] sm:$0xff] }
 0xdc6   :  { %v4419_v17 = vadd.f32 %v4418_v36, %v4402_v58  ;;  %v7902_v44 = vpack.c.bf16 %v4448_v27, %v4445_v23  ;;  %v7992_v58 = vpack.c.bf16 %v4686_v15, %v4680_v14  ;;  %v4679_v36 = vld [vmem:[#allocation7 + $0x130] sm:$0xff]  ;;  %v4708_v23 = vld [vmem:[#allocation7 + $0x218] sm:$0xff]  ;;  %v4733_v14 = vld [vmem:[#allocation7 + $0x2e0] sm:$0xff] }
 0xdc8   :  { %8371 = vtanh.f32 %v4419_v17  ;;  %v4685_v17 = vld [vmem:[#allocation7 + $0x160] sm:$0xff] }
 0xdc9   :  { %v7994_v48 = vpack.c.bf16 %v4685_v17, %v4679_v36  ;;  %v4744_v36 = vld [vmem:[#allocation7 + $0x338] sm:$0xff] }
 0xdd2   :  { %v8372_v19 = vpop.eup %8371 }
 0xdd3   :  { %v4422_v42 = vmul.f32 %v8372_v19, %v4421_v57  ;;  %v4690_v57 = vld [vmem:[#allocation7 + $0x188] sm:$0xff]  ;;  %v4689_v19 = vld [vmem:[#allocation7 + $0x180] sm:$0xff] }
 0xdd4   :  { %v7932_v18 = vpack.c.bf16 %v4696_v6, %v4690_v57  ;;  %v4743_v57 = vld [vmem:[#allocation7 + $0x330] sm:$0xff]  ;;  %v4740_v6 = vld [vmem:[#allocation7 + $0x318] sm:$0xff] }
 0xdd5   :  { %v9021_v47 = vadd.f32 %v4423_v32, %v4422_v42  ;;  %v4695_v42 = vld [vmem:[#allocation7 + $0x1b0] sm:$0xff]  ;;  %v4692_v32 = vld [vmem:[#allocation7 + $0x198] sm:$0xff] }
 0xdd6   :  { %7933 = vmatprep.subr.bf16.mxu0 %v7932_v18  ;;  %v7996_v50 = vpack.c.bf16 %v4698_v12, %v4692_v32  ;;  %v4745_v32 = vld [vmem:[#allocation7 + $0x340] sm:$0xff] }
 0xdd7   :  { %4538 = vmatmul.mubr.f32.vlgmr.msra.gmra.mrb[38].mxu1 %v9021_v47 }
 0xdd8   :  { %7894 = vmatpush3.bf16.msra.mxu1 %v7893_v46  ;;  %6054 = vmatprep.mubr.msk.f32.mxu1 %vm8556_vm0, %v8554_v0  ;;  %v7934_v46 = vpack.c.bf16 %v4695_v42, %v4689_v19  ;;  %v4746_v19 = vld [vmem:[#allocation7 + $0x348] sm:$0xff]  ;;  %v4739_v42 = vld [vmem:[#allocation7 + $0x310] sm:$0xff] }
 0xdd9   :  { %7895 = vmatprep.subr.bf16.mxu1 %v8555_v34  ;;  %v8014_v12 = vpack.c.bf16 %v4745_v32, %v4739_v42  ;;  %v4798_v42 = vld [vmem:[#allocation7 + $0x4e8] sm:$0xff]  ;;  %v4804_v32 = vld [vmem:[#allocation7 + $0x518] sm:$0xff] }
 0xdda   :  { %7935 = vmatpush1.bf16.msra.mxu0 %v7934_v46  ;;  %v8012_v46 = vpack.c.bf16 %v4746_v19, %v4740_v6  ;;  %v4793_v6 = vld [vmem:[#allocation7 + $0x4c0] sm:$0xff] }
 0xddc   :  { %7897 = vmatpush3.bf16.msra.mxu1 %v7896_v13  ;;  %v4697_v13 = vld [vmem:[#allocation7 + $0x1c0] sm:$0xff] }
 0xddd   :  { %7898 = vmatprep.subr.bf16.mxu1 %v8555_v34  ;;  %v7998_v61 = vpack.c.bf16 %v4697_v13, %v4691_v43  ;;  %v4750_v43 = vld [vmem:[#allocation7 + $0x368] sm:$0xff]  ;;  %v4756_v13 = vld [vmem:[#allocation7 + $0x398] sm:$0xff] }
 0xde0   :  { %7900 = vmatpush3.bf16.msra.mxu1 %v7899_v26  ;;  %v4702_v26 = vld [vmem:[#allocation7 + $0x1e8] sm:$0xff] }
 0xde1   :  { %7901 = vmatprep.subr.bf16.mxu1 %v8555_v34  ;;  %v7936_v27 = vpack.c.bf16 %v4708_v23, %v4702_v26  ;;  %v4755_v26 = vld [vmem:[#allocation7 + $0x390] sm:$0xff]  ;;  %v4752_v23 = vld [vmem:[#allocation7 + $0x378] sm:$0xff] }
 0xde3   :  { %7937 = vmatprep.subr.bf16.mxu0 %v7936_v27  ;;  %v4758_v27 = vld [vmem:[#allocation7 + $0x3a8] sm:$0xff] }
 0xde4   :  { %7903 = vmatpush3.bf16.msra.mxu1 %v7902_v44  ;;  %v4701_v44 = vld [vmem:[#allocation7 + $0x1e0] sm:$0xff] }
 0xde5   :  { %7904 = vmatprep.subr.bf16.mxu1 %v8555_v34 }
 0xde7   :  { %v9030_v37 = vpop.f32.mrb[26].mxu0 }
 0xde8   :  { %v9032_v51 = vpop.f32.mrb[27].mxu0  ;;  %7906 = vmatpush3.bf16.msra.mxu1 %v7905_v22  ;;  %v7938_v22 = vpack.c.bf16 %v4707_v31, %v4701_v44  ;;  %v8016_v31 = vpack.c.bf16 %v4758_v27, %v4752_v23  ;;  %v4805_v23 = vld [vmem:[#allocation7 + $0x520] sm:$0xff] }
 0xde9   :  { %7907 = vmatprep.subr.bf16.mxu1 %v8555_v34 }
 0xdea   :  { %7939 = vmatpush1.bf16.msra.mxu0 %v7938_v22  ;;  %v4757_v22 = vld [vmem:[#allocation7 + $0x3a0] sm:$0xff] }
 0xdec   :  { %7909 = vmatpush3.bf16.msra.mxu1 %v7908_v20  ;;  %v4709_v20 = vld [vmem:[#allocation7 + $0x220] sm:$0xff] }
 0xded   :  { %7910 = vmatprep.subr.bf16.mxu1 %v8555_v34  ;;  %v8002_v62 = vpack.c.bf16 %v4709_v20, %v4703_v29  ;;  %v8018_v29 = vpack.c.bf16 %v4757_v22, %v4751_v53  ;;  %v4768_v20 = vld [vmem:[#allocation7 + $0x3f8] sm:$0xff] }
 0xdee   :  { %v4816_v53 = vld [vmem:[#allocation7 + $0x578] sm:$0xff] }
 0xdf0   :  { %7912 = vmatpush3.bf16.msra.mxu1 %v7911_v49  ;;  %v4714_v49 = vld [vmem:[#allocation7 + $0x248] sm:$0xff] }
 0xdf1   :  { %7913 = vmatprep.subr.bf16.mxu1 %v8555_v34  ;;  %v7940_v3 = vpack.c.bf16 %v4720_v52, %v4714_v49  ;;  %v7956_v49 = vpack.c.bf16 %v4768_v20, %v4762_v55  ;;  %v4809_v55 = vld [vmem:[#allocation7 + $0x540] sm:$0xff]  ;;  %v4812_v20 = vld [vmem:[#allocation7 + $0x558] sm:$0xff] }
 0xdf3   :  { %7941 = vmatprep.subr.bf16.mxu0 %v7940_v3  ;;  %v4764_v3 = vld [vmem:[#allocation7 + $0x3d8] sm:$0xff] }
 0xdf4   :  { %7915 = vmatpush3.bf16.msra.mxu1 %v7914_v25  ;;  %v4716_v25 = vld [vmem:[#allocation7 + $0x258] sm:$0xff] }
 0xdf5   :  { %7981 = vmatprep.subr.bf16.mxu1 %v7980_v24  ;;  %v7942_v24 = vpack.c.bf16 %v4719_v21, %v4713_v8  ;;  %v8004_v56 = vpack.c.bf16 %v4722_v38, %v4716_v25  ;;  %v4770_v8 = vld [vmem:[#allocation7 + $0x408] sm:$0xff]  ;;  %v4763_v21 = vld [vmem:[#allocation7 + $0x3d0] sm:$0xff] }
 0xdf6   :  { %v8020_v25 = vpack.c.bf16 %v4770_v8, %v4764_v3  ;;  %v4774_v38 = vld [vmem:[#allocation7 + $0x428] sm:$0xff] }
 0xdf7   :  { %6055 = vmatmul.mubr.f32.vlgmr.msra.gmra.mrb[40].mxu1 %v9021_v47  ;;  %7943 = vmatpush1.bf16.msra.mxu0 %v7942_v24  ;;  %v4769_v24 = vld [vmem:[#allocation7 + $0x400] sm:$0xff] }
 0xdf8   :  { %7983 = vmatpush1.bf16.msra.mxu1 %v7982_v9  ;;  %v8006_v9 = vpack.c.bf16 %v4721_v2, %v4715_v40  ;;  %v4780_v40 = vld [vmem:[#allocation7 + $0x458] sm:$0xff]  ;;  %v8022_v2 = vpack.c.bf16 %v4769_v24, %v4763_v21  ;;  %v4822_v21 = vld [vmem:[#allocation7 + $0x5a8] sm:$0xff] }
 0xdf9   :  { %7985 = vmatprep.subr.bf16.mxu1 %v7984_v30  ;;  %v4726_v30 = vld [vmem:[#allocation7 + $0x2a8] sm:$0xff] }
 0xdfa   :  { %v7944_v1 = vpack.c.bf16 %v4732_v59, %v4726_v30  ;;  %v4779_v30 = vld [vmem:[#allocation7 + $0x450] sm:$0xff]  ;;  %v4776_v59 = vld [vmem:[#allocation7 + $0x438] sm:$0xff] }
 0xdfc   :  { %7987 = vmatpush1.bf16.msra.mxu1 %v7986_v63  ;;  %v4728_v63 = vld [vmem:[#allocation7 + $0x2b8] sm:$0xff]  ;;  %7945 = vmatprep.subr.bf16.mxu0 %v7944_v1  ;;  %v4782_v1 = vld [vmem:[#allocation7 + $0x468] sm:$0xff] }
 0xdfd   :  { %7989 = vmatprep.subr.bf16.mxu1 %v7988_v4  ;;  %v7946_v4 = vpack.c.bf16 %v4731_v35, %v4725_v60  ;;  %v8008_v15 = vpack.c.bf16 %v4734_v10, %v4728_v63  ;;  %v8024_v35 = vpack.c.bf16 %v4782_v1, %v4776_v59  ;;  %v4775_v63 = vld [vmem:[#allocation7 + $0x430] sm:$0xff]  ;;  %v4829_v59 = vld [vmem:[#allocation7 + $0x5e0] sm:$0xff] }
 0xdff   :  { %7947 = vmatpush1.bf16.msra.mxu0 %v7946_v4  ;;  %v4781_v4 = vld [vmem:[#allocation7 + $0x460] sm:$0xff] }
 0xe00   :  { %7991 = vmatpush1.bf16.msra.mxu1 %v7990_v16  ;;  %v8010_v16 = vpack.c.bf16 %v4733_v14, %v4727_v11  ;;  %v8026_v10 = vpack.c.bf16 %v4781_v4, %v4775_v63  ;;  %v4786_v11 = vld [vmem:[#allocation7 + $0x488] sm:$0xff]  ;;  %v4792_v14 = vld [vmem:[#allocation7 + $0x4b8] sm:$0xff] }
 0xe01   :  { %7993 = vmatprep.subr.bf16.mxu1 %v7992_v58  ;;  %v4738_v58 = vld [vmem:[#allocation7 + $0x308] sm:$0xff]  ;;  %v4652_v63 = vld [vmem:[#allocation7 + $0x58] sm:$0xff] }
 0xe02   :  { %v7948_v17 = vpack.c.bf16 %v4744_v36, %v4738_v58  ;;  %v4791_v58 = vld [vmem:[#allocation7 + $0x4b0] sm:$0xff]  ;;  %v4788_v36 = vld [vmem:[#allocation7 + $0x498] sm:$0xff] }
 0xe04   :  { %7995 = vmatpush1.bf16.msra.mxu1 %v7994_v48  ;;  %v4737_v48 = vld [vmem:[#allocation7 + $0x300] sm:$0xff]  ;;  %7949 = vmatprep.subr.bf16.mxu0 %v7948_v17 }
 0xe05   :  { %7997 = vmatprep.subr.bf16.mxu1 %v7996_v50  ;;  %v7950_v18 = vpack.c.bf16 %v4743_v57, %v4737_v48  ;;  %v4749_v50 = vld [vmem:[#allocation7 + $0x360] sm:$0xff]  ;;  %v4794_v48 = vld [vmem:[#allocation7 + $0x4c8] sm:$0xff]  ;;  %v4787_v57 = vld [vmem:[#allocation7 + $0x490] sm:$0xff] }
 0xe06   :  { %v7954_v44 = vpack.c.bf16 %v4755_v26, %v4749_v50  ;;  %v8030_v19 = vpack.c.bf16 %v4793_v6, %v4787_v57  ;;  %v4799_v26 = vld [vmem:[#allocation7 + $0x4f0] sm:$0xff] }
 0xe07   :  { %7951 = vmatpush1.bf16.msra.mxu0 %v7950_v18  ;;  %v8028_v18 = vpack.c.bf16 %v4794_v48, %v4788_v36 }
 0xe08   :  { %7999 = vmatpush1.bf16.msra.mxu1 %v7998_v61  ;;  %v7952_v61 = vpack.c.bf16 %v4756_v13, %v4750_v43  ;;  %v4803_v43 = vld [vmem:[#allocation7 + $0x510] sm:$0xff]  ;;  %v4800_v13 = vld [vmem:[#allocation7 + $0x4f8] sm:$0xff] }
 0xe09   :  { %8001 = vmatprep.subr.bf16.mxu1 %v8000_v54  ;;  %v4761_v54 = vld [vmem:[#allocation7 + $0x3c0] sm:$0xff] }
 0xe0a   :  { %7953 = vmatprep.subr.bf16.mxu0 %v7952_v61  ;;  %v4806_v61 = vld [vmem:[#allocation7 + $0x528] sm:$0xff] }
 0xe0b   :  { %7955 = vmatpush1.bf16.msra.mxu0 %v7954_v44  ;;  %v8032_v27 = vpack.c.bf16 %v4806_v61, %v4800_v13  ;;  %v8034_v44 = vpack.c.bf16 %v4805_v23, %v4799_v26  ;;  %v4658_v61 = vld [vmem:[#allocation7 + $0x88] sm:$0xff]  ;;  %v4664_v26 = vld [vmem:[#allocation7 + $0xb8] sm:$0xff] }
 0xe0c   :  { %8003 = vmatpush1.bf16.msra.mxu1 %v8002_v62  ;;  %v4767_v62 = vld [vmem:[#allocation7 + $0x3f0] sm:$0xff]  ;;  %7957 = vmatprep.subr.bf16.mxu0 %v7956_v49 }
 0xe0d   :  { %8005 = vmatprep.subr.bf16.mxu1 %v8004_v56  ;;  %v7958_v52 = vpack.c.bf16 %v4767_v62, %v4761_v54  ;;  %v7960_v56 = vpack.c.bf16 %v4780_v40, %v4774_v38  ;;  %v4818_v62 = vld [vmem:[#allocation7 + $0x588] sm:$0xff]  ;;  %v4811_v49 = vld [vmem:[#allocation7 + $0x550] sm:$0xff]  ;;  %v4821_v38 = vld [vmem:[#allocation7 + $0x5a0] sm:$0xff] }
 0xe0e   :  { %v8036_v3 = vpack.c.bf16 %v4818_v62, %v4812_v20  ;;  %v4827_v40 = vld [vmem:[#allocation7 + $0x5d0] sm:$0xff]  ;;  %v4669_v20 = vld [vmem:[#allocation7 + $0xe0] sm:$0xff]  ;;  %v4682_v62 = vld [vmem:[#allocation7 + $0x148] sm:$0xff] }
 0xe0f   :  { %7959 = vmatpush1.bf16.msra.mxu0 %v7958_v52  ;;  %v4817_v52 = vld [vmem:[#allocation7 + $0x580] sm:$0xff] }
 0xe10   :  { %8007 = vmatpush1.bf16.msra.mxu1 %v8006_v9  ;;  %v4773_v9 = vld [vmem:[#allocation7 + $0x420] sm:$0xff]  ;;  %7961 = vmatprep.subr.bf16.mxu0 %v7960_v56  ;;  %v8038_v8 = vpack.c.bf16 %v4817_v52, %v4811_v49  ;;  %v7978_v56 = vpack.c.bf16 %v4827_v40, %v4821_v38  ;;  %v4688_v49 = vld [vmem:[#allocation7 + $0x178] sm:$0xff] }
 0xe11   :  { %8009 = vmatprep.subr.bf16.mxu1 %v8008_v15  ;;  %v7962_v60 = vpack.c.bf16 %v4779_v30, %v4773_v9  ;;  %v7964_v15 = vpack.c.bf16 %v4792_v14, %v4786_v11  ;;  %v4830_v9 = vld [vmem:[#allocation7 + $0x5e8] sm:$0xff]  ;;  %v4823_v30 = vld [vmem:[#allocation7 + $0x5b0] sm:$0xff] }
 0xe13   :  { %7963 = vmatpush1.bf16.msra.mxu0 %v7962_v60  ;;  %v8042_v60 = vpack.c.bf16 %v4829_v59, %v4823_v30  ;;  %v4712_v30 = vld [vmem:[#allocation7 + $0x238] sm:$0xff] }
 0xe14   :  { %8011 = vmatpush1.bf16.msra.mxu1 %v8010_v16  ;;  %v4785_v16 = vld [vmem:[#allocation7 + $0x480] sm:$0xff]  ;;  %7965 = vmatprep.subr.bf16.mxu0 %v7964_v15 }
 0xe15   :  { %8013 = vmatprep.subr.bf16.mxu1 %v8012_v46  ;;  %v7966_v17 = vpack.c.bf16 %v4791_v58, %v4785_v16  ;;  %v7968_v46 = vpack.c.bf16 %v4804_v32, %v4798_v42 }
 0xe17   :  { %7967 = vmatpush1.bf16.msra.mxu0 %v7966_v17 }
 0xe18   :  { %8015 = vmatpush1.bf16.msra.mxu1 %v8014_v12  ;;  %v4797_v12 = vld [vmem:[#allocation7 + $0x4e0] sm:$0xff]  ;;  %7969 = vmatprep.subr.bf16.mxu0 %v7968_v46 }
 0xe19   :  { %8017 = vmatprep.subr.bf16.mxu1 %v8016_v31  ;;  %v7970_v50 = vpack.c.bf16 %v4803_v43, %v4797_v12  ;;  %v4810_v31 = vld [vmem:[#allocation7 + $0x548] sm:$0xff]  ;;  %v4645_v12 = vld [vmem:[#allocation7 + $0x20] sm:$0xff]  ;;  %v4651_v43 = vld [vmem:[#allocation7 + $0x50] sm:$0xff] }
 0xe1a   :  { %v7972_v22 = vpack.c.bf16 %v4816_v53, %v4810_v31  ;;  %v4663_v31 = vld [vmem:[#allocation7 + $0xb0] sm:$0xff]  ;;  %v4670_v53 = vld [vmem:[#allocation7 + $0xe8] sm:$0xff] }
 0xe1b   :  { %7971 = vmatpush1.bf16.msra.mxu0 %v7970_v50 }
 0xe1c   :  { %8019 = vmatpush1.bf16.msra.mxu1 %v8018_v29  ;;  %v4815_v29 = vld [vmem:[#allocation7 + $0x570] sm:$0xff]  ;;  %7973 = vmatprep.subr.bf16.mxu0 %v7972_v22  ;;  %v4676_v22 = vld [vmem:[#allocation7 + $0x118] sm:$0xff] }
 0xe1d   :  { %8021 = vmatprep.subr.bf16.mxu1 %v8020_v25  ;;  %v7974_v54 = vpack.c.bf16 %v4815_v29, %v4809_v55  ;;  %v4828_v25 = vld [vmem:[#allocation7 + $0x5d8] sm:$0xff]  ;;  %v8052_v29 = vpack.c.bf16 %v4676_v22, %v4670_v53  ;;  %v4778_v53 = vld [vmem:[#allocation7 + $0x448] sm:$0xff] }
 0xe1e   :  { %v7976_v24 = vpack.c.bf16 %v4828_v25, %v4822_v21  ;;  %v4687_v21 = vld [vmem:[#allocation7 + $0x170] sm:$0xff]  ;;  %v4694_v25 = vld [vmem:[#allocation7 + $0x1a8] sm:$0xff]  ;;  %v4784_v22 = vld [vmem:[#allocation7 + $0x478] sm:$0xff] }
 0xe1f   :  { %7975 = vmatpush1.bf16.msra.mxu0 %v7974_v54  ;;  %v4675_v54 = vld [vmem:[#allocation7 + $0x110] sm:$0xff] }
 0xe20   :  { %8023 = vmatpush1.bf16.msra.mxu1 %v8022_v2  ;;  %v4824_v2 = vld [vmem:[#allocation7 + $0x5b8] sm:$0xff]  ;;  %7977 = vmatprep.subr.bf16.mxu0 %v7976_v24  ;;  %v8054_v52 = vpack.c.bf16 %v4675_v54, %v4669_v20  ;;  %v4777_v20 = vld [vmem:[#allocation7 + $0x440] sm:$0xff]  ;;  %v4783_v54 = vld [vmem:[#allocation7 + $0x470] sm:$0xff] }
 0xe21   :  { %8025 = vmatprep.subr.bf16.mxu1 %v8024_v35  ;;  %v8040_v1 = vpack.c.bf16 %v4830_v9, %v4824_v2  ;;  %v4646_v35 = vld [vmem:[#allocation7 + $0x28] sm:$0xff]  ;;  %v4700_v24 = vld [vmem:[#allocation7 + $0x1d8] sm:$0xff]  ;;  %v4693_v2 = vld [vmem:[#allocation7 + $0x1a0] sm:$0xff] }
 0xe22   :  { %v8044_v4 = vpack.c.bf16 %v4652_v63, %v4646_v35  ;;  %v8060_v40 = vpack.c.bf16 %v4700_v24, %v4694_v25  ;;  %v4706_v9 = vld [vmem:[#allocation7 + $0x208] sm:$0xff]  ;;  %v4711_v35 = vld [vmem:[#allocation7 + $0x230] sm:$0xff]  ;;  %v4808_v24 = vld [vmem:[#allocation7 + $0x538] sm:$0xff] }
 0xe23   :  { %7979 = vmatpush1.bf16.msra.mxu0 %v7978_v56  ;;  %v4699_v56 = vld [vmem:[#allocation7 + $0x1d0] sm:$0xff]  ;;  %v4718_v63 = vld [vmem:[#allocation7 + $0x268] sm:$0xff] }
 0xe24   :  { %8027 = vmatpush1.bf16.msra.mxu1 %v8026_v10  ;;  %8045 = vmatprep.subr.bf16.mxu0 %v8044_v4  ;;  %v8062_v59 = vpack.c.bf16 %v4699_v56, %v4693_v2  ;;  %v4724_v4 = vld [vmem:[#allocation7 + $0x298] sm:$0xff]  ;;  %v4802_v25 = vld [vmem:[#allocation7 + $0x508] sm:$0xff]  ;;  %v4801_v2 = vld [vmem:[#allocation7 + $0x500] sm:$0xff] }
 0xe25   :  { %8029 = vmatprep.subr.bf16.mxu1 %v8028_v18  ;;  %v4807_v56 = vld [vmem:[#allocation7 + $0x530] sm:$0xff] }
 0xe28   :  { %8031 = vmatpush1.bf16.msra.mxu1 %v8030_v19 }
 0xe29   :  { %8033 = vmatprep.subr.bf16.mxu1 %v8032_v27  ;;  %v8046_v27 = vpack.c.bf16 %v4651_v43, %v4645_v12 }
 0xe2c   :  { %8035 = vmatpush1.bf16.msra.mxu1 %v8034_v44  ;;  %v8048_v44 = vpack.c.bf16 %v4664_v26, %v4658_v61  ;;  %v4766_v61 = vld [vmem:[#allocation7 + $0x3e8] sm:$0xff]  ;;  %v4772_v26 = vld [vmem:[#allocation7 + $0x418] sm:$0xff] }
 0xe2d   :  { %8037 = vmatprep.subr.bf16.mxu1 %v8036_v3  ;;  %v8056_v3 = vpack.c.bf16 %v4688_v49, %v4682_v62  ;;  %v4790_v62 = vld [vmem:[#allocation7 + $0x4a8] sm:$0xff]  ;;  %v4796_v49 = vld [vmem:[#allocation7 + $0x4d8] sm:$0xff] }
 0xe30   :  { %8039 = vmatpush1.bf16.msra.mxu1 %v8038_v8  ;;  %v4681_v8 = vld [vmem:[#allocation7 + $0x140] sm:$0xff] }
 0xe31   :  { %8041 = vmatprep.subr.bf16.mxu1 %v8040_v1  ;;  %v8058_v38 = vpack.c.bf16 %v4687_v21, %v4681_v8  ;;  %v8064_v1 = vpack.c.bf16 %v4712_v30, %v4706_v9  ;;  %v4789_v8 = vld [vmem:[#allocation7 + $0x4a0] sm:$0xff]  ;;  %v4795_v21 = vld [vmem:[#allocation7 + $0x4d0] sm:$0xff]  ;;  %v4814_v9 = vld [vmem:[#allocation7 + $0x568] sm:$0xff] }
 0xe32   :  { %v4820_v30 = vld [vmem:[#allocation7 + $0x598] sm:$0xff] }
 0xe34   :  { %8043 = vmatpush1.bf16.msra.mxu1 %v8042_v60  ;;  %v4705_v60 = vld [vmem:[#allocation7 + $0x200] sm:$0xff] }
 0xeaa   :  { %v4539_v10 = vpop.f32.mrb[38].mxu1 }
 0xeab   :  { %v4614_v11 = vadd.f32 %v4539_v10, %v9018_v41  ;;  %v4541_v14 = vpop.f32.mrb[39].mxu1  ;;  %v8066_v10 = vpack.c.bf16 %v4711_v35, %v4705_v60  ;;  %v4813_v60 = vld [vmem:[#allocation7 + $0x560] sm:$0xff]  ;;  %v4819_v35 = vld [vmem:[#allocation7 + $0x590] sm:$0xff] }
 0xeac   :  { %v4621_v15 = vadd.f32 %v4541_v14, %v9030_v37  ;;  %v4717_v14 = vld [vmem:[#allocation7 + $0x260] sm:$0xff] }
 0xead   :  { %v5620_v16 = vmul.f32 -1.442695, %v4614_v11  ;;  %v8068_v11 = vpack.c.bf16 %v4724_v4, %v4718_v63  ;;  %v4826_v63 = vld [vmem:[#allocation7 + $0x5c8] sm:$0xff]  ;;  %v4832_v4 = vld [vmem:[#allocation7 + $0x5f8] sm:$0xff] }
 0xeae   :  { %v5621_v58 = vmul.f32 -1.442695, %v4621_v15  ;;  %v4723_v15 = vld [vmem:[#allocation7 + $0x290] sm:$0xff] }
 0xeaf   :  { %8373 = vpow2.f32 %v5620_v16  ;;  %v4730_v16 = vld [vmem:[#allocation7 + $0x2c8] sm:$0xff] }
 0xeb0   :  { %8375 = vpow2.f32 %v5621_v58  ;;  %v4736_v58 = vld [vmem:[#allocation7 + $0x2f8] sm:$0xff] }
 0xeb9   :  { %v8374_v36 = vpop.eup %8373 }
 0xeba   :  { %v4618_v17 = vadd.f32 1.0, %v8374_v36  ;;  %v8376_v48 = vpop.eup %8375  ;;  %v8070_v36 = vpack.c.bf16 %v4723_v15, %v4717_v14  ;;  %v4825_v14 = vld [vmem:[#allocation7 + $0x5c0] sm:$0xff]  ;;  %v4831_v15 = vld [vmem:[#allocation7 + $0x5f0] sm:$0xff] }
 0xebb   :  { %v4625_v57 = vadd.f32 1.0, %v8376_v48  ;;  %v4729_v48 = vld [vmem:[#allocation7 + $0x2c0] sm:$0xff] }
 0xebc   :  { %8377 = vrcp.f32 %v4618_v17  ;;  %v8072_v17 = vpack.c.bf16 %v4736_v58, %v4730_v16  ;;  %v5296_v16 = vld [vmem:[#allocation10] sm:$0xff]  ;;  %v5297_v58 = vld [vmem:[#allocation10 + $0x8] sm:$0xff] }
 0xebd   :  { %8379 = vrcp.f32 %v4625_v57  ;;  %v4735_v57 = vld [vmem:[#allocation7 + $0x2f0] sm:$0xff] }
 0xec6   :  { %v8378_v6 = vpop.eup %8377 }
 0xec7   :  { %v4628_v18 = vmul.f32 %v8378_v6, %v9032_v51  ;;  %v8380_v41 = vpop.eup %8379  ;;  %v4657_v51 = vld [vmem:[#allocation7 + $0x80] sm:$0xff]  ;;  %v4742_v6 = vld [vmem:[#allocation7 + $0x328] sm:$0xff] }
 0xec8   :  { %v4631_v46 = vsub.f32 1.0, %v8380_v41  ;;  %v4633_v50 = vmul.f32 %v8380_v41, %v9008_v5  ;;  %v8050_v55 = vpack.c.bf16 %v4663_v31, %v4657_v51  ;;  %v4747_v41 = vld [vmem:[#allocation7 + $0x350] sm:$0xff]  ;;  %v4765_v51 = vld [vmem:[#allocation7 + $0x3e0] sm:$0xff] }
 0xec9   :  { %v4771_v31 = vld [vmem:[#allocation7 + $0x410] sm:$0xff] }
 0xeca   :  { %v4610_v19 = vpop.f32.mrb[40].mxu1 }
 0xecb   :  { %v4629_v42 = vadd.f32 %v4628_v18, %v4610_v19  ;;  %v6056_v32 = vpop.f32.mrb[41].mxu1  ;;  %v4748_v18 = vld [vmem:[#allocation7 + $0x358] sm:$0xff]  ;;  %v8074_v19 = vpack.c.bf16 %v4735_v57, %v4729_v48  ;;  %v5298_v48 = vld [vmem:[#allocation10 + $0x10] sm:$0xff] }
 0xecc   :  { %v4741_v32 = vld [vmem:[#allocation7 + $0x320] sm:$0xff]  ;;  %v5299_v57 = vld [vmem:[#allocation10 + $0x18] sm:$0xff] }
 0xecd   :  { %8381 = vtanh.f32 %v4629_v42  ;;  %v8076_v42 = vpack.c.bf16 %v4748_v18, %v4742_v6  ;;  %v8078_v12 = vpack.c.bf16 %v4747_v41, %v4741_v32  ;;  %v8168_v6 = vpack.c.bf16 %v5299_v57, %v5298_v48  ;;  %v5300_v18 = vld [vmem:[#allocation10 + $0x20] sm:$0xff]  ;;  %v5302_v32 = vld [vmem:[#allocation10 + $0x30] sm:$0xff]  ;;  %v5303_v41 = vld [vmem:[#allocation10 + $0x38] sm:$0xff] }
 0xece   :  { %v5110_v48 = vld [vmem:[#allocation9 + $0x120] sm:$0xff]  ;;  %v5113_v57 = vld [vmem:[#allocation9 + $0x138] sm:$0xff] }
 0xed7   :  { %v8382_v37 = vpop.eup %8381 }
 0xed8   :  { %v4632_v13 = vmul.f32 %v8382_v37, %v4631_v46  ;;  %v4754_v46 = vld [vmem:[#allocation7 + $0x388] sm:$0xff]  ;;  %v4760_v37 = vld [vmem:[#allocation7 + $0x3b8] sm:$0xff] }
 0xed9   :  { %v8080_v43 = vpack.c.bf16 %v4760_v37, %v4754_v46  ;;  %v8176_v46 = vpack.c.bf16 %v5303_v41, %v5302_v32  ;;  %v5304_v37 = vld [vmem:[#allocation10 + $0x40] sm:$0xff]  ;;  %v5116_v32 = vld [vmem:[#allocation9 + $0x150] sm:$0xff]  ;;  %v5119_v41 = vld [vmem:[#allocation9 + $0x168] sm:$0xff] }
 0xeda   :  { %v9042_v23 = vadd.f32 %v4633_v50, %v4632_v13  ;;  %v4753_v13 = vld [vmem:[#allocation7 + $0x380] sm:$0xff]  ;;  %v4759_v50 = vld [vmem:[#allocation7 + $0x3b0] sm:$0xff] }
 0xedc   :  { %4897 = vmatprep.mubr.f32.mxu0 %v9042_v23  ;;  %4968 = vmatprep.mubr.f32.mxu1 %v9042_v23 }
 0xedd   :  { %4898 = vmatmul.mubr.f32.vlgmr.msra.gmra.mrb[28].mxu0 %v9021_v47  ;;  %4969 = vmatmul.mubr.f32.vlgmr.msra.gmra.mrb[42].mxu1 %v9021_v47 }
 0xede   :  { %8047 = vmatpush1.bf16.msra.mxu0 %v8046_v27  ;;  %5039 = vmatprep.mubr.f32.mxu0 %v9042_v23  ;;  %v8082_v27 = vpack.c.bf16 %v4759_v50, %v4753_v13  ;;  %v5306_v13 = vld [vmem:[#allocation10 + $0x50] sm:$0xff]  ;;  %v5307_v50 = vld [vmem:[#allocation10 + $0x58] sm:$0xff] }
 0xedf   :  { %8049 = vmatprep.subr.bf16.mxu0 %v8048_v44  ;;  %5186 = vmatprep.mubr.f32.mxu1 %v8554_v0  ;;  %v8084_v44 = vpack.c.bf16 %v4772_v26, %v4766_v61  ;;  %v8184_v61 = vpack.c.bf16 %v5307_v50, %v5306_v13  ;;  %v5308_v26 = vld [vmem:[#allocation10 + $0x60] sm:$0xff] }
 0xee2   :  { %8051 = vmatpush1.bf16.msra.mxu0 %v8050_v55  ;;  %v8086_v55 = vpack.c.bf16 %v4771_v31, %v4765_v51  ;;  %v5311_v51 = vld [vmem:[#allocation10 + $0x78] sm:$0xff] }
 0xee3   :  { %8053 = vmatprep.subr.bf16.mxu0 %v8052_v29  ;;  %v8088_v29 = vpack.c.bf16 %v4784_v22, %v4778_v53  ;;  %v5075_v53 = vld [vmem:[#allocation9 + $0x8] sm:$0xff]  ;;  %v5078_v22 = vld [vmem:[#allocation9 + $0x20] sm:$0xff] }
 0xee6   :  { %8055 = vmatpush1.bf16.msra.mxu0 %v8054_v52  ;;  %v8090_v52 = vpack.c.bf16 %v4783_v54, %v4777_v20  ;;  %v5077_v20 = vld [vmem:[#allocation9 + $0x18] sm:$0xff] }
 0xee7   :  { %8057 = vmatprep.subr.bf16.mxu0 %v8056_v3  ;;  %v8092_v3 = vpack.c.bf16 %v4796_v49, %v4790_v62  ;;  %v5081_v62 = vld [vmem:[#allocation9 + $0x38] sm:$0xff]  ;;  %v5084_v49 = vld [vmem:[#allocation9 + $0x50] sm:$0xff] }
 0xeea   :  { %8059 = vmatpush1.bf16.msra.mxu0 %v8058_v38  ;;  %v8094_v38 = vpack.c.bf16 %v4795_v21, %v4789_v8  ;;  %v5083_v8 = vld [vmem:[#allocation9 + $0x48] sm:$0xff]  ;;  %v5090_v21 = vld [vmem:[#allocation9 + $0x80] sm:$0xff] }
 0xeeb   :  { %8061 = vmatprep.subr.bf16.mxu0 %v8060_v40  ;;  %v8096_v40 = vpack.c.bf16 %v4808_v24, %v4802_v25  ;;  %v5086_v24 = vld [vmem:[#allocation9 + $0x60] sm:$0xff] }
 0xeee   :  { %8063 = vmatpush1.bf16.msra.mxu0 %v8062_v59  ;;  %v8098_v59 = vpack.c.bf16 %v4807_v56, %v4801_v2  ;;  %v5092_v56 = vld [vmem:[#allocation9 + $0x90] sm:$0xff] }
 0xeef   :  { %8065 = vmatprep.subr.bf16.mxu0 %v8064_v1  ;;  %v8100_v1 = vpack.c.bf16 %v4820_v30, %v4814_v9  ;;  %v5095_v9 = vld [vmem:[#allocation9 + $0xa8] sm:$0xff] }
 0xef0   :  { %v8122_v30 = vpack.c.bf16 %v5095_v9, %v5092_v56  ;;  %v5094_v56 = vld [vmem:[#allocation9 + $0xa0] sm:$0xff] }
 0xef2   :  { %8067 = vmatpush1.bf16.msra.mxu0 %v8066_v10  ;;  %v8102_v10 = vpack.c.bf16 %v4819_v35, %v4813_v60  ;;  %v5098_v60 = vld [vmem:[#allocation9 + $0xc0] sm:$0xff]  ;;  %v5101_v35 = vld [vmem:[#allocation9 + $0xd8] sm:$0xff] }
 0xef3   :  { %8069 = vmatprep.subr.bf16.mxu0 %v8068_v11  ;;  %v8104_v11 = vpack.c.bf16 %v4832_v4, %v4826_v63  ;;  %v8126_v63 = vpack.c.bf16 %v5101_v35, %v5098_v60  ;;  %v5105_v4 = vld [vmem:[#allocation9 + $0xf8] sm:$0xff] }
 0xef6   :  { %8071 = vmatpush1.bf16.msra.mxu0 %v8070_v36  ;;  %v8106_v36 = vpack.c.bf16 %v4831_v15, %v4825_v14  ;;  %v5107_v15 = vld [vmem:[#allocation9 + $0x108] sm:$0xff] }
 0xef7   :  { %8073 = vmatprep.subr.bf16.mxu0 %v8072_v17  ;;  %v8164_v17 = vpack.c.bf16 %v5297_v58, %v5296_v16  ;;  %v5111_v16 = vld [vmem:[#allocation9 + $0x128] sm:$0xff]  ;;  %v5114_v58 = vld [vmem:[#allocation9 + $0x140] sm:$0xff] }
 0xefa   :  { %8075 = vmatpush1.bf16.msra.mxu0 %v8074_v19  ;;  %v5301_v19 = vld [vmem:[#allocation10 + $0x28] sm:$0xff] }
 0xefb   :  { %8077 = vmatprep.subr.bf16.mxu0 %v8076_v42  ;;  %v8172_v42 = vpack.c.bf16 %v5301_v19, %v5300_v18  ;;  %v5120_v18 = vld [vmem:[#allocation9 + $0x170] sm:$0xff]  ;;  %v8134_v19 = vpack.c.bf16 %v5113_v57, %v5110_v48  ;;  %v5435_v57 = vld [vmem:[#allocation12 + $0x18] sm:$0xff] }
 0xefc   :  { %v5434_v48 = vld [vmem:[#allocation12 + $0x10] sm:$0xff] }
 0xefe   :  { %8079 = vmatpush1.bf16.msra.mxu0 %v8078_v12  ;;  %v5305_v12 = vld [vmem:[#allocation10 + $0x48] sm:$0xff] }
 0xeff   :  { %8081 = vmatprep.subr.bf16.mxu0 %v8080_v43  ;;  %v8180_v43 = vpack.c.bf16 %v5305_v12, %v5304_v37  ;;  %v5049_v37 = vld [vmem:[#allocation4 + $0xa8] sm:$0xff] }
 0xf02   :  { %8083 = vmatpush1.bf16.msra.mxu0 %v8082_v27  ;;  %v5309_v27 = vld [vmem:[#allocation10 + $0x68] sm:$0xff] }
 0xf03   :  { %8085 = vmatprep.subr.bf16.mxu0 %v8084_v44  ;;  %v5310_v44 = vld [vmem:[#allocation10 + $0x70] sm:$0xff] }
 0xf04   :  { %v8192_v31 = vpack.c.bf16 %v5311_v51, %v5310_v44 }
 0xf06   :  { %8087 = vmatpush1.bf16.msra.mxu0 %v8086_v55  ;;  %v8108_v55 = vpack.c.bf16 %v5078_v22, %v5075_v53 }
 0xf07   :  { %8089 = vmatprep.subr.bf16.mxu0 %v8088_v29  ;;  %v5074_v29 = vld [vmem:[#allocation9] sm:$0xff] }
 0xf08   :  { %v8110_v54 = vpack.c.bf16 %v5077_v20, %v5074_v29  ;;  %8109 = vmatprep.subr.bf16.mxu1 %v8108_v55  ;;  %v5051_v29 = vld [vmem:[#allocation4 + $0xb8] sm:$0xff] }
 0xf0a   :  { %8091 = vmatpush1.bf16.msra.mxu0 %v8090_v52  ;;  %8111 = vmatpush1.bf16.msra.mxu1 %v8110_v54  ;;  %v8112_v52 = vpack.c.bf16 %v5084_v49, %v5081_v62 }
 0xf0b   :  { %8093 = vmatprep.subr.bf16.mxu0 %v8092_v3  ;;  %v5080_v3 = vld [vmem:[#allocation9 + $0x30] sm:$0xff] }
 0xf0c   :  { %8113 = vmatprep.subr.bf16.mxu1 %v8112_v52  ;;  %v5076_v52 = vld [vmem:[#allocation9 + $0x10] sm:$0xff] }
 0xf0e   :  { %8095 = vmatpush1.bf16.msra.mxu0 %v8094_v38 }
 0xf0f   :  { %8097 = vmatprep.subr.bf16.mxu0 %v8096_v40  ;;  %v5093_v40 = vld [vmem:[#allocation9 + $0x98] sm:$0xff] }
 0xf12   :  { %8099 = vmatpush1.bf16.msra.mxu0 %v8098_v59  ;;  %v5102_v59 = vld [vmem:[#allocation9 + $0xe0] sm:$0xff] }
 0xf13   :  { %8101 = vmatprep.subr.bf16.mxu0 %v8100_v1 }
 0xf16   :  { %8103 = vmatpush1.bf16.msra.mxu0 %v8102_v10  ;;  %v5108_v10 = vld [vmem:[#allocation9 + $0x110] sm:$0xff] }
 0xf17   :  { %8105 = vmatprep.subr.bf16.mxu0 %v8104_v11  ;;  %v5104_v11 = vld [vmem:[#allocation9 + $0xf0] sm:$0xff]  ;;  %v8128_v14 = vpack.c.bf16 %v5108_v10, %v5105_v4  ;;  %v5115_v10 = vld [vmem:[#allocation9 + $0x148] sm:$0xff] }
 0xf18   :  { %v5112_v4 = vld [vmem:[#allocation9 + $0x130] sm:$0xff] }
 0xf1a   :  { %8107 = vmatpush1.bf16.msra.mxu0 %v8106_v36  ;;  %v8130_v36 = vpack.c.bf16 %v5107_v15, %v5104_v11  ;;  %v8159_v11 = vpack.c.bf16 %v5115_v10, %v5112_v4  ;;  %v5121_v15 = vld [vmem:[#allocation9 + $0x178] sm:$0xff] }
 0xf1b   :  { %8165 = vmatprep.subr.bf16.mxu0 %v8164_v17 }
 0xf1d   :  { %5040 = vmatmul.mubr.f32.vlgmr.msra.gmra.mrb[30].mxu0 %v9021_v47 }
 0xf1e   :  { %8167 = vmatpush3.bf16.msra.mxu0 %v8164_v17  ;;  %6124 = vmatprep.mubr.f32.mxu0 %v8826_v39  ;;  %v8188_v39 = vpack.c.bf16 %v5309_v27, %v5308_v26  ;;  %v8132_v17 = vpack.c.bf16 %v5114_v58, %v5111_v16  ;;  %v5432_v16 = vld [vmem:[#allocation12] sm:$0xff]  ;;  %v5433_v58 = vld [vmem:[#allocation12 + $0x8] sm:$0xff] }
 0xf1f   :  { %8169 = vmatprep.subr.bf16.mxu0 %v8168_v6 }
 0xf22   :  { %8171 = vmatpush3.bf16.msra.mxu0 %v8168_v6  ;;  %v5117_v6 = vld [vmem:[#allocation9 + $0x158] sm:$0xff] }
 0xf23   :  { %8173 = vmatprep.subr.bf16.mxu0 %v8172_v42 }
 0xf26   :  { %8175 = vmatpush3.bf16.msra.mxu0 %v8172_v42  ;;  %v8136_v42 = vpack.c.bf16 %v5120_v18, %v5117_v6  ;;  %v8200_v6 = vpack.c.bf16 %v5435_v57, %v5434_v48  ;;  %v5436_v18 = vld [vmem:[#allocation12 + $0x20] sm:$0xff] }
 0xf27   :  { %8177 = vmatprep.subr.bf16.mxu0 %v8176_v46 }
 0xf2a   :  { %8179 = vmatpush3.bf16.msra.mxu0 %v8176_v46  ;;  %v8138_v46 = vpack.c.bf16 %v5119_v41, %v5116_v32  ;;  %v5438_v32 = vld [vmem:[#allocation12 + $0x30] sm:$0xff]  ;;  %v5439_v41 = vld [vmem:[#allocation12 + $0x38] sm:$0xff] }
 0xf2b   :  { %8181 = vmatprep.subr.bf16.mxu0 %v8180_v43 }
 0xf2e   :  { %8183 = vmatpush3.bf16.msra.mxu0 %v8180_v43 }
 0xf2f   :  { %8185 = vmatprep.subr.bf16.mxu0 %v8184_v61 }
 0xf32   :  { %8187 = vmatpush3.bf16.msra.mxu0 %v8184_v61  ;;  %v5050_v61 = vld [vmem:[#allocation4 + $0xb0] sm:$0xff] }
 0xf33   :  { %8189 = vmatprep.subr.bf16.mxu0 %v8188_v39 }
 0xf36   :  { %8191 = vmatpush3.bf16.msra.mxu0 %v8188_v39 }
 0xf37   :  { %8193 = vmatprep.subr.bf16.mxu0 %v8192_v31 }
 0xf3a   :  { %8195 = vmatpush3.bf16.msra.mxu0 %v8192_v31 }
 0xf3d   :  { %6125 = vmatmul.mubr.f32.vlgmr.msra.gmra.mrb[32].mxu0 %v8872_v28  ;;  %v8114_v28 = vpack.c.bf16 %v5083_v8, %v5080_v3  ;;  %v5079_v3 = vld [vmem:[#allocation9 + $0x28] sm:$0xff] }
 0xf3e   :  { %6127 = vmatprep.mubr.f32.mxu0 %v8906_v33  ;;  %v5087_v33 = vld [vmem:[#allocation9 + $0x68] sm:$0xff] }
 0xf3f   :  { %8115 = vmatpush1.bf16.msra.mxu1 %v8114_v28  ;;  %v8116_v25 = vpack.c.bf16 %v5090_v21, %v5087_v33  ;;  %v8141_v21 = vpack.c.bf16 %v5079_v3, %v5076_v52 }
 0xf41   :  { %6128 = vmatmul.mubr.f32.gmra.mrb[34].mxu0 %v8940_v7  ;;  %v5089_v7 = vld [vmem:[#allocation9 + $0x78] sm:$0xff]  ;;  %8117 = vmatprep.subr.bf16.mxu1 %v8116_v25 }
 0xf42   :  { %6130 = vmatprep.mubr.f32.mxu0 %v8974_v45  ;;  %v8118_v38 = vpack.c.bf16 %v5089_v7, %v5086_v24  ;;  %v5096_v45 = vld [vmem:[#allocation9 + $0xb0] sm:$0xff]  ;;  %v5082_v24 = vld [vmem:[#allocation9 + $0x40] sm:$0xff]  ;;  %v5085_v7 = vld [vmem:[#allocation9 + $0x58] sm:$0xff] }
 0xf43   :  { %v8120_v2 = vpack.c.bf16 %v5096_v45, %v5093_v40  ;;  %v5088_v40 = vld [vmem:[#allocation9 + $0x70] sm:$0xff]  ;;  %v5091_v45 = vld [vmem:[#allocation9 + $0x88] sm:$0xff] }
 0xf44   :  { %8119 = vmatpush1.bf16.msra.mxu1 %v8118_v38  ;;  %v8144_v38 = vpack.c.bf16 %v5085_v7, %v5082_v24 }
 0xf45   :  { %6131 = vmatmul.mubr.f32.gmra.mrb[36].mxu0 %v9008_v5  ;;  %8121 = vmatprep.subr.bf16.mxu1 %v8120_v2  ;;  %v5099_v5 = vld [vmem:[#allocation9 + $0xc8] sm:$0xff]  ;;  %v8147_v2 = vpack.c.bf16 %v5091_v45, %v5088_v40 }
 0xf46   :  { %6133 = vmatprep.mubr.f32.mxu0 %v9042_v23  ;;  %v8124_v1 = vpack.c.bf16 %v5102_v59, %v5099_v5  ;;  %v5103_v5 = vld [vmem:[#allocation9 + $0xe8] sm:$0xff] }
 0xf48   :  { %8123 = vmatpush1.bf16.msra.mxu1 %v8122_v30  ;;  %v5100_v30 = vld [vmem:[#allocation9 + $0xd0] sm:$0xff] }
 0xf49   :  { %8125 = vmatprep.subr.bf16.mxu1 %v8124_v1  ;;  %v8153_v59 = vpack.c.bf16 %v5103_v5, %v5100_v30  ;;  %v5109_v1 = vld [vmem:[#allocation9 + $0x118] sm:$0xff] }
 0xf4c   :  { %8127 = vmatpush1.bf16.msra.mxu1 %v8126_v63 }
 0xf4d   :  { %8129 = vmatprep.subr.bf16.mxu1 %v8128_v14  ;;  %v5118_v14 = vld [vmem:[#allocation9 + $0x160] sm:$0xff] }
 0xf50   :  { %8131 = vmatpush1.bf16.msra.mxu1 %v8130_v36  ;;  %v8162_v36 = vpack.c.bf16 %v5121_v15, %v5118_v14 }
 0xf51   :  { %8133 = vmatprep.subr.bf16.mxu1 %v8132_v17  ;;  %v8196_v17 = vpack.c.bf16 %v5433_v58, %v5432_v16 }
 0xf54   :  { %8135 = vmatpush1.bf16.msra.mxu1 %v8134_v19  ;;  %v5437_v19 = vld [vmem:[#allocation12 + $0x28] sm:$0xff] }
 0xf55   :  { %8137 = vmatprep.subr.bf16.mxu1 %v8136_v42  ;;  %v8204_v42 = vpack.c.bf16 %v5437_v19, %v5436_v18 }
 0xf58   :  { %8139 = vmatpush1.bf16.msra.mxu1 %v8138_v46  ;;  %v8208_v46 = vpack.c.bf16 %v5439_v41, %v5438_v32 }
 0xf59   :  { %8140 = vmatprep.subr.bf16.mxu1 %v8555_v34 }
 0xfb0   :  { %v4899_v12 = vpop.f32.mrb[28].mxu0  ;;  %v4970_v43 = vpop.f32.mrb[42].mxu1 }
 0xfb1   :  { %v5053_v13 = vadd.f32 %v5049_v37, %v4899_v12  ;;  %v4901_v50 = vpop.f32.mrb[29].mxu0  ;;  %v9059_v26 = vpop.f32.mrb[43].mxu1  ;;  %v5440_v37 = vld [vmem:[#allocation12 + $0x40] sm:$0xff]  ;;  %v5441_v12 = vld [vmem:[#allocation12 + $0x48] sm:$0xff] }
 0xfb2   :  { %v5060_v39 = vadd.f32 %v5050_v61, %v4901_v50  ;;  %v9078_v61 = vld [vmem:[%s9114_s4] ss:$0 sm:$0xff] }
 0xfb3   :  { %v5622_v27 = vmul.f32 -1.442695, %v5053_v13  ;;  %v5443_v13 = vld [vmem:[#allocation12 + $0x58] sm:$0xff] }
 0xfb4   :  { %v5623_v44 = vmul.f32 -1.442695, %v5060_v39  ;;  %v5445_v39 = vld [vmem:[#allocation12 + $0x68] sm:$0xff] }
 0xfb5   :  { %8383 = vpow2.f32 %v5622_v27  ;;  %v5444_v27 = vld [vmem:[#allocation12 + $0x60] sm:$0xff] }
 0xfb6   :  { %8385 = vpow2.f32 %v5623_v44 }
 0xfbf   :  { %v8384_v51 = vpop.eup %8383 }
 0xfc0   :  { %v5057_v31 = vadd.f32 1.0, %v8384_v51  ;;  %v8386_v53 = vpop.eup %8385 }
 0xfc1   :  { %v5064_v22 = vadd.f32 1.0, %v8386_v53  ;;  %v8220_v53 = vpack.c.bf16 %v5445_v39, %v5444_v27 }
 0xfc2   :  { %8387 = vrcp.f32 %v5057_v31 }
 0xfc3   :  { %8389 = vrcp.f32 %v5064_v22  ;;  %v5446_v22 = vld [vmem:[#allocation12 + $0x70] sm:$0xff] }
 0xfcc   :  { %v8388_v55 = vpop.eup %8387 }
 0xfcd   :  { %v5067_v20 = vmul.f32 %v8388_v55, %v4970_v43  ;;  %v8390_v62 = vpop.eup %8389  ;;  %v5442_v43 = vld [vmem:[#allocation12 + $0x50] sm:$0xff]  ;;  %v5447_v55 = vld [vmem:[#allocation12 + $0x78] sm:$0xff] }
 0xfce   :  { %v5070_v49 = vsub.f32 1.0, %v8390_v62  ;;  %v5072_v33 = vmul.f32 %v8390_v62, %v9021_v47  ;;  %v5097_v47 = vld [vmem:[#allocation9 + $0xb8] sm:$0xff]  ;;  %v8216_v50 = vpack.c.bf16 %v5443_v13, %v5442_v43  ;;  %v8224_v62 = vpack.c.bf16 %v5447_v55, %v5446_v22 }
 0xfcf   :  { %v5068_v54 = vadd.f32 %v5067_v20, %v5051_v29  ;;  %v8150_v9 = vpack.c.bf16 %v5097_v47, %v5094_v56 }
 0xfd1   :  { %8391 = vtanh.f32 %v5068_v54 }
 0xfdb   :  { %v8392_v8 = vpop.eup %8391 }
 0xfdc   :  { %v5071_v28 = vmul.f32 %v8392_v8, %v5070_v49 }
 0xfde   :  { %v5073_v25 = vadd.f32 %v5072_v33, %v5071_v28 }
 0xfe0   :  { %5187 = vmatmul.mubr.f32.vlgmr.msra.gmra.mrb[44].mxu1 %v5073_v25 }
 0xfe1   :  { %8142 = vmatpush3.bf16.msra.mxu1 %v8141_v21  ;;  %6089 = vmatprep.mubr.msk.f32.mxu1 %vm8556_vm0, %v8554_v0  ;;  %v5106_v0 = vld [vmem:[#allocation9 + $0x100] sm:$0xff] }
 0xfe2   :  { %8143 = vmatprep.subr.bf16.mxu1 %v8555_v34  ;;  %v8156_v63 = vpack.c.bf16 %v5109_v1, %v5106_v0 }
 0xfe5   :  { %8145 = vmatpush3.bf16.msra.mxu1 %v8144_v38 }
 0xfe6   :  { %8146 = vmatprep.subr.bf16.mxu1 %v8555_v34 }
 0xfe9   :  { %8148 = vmatpush3.bf16.msra.mxu1 %v8147_v2 }
 0xfea   :  { %8149 = vmatprep.subr.bf16.mxu1 %v8555_v34 }
 0xfed   :  { %8151 = vmatpush3.bf16.msra.mxu1 %v8150_v9 }
 0xfee   :  { %8152 = vmatprep.subr.bf16.mxu1 %v8555_v34 }
 0xff0   :  { %v9068_v60 = vpop.f32.mrb[30].mxu0 }
 0xff1   :  { %v9070_v35 = vpop.f32.mrb[31].mxu0  ;;  %8154 = vmatpush3.bf16.msra.mxu1 %v8153_v59 }
 0xff2   :  { %8155 = vmatprep.subr.bf16.mxu1 %v8555_v34 }
 0xff5   :  { %8157 = vmatpush3.bf16.msra.mxu1 %v8156_v63 }
 0xff6   :  { %8158 = vmatprep.subr.bf16.mxu1 %v8555_v34 }
 0xff9   :  { %8160 = vmatpush3.bf16.msra.mxu1 %v8159_v11 }
 0xffa   :  { %8161 = vmatprep.subr.bf16.mxu1 %v8555_v34  ;;  %v8212_v34 = vpack.c.bf16 %v5441_v12, %v5440_v37 }
 0xffd   :  { %8163 = vmatpush3.bf16.msra.mxu1 %v8162_v36 }
 0xffe   :  { %8197 = vmatprep.subr.bf16.mxu1 %v8196_v17 }
0x1000   :  { %6090 = vmatmul.mubr.f32.vlgmr.msra.gmra.mrb[46].mxu1 %v5073_v25 }
0x1001   :  { %8199 = vmatpush3.bf16.msra.mxu1 %v8196_v17  ;;  %v5627_v17 = vld [vmem:[%s9116_s6] ss:$0 sm:$0xff]  ;;  %s8557_s6 = smov [#allocation13]  }
0x1002   :  { %8201 = vmatprep.subr.bf16.mxu1 %v8200_v6  ;;  %s5573_s19 = sshll.u32 %s8557_s6, 4  ;;  %s5574_s19 = int_to_ptr.vmem [resolvable:$true] %s5573_s19 }
0x1003   :  { %s8513_s20 = scalar_lea.vmem %s5574_s19, 1024  ;;  %p8518_p13 = scmp.lt.s32.totalorder %s5574_s19, %s5574_s19 }
0x1004   :  { %p8514_p12 = scmp.ne.s32.totalorder %s5574_s19, %s8513_s20  ;;  %p8519_p0 = scmp.lt.s32.totalorder %s8513_s20, %s8513_s20 }
0x1005   :  { %8203 = vmatpush3.bf16.msra.mxu1 %v8200_v6 }
0x1006   :  { %8205 = vmatprep.subr.bf16.mxu1 %v8204_v42  ;;  %p8520_p1 = por %p8519_p0, %p8518_p13 }
0x1008   :  { %p8521_p2 = pnand %p8520_p1, %p8514_p12 }
0x1009   :  { %8207 = vmatpush3.bf16.msra.mxu1 %v8204_v42 }
0x100a   :  { %8209 = vmatprep.subr.bf16.mxu1 %v8208_v46 }
0x100d   :  { %8211 = vmatpush3.bf16.msra.mxu1 %v8208_v46 }
0x100e   :  { %8213 = vmatprep.subr.bf16.mxu1 %v8212_v34 }
0x1010   :  { %v6126_v44 = vpop.f32.mrb[32].mxu0 }
0x1011   :  { %v5385_v51 = vpop.f32.mrb[33].mxu0  ;;  %8215 = vmatpush3.bf16.msra.mxu1 %v8212_v34  ;;  %v5391_v3 = vadd.f32 %v6126_v44, %v9078_v61 }
0x1012   :  { %v5386_v31 = vadd.f32 %v9078_v61, %v5385_v51  ;;  %8217 = vmatprep.subr.bf16.mxu1 %v8216_v50 }
0x1013   :  { %v5425_v28 = vmax.f32 %v5391_v3, 0.0 }
0x1014   :  { %v5424_v29 = vmax.f32 %v5386_v31, 0.0  ;;  %v6129_v20 = vpop.f32.mrb[34].mxu0 }
0x1015   :  { %v5395_v54 = vpop.f32.mrb[35].mxu0  ;;  %8219 = vmatpush3.bf16.msra.mxu1 %v8216_v50  ;;  %v5401_v33 = vadd.f32 %v6129_v20, %v9078_v61 }
0x1016   :  { %6168 = vmatprep.mubr.f32.mxu1 %v5424_v29  ;;  %8221 = vmatprep.subr.bf16.mxu1 %v8220_v53  ;;  %v5396_v8 = vadd.f32 %v9078_v61, %v5395_v54 }
0x1017   :  { %v5427_v24 = vmax.f32 %v5401_v33, 0.0 }
0x1018   :  { %v6132_v49 = vpop.f32.mrb[36].mxu0  ;;  %v5426_v21 = vmax.f32 %v5396_v8, 0.0 }
0x1019   :  { %v5405_v52 = vpop.f32.mrb[37].mxu0  ;;  %8223 = vmatpush3.bf16.msra.mxu1 %v8220_v53  ;;  %v5411_v7 = vadd.f32 %v6132_v49, %v9078_v61 }
0x101a   :  { %8225 = vmatprep.subr.bf16.mxu1 %v8224_v62  ;;  %v5406_v25 = vadd.f32 %v9078_v61, %v5405_v52 }
0x101b   :  { %v5429_v40 = vmax.f32 %v5411_v7, 0.0 }
0x101c   :  { %v5428_v38 = vmax.f32 %v5406_v25, 0.0 }
0x101d   :  { %8227 = vmatpush3.bf16.msra.mxu1 %v8224_v62 }
0x1020   :  { %6169 = vmatmul.mubr.f32.vlgmr.msra.gmra.mrb[48].mxu1 %v5425_v28 }
0x1021   :  { %6171 = vmatprep.mubr.f32.mxu1 %v5426_v21 }
0x1024   :  { %6172 = vmatmul.mubr.f32.gmra.mrb[50].mxu1 %v5427_v24 }
0x1025   :  { %6174 = vmatprep.mubr.f32.mxu1 %v5428_v38 }
0x1028   :  { %6175 = vmatmul.mubr.f32.gmra.mrb[52].mxu1 %v5429_v40 }
0x10b3   :  { %v5188_v45 = vpop.f32.mrb[44].mxu1 }
0x10b4   :  { %v5263_v2 = vadd.f32 %v5188_v45, %v9059_v26  ;;  %v5190_v56 = vpop.f32.mrb[45].mxu1 }
0x10b5   :  { %v5270_v47 = vadd.f32 %v5190_v56, %v9068_v60 }
0x10b6   :  { %v5624_v9 = vmul.f32 -1.442695, %v5263_v2 }
0x10b7   :  { %v5625_v30 = vmul.f32 -1.442695, %v5270_v47 }
0x10b8   :  { %8393 = vpow2.f32 %v5624_v9 }
0x10b9   :  { %8395 = vpow2.f32 %v5625_v30 }
0x10c2   :  { %v8394_v5 = vpop.eup %8393 }
0x10c3   :  { %v5267_v59 = vadd.f32 1.0, %v8394_v5  ;;  %v8396_v0 = vpop.eup %8395 }
0x10c4   :  { %v5274_v1 = vadd.f32 1.0, %v8396_v0 }
0x10c5   :  { %8397 = vrcp.f32 %v5267_v59 }
0x10c6   :  { %8399 = vrcp.f32 %v5274_v1 }
0x10cf   :  { %v8398_v63 = vpop.eup %8397 }
0x10d0   :  { %v5277_v4 = vmul.f32 %v8398_v63, %v9070_v35  ;;  %v8400_v26 = vpop.eup %8399 }
0x10d1   :  { %v5280_v15 = vsub.f32 1.0, %v8400_v26  ;;  %v5282_v58 = vmul.f32 %v8400_v26, %v9042_v23 }
0x10d3   :  { %v5259_v10 = vpop.f32.mrb[46].mxu1 }
0x10d4   :  { %v5278_v11 = vadd.f32 %v5277_v4, %v5259_v10  ;;  %v6091_v14 = vpop.f32.mrb[47].mxu1 }
0x10d6   :  { %8401 = vtanh.f32 %v5278_v11 }
0x10e0   :  { %v8402_v60 = vpop.eup %8401 }
0x10e1   :  { %v5281_v16 = vmul.f32 %v8402_v60, %v5280_v15 }
0x10e3   :  { %v5283_v36 = vadd.f32 %v5282_v58, %v5281_v16 }
0x10e5   :  { %6134 = vmatmul.mubr.f32.gmra.mrb[38].mxu0 %v5283_v36 }
0x10f3   :  { %v6170_v48 = vpop.f32.mrb[48].mxu1 }
0x10f4   :  { %v5527_v57 = vadd.f32 %v6170_v48, %v5627_v17  ;;  %v5521_v35 = vpop.f32.mrb[49].mxu1 }
0x10f5   :  { %v5522_v6 = vadd.f32 %v5627_v17, %v5521_v35 }
0x10f6   :  { %5561 = vst [vmem:[#allocation13 + $0x8] sm:$0xff] %v5527_v57 }
0x10f7   :  { %5560 = vst [vmem:[#allocation13] sm:$0xff] %v5522_v6  ;;  %v6173_v18 = vpop.f32.mrb[50].mxu1 }
0x10f8   :  { %v5537_v19 = vadd.f32 %v6173_v18, %v5627_v17  ;;  %v5531_v42 = vpop.f32.mrb[51].mxu1 }
0x10f9   :  { %v5532_v32 = vadd.f32 %v5627_v17, %v5531_v42 }
0x10fa   :  { %5563 = vst [vmem:[#allocation13 + $0x18] sm:$0xff] %v5537_v19 }
0x10fb   :  { %5562 = vst [vmem:[#allocation13 + $0x10] sm:$0xff] %v5532_v32  ;;  %v6176_v41 = vpop.f32.mrb[52].mxu1 }
0x10fc   :  { %v5547_v23 = vadd.f32 %v6176_v41, %v5627_v17  ;;  %v5541_v46 = vpop.f32.mrb[53].mxu1 }
0x10fd   :  { %v5542_v37 = vadd.f32 %v5627_v17, %v5541_v46 }
0x10fe   :  { %5565 = vst [vmem:[#allocation13 + $0x28] sm:$0xff] %v5547_v23 }
0x10ff   :  { %5564 = vst [vmem:[#allocation13 + $0x20] sm:$0xff] %v5542_v37 }
0x11b8   :  { %v6135_v12 = vpop.f32.mrb[38].mxu0 }
0x11b9   :  { %v5421_v34 = vadd.f32 %v6135_v12, %v9078_v61  ;;  %v5415_v43 = vpop.f32.mrb[39].mxu0 }
0x11ba   :  { %v5416_v13 = vadd.f32 %v9078_v61, %v5415_v43 }
0x11bb   :  { %v5431_v27 = vmax.f32 %v5421_v34, 0.0 }
0x11bc   :  { %v5430_v50 = vmax.f32 %v5416_v13, 0.0 }
0x11be   :  { %6177 = vmatprep.mubr.f32.mxu1 %v5430_v50 }
0x11bf   :  { %6178 = vmatmul.mubr.f32.gmra.mrb[54].mxu1 %v5431_v27 }
0x1292   :  { %v6179_v39 = vpop.f32.mrb[54].mxu1 }
0x1293   :  { %v5557_v44 = vadd.f32 %v6179_v39, %v5627_v17  ;;  %v5551_v51 = vpop.f32.mrb[55].mxu1 }
0x1294   :  { %v5552_v31 = vadd.f32 %v5627_v17, %v5551_v51 }
0x1295   :  { %5567 = vst [vmem:[#allocation13 + $0x38] sm:$0xff] %v5557_v44 }
0x1296   :  { %5566 = vst [vmem:[#allocation13 + $0x30] sm:$0xff] %v5552_v31 }
0x1297   :  { %8524 = shalt.err (!%p8521_p2)
}
0x1298   :  { %s8525_s23 = scalar_lea.hbm %s9117_s7, 1024 }
0x1299   :  { %p8526_p3 = scmp.ne.s32.totalorder %s9117_s7, %s8525_s23  ;;  %p8529_p4 = scmp.lt.u32.totalorder %s8525_s23, %s9117_s7 }
0x129b   :  { %p8531_p5 = pnand %p8529_p4, %p8526_p3 }
0x129d   :  { %8534 = shalt.err (!%p8531_p5)
}
0x129e   :  { %5579 = dma.vmem_to_hbm [thread:$0]  %s5574_s19, 1024, %s9117_s7, [#allocation6], %s8547_s1, %s8547_s1, %s8548_s25  }
0x129f   :  { %8541 = dma.done.wait [#allocation6], 1024  }
0x12a0   :  { %8542 = vsyncadd [#allocation6], 4294966272 }
0x12a1   :  { %5583 = vsyncpa [#allocation5], 1 }
0x12a2   :  { %5584 = vsyncpa [#allocation8], 1 }
0x12a3   :  { %5585 = vsyncpa [#allocation11], 1 }
0x12a4   :  { %5586 = vsyncpa [#allocation6], 1 }

</bundles_post_ra>
